<compile_context>
chip_gen: v6e
topology: v6e:2x2x1
jax: 0.10.0
libtpu: 0.0.40
codegen_flags: <defaults>
</compile_context>

<pallas_src>
import functools

import jax
import jax.numpy as jnp
from jax.experimental import pallas as pl
from jax.experimental.pallas import tpu as pltpu

LANE = 128


def _round_up(x, m):
    return ((x + m - 1) // m) * m


# --------------------------------------------------------------------------
# Fused conv(im2col matmul) + bias + ReLU + MaxPool2d(3) kernel
# --------------------------------------------------------------------------
def _conv_relu_pool_kernel(x_ref, w_ref, b_ref, o_ref, *, taps):
    # x_ref: (taps, tm, K) bf16 — tap-major im2col rows (one row per pooled position)
    # w_ref: (K, 128) bf16, b_ref: (1, 128) f32, o_ref: (tm, 128) bf16
    w = w_ref[...]
    acc = jnp.dot(x_ref[0], w, preferred_element_type=jnp.float32)
    for t in range(1, taps):
        acc = jnp.maximum(
            acc, jnp.dot(x_ref[t], w, preferred_element_type=jnp.float32))
    # MaxPool(ReLU(y_t + b)) == ReLU(max_t(y_t) + b): bias/ReLU commute with max.
    y = jnp.maximum(acc + b_ref[...], 0.0)
    o_ref[...] = y.astype(o_ref.dtype)


def conv_relu_pool(patches, w, b):
    """patches: (T, Mp, Kraw); w: (K, 128) bf16; b: (1, 128) f32.

    Returns (Mpp, 128) bf16 = MaxPool3(ReLU(conv)) rows (pooled positions);
    caller slices off padded rows."""
    T, Mp, Kraw = patches.shape
    Kw, N = w.shape
    if Kraw < Kw:  # zero-pad contraction dim to the 128-aligned weight K (conv1: 70->128)
        patches = jnp.pad(patches, ((0, 0), (0, 0), (0, Kw - Kraw)))
    patches = patches.astype(jnp.bfloat16)

    # Single M block when small (this model: 480 / 24 / 8 rows); tile only if huge.
    tm = Mp if Mp <= 4096 else 2048
    Mpp = _round_up(Mp, tm)
    if Mpp != Mp:
        patches = jnp.pad(patches, ((0, 0), (0, Mpp - Mp), (0, 0)))

    return pl.pallas_call(
        functools.partial(_conv_relu_pool_kernel, taps=T),
        out_shape=jax.ShapeDtypeStruct((Mpp, N), jnp.bfloat16),
        grid=(Mpp // tm,),
        in_specs=[
            pl.BlockSpec((T, tm, Kw), lambda i: (0, i, 0)),
            pl.BlockSpec((Kw, N), lambda i: (0, 0)),
            pl.BlockSpec((1, N), lambda i: (0, 0)),
        ],
        out_specs=pl.BlockSpec((tm, N), lambda i: (i, 0)),
        # Single grid step at these sizes; keep "arbitrary" to avoid pointless
        # cross-core splitting of a latency-bound kernel (v7x note in review).
        compiler_params=pltpu.CompilerParams(dimension_semantics=("arbitrary",)),
    )(patches, w, b)


# --------------------------------------------------------------------------
# Tap-major im2col (host-side JAX glue): builds only the conv output positions
# that the following MaxPool2d(3) (floor mode) actually consumes.
# --------------------------------------------------------------------------
def im2col_pooled(x, kh, kw, sh, sw, ph, pw, pool=3):
    """x: (B, H, W, C) NHWC.

    Returns (patches, Hp, Wp, Mvalid) with patches shape (pool*pool, Mpad, kh*kw*C):
    patches[t, r, :] is the (ki, kj, c)-ordered input window for conv output
    position (pool*hp + di, pool*wp + dj), t = di*pool + dj, r = b*Hp*Wp + hp*Wp + wp.
    """
    B, H, W, C = x.shape
    Ho = (H + 2 * ph - kh) // sh + 1
    Wo = (W + 2 * pw - kw) // sw + 1
    Hp, Wp = Ho // pool, Wo // pool  # pooled output size (floor mode, crop fused here)
    xp = jnp.pad(x, ((0, 0), (ph, ph), (pw, pw), (0, 0)))
    Mv = B * Hp * Wp
    Mpad = max(8, _round_up(Mv, 8))

    tap_blocks = []
    for di in range(pool):
        for dj in range(pool):
            cols = []
            for ki in range(kh):
                for kj in range(kw):
                    h0 = di * sh + ki
                    w0 = dj * sw + kj
                    sl = jax.lax.slice(
                        xp,
                        (0, h0, w0, 0),
                        (B, h0 + (Hp - 1) * pool * sh + 1,
                         w0 + (Wp - 1) * pool * sw + 1, C),
                        (1, pool * sh, pool * sw, 1),
                    )  # (B, Hp, Wp, C)
                    cols.append(sl)
            blk = jnp.stack(cols, axis=3).reshape(Mv, kh * kw * C)
            if Mpad != Mv:
                blk = jnp.pad(blk, ((0, Mpad - Mv), (0, 0)))
            tap_blocks.append(blk)
    return jnp.stack(tap_blocks, axis=0), Hp, Wp, Mv


# --------------------------------------------------------------------------
# Fused AdaptiveAvgPool2d(1) + MLP (Linear/Tanh/Linear/Tanh/Linear) + Softmax
# --------------------------------------------------------------------------
def _mlp_kernel(x_ref, w1_ref, b1_ref, w2_ref, b2_ref, w3_ref, b3_ref, o_ref):
    # x_ref: (Bp, S, 128) bf16 — post-conv3 pooled features per spatial position.
    feat = jnp.mean(x_ref[...].astype(jnp.float32), axis=1)  # AdaptiveAvgPool2d(1)+flatten
    h = jnp.tanh(jnp.dot(feat, w1_ref[...], preferred_element_type=jnp.float32) + b1_ref[...])
    h = jnp.tanh(jnp.dot(h, w2_ref[...], preferred_element_type=jnp.float32) + b2_ref[...])
    logits = jnp.dot(h, w3_ref[...], preferred_element_type=jnp.float32) + b3_ref[...]
    # Padded logit lanes carry a -1e30 bias -> exp underflows to 0, so the
    # 128-lane softmax equals nn.Softmax(dim=1) over the 2 real classes exactly.
    z = logits - jnp.max(logits, axis=-1, keepdims=True)
    e = jnp.exp(z)
    inv = pl.reciprocal(jnp.sum(e, axis=-1, keepdims=True), approx=True)
    o_ref[...] = (e * inv).astype(o_ref.dtype)


def mlp_forward(feat_bsd, params):
    Bp, S, D = feat_bsd.shape
    args = (
        feat_bsd,
        params["mw1"], params["mb1"],
        params["mw2"], params["mb2"],
        params["mw3"], params["mb3"],
    )

    def spec(shape):
        n = len(shape)
        return pl.BlockSpec(shape, lambda i, _n=n: (0,) * _n)

    return pl.pallas_call(
        _mlp_kernel,
        out_shape=jax.ShapeDtypeStruct((Bp, LANE), jnp.float32),
        grid=(1,),
        in_specs=[spec(a.shape) for a in args],
        out_specs=spec((Bp, LANE)),
    )(*args)


# --------------------------------------------------------------------------
# Parameter init (deterministic, kaiming-normal a=0.1 like the module), stored
# pre-padded to lane-dense layouts. Padded rows/cols are zero so results are
# identical to the unpadded network. NOTE: weights are stored in im2col
# (ki, kj, c_in) x c_out order; real PyTorch (c_out, c_in, kh, kw) weights would
# need to be permuted before scattering into these slabs.
# --------------------------------------------------------------------------
def _kaiming(key, shape, fan_in, a=0.1):
    gain = (2.0 / (1.0 + a * a)) ** 0.5
    return jax.random.normal(key, shape, jnp.float32) * (gain / fan_in ** 0.5)


def _bias(key, n, fan_in):
    bound = 1.0 / fan_in ** 0.5
    return jax.random.uniform(key, (n,), jnp.float32, -bound, bound)


def init_params(key):
    ks = jax.random.split(key, 12)
    p = {}
    # conv1: Conv2d(2, 32, (7,5)) -> real block (70, 32) inside a (128, 128) slab.
    w1 = jnp.zeros((LANE, LANE), jnp.float32).at[:70, :32].set(_kaiming(ks[0], (70, 32), 70))
    b1 = jnp.zeros((LANE,), jnp.float32).at[:32].set(_bias(ks[1], 32, 70))
    # conv2: Conv2d(32, 64, 3) -> real (9, 32, 64) inside (9, 128, 128).
    w2 = jnp.zeros((9, LANE, LANE), jnp.float32).at[:, :32, :64].set(
        _kaiming(ks[2], (9, 32, 64), 32 * 9))
    b2 = jnp.zeros((LANE,), jnp.float32).at[:64].set(_bias(ks[3], 64, 32 * 9))
    # conv3: Conv2d(64, 128, 3) -> real (9, 64, 128) inside (9, 128, 128).
    w3 = jnp.zeros((9, LANE, LANE), jnp.float32).at[:, :64, :].set(
        _kaiming(ks[4], (9, 64, 128), 64 * 9))
    b3 = _bias(ks[5], LANE, 64 * 9)

    p["w1"] = w1.astype(jnp.bfloat16)
    p["b1"] = b1.reshape(1, LANE)
    p["w2"] = w2.reshape(9 * LANE, LANE).astype(jnp.bfloat16)
    p["b2"] = b2.reshape(1, LANE)
    p["w3"] = w3.reshape(9 * LANE, LANE).astype(jnp.bfloat16)
    p["b3"] = b3.reshape(1, LANE)

    # MLP weights stored as (in, out) = transpose of PyTorch (out, in), 128-padded.
    p["mw1"] = jnp.zeros((LANE, LANE), jnp.float32).at[:, :64].set(_kaiming(ks[6], (128, 64), 128))
    p["mb1"] = jnp.zeros((1, LANE), jnp.float32).at[0, :64].set(_bias(ks[7], 64, 128))
    p["mw2"] = jnp.zeros((LANE, LANE), jnp.float32).at[:64, :32].set(_kaiming(ks[8], (64, 32), 64))
    p["mb2"] = jnp.zeros((1, LANE), jnp.float32).at[0, :32].set(_bias(ks[9], 32, 64))
    p["mw3"] = jnp.zeros((LANE, LANE), jnp.float32).at[:32, :2].set(_kaiming(ks[10], (32, 2), 32))
    # padded logit columns get -1e30 so the in-kernel 128-lane softmax is exact
    p["mb3"] = jnp.full((1, LANE), -1e30, jnp.float32).at[0, :2].set(_bias(ks[11], 2, 32))
    return p


# --------------------------------------------------------------------------
# Full forward (inference / eval semantics: dropouts are identity)
# --------------------------------------------------------------------------
def model2_forward(x_nchw, params):
    x = jnp.transpose(x_nchw, (0, 2, 3, 1)).astype(jnp.float32)  # NCHW -> NHWC
    B = x.shape[0]

    # conv1: Conv2d(2,32,(7,5),s2,p2) + ReLU + MaxPool2d(3)  (Cout padded to 128)
    patches, Hp, Wp, Mv = im2col_pooled(x, 7, 5, 2, 2, 2, 2)
    x = conv_relu_pool(patches, params["w1"], params["b1"])[:Mv].reshape(B, Hp, Wp, LANE)

    # conv2: Conv2d(32,64,3,s2,p2) + ReLU + MaxPool2d(3)     (channels stay 128-padded)
    patches, Hp, Wp, Mv = im2col_pooled(x, 3, 3, 2, 2, 2, 2)
    x = conv_relu_pool(patches, params["w2"], params["b2"])[:Mv].reshape(B, Hp, Wp, LANE)

    # conv3: Conv2d(64,128,3,s2,p2) + ReLU + MaxPool2d(3) + Dropout(eval=id)
    patches, Hp, Wp, Mv = im2col_pooled(x, 3, 3, 2, 2, 2, 2)
    x = conv_relu_pool(patches, params["w3"], params["b3"])[:Mv]  # (B*Hp*Wp, 128)
    # TODO(synk): Dropout(0.5) layers implemented as eval-mode identity (no train-mode RNG).

    # AdaptiveAvgPool2d(1) + flatten + MLP + Softmax, fused into one kernel.
    S = Hp * Wp
    Bp = max(8, _round_up(B, 8))
    feat = jnp.pad(x.reshape(B, S, LANE), ((0, Bp - B), (0, 0), (0, 0)))
    out = mlp_forward(feat, params)          # (Bp, 128) f32, padded slab
    return out[:B, :2]


if __name__ == "__main__":
    key = jax.random.PRNGKey(0)
    pkey, xkey = jax.random.split(key)
    params = init_params(pkey)

    # Input: NCHW, 2 channels, 96x96 spatial — the smallest round size that survives
    # three (conv stride-2 + MaxPool2d(3)) stages of this architecture.
    x = jax.random.normal(xkey, (2, 2, 96, 96), dtype=jnp.float32)

    out = jax.jit(model2_forward)(x, params)
    out = jax.block_until_ready(out)

    assert out.shape == (2, 2), out.shape
    assert bool(jnp.all(jnp.isfinite(out)))
    # softmax rows sum to 1 (approx-reciprocal normalization => ~1e-4 tolerance)
    assert bool(jnp.allclose(jnp.sum(out, axis=-1), 1.0, atol=2e-3))
    print("KERNEL_OK")
</pallas_src>

<mosaic_0001>
module attributes {stable_mosaic.version = 11 : i64} {
  func.func @_conv_relu_pool_kernel(%arg0: i32, %arg1: memref<9x480x128xbf16, #tpu.memory_space<vmem>>, %arg2: memref<128x128xbf16, #tpu.memory_space<vmem>>, %arg3: memref<1x128xf32, #tpu.memory_space<vmem>>, %arg4: memref<480x128xbf16, #tpu.memory_space<vmem>>) attributes {dimension_semantics = [#tpu.dimension_semantics<arbitrary>], iteration_bounds = array<i64: 1>, scalar_prefetch = 0 : i64, scratch_operands = 0 : i64, tpu.core_type = #tpu.core_type<tc>, window_params = [{transform_indices = @transform_0, window_bounds = array<i64: 9, 480, 128>}, {pipeline_mode = #tpu.pipeline_mode<synchronous>, transform_indices = @transform_1, window_bounds = array<i64: 128, 128>}, {pipeline_mode = #tpu.pipeline_mode<synchronous>, transform_indices = @transform_2, window_bounds = array<i64: 1, 128>}, {transform_indices = @transform_3, window_bounds = array<i64: 480, 128>}]} {
    %c0 = arith.constant 0 : index
    %c0_0 = arith.constant 0 : index
    %0 = vector.load %arg2[%c0, %c0_0] : memref<128x128xbf16, #tpu.memory_space<vmem>>, vector<128x128xbf16>
    %c0_1 = arith.constant 0 : index
    %c0_2 = arith.constant 0 : index
    %c0_3 = arith.constant 0 : index
    %1 = vector.load %arg1[%c0_1, %c0_2, %c0_3] : memref<9x480x128xbf16, #tpu.memory_space<vmem>>, vector<1x480x128xbf16>
    %2 = vector.shape_cast %1 : vector<1x480x128xbf16> to vector<480x128xbf16>
    %cst = arith.constant dense<0.000000e+00> : vector<480x128xf32>
    %3 = tpu.matmul %2, %0, %cst {dimension_numbers = #tpu.dot_dimension_numbers<[1], [0], [0], [1], [0, 0, 1, 1], [], []>} : vector<480x128xbf16>, vector<128x128xbf16>, vector<480x128xf32> -> vector<480x128xf32>
    %c1 = arith.constant 1 : index
    %c0_4 = arith.constant 0 : index
    %c0_5 = arith.constant 0 : index
    %4 = vector.load %arg1[%c1, %c0_4, %c0_5] : memref<9x480x128xbf16, #tpu.memory_space<vmem>>, vector<1x480x128xbf16>
    %5 = vector.shape_cast %4 : vector<1x480x128xbf16> to vector<480x128xbf16>
    %cst_6 = arith.constant dense<0.000000e+00> : vector<480x128xf32>
    %6 = tpu.matmul %5, %0, %cst_6 {dimension_numbers = #tpu.dot_dimension_numbers<[1], [0], [0], [1], [0, 0, 1, 1], [], []>} : vector<480x128xbf16>, vector<128x128xbf16>, vector<480x128xf32> -> vector<480x128xf32>
    %7 = arith.maximumf %3, %6 : vector<480x128xf32>
    %c2 = arith.constant 2 : index
    %c0_7 = arith.constant 0 : index
    %c0_8 = arith.constant 0 : index
    %8 = vector.load %arg1[%c2, %c0_7, %c0_8] : memref<9x480x128xbf16, #tpu.memory_space<vmem>>, vector<1x480x128xbf16>
    %9 = vector.shape_cast %8 : vector<1x480x128xbf16> to vector<480x128xbf16>
    %cst_9 = arith.constant dense<0.000000e+00> : vector<480x128xf32>
    %10 = tpu.matmul %9, %0, %cst_9 {dimension_numbers = #tpu.dot_dimension_numbers<[1], [0], [0], [1], [0, 0, 1, 1], [], []>} : vector<480x128xbf16>, vector<128x128xbf16>, vector<480x128xf32> -> vector<480x128xf32>
    %11 = arith.maximumf %7, %10 : vector<480x128xf32>
    %c3 = arith.constant 3 : index
    %c0_10 = arith.constant 0 : index
    %c0_11 = arith.constant 0 : index
    %12 = vector.load %arg1[%c3, %c0_10, %c0_11] : memref<9x480x128xbf16, #tpu.memory_space<vmem>>, vector<1x480x128xbf16>
    %13 = vector.shape_cast %12 : vector<1x480x128xbf16> to vector<480x128xbf16>
    %cst_12 = arith.constant dense<0.000000e+00> : vector<480x128xf32>
    %14 = tpu.matmul %13, %0, %cst_12 {dimension_numbers = #tpu.dot_dimension_numbers<[1], [0], [0], [1], [0, 0, 1, 1], [], []>} : vector<480x128xbf16>, vector<128x128xbf16>, vector<480x128xf32> -> vector<480x128xf32>
    %15 = arith.maximumf %11, %14 : vector<480x128xf32>
    %c4 = arith.constant 4 : index
    %c0_13 = arith.constant 0 : index
    %c0_14 = arith.constant 0 : index
    %16 = vector.load %arg1[%c4, %c0_13, %c0_14] : memref<9x480x128xbf16, #tpu.memory_space<vmem>>, vector<1x480x128xbf16>
    %17 = vector.shape_cast %16 : vector<1x480x128xbf16> to vector<480x128xbf16>
    %cst_15 = arith.constant dense<0.000000e+00> : vector<480x128xf32>
    %18 = tpu.matmul %17, %0, %cst_15 {dimension_numbers = #tpu.dot_dimension_numbers<[1], [0], [0], [1], [0, 0, 1, 1], [], []>} : vector<480x128xbf16>, vector<128x128xbf16>, vector<480x128xf32> -> vector<480x128xf32>
    %19 = arith.maximumf %15, %18 : vector<480x128xf32>
    %c5 = arith.constant 5 : index
    %c0_16 = arith.constant 0 : index
    %c0_17 = arith.constant 0 : index
    %20 = vector.load %arg1[%c5, %c0_16, %c0_17] : memref<9x480x128xbf16, #tpu.memory_space<vmem>>, vector<1x480x128xbf16>
    %21 = vector.shape_cast %20 : vector<1x480x128xbf16> to vector<480x128xbf16>
    %cst_18 = arith.constant dense<0.000000e+00> : vector<480x128xf32>
    %22 = tpu.matmul %21, %0, %cst_18 {dimension_numbers = #tpu.dot_dimension_numbers<[1], [0], [0], [1], [0, 0, 1, 1], [], []>} : vector<480x128xbf16>, vector<128x128xbf16>, vector<480x128xf32> -> vector<480x128xf32>
    %23 = arith.maximumf %19, %22 : vector<480x128xf32>
    %c6 = arith.constant 6 : index
    %c0_19 = arith.constant 0 : index
    %c0_20 = arith.constant 0 : index
    %24 = vector.load %arg1[%c6, %c0_19, %c0_20] : memref<9x480x128xbf16, #tpu.memory_space<vmem>>, vector<1x480x128xbf16>
    %25 = vector.shape_cast %24 : vector<1x480x128xbf16> to vector<480x128xbf16>
    %cst_21 = arith.constant dense<0.000000e+00> : vector<480x128xf32>
    %26 = tpu.matmul %25, %0, %cst_21 {dimension_numbers = #tpu.dot_dimension_numbers<[1], [0], [0], [1], [0, 0, 1, 1], [], []>} : vector<480x128xbf16>, vector<128x128xbf16>, vector<480x128xf32> -> vector<480x128xf32>
    %27 = arith.maximumf %23, %26 : vector<480x128xf32>
    %c7 = arith.constant 7 : index
    %c0_22 = arith.constant 0 : index
    %c0_23 = arith.constant 0 : index
    %28 = vector.load %arg1[%c7, %c0_22, %c0_23] : memref<9x480x128xbf16, #tpu.memory_space<vmem>>, vector<1x480x128xbf16>
    %29 = vector.shape_cast %28 : vector<1x480x128xbf16> to vector<480x128xbf16>
    %cst_24 = arith.constant dense<0.000000e+00> : vector<480x128xf32>
    %30 = tpu.matmul %29, %0, %cst_24 {dimension_numbers = #tpu.dot_dimension_numbers<[1], [0], [0], [1], [0, 0, 1, 1], [], []>} : vector<480x128xbf16>, vector<128x128xbf16>, vector<480x128xf32> -> vector<480x128xf32>
    %31 = arith.maximumf %27, %30 : vector<480x128xf32>
    %c8 = arith.constant 8 : index
    %c0_25 = arith.constant 0 : index
    %c0_26 = arith.constant 0 : index
    %32 = vector.load %arg1[%c8, %c0_25, %c0_26] : memref<9x480x128xbf16, #tpu.memory_space<vmem>>, vector<1x480x128xbf16>
    %33 = vector.shape_cast %32 : vector<1x480x128xbf16> to vector<480x128xbf16>
    %cst_27 = arith.constant dense<0.000000e+00> : vector<480x128xf32>
    %34 = tpu.matmul %33, %0, %cst_27 {dimension_numbers = #tpu.dot_dimension_numbers<[1], [0], [0], [1], [0, 0, 1, 1], [], []>} : vector<480x128xbf16>, vector<128x128xbf16>, vector<480x128xf32> -> vector<480x128xf32>
    %35 = arith.maximumf %31, %34 : vector<480x128xf32>
    %c0_28 = arith.constant 0 : index
    %c0_29 = arith.constant 0 : index
    %36 = vector.load %arg3[%c0_28, %c0_29] : memref<1x128xf32, #tpu.memory_space<vmem>>, vector<1x128xf32>
    %37 = vector.broadcast %36 : vector<1x128xf32> to vector<480x128xf32>
    %38 = arith.addf %35, %37 : vector<480x128xf32>
    %cst_30 = arith.constant 0.000000e+00 : f32
    %39 = vector.broadcast %cst_30 : f32 to vector<480x128xf32>
    %40 = arith.maximumf %38, %39 : vector<480x128xf32>
    %41 = arith.truncf %40 : vector<480x128xf32> to vector<480x128xbf16>
    %c0_31 = arith.constant 0 : index
    %c0_32 = arith.constant 0 : index
    %42 = vector.load %arg4[%c0_31, %c0_32] : memref<480x128xbf16, #tpu.memory_space<vmem>>, vector<480x128xbf16>
    tpu.vector_store %arg4[%c0_31, %c0_32], %41 {strides = array<i32>} : memref<480x128xbf16, #tpu.memory_space<vmem>>, vector<480x128xbf16>,
    return
  }
  func.func @transform_0(%arg0: i32) -> (i32, i32, i32) {
    %c0_i32 = arith.constant 0 : i32
    %c0_i32_0 = arith.constant 0 : i32
    %c0_i32_1 = arith.constant 0 : i32
    return %c0_i32, %arg0, %c0_i32_0 : i32, i32, i32
  }
  func.func @transform_1(%arg0: i32) -> (i32, i32) {
    %c0_i32 = arith.constant 0 : i32
    %c0_i32_0 = arith.constant 0 : i32
    %c0_i32_1 = arith.constant 0 : i32
    return %c0_i32, %c0_i32_0 : i32, i32
  }
  func.func @transform_2(%arg0: i32) -> (i32, i32) {
    %c0_i32 = arith.constant 0 : i32
    %c0_i32_0 = arith.constant 0 : i32
    %c0_i32_1 = arith.constant 0 : i32
    return %c0_i32, %c0_i32_0 : i32, i32
  }
  func.func @transform_3(%arg0: i32) -> (i32, i32) {
    %c0_i32 = arith.constant 0 : i32
    %c0_i32_0 = arith.constant 0 : i32
    return %arg0, %c0_i32 : i32, i32
  }
}

module attributes {stable_mosaic.version = 11 : i64} {
  func.func @_conv_relu_pool_kernel(%arg0: i32, %arg1: memref<9x24x1152xbf16, #tpu.memory_space<vmem>>, %arg2: memref<1152x128xbf16, #tpu.memory_space<vmem>>, %arg3: memref<1x128xf32, #tpu.memory_space<vmem>>, %arg4: memref<24x128xbf16, #tpu.memory_space<vmem>>) attributes {dimension_semantics = [#tpu.dimension_semantics<arbitrary>], iteration_bounds = array<i64: 1>, scalar_prefetch = 0 : i64, scratch_operands = 0 : i64, tpu.core_type = #tpu.core_type<tc>, window_params = [{transform_indices = @transform_0, window_bounds = array<i64: 9, 24, 1152>}, {pipeline_mode = #tpu.pipeline_mode<synchronous>, transform_indices = @transform_1, window_bounds = array<i64: 1152, 128>}, {pipeline_mode = #tpu.pipeline_mode<synchronous>, transform_indices = @transform_2, window_bounds = array<i64: 1, 128>}, {transform_indices = @transform_3, window_bounds = array<i64: 24, 128>}]} {
    %c0 = arith.constant 0 : index
    %c0_0 = arith.constant 0 : index
    %0 = vector.load %arg2[%c0, %c0_0] : memref<1152x128xbf16, #tpu.memory_space<vmem>>, vector<1152x128xbf16>
    %c0_1 = arith.constant 0 : index
    %c0_2 = arith.constant 0 : index
    %c0_3 = arith.constant 0 : index
    %1 = vector.load %arg1[%c0_1, %c0_2, %c0_3] : memref<9x24x1152xbf16, #tpu.memory_space<vmem>>, vector<1x24x1152xbf16>
    %2 = vector.shape_cast %1 : vector<1x24x1152xbf16> to vector<24x1152xbf16>
    %cst = arith.constant dense<0.000000e+00> : vector<24x128xf32>
    %3 = tpu.matmul %2, %0, %cst {dimension_numbers = #tpu.dot_dimension_numbers<[1], [0], [0], [1], [0, 0, 1, 1], [], []>} : vector<24x1152xbf16>, vector<1152x128xbf16>, vector<24x128xf32> -> vector<24x128xf32>
    %c1 = arith.constant 1 : index
    %c0_4 = arith.constant 0 : index
    %c0_5 = arith.constant 0 : index
    %4 = vector.load %arg1[%c1, %c0_4, %c0_5] : memref<9x24x1152xbf16, #tpu.memory_space<vmem>>, vector<1x24x1152xbf16>
    %5 = vector.shape_cast %4 : vector<1x24x1152xbf16> to vector<24x1152xbf16>
    %cst_6 = arith.constant dense<0.000000e+00> : vector<24x128xf32>
    %6 = tpu.matmul %5, %0, %cst_6 {dimension_numbers = #tpu.dot_dimension_numbers<[1], [0], [0], [1], [0, 0, 1, 1], [], []>} : vector<24x1152xbf16>, vector<1152x128xbf16>, vector<24x128xf32> -> vector<24x128xf32>
    %7 = arith.maximumf %3, %6 : vector<24x128xf32>
    %c2 = arith.constant 2 : index
    %c0_7 = arith.constant 0 : index
    %c0_8 = arith.constant 0 : index
    %8 = vector.load %arg1[%c2, %c0_7, %c0_8] : memref<9x24x1152xbf16, #tpu.memory_space<vmem>>, vector<1x24x1152xbf16>
    %9 = vector.shape_cast %8 : vector<1x24x1152xbf16> to vector<24x1152xbf16>
    %cst_9 = arith.constant dense<0.000000e+00> : vector<24x128xf32>
    %10 = tpu.matmul %9, %0, %cst_9 {dimension_numbers = #tpu.dot_dimension_numbers<[1], [0], [0], [1], [0, 0, 1, 1], [], []>} : vector<24x1152xbf16>, vector<1152x128xbf16>, vector<24x128xf32> -> vector<24x128xf32>
    %11 = arith.maximumf %7, %10 : vector<24x128xf32>
    %c3 = arith.constant 3 : index
    %c0_10 = arith.constant 0 : index
    %c0_11 = arith.constant 0 : index
    %12 = vector.load %arg1[%c3, %c0_10, %c0_11] : memref<9x24x1152xbf16, #tpu.memory_space<vmem>>, vector<1x24x1152xbf16>
    %13 = vector.shape_cast %12 : vector<1x24x1152xbf16> to vector<24x1152xbf16>
    %cst_12 = arith.constant dense<0.000000e+00> : vector<24x128xf32>
    %14 = tpu.matmul %13, %0, %cst_12 {dimension_numbers = #tpu.dot_dimension_numbers<[1], [0], [0], [1], [0, 0, 1, 1], [], []>} : vector<24x1152xbf16>, vector<1152x128xbf16>, vector<24x128xf32> -> vector<24x128xf32>
    %15 = arith.maximumf %11, %14 : vector<24x128xf32>
    %c4 = arith.constant 4 : index
    %c0_13 = arith.constant 0 : index
    %c0_14 = arith.constant 0 : index
    %16 = vector.load %arg1[%c4, %c0_13, %c0_14] : memref<9x24x1152xbf16, #tpu.memory_space<vmem>>, vector<1x24x1152xbf16>
    %17 = vector.shape_cast %16 : vector<1x24x1152xbf16> to vector<24x1152xbf16>
    %cst_15 = arith.constant dense<0.000000e+00> : vector<24x128xf32>
    %18 = tpu.matmul %17, %0, %cst_15 {dimension_numbers = #tpu.dot_dimension_numbers<[1], [0], [0], [1], [0, 0, 1, 1], [], []>} : vector<24x1152xbf16>, vector<1152x128xbf16>, vector<24x128xf32> -> vector<24x128xf32>
    %19 = arith.maximumf %15, %18 : vector<24x128xf32>
    %c5 = arith.constant 5 : index
    %c0_16 = arith.constant 0 : index
    %c0_17 = arith.constant 0 : index
    %20 = vector.load %arg1[%c5, %c0_16, %c0_17] : memref<9x24x1152xbf16, #tpu.memory_space<vmem>>, vector<1x24x1152xbf16>
    %21 = vector.shape_cast %20 : vector<1x24x1152xbf16> to vector<24x1152xbf16>
    %cst_18 = arith.constant dense<0.000000e+00> : vector<24x128xf32>
    %22 = tpu.matmul %21, %0, %cst_18 {dimension_numbers = #tpu.dot_dimension_numbers<[1], [0], [0], [1], [0, 0, 1, 1], [], []>} : vector<24x1152xbf16>, vector<1152x128xbf16>, vector<24x128xf32> -> vector<24x128xf32>
    %23 = arith.maximumf %19, %22 : vector<24x128xf32>
    %c6 = arith.constant 6 : index
    %c0_19 = arith.constant 0 : index
    %c0_20 = arith.constant 0 : index
    %24 = vector.load %arg1[%c6, %c0_19, %c0_20] : memref<9x24x1152xbf16, #tpu.memory_space<vmem>>, vector<1x24x1152xbf16>
    %25 = vector.shape_cast %24 : vector<1x24x1152xbf16> to vector<24x1152xbf16>
    %cst_21 = arith.constant dense<0.000000e+00> : vector<24x128xf32>
    %26 = tpu.matmul %25, %0, %cst_21 {dimension_numbers = #tpu.dot_dimension_numbers<[1], [0], [0], [1], [0, 0, 1, 1], [], []>} : vector<24x1152xbf16>, vector<1152x128xbf16>, vector<24x128xf32> -> vector<24x128xf32>
    %27 = arith.maximumf %23, %26 : vector<24x128xf32>
    %c7 = arith.constant 7 : index
    %c0_22 = arith.constant 0 : index
    %c0_23 = arith.constant 0 : index
    %28 = vector.load %arg1[%c7, %c0_22, %c0_23] : memref<9x24x1152xbf16, #tpu.memory_space<vmem>>, vector<1x24x1152xbf16>
    %29 = vector.shape_cast %28 : vector<1x24x1152xbf16> to vector<24x1152xbf16>
    %cst_24 = arith.constant dense<0.000000e+00> : vector<24x128xf32>
    %30 = tpu.matmul %29, %0, %cst_24 {dimension_numbers = #tpu.dot_dimension_numbers<[1], [0], [0], [1], [0, 0, 1, 1], [], []>} : vector<24x1152xbf16>, vector<1152x128xbf16>, vector<24x128xf32> -> vector<24x128xf32>
    %31 = arith.maximumf %27, %30 : vector<24x128xf32>
    %c8 = arith.constant 8 : index
    %c0_25 = arith.constant 0 : index
    %c0_26 = arith.constant 0 : index
    %32 = vector.load %arg1[%c8, %c0_25, %c0_26] : memref<9x24x1152xbf16, #tpu.memory_space<vmem>>, vector<1x24x1152xbf16>
    %33 = vector.shape_cast %32 : vector<1x24x1152xbf16> to vector<24x1152xbf16>
    %cst_27 = arith.constant dense<0.000000e+00> : vector<24x128xf32>
    %34 = tpu.matmul %33, %0, %cst_27 {dimension_numbers = #tpu.dot_dimension_numbers<[1], [0], [0], [1], [0, 0, 1, 1], [], []>} : vector<24x1152xbf16>, vector<1152x128xbf16>, vector<24x128xf32> -> vector<24x128xf32>
    %35 = arith.maximumf %31, %34 : vector<24x128xf32>
    %c0_28 = arith.constant 0 : index
    %c0_29 = arith.constant 0 : index
    %36 = vector.load %arg3[%c0_28, %c0_29] : memref<1x128xf32, #tpu.memory_space<vmem>>, vector<1x128xf32>
    %37 = vector.broadcast %36 : vector<1x128xf32> to vector<24x128xf32>
    %38 = arith.addf %35, %37 : vector<24x128xf32>
    %cst_30 = arith.constant 0.000000e+00 : f32
    %39 = vector.broadcast %cst_30 : f32 to vector<24x128xf32>
    %40 = arith.maximumf %38, %39 : vector<24x128xf32>
    %41 = arith.truncf %40 : vector<24x128xf32> to vector<24x128xbf16>
    %c0_31 = arith.constant 0 : index
    %c0_32 = arith.constant 0 : index
    %42 = vector.load %arg4[%c0_31, %c0_32] : memref<24x128xbf16, #tpu.memory_space<vmem>>, vector<24x128xbf16>
    tpu.vector_store %arg4[%c0_31, %c0_32], %41 {strides = array<i32>} : memref<24x128xbf16, #tpu.memory_space<vmem>>, vector<24x128xbf16>,
    return
  }
  func.func @transform_0(%arg0: i32) -> (i32, i32, i32) {
    %c0_i32 = arith.constant 0 : i32
    %c0_i32_0 = arith.constant 0 : i32
    %c0_i32_1 = arith.constant 0 : i32
    return %c0_i32, %arg0, %c0_i32_0 : i32, i32, i32
  }
  func.func @transform_1(%arg0: i32) -> (i32, i32) {
    %c0_i32 = arith.constant 0 : i32
    %c0_i32_0 = arith.constant 0 : i32
    %c0_i32_1 = arith.constant 0 : i32
    return %c0_i32, %c0_i32_0 : i32, i32
  }
  func.func @transform_2(%arg0: i32) -> (i32, i32) {
    %c0_i32 = arith.constant 0 : i32
    %c0_i32_0 = arith.constant 0 : i32
    %c0_i32_1 = arith.constant 0 : i32
    return %c0_i32, %c0_i32_0 : i32, i32
  }
  func.func @transform_3(%arg0: i32) -> (i32, i32) {
    %c0_i32 = arith.constant 0 : i32
    %c0_i32_0 = arith.constant 0 : i32
    return %arg0, %c0_i32 : i32, i32
  }
}

module attributes {stable_mosaic.version = 11 : i64} {
  func.func @_mlp_kernel(%arg0: i32, %arg1: memref<8x1x128xbf16, #tpu.memory_space<vmem>>, %arg2: memref<128x128xf32, #tpu.memory_space<vmem>>, %arg3: memref<1x128xf32, #tpu.memory_space<vmem>>, %arg4: memref<128x128xf32, #tpu.memory_space<vmem>>, %arg5: memref<1x128xf32, #tpu.memory_space<vmem>>, %arg6: memref<128x128xf32, #tpu.memory_space<vmem>>, %arg7: memref<1x128xf32, #tpu.memory_space<vmem>>, %arg8: memref<8x128xf32, #tpu.memory_space<vmem>>) attributes {dimension_semantics = [#tpu.dimension_semantics<arbitrary>], iteration_bounds = array<i64: 1>, scalar_prefetch = 0 : i64, scratch_operands = 0 : i64, tpu.core_type = #tpu.core_type<tc>, window_params = [{pipeline_mode = #tpu.pipeline_mode<synchronous>, transform_indices = @transform_0, window_bounds = array<i64: 8, 1, 128>}, {pipeline_mode = #tpu.pipeline_mode<synchronous>, transform_indices = @transform_1, window_bounds = array<i64: 128, 128>}, {pipeline_mode = #tpu.pipeline_mode<synchronous>, transform_indices = @transform_2, window_bounds = array<i64: 1, 128>}, {pipeline_mode = #tpu.pipeline_mode<synchronous>, transform_indices = @transform_3, window_bounds = array<i64: 128, 128>}, {pipeline_mode = #tpu.pipeline_mode<synchronous>, transform_indices = @transform_4, window_bounds = array<i64: 1, 128>}, {pipeline_mode = #tpu.pipeline_mode<synchronous>, transform_indices = @transform_5, window_bounds = array<i64: 128, 128>}, {pipeline_mode = #tpu.pipeline_mode<synchronous>, transform_indices = @transform_6, window_bounds = array<i64: 1, 128>}, {pipeline_mode = #tpu.pipeline_mode<synchronous>, transform_indices = @transform_7, window_bounds = array<i64: 8, 128>}]} {
    %c0 = arith.constant 0 : index
    %c0_0 = arith.constant 0 : index
    %c0_1 = arith.constant 0 : index
    %0 = vector.load %arg1[%c0, %c0_0, %c0_1] : memref<8x1x128xbf16, #tpu.memory_space<vmem>>, vector<8x1x128xbf16>
    %1 = arith.extf %0 : vector<8x1x128xbf16> to vector<8x1x128xf32>
    %cst = arith.constant dense<0.000000e+00> : vector<8x128xf32>
    %2 = vector.multi_reduction <add>, %1, %cst [1] : vector<8x1x128xf32> to vector<8x128xf32>
    %cst_2 = arith.constant 1.000000e+00 : f32
    %3 = vector.broadcast %cst_2 : f32 to vector<8x128xf32>
    %4 = arith.divf %2, %3 : vector<8x128xf32>
    %c0_3 = arith.constant 0 : index
    %c0_4 = arith.constant 0 : index
    %5 = vector.load %arg2[%c0_3, %c0_4] : memref<128x128xf32, #tpu.memory_space<vmem>>, vector<128x128xf32>
    %cst_5 = arith.constant dense<0.000000e+00> : vector<8x128xf32>
    %6 = tpu.matmul %4, %5, %cst_5 {dimension_numbers = #tpu.dot_dimension_numbers<[1], [0], [0], [1], [0, 0, 1, 1], [], []>} : vector<8x128xf32>, vector<128x128xf32>, vector<8x128xf32> -> vector<8x128xf32>
    %c0_6 = arith.constant 0 : index
    %c0_7 = arith.constant 0 : index
    %7 = vector.load %arg3[%c0_6, %c0_7] : memref<1x128xf32, #tpu.memory_space<vmem>>, vector<1x128xf32>
    %8 = vector.broadcast %7 : vector<1x128xf32> to vector<8x128xf32>
    %9 = arith.addf %6, %8 : vector<8x128xf32>
    %10 = math.tanh %9 : vector<8x128xf32>
    %c0_8 = arith.constant 0 : index
    %c0_9 = arith.constant 0 : index
    %11 = vector.load %arg4[%c0_8, %c0_9] : memref<128x128xf32, #tpu.memory_space<vmem>>, vector<128x128xf32>
    %cst_10 = arith.constant dense<0.000000e+00> : vector<8x128xf32>
    %12 = tpu.matmul %10, %11, %cst_10 {dimension_numbers = #tpu.dot_dimension_numbers<[1], [0], [0], [1], [0, 0, 1, 1], [], []>} : vector<8x128xf32>, vector<128x128xf32>, vector<8x128xf32> -> vector<8x128xf32>
    %c0_11 = arith.constant 0 : index
    %c0_12 = arith.constant 0 : index
    %13 = vector.load %arg5[%c0_11, %c0_12] : memref<1x128xf32, #tpu.memory_space<vmem>>, vector<1x128xf32>
    %14 = vector.broadcast %13 : vector<1x128xf32> to vector<8x128xf32>
    %15 = arith.addf %12, %14 : vector<8x128xf32>
    %16 = math.tanh %15 : vector<8x128xf32>
    %c0_13 = arith.constant 0 : index
    %c0_14 = arith.constant 0 : index
    %17 = vector.load %arg6[%c0_13, %c0_14] : memref<128x128xf32, #tpu.memory_space<vmem>>, vector<128x128xf32>
    %cst_15 = arith.constant dense<0.000000e+00> : vector<8x128xf32>
    %18 = tpu.matmul %16, %17, %cst_15 {dimension_numbers = #tpu.dot_dimension_numbers<[1], [0], [0], [1], [0, 0, 1, 1], [], []>} : vector<8x128xf32>, vector<128x128xf32>, vector<8x128xf32> -> vector<8x128xf32>
    %c0_16 = arith.constant 0 : index
    %c0_17 = arith.constant 0 : index
    %19 = vector.load %arg7[%c0_16, %c0_17] : memref<1x128xf32, #tpu.memory_space<vmem>>, vector<1x128xf32>
    %20 = vector.broadcast %19 : vector<1x128xf32> to vector<8x128xf32>
    %21 = arith.addf %18, %20 : vector<8x128xf32>
    %cst_18 = arith.constant dense<0xFF800000> : vector<8xf32>
    %22 = vector.multi_reduction <maximumf>, %21, %cst_18 [1] : vector<8x128xf32> to vector<8xf32>
    %23 = vector.shape_cast %22 : vector<8xf32> to vector<8x1xf32>
    %24 = vector.broadcast %23 : vector<8x1xf32> to vector<8x128xf32>
    %25 = arith.subf %21, %24 : vector<8x128xf32>
    %26 = math.exp %25 : vector<8x128xf32>
    %cst_19 = arith.constant dense<0.000000e+00> : vector<8xf32>
    %27 = vector.multi_reduction <add>, %26, %cst_19 [1] : vector<8x128xf32> to vector<8xf32>
    %28 = vector.shape_cast %27 : vector<8xf32> to vector<8x1xf32>
    %29 = tpu.reciprocal %28 {approx = true} : vector<8x1xf32> -> vector<8x1xf32>
    %30 = vector.broadcast %29 : vector<8x1xf32> to vector<8x128xf32>
    %31 = arith.mulf %26, %30 : vector<8x128xf32>
    %c0_20 = arith.constant 0 : index
    %c0_21 = arith.constant 0 : index
    %32 = vector.load %arg8[%c0_20, %c0_21] : memref<8x128xf32, #tpu.memory_space<vmem>>, vector<8x128xf32>
    tpu.vector_store %arg8[%c0_20, %c0_21], %31 {strides = array<i32>} : memref<8x128xf32, #tpu.memory_space<vmem>>, vector<8x128xf32>,
    return
  }
  func.func @transform_0(%arg0: i32) -> (i32, i32, i32) {
    %c0_i32 = arith.constant 0 : i32
    %c0_i32_0 = arith.constant 0 : i32
    %c0_i32_1 = arith.constant 0 : i32
    %c0_i32_2 = arith.constant 0 : i32
    return %c0_i32, %c0_i32_0, %c0_i32_1 : i32, i32, i32
  }
  func.func @transform_1(%arg0: i32) -> (i32, i32) {
    %c0_i32 = arith.constant 0 : i32
    %c0_i32_0 = arith.constant 0 : i32
    %c0_i32_1 = arith.constant 0 : i32
    return %c0_i32, %c0_i32_0 : i32, i32
  }
  func.func @transform_2(%arg0: i32) -> (i32, i32) {
    %c0_i32 = arith.constant 0 : i32
    %c0_i32_0 = arith.constant 0 : i32
    %c0_i32_1 = arith.constant 0 : i32
    return %c0_i32, %c0_i32_0 : i32, i32
  }
  func.func @transform_3(%arg0: i32) -> (i32, i32) {
    %c0_i32 = arith.constant 0 : i32
    %c0_i32_0 = arith.constant 0 : i32
    %c0_i32_1 = arith.constant 0 : i32
    return %c0_i32, %c0_i32_0 : i32, i32
  }
  func.func @transform_4(%arg0: i32) -> (i32, i32) {
    %c0_i32 = arith.constant 0 : i32
    %c0_i32_0 = arith.constant 0 : i32
    %c0_i32_1 = arith.constant 0 : i32
    return %c0_i32, %c0_i32_0 : i32, i32
  }
  func.func @transform_5(%arg0: i32) -> (i32, i32) {
    %c0_i32 = arith.constant 0 : i32
    %c0_i32_0 = arith.constant 0 : i32
    %c0_i32_1 = arith.constant 0 : i32
    return %c0_i32, %c0_i32_0 : i32, i32
  }
  func.func @transform_6(%arg0: i32) -> (i32, i32) {
    %c0_i32 = arith.constant 0 : i32
    %c0_i32_0 = arith.constant 0 : i32
    %c0_i32_1 = arith.constant 0 : i32
    return %c0_i32, %c0_i32_0 : i32, i32
  }
  func.func @transform_7(%arg0: i32) -> (i32, i32) {
    %c0_i32 = arith.constant 0 : i32
    %c0_i32_0 = arith.constant 0 : i32
    %c0_i32_1 = arith.constant 0 : i32
    return %c0_i32, %c0_i32_0 : i32, i32
  }
}

module attributes {stable_mosaic.version = 11 : i64} {
  func.func @_conv_relu_pool_kernel(%arg0: i32, %arg1: memref<9x8x1152xbf16, #tpu.memory_space<vmem>>, %arg2: memref<1152x128xbf16, #tpu.memory_space<vmem>>, %arg3: memref<1x128xf32, #tpu.memory_space<vmem>>, %arg4: memref<8x128xbf16, #tpu.memory_space<vmem>>) attributes {dimension_semantics = [#tpu.dimension_semantics<arbitrary>], iteration_bounds = array<i64: 1>, scalar_prefetch = 0 : i64, scratch_operands = 0 : i64, tpu.core_type = #tpu.core_type<tc>, window_params = [{transform_indices = @transform_0, window_bounds = array<i64: 9, 8, 1152>}, {pipeline_mode = #tpu.pipeline_mode<synchronous>, transform_indices = @transform_1, window_bounds = array<i64: 1152, 128>}, {pipeline_mode = #tpu.pipeline_mode<synchronous>, transform_indices = @transform_2, window_bounds = array<i64: 1, 128>}, {transform_indices = @transform_3, window_bounds = array<i64: 8, 128>}]} {
    %c0 = arith.constant 0 : index
    %c0_0 = arith.constant 0 : index
    %0 = vector.load %arg2[%c0, %c0_0] : memref<1152x128xbf16, #tpu.memory_space<vmem>>, vector<1152x128xbf16>
    %c0_1 = arith.constant 0 : index
    %c0_2 = arith.constant 0 : index
    %c0_3 = arith.constant 0 : index
    %1 = vector.load %arg1[%c0_1, %c0_2, %c0_3] : memref<9x8x1152xbf16, #tpu.memory_space<vmem>>, vector<1x8x1152xbf16>
    %2 = vector.shape_cast %1 : vector<1x8x1152xbf16> to vector<8x1152xbf16>
    %cst = arith.constant dense<0.000000e+00> : vector<8x128xf32>
    %3 = tpu.matmul %2, %0, %cst {dimension_numbers = #tpu.dot_dimension_numbers<[1], [0], [0], [1], [0, 0, 1, 1], [], []>} : vector<8x1152xbf16>, vector<1152x128xbf16>, vector<8x128xf32> -> vector<8x128xf32>
    %c1 = arith.constant 1 : index
    %c0_4 = arith.constant 0 : index
    %c0_5 = arith.constant 0 : index
    %4 = vector.load %arg1[%c1, %c0_4, %c0_5] : memref<9x8x1152xbf16, #tpu.memory_space<vmem>>, vector<1x8x1152xbf16>
    %5 = vector.shape_cast %4 : vector<1x8x1152xbf16> to vector<8x1152xbf16>
    %cst_6 = arith.constant dense<0.000000e+00> : vector<8x128xf32>
    %6 = tpu.matmul %5, %0, %cst_6 {dimension_numbers = #tpu.dot_dimension_numbers<[1], [0], [0], [1], [0, 0, 1, 1], [], []>} : vector<8x1152xbf16>, vector<1152x128xbf16>, vector<8x128xf32> -> vector<8x128xf32>
    %7 = arith.maximumf %3, %6 : vector<8x128xf32>
    %c2 = arith.constant 2 : index
    %c0_7 = arith.constant 0 : index
    %c0_8 = arith.constant 0 : index
    %8 = vector.load %arg1[%c2, %c0_7, %c0_8] : memref<9x8x1152xbf16, #tpu.memory_space<vmem>>, vector<1x8x1152xbf16>
    %9 = vector.shape_cast %8 : vector<1x8x1152xbf16> to vector<8x1152xbf16>
    %cst_9 = arith.constant dense<0.000000e+00> : vector<8x128xf32>
    %10 = tpu.matmul %9, %0, %cst_9 {dimension_numbers = #tpu.dot_dimension_numbers<[1], [0], [0], [1], [0, 0, 1, 1], [], []>} : vector<8x1152xbf16>, vector<1152x128xbf16>, vector<8x128xf32> -> vector<8x128xf32>
    %11 = arith.maximumf %7, %10 : vector<8x128xf32>
    %c3 = arith.constant 3 : index
    %c0_10 = arith.constant 0 : index
    %c0_11 = arith.constant 0 : index
    %12 = vector.load %arg1[%c3, %c0_10, %c0_11] : memref<9x8x1152xbf16, #tpu.memory_space<vmem>>, vector<1x8x1152xbf16>
    %13 = vector.shape_cast %12 : vector<1x8x1152xbf16> to vector<8x1152xbf16>
    %cst_12 = arith.constant dense<0.000000e+00> : vector<8x128xf32>
    %14 = tpu.matmul %13, %0, %cst_12 {dimension_numbers = #tpu.dot_dimension_numbers<[1], [0], [0], [1], [0, 0, 1, 1], [], []>} : vector<8x1152xbf16>, vector<1152x128xbf16>, vector<8x128xf32> -> vector<8x128xf32>
    %15 = arith.maximumf %11, %14 : vector<8x128xf32>
    %c4 = arith.constant 4 : index
    %c0_13 = arith.constant 0 : index
    %c0_14 = arith.constant 0 : index
    %16 = vector.load %arg1[%c4, %c0_13, %c0_14] : memref<9x8x1152xbf16, #tpu.memory_space<vmem>>, vector<1x8x1152xbf16>
    %17 = vector.shape_cast %16 : vector<1x8x1152xbf16> to vector<8x1152xbf16>
    %cst_15 = arith.constant dense<0.000000e+00> : vector<8x128xf32>
    %18 = tpu.matmul %17, %0, %cst_15 {dimension_numbers = #tpu.dot_dimension_numbers<[1], [0], [0], [1], [0, 0, 1, 1], [], []>} : vector<8x1152xbf16>, vector<1152x128xbf16>, vector<8x128xf32> -> vector<8x128xf32>
    %19 = arith.maximumf %15, %18 : vector<8x128xf32>
    %c5 = arith.constant 5 : index
    %c0_16 = arith.constant 0 : index
    %c0_17 = arith.constant 0 : index
    %20 = vector.load %arg1[%c5, %c0_16, %c0_17] : memref<9x8x1152xbf16, #tpu.memory_space<vmem>>, vector<1x8x1152xbf16>
    %21 = vector.shape_cast %20 : vector<1x8x1152xbf16> to vector<8x1152xbf16>
    %cst_18 = arith.constant dense<0.000000e+00> : vector<8x128xf32>
    %22 = tpu.matmul %21, %0, %cst_18 {dimension_numbers = #tpu.dot_dimension_numbers<[1], [0], [0], [1], [0, 0, 1, 1], [], []>} : vector<8x1152xbf16>, vector<1152x128xbf16>, vector<8x128xf32> -> vector<8x128xf32>
    %23 = arith.maximumf %19, %22 : vector<8x128xf32>
    %c6 = arith.constant 6 : index
    %c0_19 = arith.constant 0 : index
    %c0_20 = arith.constant 0 : index
    %24 = vector.load %arg1[%c6, %c0_19, %c0_20] : memref<9x8x1152xbf16, #tpu.memory_space<vmem>>, vector<1x8x1152xbf16>
    %25 = vector.shape_cast %24 : vector<1x8x1152xbf16> to vector<8x1152xbf16>
    %cst_21 = arith.constant dense<0.000000e+00> : vector<8x128xf32>
    %26 = tpu.matmul %25, %0, %cst_21 {dimension_numbers = #tpu.dot_dimension_numbers<[1], [0], [0], [1], [0, 0, 1, 1], [], []>} : vector<8x1152xbf16>, vector<1152x128xbf16>, vector<8x128xf32> -> vector<8x128xf32>
    %27 = arith.maximumf %23, %26 : vector<8x128xf32>
    %c7 = arith.constant 7 : index
    %c0_22 = arith.constant 0 : index
    %c0_23 = arith.constant 0 : index
    %28 = vector.load %arg1[%c7, %c0_22, %c0_23] : memref<9x8x1152xbf16, #tpu.memory_space<vmem>>, vector<1x8x1152xbf16>
    %29 = vector.shape_cast %28 : vector<1x8x1152xbf16> to vector<8x1152xbf16>
    %cst_24 = arith.constant dense<0.000000e+00> : vector<8x128xf32>
    %30 = tpu.matmul %29, %0, %cst_24 {dimension_numbers = #tpu.dot_dimension_numbers<[1], [0], [0], [1], [0, 0, 1, 1], [], []>} : vector<8x1152xbf16>, vector<1152x128xbf16>, vector<8x128xf32> -> vector<8x128xf32>
    %31 = arith.maximumf %27, %30 : vector<8x128xf32>
    %c8 = arith.constant 8 : index
    %c0_25 = arith.constant 0 : index
    %c0_26 = arith.constant 0 : index
    %32 = vector.load %arg1[%c8, %c0_25, %c0_26] : memref<9x8x1152xbf16, #tpu.memory_space<vmem>>, vector<1x8x1152xbf16>
    %33 = vector.shape_cast %32 : vector<1x8x1152xbf16> to vector<8x1152xbf16>
    %cst_27 = arith.constant dense<0.000000e+00> : vector<8x128xf32>
    %34 = tpu.matmul %33, %0, %cst_27 {dimension_numbers = #tpu.dot_dimension_numbers<[1], [0], [0], [1], [0, 0, 1, 1], [], []>} : vector<8x1152xbf16>, vector<1152x128xbf16>, vector<8x128xf32> -> vector<8x128xf32>
    %35 = arith.maximumf %31, %34 : vector<8x128xf32>
    %c0_28 = arith.constant 0 : index
    %c0_29 = arith.constant 0 : index
    %36 = vector.load %arg3[%c0_28, %c0_29] : memref<1x128xf32, #tpu.memory_space<vmem>>, vector<1x128xf32>
    %37 = vector.broadcast %36 : vector<1x128xf32> to vector<8x128xf32>
    %38 = arith.addf %35, %37 : vector<8x128xf32>
    %cst_30 = arith.constant 0.000000e+00 : f32
    %39 = vector.broadcast %cst_30 : f32 to vector<8x128xf32>
    %40 = arith.maximumf %38, %39 : vector<8x128xf32>
    %41 = arith.truncf %40 : vector<8x128xf32> to vector<8x128xbf16>
    %c0_31 = arith.constant 0 : index
    %c0_32 = arith.constant 0 : index
    %42 = vector.load %arg4[%c0_31, %c0_32] : memref<8x128xbf16, #tpu.memory_space<vmem>>, vector<8x128xbf16>
    tpu.vector_store %arg4[%c0_31, %c0_32], %41 {strides = array<i32>} : memref<8x128xbf16, #tpu.memory_space<vmem>>, vector<8x128xbf16>,
    return
  }
  func.func @transform_0(%arg0: i32) -> (i32, i32, i32) {
    %c0_i32 = arith.constant 0 : i32
    %c0_i32_0 = arith.constant 0 : i32
    %c0_i32_1 = arith.constant 0 : i32
    return %c0_i32, %arg0, %c0_i32_0 : i32, i32, i32
  }
  func.func @transform_1(%arg0: i32) -> (i32, i32) {
    %c0_i32 = arith.constant 0 : i32
    %c0_i32_0 = arith.constant 0 : i32
    %c0_i32_1 = arith.constant 0 : i32
    return %c0_i32, %c0_i32_0 : i32, i32
  }
  func.func @transform_2(%arg0: i32) -> (i32, i32) {
    %c0_i32 = arith.constant 0 : i32
    %c0_i32_0 = arith.constant 0 : i32
    %c0_i32_1 = arith.constant 0 : i32
    return %c0_i32, %c0_i32_0 : i32, i32
  }
  func.func @transform_3(%arg0: i32) -> (i32, i32) {
    %c0_i32 = arith.constant 0 : i32
    %c0_i32_0 = arith.constant 0 : i32
    return %arg0, %c0_i32 : i32, i32
  }
}

</mosaic_0001>

<bundles_post_ra>
// kernel: model2_forward.4
= control target key start
LH: loop header
LB: loop body
LE: loop exit
PB: predicated region body
PF: predicated region fallthrough
CT: control target
= control target key end

     0   :  { %s9946_s1 = inlined_call_operand.vmem [shape: bf16[128,128], index: 1, kind: input, shape index: {}]   ;;  %s9947_s0 = inlined_call_operand.vmem [shape: bf16[9,480,128], index: 0, kind: input, shape index: {}]   ;;  %s9948_s2 = inlined_call_operand.vmem [shape: f32[1,128], index: 2, kind: input, shape index: {}]   ;;  %s9949_s3 = inlined_call_operand.vmem [shape: bf16[480,128], index: 3, kind: output, shape index: {}]  }
   0x1   :  { %v8024_v0 = vld [vmem:[%s9946_s1 + $0x38] sm:$0xff]   ;;  %v8029_v1 = vld [vmem:[%s9946_s1 + $0x30] sm:$0xff]   ;;  %v8040_v2 = vld [vmem:[%s9946_s1 + $0x28] sm:$0xff]  }
   0x2   :  { %7015 = vmatprep.subr.bf16.mxu0 %v8024_v0  ;;  %7699 = vmatprep.subr.bf16.mxu1 %v8024_v0  ;;  %v8047_v3 = vld [vmem:[%s9946_s1 + $0x20] sm:$0xff]   ;;  %v8064_v6 = vld [vmem:[%s9946_s1 + $0x18] sm:$0xff]   ;;  %v8073_v7 = vld [vmem:[%s9946_s1 + $0x10] sm:$0xff]  }
   0x3   :  { %7016 = vmatpush3.bf16.msra.mxu0 %v8024_v0  ;;  %7707 = vmatpush3.bf16.msra.mxu1 %v8024_v0  ;;  %v7723_v4 = vld [vmem:[%s9947_s0] sm:$0xff]   ;;  %v8082_v8 = vld [vmem:[%s9946_s1 + $0x8] sm:$0xff]   ;;  %v7727_v12 = vld [vmem:[%s9947_s0 + $0x10] sm:$0xff]  }
   0x4   :  { %7017 = vmatprep.subr.bf16.mxu0 %v8029_v1  ;;  %7700 = vmatprep.subr.bf16.mxu1 %v8029_v1  ;;  %v7724_v5 = vld [vmem:[%s9947_s0 + $0x80] sm:$0xff]   ;;  %v7725_v10 = vld [vmem:[%s9947_s0 + $0x8] sm:$0xff]   ;;  %v7728_v13 = vld [vmem:[%s9947_s0 + $0x90] sm:$0xff]  }
   0x5   :  { %7031 = vmatprep.mubr.bf16.mxu0 %v7723_v4  ;;  %7063 = vmatprep.mubr.bf16.mxu1 %v7724_v5  ;;  %v8091_v9 = vld [vmem:[%s9946_s1] sm:$0xff]   ;;  %v7726_v11 = vld [vmem:[%s9947_s0 + $0x88] sm:$0xff]   ;;  %v7729_v14 = vld [vmem:[%s9947_s0 + $0x18] sm:$0xff]  }
   0x6   :  { %v7730_v15 = vld [vmem:[%s9947_s0 + $0x98] sm:$0xff]   ;;  %v7731_v16 = vld [vmem:[%s9947_s0 + $0x20] sm:$0xff]   ;;  %v7733_v18 = vld [vmem:[%s9947_s0 + $0x28] sm:$0xff]  }
   0x7   :  { %7018 = vmatpush3.bf16.msra.mxu0 %v8029_v1  ;;  %7708 = vmatpush3.bf16.msra.mxu1 %v8029_v1  ;;  %v7732_v17 = vld [vmem:[%s9947_s0 + $0xa0] sm:$0xff]   ;;  %v7734_v19 = vld [vmem:[%s9947_s0 + $0xa8] sm:$0xff]   ;;  %v7735_v20 = vld [vmem:[%s9947_s0 + $0x30] sm:$0xff]  }
   0x8   :  { %7019 = vmatprep.subr.bf16.mxu0 %v8040_v2  ;;  %7701 = vmatprep.subr.bf16.mxu1 %v8040_v2  ;;  %v7736_v21 = vld [vmem:[%s9947_s0 + $0xb0] sm:$0xff]   ;;  %v7737_v22 = vld [vmem:[%s9947_s0 + $0x38] sm:$0xff]   ;;  %v7739_v24 = vld [vmem:[%s9947_s0 + $0x40] sm:$0xff]  }
   0x9   :  { %v7738_v23 = vld [vmem:[%s9947_s0 + $0xb8] sm:$0xff]   ;;  %v7740_v25 = vld [vmem:[%s9947_s0 + $0xc0] sm:$0xff]   ;;  %v7741_v26 = vld [vmem:[%s9947_s0 + $0x48] sm:$0xff]  }
   0xa   :  { %v7742_v27 = vld [vmem:[%s9947_s0 + $0xc8] sm:$0xff]   ;;  %v7743_v28 = vld [vmem:[%s9947_s0 + $0x50] sm:$0xff]   ;;  %v7745_v30 = vld [vmem:[%s9947_s0 + $0x58] sm:$0xff]  }
   0xb   :  { %7020 = vmatpush3.bf16.msra.mxu0 %v8040_v2  ;;  %7709 = vmatpush3.bf16.msra.mxu1 %v8040_v2  ;;  %v7744_v29 = vld [vmem:[%s9947_s0 + $0xd0] sm:$0xff]   ;;  %v7746_v31 = vld [vmem:[%s9947_s0 + $0xd8] sm:$0xff]   ;;  %v7747_v32 = vld [vmem:[%s9947_s0 + $0x60] sm:$0xff]  }
   0xc   :  { %7021 = vmatprep.subr.bf16.mxu0 %v8047_v3  ;;  %7702 = vmatprep.subr.bf16.mxu1 %v8047_v3  ;;  %v7748_v33 = vld [vmem:[%s9947_s0 + $0xe0] sm:$0xff]   ;;  %v7749_v34 = vld [vmem:[%s9947_s0 + $0x68] sm:$0xff]   ;;  %v7751_v36 = vld [vmem:[%s9947_s0 + $0x70] sm:$0xff]  }
   0xd   :  { %v7750_v35 = vld [vmem:[%s9947_s0 + $0xe8] sm:$0xff]   ;;  %v7752_v37 = vld [vmem:[%s9947_s0 + $0xf0] sm:$0xff]   ;;  %v7753_v38 = vld [vmem:[%s9947_s0 + $0x78] sm:$0xff]  }
   0xe   :  { %v7754_v39 = vld [vmem:[%s9947_s0 + $0xf8] sm:$0xff]   ;;  %v7755_v40 = vld [vmem:[%s9947_s0 + $0x100] sm:$0xff]   ;;  %v7757_v42 = vld [vmem:[%s9947_s0 + $0x108] sm:$0xff]  }
   0xf   :  { %7022 = vmatpush3.bf16.msra.mxu0 %v8047_v3  ;;  %7710 = vmatpush3.bf16.msra.mxu1 %v8047_v3  ;;  %v7756_v41 = vld [vmem:[%s9947_s0 + $0x1e0] sm:$0xff]   ;;  %v7758_v43 = vld [vmem:[%s9947_s0 + $0x1e8] sm:$0xff]   ;;  %v7759_v44 = vld [vmem:[%s9947_s0 + $0x110] sm:$0xff]  }
  0x10   :  { %7023 = vmatprep.subr.bf16.mxu0 %v8064_v6  ;;  %7703 = vmatprep.subr.bf16.mxu1 %v8064_v6  ;;  %v7760_v45 = vld [vmem:[%s9947_s0 + $0x1f0] sm:$0xff]   ;;  %v7761_v46 = vld [vmem:[%s9947_s0 + $0x118] sm:$0xff]   ;;  %v7763_v48 = vld [vmem:[%s9947_s0 + $0x120] sm:$0xff]  }
  0x11   :  { %v7762_v47 = vld [vmem:[%s9947_s0 + $0x1f8] sm:$0xff]   ;;  %v7764_v49 = vld [vmem:[%s9947_s0 + $0x200] sm:$0xff]   ;;  %v7765_v50 = vld [vmem:[%s9947_s0 + $0x128] sm:$0xff]  }
  0x12   :  { %v7766_v51 = vld [vmem:[%s9947_s0 + $0x208] sm:$0xff]   ;;  %v7767_v52 = vld [vmem:[%s9947_s0 + $0x130] sm:$0xff]   ;;  %v7769_v54 = vld [vmem:[%s9947_s0 + $0x138] sm:$0xff]  }
  0x13   :  { %7024 = vmatpush3.bf16.msra.mxu0 %v8064_v6  ;;  %7711 = vmatpush3.bf16.msra.mxu1 %v8064_v6  ;;  %v7768_v53 = vld [vmem:[%s9947_s0 + $0x210] sm:$0xff]   ;;  %v7770_v55 = vld [vmem:[%s9947_s0 + $0x218] sm:$0xff]   ;;  %v7771_v56 = vld [vmem:[%s9947_s0 + $0x140] sm:$0xff]  }
  0x14   :  { %7025 = vmatprep.subr.bf16.mxu0 %v8073_v7  ;;  %7704 = vmatprep.subr.bf16.mxu1 %v8073_v7  ;;  %v7772_v57 = vld [vmem:[%s9947_s0 + $0x220] sm:$0xff]   ;;  %v7773_v58 = vld [vmem:[%s9947_s0 + $0x148] sm:$0xff]   ;;  %v7775_v60 = vld [vmem:[%s9947_s0 + $0x150] sm:$0xff]  }
  0x15   :  { %v7774_v59 = vld [vmem:[%s9947_s0 + $0x228] sm:$0xff]   ;;  %v7776_v61 = vld [vmem:[%s9947_s0 + $0x230] sm:$0xff]   ;;  %v7777_v62 = vld [vmem:[%s9947_s0 + $0x158] sm:$0xff]  }
  0x16   :  { %v7778_v63 = vld [vmem:[%s9947_s0 + $0x238] sm:$0xff]   ;;  %v7783_v4 = vld [vmem:[%s9947_s0 + $0x170] sm:$0xff]  }
  0x17   :  { %7026 = vmatpush3.bf16.msra.mxu0 %v8073_v7  ;;  %7712 = vmatpush3.bf16.msra.mxu1 %v8073_v7  ;;  %v7784_v5 = vld [vmem:[%s9947_s0 + $0x250] sm:$0xff]  }
  0x18   :  { %7027 = vmatprep.subr.bf16.mxu0 %v8082_v8  ;;  %7705 = vmatprep.subr.bf16.mxu1 %v8082_v8 }
  0x1b   :  { %7028 = vmatpush3.bf16.msra.mxu0 %v8082_v8  ;;  %7713 = vmatpush3.bf16.msra.mxu1 %v8082_v8 }
  0x1c   :  { %7029 = vmatprep.subr.bf16.mxu0 %v8091_v9  ;;  %7706 = vmatprep.subr.bf16.mxu1 %v8091_v9 }
  0x1f   :  { %7030 = vmatpush3.bf16.msra.mxu0 %v8091_v9  ;;  %7714 = vmatpush3.bf16.msra.mxu1 %v8091_v9 }
  0x20   :  { %7167 = vmatprep.subr.bf16.mxu0 %v8024_v0  ;;  %7091 = vmatprep.subr.bf16.mxu1 %v8024_v0 }
  0x22   :  { %7032 = vmatmul.mubr.bf16.vlgmr.msra.gmra.mxu0 %v7725_v10  ;;  %7064 = vmatmul.mubr.bf16.vlgmr.msra.gmra.mxu1 %v7726_v11  ;;  %v7789_v10 = vld [vmem:[%s9947_s0 + $0x188] sm:$0xff]  }
  0x23   :  { %7168 = vmatpush3.bf16.msra.mxu0 %v8024_v0  ;;  %7035 = vmatprep.mubr.bf16.mxu0 %v7727_v12  ;;  %v7790_v11 = vld [vmem:[%s9947_s0 + $0x268] sm:$0xff]   ;;  %v7791_v12 = vld [vmem:[%s9947_s0 + $0x190] sm:$0xff]  }
  0x24   :  { %7067 = vmatprep.mubr.bf16.mxu1 %v7728_v13  ;;  %7092 = vmatpush3.bf16.msra.mxu1 %v8024_v0  ;;  %v7792_v13 = vld [vmem:[%s9947_s0 + $0x270] sm:$0xff]  }
  0x25   :  { %7169 = vmatprep.subr.bf16.mxu0 %v8029_v1  ;;  %7093 = vmatprep.subr.bf16.mxu1 %v8029_v1 }
  0x27   :  { %7170 = vmatpush3.bf16.msra.mxu0 %v8029_v1 }
  0x28   :  { %7094 = vmatpush3.bf16.msra.mxu1 %v8029_v1  ;;  %7171 = vmatprep.subr.bf16.mxu0 %v8040_v2 }
  0x29   :  { %7095 = vmatprep.subr.bf16.mxu1 %v8040_v2 }
  0x2a   :  { %7036 = vmatmul.mubr.bf16.gmra.mxu0 %v7729_v14  ;;  %7068 = vmatmul.mubr.bf16.gmra.mxu1 %v7730_v15  ;;  %v7793_v14 = vld [vmem:[%s9947_s0 + $0x198] sm:$0xff]  }
  0x2b   :  { %7039 = vmatprep.mubr.bf16.mxu0 %v7731_v16  ;;  %7071 = vmatprep.mubr.bf16.mxu1 %v7732_v17  ;;  %v7794_v15 = vld [vmem:[%s9947_s0 + $0x278] sm:$0xff]   ;;  %v7795_v16 = vld [vmem:[%s9947_s0 + $0x1a0] sm:$0xff]  }
  0x2c   :  { %7172 = vmatpush3.bf16.msra.mxu0 %v8040_v2  ;;  %7096 = vmatpush3.bf16.msra.mxu1 %v8040_v2  ;;  %v7796_v17 = vld [vmem:[%s9947_s0 + $0x280] sm:$0xff]  }
  0x2d   :  { %7173 = vmatprep.subr.bf16.mxu0 %v8047_v3  ;;  %7097 = vmatprep.subr.bf16.mxu1 %v8047_v3 }
  0x30   :  { %7174 = vmatpush3.bf16.msra.mxu0 %v8047_v3  ;;  %7098 = vmatpush3.bf16.msra.mxu1 %v8047_v3 }
  0x31   :  { %7175 = vmatprep.subr.bf16.mxu0 %v8064_v6  ;;  %7099 = vmatprep.subr.bf16.mxu1 %v8064_v6 }
  0x32   :  { %7040 = vmatmul.mubr.bf16.gmra.mxu0 %v7733_v18  ;;  %7072 = vmatmul.mubr.bf16.gmra.mxu1 %v7734_v19  ;;  %v7797_v18 = vld [vmem:[%s9947_s0 + $0x1a8] sm:$0xff]  }
  0x33   :  { %7043 = vmatprep.mubr.bf16.mxu0 %v7735_v20  ;;  %7075 = vmatprep.mubr.bf16.mxu1 %v7736_v21  ;;  %v7798_v19 = vld [vmem:[%s9947_s0 + $0x288] sm:$0xff]   ;;  %v7799_v20 = vld [vmem:[%s9947_s0 + $0x1b0] sm:$0xff]  }
  0x34   :  { %7176 = vmatpush3.bf16.msra.mxu0 %v8064_v6  ;;  %7100 = vmatpush3.bf16.msra.mxu1 %v8064_v6  ;;  %v7800_v21 = vld [vmem:[%s9947_s0 + $0x290] sm:$0xff]  }
  0x35   :  { %7177 = vmatprep.subr.bf16.mxu0 %v8073_v7  ;;  %7101 = vmatprep.subr.bf16.mxu1 %v8073_v7 }
  0x38   :  { %7178 = vmatpush3.bf16.msra.mxu0 %v8073_v7  ;;  %7102 = vmatpush3.bf16.msra.mxu1 %v8073_v7 }
  0x39   :  { %7103 = vmatprep.subr.bf16.mxu1 %v8082_v8  ;;  %7179 = vmatprep.subr.bf16.mxu0 %v8082_v8 }
  0x3a   :  { %7044 = vmatmul.mubr.bf16.gmra.mxu0 %v7737_v22  ;;  %7076 = vmatmul.mubr.bf16.gmra.mxu1 %v7738_v23  ;;  %v7801_v22 = vld [vmem:[%s9947_s0 + $0x1b8] sm:$0xff]  }
  0x3b   :  { %7047 = vmatprep.mubr.bf16.mxu0 %v7739_v24  ;;  %7079 = vmatprep.mubr.bf16.mxu1 %v7740_v25  ;;  %v7802_v23 = vld [vmem:[%s9947_s0 + $0x298] sm:$0xff]   ;;  %v7803_v24 = vld [vmem:[%s9947_s0 + $0x1c0] sm:$0xff]  }
  0x3c   :  { %7104 = vmatpush3.bf16.msra.mxu1 %v8082_v8  ;;  %7180 = vmatpush3.bf16.msra.mxu0 %v8082_v8  ;;  %v7804_v25 = vld [vmem:[%s9947_s0 + $0x2a0] sm:$0xff]  }
  0x3d   :  { %7105 = vmatprep.subr.bf16.mxu1 %v8091_v9  ;;  %7181 = vmatprep.subr.bf16.mxu0 %v8091_v9 }
  0x40   :  { %7106 = vmatpush3.bf16.msra.mxu1 %v8091_v9  ;;  %7182 = vmatpush3.bf16.msra.mxu0 %v8091_v9 }
  0x41   :  { %7243 = vmatprep.subr.bf16.mxu1 %v8024_v0  ;;  %7319 = vmatprep.subr.bf16.mxu0 %v8024_v0 }
  0x42   :  { %7048 = vmatmul.mubr.bf16.gmra.mxu0 %v7741_v26  ;;  %7080 = vmatmul.mubr.bf16.gmra.mxu1 %v7742_v27  ;;  %v7805_v26 = vld [vmem:[%s9947_s0 + $0x1c8] sm:$0xff]  }
  0x43   :  { %7051 = vmatprep.mubr.bf16.mxu0 %v7743_v28  ;;  %7083 = vmatprep.mubr.bf16.mxu1 %v7744_v29  ;;  %v7806_v27 = vld [vmem:[%s9947_s0 + $0x2a8] sm:$0xff]   ;;  %v7807_v28 = vld [vmem:[%s9947_s0 + $0x1d0] sm:$0xff]  }
  0x44   :  { %v7808_v29 = vld [vmem:[%s9947_s0 + $0x2b0] sm:$0xff]  }
  0x4a   :  { %7052 = vmatmul.mubr.bf16.gmra.mxu0 %v7745_v30  ;;  %7084 = vmatmul.mubr.bf16.gmra.mxu1 %v7746_v31  ;;  %v7809_v30 = vld [vmem:[%s9947_s0 + $0x1d8] sm:$0xff]  }
  0x4b   :  { %7055 = vmatprep.mubr.bf16.mxu0 %v7747_v32  ;;  %7087 = vmatprep.mubr.bf16.mxu1 %v7748_v33  ;;  %v7810_v31 = vld [vmem:[%s9947_s0 + $0x2b8] sm:$0xff]   ;;  %v7811_v32 = vld [vmem:[%s9947_s0 + $0x2c0] sm:$0xff]   ;;  %v7812_v33 = vld [vmem:[%s9947_s0 + $0x2d0] sm:$0xff]  }
  0x52   :  { %7056 = vmatmul.mubr.bf16.gmra.mxu0 %v7749_v34  ;;  %7088 = vmatmul.mubr.bf16.gmra.mxu1 %v7750_v35  ;;  %v7813_v34 = vld [vmem:[%s9947_s0 + $0x2c8] sm:$0xff]   ;;  %v7814_v35 = vld [vmem:[%s9947_s0 + $0x2d8] sm:$0xff]  }
  0x53   :  { %7059 = vmatprep.mubr.bf16.mxu0 %v7751_v36  ;;  %7107 = vmatprep.mubr.bf16.mxu1 %v7752_v37  ;;  %v7815_v36 = vld [vmem:[%s9947_s0 + $0x2e0] sm:$0xff]  }
  0x54   :  { %v7816_v37 = vld [vmem:[%s9947_s0 + $0x3c0] sm:$0xff]  }
  0x5a   :  { %7060 = vmatmul.mubr.bf16.gmra.mxu0 %v7753_v38  ;;  %7108 = vmatmul.mubr.bf16.vlgmr.msra.gmra.mxu1 %v7754_v39  ;;  %v8444_v38 = vld [vmem:[%s9946_s1 + $0x38] sm:$0xff]   ;;  %v7817_v39 = vld [vmem:[%s9947_s0 + $0x2e8] sm:$0xff]  }
  0x5b   :  { %7111 = vmatprep.mubr.bf16.mxu1 %v7755_v40  ;;  %7183 = vmatprep.mubr.bf16.mxu0 %v7756_v41  ;;  %v7818_v40 = vld [vmem:[%s9947_s0 + $0x3c8] sm:$0xff]   ;;  %v8456_v41 = vld [vmem:[%s9946_s1 + $0x30] sm:$0xff]  }
  0x5c   :  { %7244 = vmatpush3.bf16.msra.mxu1 %v8024_v0 }
  0x5d   :  { %7245 = vmatprep.subr.bf16.mxu1 %v8029_v1 }
  0x60   :  { %7246 = vmatpush3.bf16.msra.mxu1 %v8029_v1 }
  0x61   :  { %7247 = vmatprep.subr.bf16.mxu1 %v8040_v2 }
  0x62   :  { %7112 = vmatmul.mubr.bf16.gmra.mxu1 %v7757_v42  ;;  %7184 = vmatmul.mubr.bf16.vlgmr.msra.gmra.mxu0 %v7758_v43  ;;  %v7819_v42 = vld [vmem:[%s9947_s0 + $0x2f0] sm:$0xff]  }
  0x63   :  { %7320 = vmatpush3.bf16.msra.mxu0 %v8024_v0  ;;  %7115 = vmatprep.mubr.bf16.mxu1 %v7759_v44  ;;  %v7820_v43 = vld [vmem:[%s9947_s0 + $0x3d0] sm:$0xff]   ;;  %v8469_v44 = vld [vmem:[%s9946_s1 + $0x28] sm:$0xff]  }
  0x64   :  { %7187 = vmatprep.mubr.bf16.mxu0 %v7760_v45  ;;  %7321 = vmatprep.subr.bf16.mxu0 %v8029_v1  ;;  %v7821_v45 = vld [vmem:[%s9947_s0 + $0x2f8] sm:$0xff]  }
  0x65   :  { %7248 = vmatpush3.bf16.msra.mxu1 %v8040_v2 }
  0x66   :  { %7249 = vmatprep.subr.bf16.mxu1 %v8047_v3 }
  0x67   :  { %7322 = vmatpush3.bf16.msra.mxu0 %v8029_v1  ;;  %v7779_v1 = vld [vmem:[%s9947_s0 + $0x160] sm:$0xff]  }
  0x68   :  { %7323 = vmatprep.subr.bf16.mxu0 %v8040_v2 }
  0x69   :  { %7250 = vmatpush3.bf16.msra.mxu1 %v8047_v3 }
  0x6a   :  { %7116 = vmatmul.mubr.bf16.gmra.mxu1 %v7761_v46  ;;  %7188 = vmatmul.mubr.bf16.gmra.mxu0 %v7762_v47  ;;  %v7822_v46 = vld [vmem:[%s9947_s0 + $0x3d8] sm:$0xff]   ;;  %v8484_v47 = vld [vmem:[%s9946_s1 + $0x20] sm:$0xff]  }
  0x6b   :  { %7119 = vmatprep.mubr.bf16.mxu1 %v7763_v48  ;;  %7191 = vmatprep.mubr.bf16.mxu0 %v7764_v49  ;;  %v7823_v48 = vld [vmem:[%s9947_s0 + $0x300] sm:$0xff]  }
  0x6c   :  { %7324 = vmatpush3.bf16.msra.mxu0 %v8040_v2  ;;  %7251 = vmatprep.subr.bf16.mxu1 %v8064_v6  ;;  %v7781_v2 = vld [vmem:[%s9947_s0 + $0x168] sm:$0xff]   ;;  %v7824_v49 = vld [vmem:[%s9947_s0 + $0x3e0] sm:$0xff]  }
  0x6d   :  { %7325 = vmatprep.subr.bf16.mxu0 %v8047_v3  ;;  %7252 = vmatpush3.bf16.msra.mxu1 %v8064_v6 }
  0x6e   :  { %7253 = vmatprep.subr.bf16.mxu1 %v8073_v7 }
  0x70   :  { %7326 = vmatpush3.bf16.msra.mxu0 %v8047_v3  ;;  %v7782_v3 = vld [vmem:[%s9947_s0 + $0x248] sm:$0xff]  }
  0x71   :  { %7327 = vmatprep.subr.bf16.mxu0 %v8064_v6  ;;  %7254 = vmatpush3.bf16.msra.mxu1 %v8073_v7 }
  0x72   :  { %7120 = vmatmul.mubr.bf16.gmra.mxu1 %v7765_v50  ;;  %7192 = vmatmul.mubr.bf16.gmra.mxu0 %v7766_v51 }
  0x73   :  { %7123 = vmatprep.mubr.bf16.mxu1 %v7767_v52  ;;  %7195 = vmatprep.mubr.bf16.mxu0 %v7768_v53 }
  0x74   :  { %7328 = vmatpush3.bf16.msra.mxu0 %v8064_v6  ;;  %7255 = vmatprep.subr.bf16.mxu1 %v8082_v8  ;;  %v7785_v6 = vld [vmem:[%s9947_s0 + $0x178] sm:$0xff]  }
  0x75   :  { %7329 = vmatprep.subr.bf16.mxu0 %v8073_v7  ;;  %7256 = vmatpush3.bf16.msra.mxu1 %v8082_v8 }
  0x76   :  { %7257 = vmatprep.subr.bf16.mxu1 %v8091_v9 }
  0x78   :  { %7330 = vmatpush3.bf16.msra.mxu0 %v8073_v7  ;;  %v7786_v7 = vld [vmem:[%s9947_s0 + $0x258] sm:$0xff]  }
  0x79   :  { %7331 = vmatprep.subr.bf16.mxu0 %v8082_v8  ;;  %7258 = vmatpush3.bf16.msra.mxu1 %v8091_v9 }
  0x7a   :  { %7124 = vmatmul.mubr.bf16.gmra.mxu1 %v7769_v54  ;;  %7196 = vmatmul.mubr.bf16.gmra.mxu0 %v7770_v55  ;;  %v7825_v54 = vld [vmem:[%s9947_s0 + $0x308] sm:$0xff]  }
  0x7b   :  { %7127 = vmatprep.mubr.bf16.mxu1 %v7771_v56  ;;  %7199 = vmatprep.mubr.bf16.mxu0 %v7772_v57  ;;  %v7826_v55 = vld [vmem:[%s9947_s0 + $0x3e8] sm:$0xff]   ;;  %v8514_v56 = vld [vmem:[%s9946_s1 + $0x18] sm:$0xff]  }
  0x7c   :  { %7332 = vmatpush3.bf16.msra.mxu0 %v8082_v8  ;;  %7395 = vmatprep.subr.bf16.mxu1 %v8024_v0  ;;  %v7787_v8 = vld [vmem:[%s9947_s0 + $0x180] sm:$0xff]  }
  0x7d   :  { %7333 = vmatprep.subr.bf16.mxu0 %v8091_v9 }
  0x80   :  { %7334 = vmatpush3.bf16.msra.mxu0 %v8091_v9  ;;  %v7788_v9 = vld [vmem:[%s9947_s0 + $0x260] sm:$0xff]  }
  0x81   :  { %7471 = vmatprep.subr.bf16.mxu0 %v8024_v0  ;;  %v7780_v0 = vld [vmem:[%s9947_s0 + $0x240] sm:$0xff]  }
  0x82   :  { %7128 = vmatmul.mubr.bf16.gmra.mxu1 %v7773_v58  ;;  %7200 = vmatmul.mubr.bf16.gmra.mxu0 %v7774_v59  ;;  %v8526_v59 = vld [vmem:[%s9946_s1 + $0x10] sm:$0xff]  }
  0x83   :  { %7131 = vmatprep.mubr.bf16.mxu1 %v7775_v60  ;;  %7203 = vmatprep.mubr.bf16.mxu0 %v7776_v61  ;;  %v7827_v60 = vld [vmem:[%s9947_s0 + $0x310] sm:$0xff]  }
  0x84   :  { %v7828_v61 = vld [vmem:[%s9947_s0 + $0x3f0] sm:$0xff]  }
  0x8a   :  { %7132 = vmatmul.mubr.bf16.gmra.mxu1 %v7777_v62  ;;  %7204 = vmatmul.mubr.bf16.gmra.mxu0 %v7778_v63 }
  0x8b   :  { %7135 = vmatprep.mubr.bf16.mxu1 %v7779_v1  ;;  %7207 = vmatprep.mubr.bf16.mxu0 %v7780_v0 }
  0x92   :  { %7136 = vmatmul.mubr.bf16.gmra.mxu1 %v7781_v2  ;;  %7208 = vmatmul.mubr.bf16.gmra.mxu0 %v7782_v3 }
  0x93   :  { %7139 = vmatprep.mubr.bf16.mxu1 %v7783_v4  ;;  %7211 = vmatprep.mubr.bf16.mxu0 %v7784_v5  ;;  %v7829_v4 = vld [vmem:[%s9947_s0 + $0x318] sm:$0xff]  }
  0x94   :  { %v7830_v5 = vld [vmem:[%s9947_s0 + $0x3f8] sm:$0xff]  }
  0x9a   :  { %7140 = vmatmul.mubr.bf16.gmra.mxu1 %v7785_v6  ;;  %7212 = vmatmul.mubr.bf16.gmra.mxu0 %v7786_v7  ;;  %v8560_v6 = vld [vmem:[%s9946_s1 + $0x8] sm:$0xff]  }
  0x9b   :  { %7143 = vmatprep.mubr.bf16.mxu1 %v7787_v8  ;;  %7215 = vmatprep.mubr.bf16.mxu0 %v7788_v9  ;;  %v8572_v9 = vld [vmem:[%s9946_s1] sm:$0xff]  }
  0xa2   :  { %7144 = vmatmul.mubr.bf16.gmra.mxu1 %v7789_v10  ;;  %7216 = vmatmul.mubr.bf16.gmra.mxu0 %v7790_v11  ;;  %v7831_v10 = vld [vmem:[%s9947_s0 + $0x320] sm:$0xff]  }
  0xa3   :  { %7147 = vmatprep.mubr.bf16.mxu1 %v7791_v12  ;;  %7219 = vmatprep.mubr.bf16.mxu0 %v7792_v13  ;;  %v7832_v11 = vld [vmem:[%s9947_s0 + $0x400] sm:$0xff]  }
  0xaa   :  { %7148 = vmatmul.mubr.bf16.gmra.mxu1 %v7793_v14  ;;  %7220 = vmatmul.mubr.bf16.gmra.mxu0 %v7794_v15 }
  0xab   :  { %7151 = vmatprep.mubr.bf16.mxu1 %v7795_v16  ;;  %7223 = vmatprep.mubr.bf16.mxu0 %v7796_v17 }
  0xb2   :  { %7152 = vmatmul.mubr.bf16.gmra.mxu1 %v7797_v18  ;;  %7224 = vmatmul.mubr.bf16.gmra.mxu0 %v7798_v19 }
  0xb3   :  { %7155 = vmatprep.mubr.bf16.mxu1 %v7799_v20  ;;  %7227 = vmatprep.mubr.bf16.mxu0 %v7800_v21  ;;  %v7833_v20 = vld [vmem:[%s9947_s0 + $0x328] sm:$0xff]  }
  0xb4   :  { %v7834_v21 = vld [vmem:[%s9947_s0 + $0x408] sm:$0xff]  }
  0xba   :  { %7156 = vmatmul.mubr.bf16.gmra.mxu1 %v7801_v22  ;;  %7228 = vmatmul.mubr.bf16.gmra.mxu0 %v7802_v23  ;;  %v7835_v22 = vld [vmem:[%s9947_s0 + $0x330] sm:$0xff]  }
  0xbb   :  { %7159 = vmatprep.mubr.bf16.mxu1 %v7803_v24  ;;  %7231 = vmatprep.mubr.bf16.mxu0 %v7804_v25  ;;  %v7836_v23 = vld [vmem:[%s9947_s0 + $0x410] sm:$0xff]  }
  0xc2   :  { %7160 = vmatmul.mubr.bf16.gmra.mxu1 %v7805_v26  ;;  %7232 = vmatmul.mubr.bf16.gmra.mxu0 %v7806_v27 }
  0xc3   :  { %7163 = vmatprep.mubr.bf16.mxu1 %v7807_v28  ;;  %7235 = vmatprep.mubr.bf16.mxu0 %v7808_v29 }
  0xca   :  { %7164 = vmatmul.mubr.bf16.gmra.mxu1 %v7809_v30  ;;  %7236 = vmatmul.mubr.bf16.gmra.mxu0 %v7810_v31 }
  0xcb   :  { %7239 = vmatprep.mubr.bf16.mxu0 %v7811_v32  ;;  %7259 = vmatprep.mubr.bf16.mxu1 %v7812_v33  ;;  %v7837_v32 = vld [vmem:[%s9947_s0 + $0x338] sm:$0xff]  }
  0xcc   :  { %v7838_v33 = vld [vmem:[%s9947_s0 + $0x418] sm:$0xff]  }
  0xd2   :  { %7240 = vmatmul.mubr.bf16.gmra.mxu0 %v7813_v34  ;;  %7260 = vmatmul.mubr.bf16.vlgmr.msra.gmra.mxu1 %v7814_v35  ;;  %v7839_v34 = vld [vmem:[%s9947_s0 + $0x340] sm:$0xff]  }
  0xd3   :  { %7263 = vmatprep.mubr.bf16.mxu1 %v7815_v36  ;;  %7335 = vmatprep.mubr.bf16.mxu0 %v7816_v37  ;;  %v7840_v35 = vld [vmem:[%s9947_s0 + $0x420] sm:$0xff]  }
  0xd4   :  { %7396 = vmatpush3.bf16.msra.mxu1 %v8444_v38 }
  0xd5   :  { %7397 = vmatprep.subr.bf16.mxu1 %v8456_v41 }
  0xd8   :  { %7398 = vmatpush3.bf16.msra.mxu1 %v8456_v41 }
  0xd9   :  { %7399 = vmatprep.subr.bf16.mxu1 %v8469_v44 }
  0xda   :  { %7264 = vmatmul.mubr.bf16.gmra.mxu1 %v7817_v39  ;;  %7336 = vmatmul.mubr.bf16.vlgmr.msra.gmra.mxu0 %v7818_v40 }
  0xdb   :  { %7472 = vmatpush3.bf16.msra.mxu0 %v8444_v38  ;;  %7267 = vmatprep.mubr.bf16.mxu1 %v7819_v42 }
  0xdc   :  { %7339 = vmatprep.mubr.bf16.mxu0 %v7820_v43  ;;  %7473 = vmatprep.subr.bf16.mxu0 %v8456_v41 }
  0xdd   :  { %7400 = vmatpush3.bf16.msra.mxu1 %v8469_v44 }
  0xde   :  { %7401 = vmatprep.subr.bf16.mxu1 %v8484_v47 }
  0xdf   :  { %7474 = vmatpush3.bf16.msra.mxu0 %v8456_v41 }
  0xe0   :  { %7475 = vmatprep.subr.bf16.mxu0 %v8469_v44 }
  0xe1   :  { %7402 = vmatpush3.bf16.msra.mxu1 %v8484_v47 }
  0xe2   :  { %v8496_v50 = vpop.f32.mrf.mxu0  ;;  %v8498_v51 = vpop.f32.mrf.mxu1  ;;  %7268 = vmatmul.mubr.bf16.gmra.mxu1 %v7821_v45  ;;  %7340 = vmatmul.mubr.bf16.gmra.mxu0 %v7822_v46 }
  0xe3   :  { %7271 = vmatprep.mubr.bf16.mxu1 %v7823_v48  ;;  %7343 = vmatprep.mubr.bf16.mxu0 %v7824_v49  ;;  %v7841_v48 = vld [vmem:[%s9947_s0 + $0x348] sm:$0xff]  }
  0xe4   :  { %v8500_v52 = vpop.f32.mrf.mxu0  ;;  %v8502_v53 = vpop.f32.mrf.mxu1  ;;  %7476 = vmatpush3.bf16.msra.mxu0 %v8469_v44  ;;  %7403 = vmatprep.subr.bf16.mxu1 %v8514_v56  ;;  %v7842_v49 = vld [vmem:[%s9947_s0 + $0x428] sm:$0xff]  }
  0xe5   :  { %7477 = vmatprep.subr.bf16.mxu0 %v8484_v47  ;;  %7404 = vmatpush3.bf16.msra.mxu1 %v8514_v56 }
  0xe6   :  { %v8519_v57 = vpop.f32.mrf.mxu0  ;;  %v8521_v58 = vpop.f32.mrf.mxu1  ;;  %7405 = vmatprep.subr.bf16.mxu1 %v8526_v59 }
  0xe8   :  { %v8535_v62 = vpop.f32.mrf.mxu0  ;;  %v8537_v63 = vpop.f32.mrf.mxu1  ;;  %7478 = vmatpush3.bf16.msra.mxu0 %v8484_v47 }
  0xe9   :  { %7479 = vmatprep.subr.bf16.mxu0 %v8514_v56  ;;  %7406 = vmatpush3.bf16.msra.mxu1 %v8526_v59 }
  0xea   :  { %v8542_v1 = vpop.f32.mrf.mxu0  ;;  %v8544_v0 = vpop.f32.mrf.mxu1  ;;  %7272 = vmatmul.mubr.bf16.gmra.mxu1 %v7825_v54  ;;  %7344 = vmatmul.mubr.bf16.gmra.mxu0 %v7826_v55  ;;  %v7843_v54 = vld [vmem:[%s9947_s0 + $0x350] sm:$0xff]  }
  0xeb   :  { %7275 = vmatprep.mubr.bf16.mxu1 %v7827_v60  ;;  %7347 = vmatprep.mubr.bf16.mxu0 %v7828_v61  ;;  %v7844_v55 = vld [vmem:[%s9947_s0 + $0x430] sm:$0xff]  }
  0xec   :  { %v8546_v2 = vpop.f32.mrf.mxu0  ;;  %v8548_v3 = vpop.f32.mrf.mxu1  ;;  %7480 = vmatpush3.bf16.msra.mxu0 %v8514_v56  ;;  %7407 = vmatprep.subr.bf16.mxu1 %v8560_v6 }
  0xed   :  { %7481 = vmatprep.subr.bf16.mxu0 %v8526_v59  ;;  %7408 = vmatpush3.bf16.msra.mxu1 %v8560_v6 }
  0xee   :  { %v8565_v7 = vpop.f32.mrf.mxu0  ;;  %v8567_v8 = vpop.f32.mrf.mxu1  ;;  %7409 = vmatprep.subr.bf16.mxu1 %v8572_v9 }
  0xf0   :  { %v8581_v12 = vpop.f32.mrf.mxu0  ;;  %v8583_v13 = vpop.f32.mrf.mxu1  ;;  %7482 = vmatpush3.bf16.msra.mxu0 %v8526_v59 }
  0xf1   :  { %7483 = vmatprep.subr.bf16.mxu0 %v8560_v6  ;;  %7410 = vmatpush3.bf16.msra.mxu1 %v8572_v9 }
  0xf2   :  { %v8588_v14 = vpop.f32.mrf.mxu0  ;;  %v8590_v15 = vpop.f32.mrf.mxu1  ;;  %7276 = vmatmul.mubr.bf16.gmra.mxu1 %v7829_v4  ;;  %7348 = vmatmul.mubr.bf16.gmra.mxu0 %v7830_v5 }
  0xf3   :  { %9950 = vst [vmem:[#allocation2_spill] sm:$0xff] %v8590_v15  ;;  %7279 = vmatprep.mubr.bf16.mxu1 %v7831_v10  ;;  %7351 = vmatprep.mubr.bf16.mxu0 %v7832_v11 }
  0xf4   :  { %v8592_v16 = vpop.f32.mrf.mxu0  ;;  %v8594_v17 = vpop.f32.mrf.mxu1  ;;  %7484 = vmatpush3.bf16.msra.mxu0 %v8560_v6  ;;  %7547 = vmatprep.subr.bf16.mxu1 %v8444_v38 }
  0xf5   :  { %9951 = vst [vmem:[#allocation3_spill] sm:$0xff] %v8594_v17  ;;  %7485 = vmatprep.subr.bf16.mxu0 %v8572_v9 }
  0xf6   :  { %v8599_v18 = vpop.f32.mrf.mxu0  ;;  %v8601_v19 = vpop.f32.mrf.mxu1 }
  0xf7   :  { %9952 = vst [vmem:[#allocation4_spill] sm:$0xff] %v8601_v19 }
  0xf8   :  { %v8615_v24 = vpop.f32.mrf.mxu0  ;;  %v8617_v25 = vpop.f32.mrf.mxu1  ;;  %7486 = vmatpush3.bf16.msra.mxu0 %v8572_v9 }
  0xf9   :  { %9953 = vst [vmem:[#allocation5_spill] sm:$0xff] %v8617_v25  ;;  %7623 = vmatprep.subr.bf16.mxu0 %v8444_v38 }
  0xfa   :  { %v8621_v26 = vpop.f32.mrf.mxu0  ;;  %v8623_v27 = vpop.f32.mrf.mxu1  ;;  %7280 = vmatmul.mubr.bf16.gmra.mxu1 %v7833_v20  ;;  %7352 = vmatmul.mubr.bf16.gmra.mxu0 %v7834_v21 }
  0xfb   :  { %9954 = vst [vmem:[#allocation6_spill] sm:$0xff] %v8623_v27  ;;  %7283 = vmatprep.mubr.bf16.mxu1 %v7835_v22  ;;  %7355 = vmatprep.mubr.bf16.mxu0 %v7836_v23  ;;  %v7845_v22 = vld [vmem:[%s9947_s0 + $0x358] sm:$0xff]  }
  0xfc   :  { %v8625_v28 = vpop.f32.mrf.mxu0  ;;  %v8627_v29 = vpop.f32.mrf.mxu1  ;;  %v7846_v23 = vld [vmem:[%s9947_s0 + $0x438] sm:$0xff]  }
  0xfd   :  { %9955 = vst [vmem:[#allocation7_spill] sm:$0xff] %v8627_v29 }
  0xfe   :  { %v8629_v30 = vpop.f32.mrf.mxu0  ;;  %v8631_v31 = vpop.f32.mrf.mxu1 }
  0xff   :  { %9956 = vst [vmem:[#allocation8_spill] sm:$0xff] %v8631_v31 }
 0x100   :  { %v8645_v36 = vpop.f32.mrf.mxu0  ;;  %v8647_v37 = vpop.f32.mrf.mxu1 }
 0x101   :  { %9957 = vst [vmem:[#allocation9_spill] sm:$0xff] %v8647_v37 }
 0x102   :  { %v8649_v39 = vpop.f32.mrf.mxu0  ;;  %v8651_v40 = vpop.f32.mrf.mxu1  ;;  %7284 = vmatmul.mubr.bf16.gmra.mxu1 %v7837_v32  ;;  %7356 = vmatmul.mubr.bf16.gmra.mxu0 %v7838_v33  ;;  %v7847_v32 = vld [vmem:[%s9947_s0 + $0x360] sm:$0xff]  }
 0x103   :  { %9958 = vst [vmem:[#allocation10_spill] sm:$0xff] %v8651_v40  ;;  %7287 = vmatprep.mubr.bf16.mxu1 %v7839_v34  ;;  %7359 = vmatprep.mubr.bf16.mxu0 %v7840_v35  ;;  %v7848_v33 = vld [vmem:[%s9947_s0 + $0x440] sm:$0xff]  }
 0x104   :  { %v8653_v42 = vpop.f32.mrf.mxu0  ;;  %v8655_v43 = vpop.f32.mrf.mxu1 }
 0x105   :  { %9959 = vst [vmem:[#allocation11_spill] sm:$0xff] %v8655_v43 }
 0x106   :  { %v8657_v45 = vpop.f32.mrf.mxu0  ;;  %v8659_v46 = vpop.f32.mrf.mxu1 }
 0x107   :  { %9960 = vst [vmem:[#allocation12_spill] sm:$0xff] %v8659_v46 }
 0x108   :  { %v8673_v60 = vpop.f32.mrf.mxu0  ;;  %v8675_v61 = vpop.f32.mrf.mxu1 }
 0x109   :  { %9961 = vst [vmem:[#allocation13_spill] sm:$0xff] %v8675_v61 }
 0x10a   :  { %v8677_v4 = vpop.f32.mrf.mxu0  ;;  %v8679_v5 = vpop.f32.mrf.mxu1  ;;  %7288 = vmatmul.mubr.bf16.gmra.mxu1 %v7841_v48  ;;  %7360 = vmatmul.mubr.bf16.gmra.mxu0 %v7842_v49 }
 0x10b   :  { %9962 = vst [vmem:[#allocation14_spill] sm:$0xff] %v8679_v5  ;;  %7291 = vmatprep.mubr.bf16.mxu1 %v7843_v54  ;;  %7363 = vmatprep.mubr.bf16.mxu0 %v7844_v55 }
 0x10c   :  { %v8681_v10 = vpop.f32.mrf.mxu0  ;;  %v8683_v11 = vpop.f32.mrf.mxu1 }
 0x10d   :  { %9963 = vst [vmem:[#allocation15_spill] sm:$0xff] %v8683_v11 }
 0x10e   :  { %v8685_v20 = vpop.f32.mrf.mxu0  ;;  %v8687_v21 = vpop.f32.mrf.mxu1 }
 0x10f   :  { %9964 = vst [vmem:[#allocation16_spill] sm:$0xff] %v8687_v21 }
 0x110   :  { %v8701_v34 = vpop.f32.mrf.mxu0  ;;  %v8703_v35 = vpop.f32.mrf.mxu1 }
 0x111   :  { %9965 = vst [vmem:[#allocation17_spill] sm:$0xff] %v8703_v35  ;;  %v7849_v35 = vld [vmem:[%s9947_s0 + $0x368] sm:$0xff]  }
 0x112   :  { %v8705_v48 = vpop.f32.mrf.mxu0  ;;  %v8707_v49 = vpop.f32.mrf.mxu1  ;;  %7292 = vmatmul.mubr.bf16.gmra.mxu1 %v7845_v22  ;;  %7364 = vmatmul.mubr.bf16.gmra.mxu0 %v7846_v23  ;;  %v7851_v22 = vld [vmem:[%s9947_s0 + $0x370] sm:$0xff]  }
 0x113   :  { %9966 = vst [vmem:[#allocation18_spill] sm:$0xff] %v8707_v49  ;;  %7295 = vmatprep.mubr.bf16.mxu1 %v7847_v32  ;;  %7367 = vmatprep.mubr.bf16.mxu0 %v7848_v33  ;;  %v7850_v49 = vld [vmem:[%s9947_s0 + $0x448] sm:$0xff]   ;;  %v7852_v23 = vld [vmem:[%s9947_s0 + $0x450] sm:$0xff]  }
 0x114   :  { %v8709_v54 = vpop.f32.mrf.mxu0  ;;  %v8711_v55 = vpop.f32.mrf.mxu1 }
 0x115   :  { %9967 = vst [vmem:[#allocation19_spill] sm:$0xff] %v8711_v55 }
 0x116   :  { %v8713_v21 = vpop.f32.mrf.mxu0  ;;  %v8715_v11 = vpop.f32.mrf.mxu1 }
 0x117   :  { %9968 = vst [vmem:[#allocation20_spill] sm:$0xff] %v8715_v11 }
 0x118   :  { %v8729_v32 = vpop.f32.mrf.mxu0  ;;  %v8731_v33 = vpop.f32.mrf.mxu1 }
 0x119   :  { %9969 = vst [vmem:[#allocation21_spill] sm:$0xff] %v8731_v33  ;;  %v7853_v33 = vld [vmem:[%s9947_s0 + $0x378] sm:$0xff]  }
 0x11a   :  { %v8733_v11 = vpop.f32.mrf.mxu0  ;;  %v7109_v55 = vpop.f32.mrf.mxu1  ;;  %7296 = vmatmul.mubr.bf16.gmra.mxu1 %v7849_v35  ;;  %7368 = vmatmul.mubr.bf16.gmra.mxu0 %v7850_v49  ;;  %v7854_v35 = vld [vmem:[%s9947_s0 + $0x458] sm:$0xff]   ;;  %v7855_v49 = vld [vmem:[%s9947_s0 + $0x380] sm:$0xff]  }
 0x11b   :  { %v1108_v5 = vmax.f32 %v8496_v50, %v7109_v55  ;;  %7299 = vmatprep.mubr.bf16.mxu1 %v7851_v22  ;;  %7371 = vmatprep.mubr.bf16.mxu0 %v7852_v23 }
 0x11c   :  { %v8736_v61 = vpop.f32.mrf.mxu0  ;;  %v867_v46 = vpop.f32.mrf.mxu1 }
 0x11d   :  { %v1106_v43 = vmax.f32 %v8500_v52, %v867_v46  ;;  %v7856_v52 = vld [vmem:[%s9947_s0 + $0x460] sm:$0xff]  }
 0x11e   :  { %v8739_v40 = vpop.f32.mrf.mxu0  ;;  %v7110_v37 = vpop.f32.mrf.mxu1 }
 0x11f   :  { %v1109_v50 = vmax.f32 %v8519_v57, %v7110_v37 }
 0x120   :  { %v8754_v46 = vpop.f32.mrf.mxu0  ;;  %v870_v55 = vpop.f32.mrf.mxu1 }
 0x121   :  { %v1107_v22 = vmax.f32 %v8535_v62, %v870_v55  ;;  %v7857_v62 = vld [vmem:[%s9947_s0 + $0x388] sm:$0xff]  }
 0x122   :  { %v7113_v23 = vpop.f32.mrf.mxu1  ;;  %v7185_v31 = vpop.f32.mrf.mxu0  ;;  %7300 = vmatmul.mubr.bf16.gmra.mxu1 %v7853_v33  ;;  %7372 = vmatmul.mubr.bf16.gmra.mxu0 %v7854_v35 }
 0x123   :  { %v1112_v29 = vmax.f32 %v8542_v1, %v7113_v23  ;;  %v8758_v57 = vmax.f32 %v1108_v5, %v7185_v31  ;;  %7303 = vmatprep.mubr.bf16.mxu1 %v7855_v49  ;;  %7375 = vmatprep.mubr.bf16.mxu0 %v7856_v52  ;;  %v7858_v1 = vld [vmem:[%s9947_s0 + $0x468] sm:$0xff]  }
 0x124   :  { %v883_v37 = vpop.f32.mrf.mxu1  ;;  %v1441_v27 = vpop.f32.mrf.mxu0 }
 0x125   :  { %v1110_v25 = vmax.f32 %v8546_v2, %v883_v37  ;;  %v8761_v19 = vmax.f32 %v1106_v43, %v1441_v27  ;;  %v7859_v2 = vld [vmem:[%s9947_s0 + $0x390] sm:$0xff]  }
 0x126   :  { %v7114_v17 = vpop.f32.mrf.mxu1  ;;  %v7186_v15 = vpop.f32.mrf.mxu0  ;;  %v7860_v27 = vld [vmem:[%s9947_s0 + $0x470] sm:$0xff]  }
 0x127   :  { %v1113_v31 = vmax.f32 %v8565_v7, %v7114_v17  ;;  %v8770_v5 = vmax.f32 %v1109_v50, %v7186_v15 }
 0x128   :  { %v886_v43 = vpop.f32.mrf.mxu1  ;;  %v1444_v33 = vpop.f32.mrf.mxu0 }
 0x129   :  { %9970 = vst [vmem:[#allocation22_spill] sm:$0xff] %v8770_v5  ;;  %v1111_v35 = vmax.f32 %v8581_v12, %v886_v43  ;;  %v8779_v49 = vmax.f32 %v1107_v22, %v1444_v33  ;;  %v7861_v22 = vld [vmem:[%s9947_s0 + $0x398] sm:$0xff]  }
 0x12a   :  { %v7117_v52 = vpop.f32.mrf.mxu1  ;;  %v7189_v55 = vpop.f32.mrf.mxu0  ;;  %7304 = vmatmul.mubr.bf16.gmra.mxu1 %v7857_v62  ;;  %7376 = vmatmul.mubr.bf16.gmra.mxu0 %v7858_v1 }
 0x12b   :  { %v1116_v7 = vmax.f32 %v8588_v14, %v7117_v52  ;;  %v8782_v15 = vmax.f32 %v1112_v29, %v7189_v55  ;;  %7307 = vmatprep.mubr.bf16.mxu1 %v7859_v2  ;;  %7379 = vmatprep.mubr.bf16.mxu0 %v7860_v27  ;;  %v7862_v14 = vld [vmem:[%s9947_s0 + $0x478] sm:$0xff]  }
 0x12c   :  { %v899_v17 = vpop.f32.mrf.mxu1  ;;  %v1457_v50 = vpop.f32.mrf.mxu0 }
 0x12d   :  { %v1114_v23 = vmax.f32 %v8592_v16, %v899_v17  ;;  %v8785_v37 = vmax.f32 %v1110_v25, %v1457_v50  ;;  %v7863_v16 = vld [vmem:[%s9947_s0 + $0x3a0] sm:$0xff]  }
 0x12e   :  { %v7118_v5 = vpop.f32.mrf.mxu1  ;;  %v7190_v12 = vpop.f32.mrf.mxu0  ;;  %v7864_v25 = vld [vmem:[%s9947_s0 + $0x480] sm:$0xff]  }
 0x12f   :  { %v1117_v29 = vmax.f32 %v8599_v18, %v7118_v5  ;;  %v8794_v62 = vmax.f32 %v1113_v31, %v7190_v12 }
 0x130   :  { %v902_v1 = vpop.f32.mrf.mxu1  ;;  %v1460_v2 = vpop.f32.mrf.mxu0 }
 0x131   :  { %v1115_v27 = vmax.f32 %v8615_v24, %v902_v1  ;;  %v8803_v43 = vmax.f32 %v1111_v35, %v1460_v2  ;;  %v7865_v35 = vld [vmem:[%s9947_s0 + $0x3a8] sm:$0xff]  }
 0x132   :  { %v7121_v33 = vpop.f32.mrf.mxu1  ;;  %v7193_v52 = vpop.f32.mrf.mxu0  ;;  %7308 = vmatmul.mubr.bf16.gmra.mxu1 %v7861_v22  ;;  %7380 = vmatmul.mubr.bf16.gmra.mxu0 %v7862_v14 }
 0x133   :  { %v1120_v18 = vmax.f32 %v8621_v26, %v7121_v33  ;;  %v8806_v31 = vmax.f32 %v1116_v7, %v7193_v52  ;;  %7311 = vmatprep.mubr.bf16.mxu1 %v7863_v16  ;;  %7383 = vmatprep.mubr.bf16.mxu0 %v7864_v25  ;;  %v7866_v26 = vld [vmem:[%s9947_s0 + $0x488] sm:$0xff]  }
 0x134   :  { %v915_v5 = vpop.f32.mrf.mxu1  ;;  %v1473_v55 = vpop.f32.mrf.mxu0 }
 0x135   :  { %v1118_v17 = vmax.f32 %v8625_v28, %v915_v5  ;;  %v8809_v50 = vmax.f32 %v1114_v23, %v1473_v55  ;;  %v7867_v28 = vld [vmem:[%s9947_s0 + $0x3b0] sm:$0xff]  }
 0x136   :  { %v7122_v12 = vpop.f32.mrf.mxu1  ;;  %v7194_v24 = vpop.f32.mrf.mxu0  ;;  %v7868_v23 = vld [vmem:[%s9947_s0 + $0x490] sm:$0xff]  }
 0x137   :  { %v1121_v7 = vmax.f32 %v8629_v30, %v7122_v12  ;;  %v8818_v22 = vmax.f32 %v1117_v29, %v7194_v24 }
 0x138   :  { %v918_v14 = vpop.f32.mrf.mxu1  ;;  %v1476_v16 = vpop.f32.mrf.mxu0 }
 0x139   :  { %v1119_v25 = vmax.f32 %v8645_v36, %v918_v14  ;;  %v8827_v1 = vmax.f32 %v1115_v27, %v1476_v16  ;;  %v7869_v27 = vld [vmem:[%s9947_s0 + $0x3b8] sm:$0xff]  }
 0x13a   :  { %v7125_v2 = vpop.f32.mrf.mxu1  ;;  %v7197_v33 = vpop.f32.mrf.mxu0  ;;  %7312 = vmatmul.mubr.bf16.gmra.mxu1 %v7865_v35  ;;  %7384 = vmatmul.mubr.bf16.gmra.mxu0 %v7866_v26 }
 0x13b   :  { %v1124_v30 = vmax.f32 %v8649_v39, %v7125_v2  ;;  %v8830_v29 = vmax.f32 %v1120_v18, %v7197_v33  ;;  %7315 = vmatprep.mubr.bf16.mxu1 %v7867_v28  ;;  %7387 = vmatprep.mubr.bf16.mxu0 %v7868_v23  ;;  %v7870_v39 = vld [vmem:[%s9947_s0 + $0x498] sm:$0xff]  }
 0x13c   :  { %v931_v52 = vpop.f32.mrf.mxu1  ;;  %v1489_v5 = vpop.f32.mrf.mxu0 }
 0x13d   :  { %v1122_v55 = vmax.f32 %v8653_v42, %v931_v52  ;;  %v8833_v12 = vmax.f32 %v1118_v17, %v1489_v5  ;;  %v7871_v42 = vld [vmem:[%s9947_s0 + $0x4a0] sm:$0xff]   ;;  %v7872_v17 = vld [vmem:[%s9947_s0 + $0x4b0] sm:$0xff]  }
 0x13e   :  { %v7126_v24 = vpop.f32.mrf.mxu1  ;;  %v7198_v36 = vpop.f32.mrf.mxu0 }
 0x13f   :  { %v1125_v18 = vmax.f32 %v8657_v45, %v7126_v24  ;;  %v8842_v35 = vmax.f32 %v1121_v7, %v7198_v36 }
 0x140   :  { %v934_v26 = vpop.f32.mrf.mxu1  ;;  %v1492_v28 = vpop.f32.mrf.mxu0 }
 0x141   :  { %v1123_v23 = vmax.f32 %v8673_v60, %v934_v26  ;;  %v8851_v14 = vmax.f32 %v1119_v25, %v1492_v28  ;;  %v7873_v25 = vld [vmem:[%s9947_s0 + $0x4a8] sm:$0xff]  }
 0x142   :  { %v7129_v16 = vpop.f32.mrf.mxu1  ;;  %v7201_v2 = vpop.f32.mrf.mxu0  ;;  %7316 = vmatmul.mubr.bf16.gmra.mxu1 %v7869_v27  ;;  %7388 = vmatmul.mubr.bf16.gmra.mxu0 %v7870_v39 }
 0x143   :  { %v1128_v45 = vmax.f32 %v8677_v4, %v7129_v16  ;;  %v8854_v7 = vmax.f32 %v1124_v30, %v7201_v2  ;;  %7391 = vmatprep.mubr.bf16.mxu0 %v7871_v42  ;;  %7411 = vmatprep.mubr.bf16.mxu1 %v7872_v17  ;;  %v7874_v4 = vld [vmem:[%s9947_s0 + $0x4b8] sm:$0xff]  }
 0x144   :  { %v947_v33 = vpop.f32.mrf.mxu1  ;;  %v1505_v52 = vpop.f32.mrf.mxu0 }
 0x145   :  { %v1126_v5 = vmax.f32 %v8681_v10, %v947_v33  ;;  %v8857_v24 = vmax.f32 %v1122_v55, %v1505_v52  ;;  %v7875_v10 = vld [vmem:[%s9947_s0 + $0x4c0] sm:$0xff]  }
 0x146   :  { %v7130_v36 = vpop.f32.mrf.mxu1  ;;  %v7202_v60 = vpop.f32.mrf.mxu0  ;;  %v7876_v55 = vld [vmem:[%s9947_s0 + $0x5a0] sm:$0xff]  }
 0x147   :  { %v1129_v30 = vmax.f32 %v8685_v20, %v7130_v36  ;;  %v8866_v27 = vmax.f32 %v1125_v18, %v7202_v60 }
 0x148   :  { %v950_v39 = vpop.f32.mrf.mxu1  ;;  %v1508_v42 = vpop.f32.mrf.mxu0 }
 0x149   :  { %v1127_v17 = vmax.f32 %v8701_v34, %v950_v39  ;;  %v8875_v26 = vmax.f32 %v1123_v23, %v1508_v42 }
 0x14a   :  { %v7133_v28 = vpop.f32.mrf.mxu1  ;;  %v7205_v16 = vpop.f32.mrf.mxu0  ;;  %7392 = vmatmul.mubr.bf16.gmra.mxu0 %v7873_v25  ;;  %7412 = vmatmul.mubr.bf16.vlgmr.msra.gmra.mxu1 %v7874_v4 }
 0x14b   :  { %v1132_v20 = vmax.f32 %v8705_v48, %v7133_v28  ;;  %v8878_v18 = vmax.f32 %v1128_v45, %v7205_v16  ;;  %7415 = vmatprep.mubr.bf16.mxu1 %v7875_v10  ;;  %7487 = vmatprep.mubr.bf16.mxu0 %v7876_v55  ;;  %v7877_v48 = vld [vmem:[%s9947_s0 + $0x4c8] sm:$0xff]   ;;  %v7880_v10 = vld [vmem:[%s9947_s0 + $0x5b0] sm:$0xff]  }
 0x14c   :  { %v963_v2 = vpop.f32.mrf.mxu1  ;;  %v1521_v33 = vpop.f32.mrf.mxu0  ;;  %7548 = vmatpush3.bf16.msra.mxu1 %v8444_v38  ;;  %v7878_v45 = vld [vmem:[%s9947_s0 + $0x5a8] sm:$0xff]  }
 0x14d   :  { %v1130_v52 = vmax.f32 %v8709_v54, %v963_v2  ;;  %v8882_v36 = vmax.f32 %v1126_v5, %v1521_v33  ;;  %7549 = vmatprep.subr.bf16.mxu1 %v8456_v41  ;;  %v7879_v54 = vld [vmem:[%s9947_s0 + $0x4d0] sm:$0xff]  }
 0x14e   :  { %v7134_v34 = vpop.f32.mrf.mxu1  ;;  %v7206_v23 = vpop.f32.mrf.mxu0 }
 0x14f   :  { %v1133_v60 = vmax.f32 %v8713_v21, %v7134_v34  ;;  %v8892_v25 = vmax.f32 %v1129_v30, %v7206_v23 }
 0x150   :  { %v966_v5 = vpop.f32.mrf.mxu1  ;;  %v1524_v4 = vpop.f32.mrf.mxu0  ;;  %7550 = vmatpush3.bf16.msra.mxu1 %v8456_v41 }
 0x151   :  { %v1131_v55 = vmax.f32 %v8729_v32, %v966_v5  ;;  %v8902_v39 = vmax.f32 %v1127_v17, %v1524_v4  ;;  %7551 = vmatprep.subr.bf16.mxu1 %v8469_v44 }
 0x152   :  { %v7137_v21 = vpop.f32.mrf.mxu1  ;;  %v7209_v30 = vpop.f32.mrf.mxu0  ;;  %7416 = vmatmul.mubr.bf16.gmra.mxu1 %v7877_v48  ;;  %7488 = vmatmul.mubr.bf16.vlgmr.msra.gmra.mxu0 %v7878_v45 }
 0x153   :  { %v1136_v42 = vmax.f32 %v8733_v11, %v7137_v21  ;;  %v8906_v28 = vmax.f32 %v1132_v20, %v7209_v30  ;;  %7624 = vmatpush3.bf16.msra.mxu0 %v8444_v38  ;;  %7419 = vmatprep.mubr.bf16.mxu1 %v7879_v54  ;;  %v7881_v11 = vld [vmem:[%s9947_s0 + $0x4d8] sm:$0xff]   ;;  %v7885_v30 = vld [vmem:[%s9947_s0 + $0x4e8] sm:$0xff]  }
 0x154   :  { %v979_v16 = vpop.f32.mrf.mxu1  ;;  %v1537_v2 = vpop.f32.mrf.mxu0  ;;  %7491 = vmatprep.mubr.bf16.mxu0 %v7880_v10  ;;  %7625 = vmatprep.subr.bf16.mxu0 %v8456_v41  ;;  %v7882_v38 = vld [vmem:[%s9947_s0 + $0x5b8] sm:$0xff]  }
 0x155   :  { %v1134_v32 = vmax.f32 %v8736_v61, %v979_v16  ;;  %v8911_v17 = vmax.f32 %v1130_v52, %v1537_v2  ;;  %7552 = vmatpush3.bf16.msra.mxu1 %v8469_v44  ;;  %v7883_v61 = vld [vmem:[%s9947_s0 + $0x4e0] sm:$0xff]   ;;  %v7887_v16 = vld [vmem:[%s9947_s0 + $0x4f0] sm:$0xff]  }
 0x156   :  { %v7138_v33 = vpop.f32.mrf.mxu1  ;;  %v7210_v34 = vpop.f32.mrf.mxu0  ;;  %7553 = vmatprep.subr.bf16.mxu1 %v8484_v47  ;;  %v7884_v52 = vld [vmem:[%s9947_s0 + $0x5c0] sm:$0xff]   ;;  %v7888_v2 = vld [vmem:[%s9947_s0 + $0x5d0] sm:$0xff]  }
 0x157   :  { %v1137_v20 = vmax.f32 %v8739_v40, %v7138_v33  ;;  %v8922_v23 = vmax.f32 %v1133_v60, %v7210_v34  ;;  %7626 = vmatpush3.bf16.msra.mxu0 %v8456_v41 }
 0x158   :  { %v982_v48 = vpop.f32.mrf.mxu1  ;;  %v1540_v45 = vpop.f32.mrf.mxu0  ;;  %7627 = vmatprep.subr.bf16.mxu0 %v8469_v44 }
 0x159   :  { %v1135_v54 = vmax.f32 %v8754_v46, %v982_v48  ;;  %v8933_v5 = vmax.f32 %v1131_v55, %v1540_v45  ;;  %7554 = vmatpush3.bf16.msra.mxu1 %v8484_v47 }
 0x15a   :  { %v7141_v40 = vpop.f32.mrf.mxu1  ;;  %v7213_v60 = vpop.f32.mrf.mxu0  ;;  %7420 = vmatmul.mubr.bf16.gmra.mxu1 %v7881_v11  ;;  %7492 = vmatmul.mubr.bf16.gmra.mxu0 %v7882_v38 }
 0x15b   :  { %v8936_v4 = vmax.f32 %v1136_v42, %v7213_v60  ;;  %7423 = vmatprep.mubr.bf16.mxu1 %v7883_v61  ;;  %7495 = vmatprep.mubr.bf16.mxu0 %v7884_v52  ;;  %v7886_v42 = vld [vmem:[%s9947_s0 + $0x5c8] sm:$0xff]   ;;  %v1140_v34 = vmax.f32 %v8498_v51, %v7141_v40  ;;  %v7889_v40 = vld [vmem:[%s9947_s0 + $0x4f8] sm:$0xff]  }
 0x15c   :  { %v995_v10 = vpop.f32.mrf.mxu1  ;;  %v1553_v41 = vpop.f32.mrf.mxu0  ;;  %7628 = vmatpush3.bf16.msra.mxu0 %v8469_v44  ;;  %7555 = vmatprep.subr.bf16.mxu1 %v8514_v56 }
 0x15d   :  { %v8940_v21 = vmax.f32 %v1134_v32, %v1553_v41  ;;  %7629 = vmatprep.subr.bf16.mxu0 %v8484_v47  ;;  %7556 = vmatpush3.bf16.msra.mxu1 %v8514_v56  ;;  %v1138_v61 = vmax.f32 %v8502_v53, %v995_v10  ;;  %v7891_v10 = vld [vmem:[%s9947_s0 + $0x500] sm:$0xff]  }
 0x15e   :  { %v7142_v46 = vpop.f32.mrf.mxu1  ;;  %v7214_v55 = vpop.f32.mrf.mxu0  ;;  %7557 = vmatprep.subr.bf16.mxu1 %v8526_v59  ;;  %v7892_v41 = vld [vmem:[%s9947_s0 + $0x5e0] sm:$0xff]  }
 0x15f   :  { %v8951_v44 = vmax.f32 %v1137_v20, %v7214_v55  ;;  %v1141_v51 = vmax.f32 %v8521_v58, %v7142_v46 }
 0x160   :  { %v998_v32 = vpop.f32.mrf.mxu1  ;;  %v1556_v33 = vpop.f32.mrf.mxu0  ;;  %7630 = vmatpush3.bf16.msra.mxu0 %v8484_v47 }
 0x161   :  { %v8961_v11 = vmax.f32 %v1135_v54, %v1556_v33  ;;  %7631 = vmatprep.subr.bf16.mxu0 %v8514_v56  ;;  %7558 = vmatpush3.bf16.msra.mxu1 %v8526_v59  ;;  %v1139_v58 = vmax.f32 %v8537_v63, %v998_v32 }
 0x162   :  { %v7145_v38 = vpop.f32.mrf.mxu1  ;;  %v7217_v20 = vpop.f32.mrf.mxu0  ;;  %7424 = vmatmul.mubr.bf16.gmra.mxu1 %v7885_v30  ;;  %7496 = vmatmul.mubr.bf16.gmra.mxu0 %v7886_v42 }
 0x163   :  { %v8966_v52 = vmax.f32 %v1140_v34, %v7217_v20  ;;  %7427 = vmatprep.mubr.bf16.mxu1 %v7887_v16  ;;  %7499 = vmatprep.mubr.bf16.mxu0 %v7888_v2  ;;  %v1144_v30 = vmax.f32 %v8544_v0, %v7145_v38 }
 0x164   :  { %v1011_v48 = vpop.f32.mrf.mxu1  ;;  %v1569_v47 = vpop.f32.mrf.mxu0  ;;  %7632 = vmatpush3.bf16.msra.mxu0 %v8514_v56  ;;  %7559 = vmatprep.subr.bf16.mxu1 %v8560_v6  ;;  %v7890_v56 = vld [vmem:[%s9947_s0 + $0x5d8] sm:$0xff]  }
 0x165   :  { %v8971_v45 = vmax.f32 %v1138_v61, %v1569_v47  ;;  %7633 = vmatprep.subr.bf16.mxu0 %v8526_v59  ;;  %7560 = vmatpush3.bf16.msra.mxu1 %v8560_v6  ;;  %v1142_v2 = vmax.f32 %v8548_v3, %v1011_v48  ;;  %v7893_v3 = vld [vmem:[%s9947_s0 + $0x508] sm:$0xff]  }
 0x166   :  { %v7146_v54 = vpop.f32.mrf.mxu1  ;;  %v7218_v53 = vpop.f32.mrf.mxu0  ;;  %7561 = vmatprep.subr.bf16.mxu1 %v8572_v9  ;;  %v7894_v61 = vld [vmem:[%s9947_s0 + $0x5e8] sm:$0xff]  }
 0x167   :  { %v8983_v60 = vmax.f32 %v1141_v51, %v7218_v53  ;;  %v1145_v0 = vmax.f32 %v8567_v8, %v7146_v54  ;;  %v7896_v8 = vld [vmem:[%s9947_s0 + $0x5f0] sm:$0xff]   ;;  %v9971_v53 = vld [vmem:[#allocation2_spill] sm:$0xff] }
 0x168   :  { %v1014_v46 = vpop.f32.mrf.mxu1  ;;  %v1572_v55 = vpop.f32.mrf.mxu0  ;;  %7634 = vmatpush3.bf16.msra.mxu0 %v8526_v59 }
 0x169   :  { %v8993_v42 = vmax.f32 %v1139_v58, %v1572_v55  ;;  %7635 = vmatprep.subr.bf16.mxu0 %v8560_v6  ;;  %7562 = vmatpush3.bf16.msra.mxu1 %v8572_v9  ;;  %v1143_v48 = vmax.f32 %v8583_v13, %v1014_v46 }
 0x16a   :  { %v7149_v63 = vpop.f32.mrf.mxu1  ;;  %v7221_v16 = vpop.f32.mrf.mxu0  ;;  %7428 = vmatmul.mubr.bf16.gmra.mxu1 %v7889_v40  ;;  %7500 = vmatmul.mubr.bf16.gmra.mxu0 %v7890_v56 }
 0x16b   :  { %v8998_v32 = vmax.f32 %v1144_v30, %v7221_v16  ;;  %7431 = vmatprep.mubr.bf16.mxu1 %v7891_v10  ;;  %7503 = vmatprep.mubr.bf16.mxu0 %v7892_v41  ;;  %v1148_v40 = vmax.f32 %v9971_v53, %v7149_v63  ;;  %v9972_v10 = vld [vmem:[#allocation3_spill] sm:$0xff]  ;;  %v9973_v16 = vld [vmem:[#allocation4_spill] sm:$0xff] }
 0x16c   :  { %v1027_v33 = vpop.f32.mrf.mxu1  ;;  %v1585_v59 = vpop.f32.mrf.mxu0  ;;  %7636 = vmatpush3.bf16.msra.mxu0 %v8560_v6  ;;  %v7895_v6 = vld [vmem:[%s9947_s0 + $0x510] sm:$0xff]  }
 0x16d   :  { %v9002_v34 = vmax.f32 %v1142_v2, %v1585_v59  ;;  %7637 = vmatprep.subr.bf16.mxu0 %v8572_v9  ;;  %v1146_v41 = vmax.f32 %v9972_v10, %v1027_v33  ;;  %v7898_v33 = vld [vmem:[%s9947_s0 + $0x5f8] sm:$0xff]  }
 0x16e   :  { %v7150_v38 = vpop.f32.mrf.mxu1  ;;  %v7222_v20 = vpop.f32.mrf.mxu0 }
 0x16f   :  { %v9012_v47 = vmax.f32 %v1145_v0, %v7222_v20  ;;  %v1149_v2 = vmax.f32 %v9973_v16, %v7150_v38  ;;  %v7897_v0 = vld [vmem:[%s9947_s0 + $0x518] sm:$0xff]   ;;  %v7899_v38 = vld [vmem:[%s9947_s0 + $0x520] sm:$0xff]  }
 0x170   :  { %v1030_v51 = vpop.f32.mrf.mxu1  ;;  %v1588_v54 = vpop.f32.mrf.mxu0  ;;  %7638 = vmatpush3.bf16.msra.mxu0 %v8572_v9  ;;  %v9975_v20 = vld [vmem:[#allocation5_spill] sm:$0xff] }
 0x171   :  { %v9022_v56 = vmax.f32 %v1143_v48, %v1588_v54  ;;  %v7900_v48 = vld [vmem:[%s9947_s0 + $0x600] sm:$0xff]  }
 0x172   :  { %v7153_v58 = vpop.f32.mrf.mxu1  ;;  %v7225_v13 = vpop.f32.mrf.mxu0  ;;  %7432 = vmatmul.mubr.bf16.gmra.mxu1 %v7893_v3  ;;  %7504 = vmatmul.mubr.bf16.gmra.mxu0 %v7894_v61  ;;  %v1147_v3 = vmax.f32 %v9975_v20, %v1030_v51  ;;  %v9977_v54 = vld [vmem:[#allocation6_spill] sm:$0xff]  ;;  %v9979_v51 = vld [vmem:[#allocation7_spill] sm:$0xff] }
 0x173   :  { %v9025_v46 = vmax.f32 %v1148_v40, %v7225_v13  ;;  %7435 = vmatprep.mubr.bf16.mxu1 %v7895_v6  ;;  %7507 = vmatprep.mubr.bf16.mxu0 %v7896_v8  ;;  %v1152_v53 = vmax.f32 %v9977_v54, %v7153_v58 }
 0x174   :  { %v1043_v55 = vpop.f32.mrf.mxu1  ;;  %v1601_v30 = vpop.f32.mrf.mxu0 }
 0x175   :  { %v9028_v59 = vmax.f32 %v1146_v41, %v1601_v30  ;;  %v1150_v41 = vmax.f32 %v9979_v51, %v1043_v55  ;;  %v7902_v55 = vld [vmem:[%s9947_s0 + $0x608] sm:$0xff]  }
 0x176   :  { %v7154_v9 = vpop.f32.mrf.mxu1  ;;  %v7226_v63 = vpop.f32.mrf.mxu0 }
 0x177   :  { %9974 = vst [vmem:[#allocation2_spill] sm:$0xff] %v9028_v59  ;;  %v9037_v61 = vmax.f32 %v1149_v2, %v7226_v63  ;;  %v9981_v63 = vld [vmem:[#allocation8_spill] sm:$0xff] }
 0x178   :  { %v1046_v6 = vpop.f32.mrf.mxu1  ;;  %v1604_v8 = vpop.f32.mrf.mxu0  ;;  %v1153_v20 = vmax.f32 %v9981_v63, %v7154_v9  ;;  %v7903_v9 = vld [vmem:[%s9947_s0 + $0x530] sm:$0xff]  }
 0x179   :  { %9976 = vst [vmem:[#allocation3_spill] sm:$0xff] %v9037_v61  ;;  %v9046_v40 = vmax.f32 %v1147_v3, %v1604_v8  ;;  %v7901_v3 = vld [vmem:[%s9947_s0 + $0x528] sm:$0xff]  }
 0x17a   :  { %v7157_v13 = vpop.f32.mrf.mxu1  ;;  %v7229_v10 = vpop.f32.mrf.mxu0  ;;  %7436 = vmatmul.mubr.bf16.gmra.mxu1 %v7897_v0  ;;  %7508 = vmatmul.mubr.bf16.gmra.mxu0 %v7898_v33  ;;  %v9983_v0 = vld [vmem:[#allocation9_spill] sm:$0xff] }
 0x17b   :  { %9978 = vst [vmem:[#allocation4_spill] sm:$0xff] %v9046_v40  ;;  %v9049_v30 = vmax.f32 %v1152_v53, %v7229_v10  ;;  %7439 = vmatprep.mubr.bf16.mxu1 %v7899_v38  ;;  %7511 = vmatprep.mubr.bf16.mxu0 %v7900_v48  ;;  %v1151_v33 = vmax.f32 %v9983_v0, %v1046_v6  ;;  %v7904_v48 = vld [vmem:[%s9947_s0 + $0x610] sm:$0xff]   ;;  %v9985_v53 = vld [vmem:[#allocation10_spill] sm:$0xff]  ;;  %v9987_v6 = vld [vmem:[#allocation11_spill] sm:$0xff] }
 0x17c   :  { %v1059_v16 = vpop.f32.mrf.mxu1  ;;  %v1617_v2 = vpop.f32.mrf.mxu0  ;;  %v1156_v10 = vmax.f32 %v9985_v53, %v7157_v13  ;;  %v9993_v53 = vld [vmem:[#allocation14_spill] sm:$0xff] }
 0x17d   :  { %9980 = vst [vmem:[#allocation5_spill] sm:$0xff] %v9049_v30  ;;  %v9052_v61 = vmax.f32 %v1150_v41, %v1617_v2  ;;  %v1154_v63 = vmax.f32 %v9987_v6, %v1059_v16  ;;  %v7906_v16 = vld [vmem:[%s9947_s0 + $0x618] sm:$0xff]  }
 0x17e   :  { %v7158_v59 = vpop.f32.mrf.mxu1  ;;  %v7230_v58 = vpop.f32.mrf.mxu0 }
 0x17f   :  { %9982 = vst [vmem:[#allocation6_spill] sm:$0xff] %v9052_v61  ;;  %v9061_v38 = vmax.f32 %v1153_v20, %v7230_v58 }
 0x180   :  { %v1062_v8 = vpop.f32.mrf.mxu1  ;;  %v1620_v54 = vpop.f32.mrf.mxu0 }
 0x181   :  { %9984 = vst [vmem:[#allocation7_spill] sm:$0xff] %v9061_v38  ;;  %v9070_v51 = vmax.f32 %v1151_v33, %v1620_v54  ;;  %v9989_v38 = vld [vmem:[#allocation12_spill] sm:$0xff]  ;;  %v7905_v33 = vld [vmem:[%s9947_s0 + $0x538] sm:$0xff]  }
 0x182   :  { %v7161_v41 = vpop.f32.mrf.mxu1  ;;  %v7233_v2 = vpop.f32.mrf.mxu0  ;;  %7440 = vmatmul.mubr.bf16.gmra.mxu1 %v7901_v3  ;;  %7512 = vmatmul.mubr.bf16.gmra.mxu0 %v7902_v55  ;;  %v1157_v61 = vmax.f32 %v9989_v38, %v7158_v59  ;;  %v9991_v3 = vld [vmem:[#allocation13_spill] sm:$0xff]  ;;  %v7907_v59 = vld [vmem:[%s9947_s0 + $0x540] sm:$0xff]  }
 0x183   :  { %9986 = vst [vmem:[#allocation8_spill] sm:$0xff] %v9070_v51  ;;  %v9073_v20 = vmax.f32 %v1156_v10, %v7233_v2  ;;  %7443 = vmatprep.mubr.bf16.mxu1 %v7903_v9  ;;  %7515 = vmatprep.mubr.bf16.mxu0 %v7904_v48  ;;  %v1155_v55 = vmax.f32 %v9991_v3, %v1062_v8  ;;  %v7908_v38 = vld [vmem:[%s9947_s0 + $0x620] sm:$0xff]  }
 0x184   :  { %v1075_v58 = vpop.f32.mrf.mxu1  ;;  %v1633_v0 = vpop.f32.mrf.mxu0  ;;  %v1160_v10 = vmax.f32 %v9993_v53, %v7161_v41  ;;  %v10001_v53 = vld [vmem:[#allocation18_spill] sm:$0xff] }
 0x185   :  { %9988 = vst [vmem:[#allocation9_spill] sm:$0xff] %v9073_v20  ;;  %v9076_v30 = vmax.f32 %v1154_v63, %v1633_v0 }
 0x186   :  { %v7162_v40 = vpop.f32.mrf.mxu1  ;;  %v7234_v13 = vpop.f32.mrf.mxu0 }
 0x187   :  { %9990 = vst [vmem:[#allocation10_spill] sm:$0xff] %v9076_v30  ;;  %v9085_v9 = vmax.f32 %v1157_v61, %v7234_v13  ;;  %v9995_v61 = vld [vmem:[#allocation15_spill] sm:$0xff] }
 0x188   :  { %v1078_v48 = vpop.f32.mrf.mxu1  ;;  %v1636_v54 = vpop.f32.mrf.mxu0  ;;  %v1158_v8 = vmax.f32 %v9995_v61, %v1075_v58  ;;  %v7910_v58 = vld [vmem:[%s9947_s0 + $0x628] sm:$0xff]  }
 0x189   :  { %9992 = vst [vmem:[#allocation11_spill] sm:$0xff] %v9085_v9  ;;  %v9094_v2 = vmax.f32 %v1155_v55, %v1636_v54  ;;  %v9997_v9 = vld [vmem:[#allocation16_spill] sm:$0xff]  ;;  %v7909_v55 = vld [vmem:[%s9947_s0 + $0x548] sm:$0xff]  }
 0x18a   :  { %v7165_v6 = vpop.f32.mrf.mxu1  ;;  %v7237_v63 = vpop.f32.mrf.mxu0  ;;  %7444 = vmatmul.mubr.bf16.gmra.mxu1 %v7905_v33  ;;  %7516 = vmatmul.mubr.bf16.gmra.mxu0 %v7906_v16  ;;  %v1161_v30 = vmax.f32 %v9997_v9, %v7162_v40  ;;  %v9999_v33 = vld [vmem:[#allocation17_spill] sm:$0xff]  ;;  %v7911_v40 = vld [vmem:[%s9947_s0 + $0x550] sm:$0xff]  }
 0x18b   :  { %9994 = vst [vmem:[#allocation12_spill] sm:$0xff] %v9094_v2  ;;  %v9097_v0 = vmax.f32 %v1160_v10, %v7237_v63  ;;  %7447 = vmatprep.mubr.bf16.mxu1 %v7907_v59  ;;  %7519 = vmatprep.mubr.bf16.mxu0 %v7908_v38  ;;  %v1159_v16 = vmax.f32 %v9999_v33, %v1078_v48  ;;  %v7912_v9 = vld [vmem:[%s9947_s0 + $0x630] sm:$0xff]  }
 0x18c   :  { %v1091_v13 = vpop.f32.mrf.mxu1  ;;  %v1649_v3 = vpop.f32.mrf.mxu0  ;;  %v1164_v10 = vmax.f32 %v10001_v53, %v7165_v6 }
 0x18d   :  { %9996 = vst [vmem:[#allocation13_spill] sm:$0xff] %v9097_v0  ;;  %v9100_v20 = vmax.f32 %v1158_v8, %v1649_v3 }
 0x18e   :  { %v7166_v51 = vpop.f32.mrf.mxu1  ;;  %v7238_v41 = vpop.f32.mrf.mxu0 }
 0x18f   :  { %9998 = vst [vmem:[#allocation14_spill] sm:$0xff] %v9100_v20  ;;  %v9109_v59 = vmax.f32 %v1161_v30, %v7238_v41  ;;  %v10002_v30 = vld [vmem:[#allocation19_spill] sm:$0xff]  ;;  %v10003_v20 = vld [vmem:[#allocation20_spill] sm:$0xff] }
 0x190   :  { %v1094_v38 = vpop.f32.mrf.mxu1  ;;  %v1652_v54 = vpop.f32.mrf.mxu0  ;;  %v1162_v48 = vmax.f32 %v10002_v30, %v1091_v13  ;;  %v1165_v0 = vmax.f32 %v10003_v20, %v7166_v51  ;;  %v7913_v13 = vld [vmem:[%s9947_s0 + $0x558] sm:$0xff]   ;;  %v7916_v20 = vld [vmem:[%s9947_s0 + $0x640] sm:$0xff]  }
 0x191   :  { %10000 = vst [vmem:[#allocation15_spill] sm:$0xff] %v9109_v59  ;;  %v9118_v63 = vmax.f32 %v1159_v16, %v1652_v54 }
 0x192   :  { %v7241_v61 = vpop.f32.mrf.mxu0  ;;  %v7261_v8 = vpop.f32.mrf.mxu1  ;;  %7448 = vmatmul.mubr.bf16.gmra.mxu1 %v7909_v55  ;;  %7520 = vmatmul.mubr.bf16.gmra.mxu0 %v7910_v58  ;;  %v10004_v55 = vld [vmem:[#allocation21_spill] sm:$0xff] }
 0x193   :  { %v9121_v3 = vmax.f32 %v1164_v10, %v7241_v61  ;;  %v2256_v41 = vmax.f32 %v8758_v57, %v7261_v8  ;;  %7451 = vmatprep.mubr.bf16.mxu1 %v7911_v40  ;;  %7523 = vmatprep.mubr.bf16.mxu0 %v7912_v9  ;;  %v7914_v57 = vld [vmem:[%s9947_s0 + $0x638] sm:$0xff]   ;;  %v1163_v58 = vmax.f32 %v10004_v55, %v1094_v38  ;;  %v10005_v9 = vld [vmem:[#allocation22_spill] sm:$0xff] }
 0x194   :  { %v1665_v33 = vpop.f32.mrf.mxu0  ;;  %v2015_v59 = vpop.f32.mrf.mxu1 }
 0x195   :  { %v9125_v2 = vmax.f32 %v1162_v48, %v1665_v33  ;;  %v2254_v6 = vmax.f32 %v8761_v19, %v2015_v59  ;;  %v7915_v19 = vld [vmem:[%s9947_s0 + $0x560] sm:$0xff]  }
 0x196   :  { %v7242_v16 = vpop.f32.mrf.mxu0  ;;  %v7262_v54 = vpop.f32.mrf.mxu1 }
 0x197   :  { %v9135_v40 = vmax.f32 %v1165_v0, %v7242_v16  ;;  %v2257_v51 = vmax.f32 %v10005_v9, %v7262_v54 }
 0x198   :  { %v1668_v59 = vpop.f32.mrf.mxu0  ;;  %v2018_v53 = vpop.f32.mrf.mxu1 }
 0x199   :  { %v9144_v10 = vmax.f32 %v1163_v58, %v1668_v59  ;;  %v2255_v61 = vmax.f32 %v8779_v49, %v2018_v53  ;;  %v7917_v49 = vld [vmem:[%s9947_s0 + $0x568] sm:$0xff]  }
 0x19a   :  { %v7265_v8 = vpop.f32.mrf.mxu1  ;;  %v7337_v38 = vpop.f32.mrf.mxu0  ;;  %7452 = vmatmul.mubr.bf16.gmra.mxu1 %v7913_v13  ;;  %7524 = vmatmul.mubr.bf16.gmra.mxu0 %v7914_v57 }
 0x19b   :  { %v2260_v0 = vmax.f32 %v8782_v15, %v7265_v8  ;;  %v9148_v30 = vmax.f32 %v2256_v41, %v7337_v38  ;;  %7455 = vmatprep.mubr.bf16.mxu1 %v7915_v19  ;;  %7527 = vmatprep.mubr.bf16.mxu0 %v7916_v20  ;;  %v7918_v15 = vld [vmem:[%s9947_s0 + $0x648] sm:$0xff]  }
 0x19c   :  { %v2031_v48 = vpop.f32.mrf.mxu1  ;;  %v2589_v33 = vpop.f32.mrf.mxu0 }
 0x19d   :  { %v2258_v16 = vmax.f32 %v8785_v37, %v2031_v48  ;;  %v9151_v54 = vmax.f32 %v2254_v6, %v2589_v33  ;;  %v7919_v37 = vld [vmem:[%s9947_s0 + $0x570] sm:$0xff]  }
 0x19e   :  { %v7266_v55 = vpop.f32.mrf.mxu1  ;;  %v7338_v58 = vpop.f32.mrf.mxu0  ;;  %v7920_v6 = vld [vmem:[%s9947_s0 + $0x650] sm:$0xff]  }
 0x19f   :  { %v2261_v41 = vmax.f32 %v8794_v62, %v7266_v55  ;;  %v9160_v13 = vmax.f32 %v2257_v51, %v7338_v58 }
 0x1a0   :  { %v2034_v57 = vpop.f32.mrf.mxu1  ;;  %v2592_v9 = vpop.f32.mrf.mxu0 }
 0x1a1   :  { %v2259_v19 = vmax.f32 %v8803_v43, %v2034_v57  ;;  %v9169_v20 = vmax.f32 %v2255_v61, %v2592_v9  ;;  %v7921_v61 = vld [vmem:[%s9947_s0 + $0x578] sm:$0xff]  }
 0x1a2   :  { %v7269_v59 = vpop.f32.mrf.mxu1  ;;  %v7341_v53 = vpop.f32.mrf.mxu0  ;;  %7456 = vmatmul.mubr.bf16.gmra.mxu1 %v7917_v49  ;;  %7528 = vmatmul.mubr.bf16.gmra.mxu0 %v7918_v15 }
 0x1a3   :  { %v2264_v62 = vmax.f32 %v8806_v31, %v7269_v59  ;;  %v9172_v51 = vmax.f32 %v2260_v0, %v7341_v53  ;;  %7459 = vmatprep.mubr.bf16.mxu1 %v7919_v37  ;;  %7531 = vmatprep.mubr.bf16.mxu0 %v7920_v6  ;;  %v7922_v31 = vld [vmem:[%s9947_s0 + $0x658] sm:$0xff]  }
 0x1a4   :  { %v2047_v8 = vpop.f32.mrf.mxu1  ;;  %v2605_v38 = vpop.f32.mrf.mxu0 }
 0x1a5   :  { %v2262_v48 = vmax.f32 %v8809_v50, %v2047_v8  ;;  %v9175_v33 = vmax.f32 %v2258_v16, %v2605_v38  ;;  %v7923_v50 = vld [vmem:[%s9947_s0 + $0x580] sm:$0xff]  }
 0x1a6   :  { %v7270_v55 = vpop.f32.mrf.mxu1  ;;  %v7342_v43 = vpop.f32.mrf.mxu0  ;;  %v7924_v16 = vld [vmem:[%s9947_s0 + $0x660] sm:$0xff]  }
 0x1a7   :  { %v2265_v0 = vmax.f32 %v8818_v22, %v7270_v55  ;;  %v9184_v58 = vmax.f32 %v2261_v41, %v7342_v43 }
 0x1a8   :  { %v2050_v49 = vpop.f32.mrf.mxu1  ;;  %v2608_v15 = vpop.f32.mrf.mxu0 }
 0x1a9   :  { %v2263_v37 = vmax.f32 %v8827_v1, %v2050_v49  ;;  %v9193_v6 = vmax.f32 %v2259_v19, %v2608_v15  ;;  %v7925_v19 = vld [vmem:[%s9947_s0 + $0x588] sm:$0xff]  }
 0x1aa   :  { %v7273_v57 = vpop.f32.mrf.mxu1  ;;  %v7345_v9 = vpop.f32.mrf.mxu0  ;;  %7460 = vmatmul.mubr.bf16.gmra.mxu1 %v7921_v61  ;;  %7532 = vmatmul.mubr.bf16.gmra.mxu0 %v7922_v31 }
 0x1ab   :  { %v2268_v22 = vmax.f32 %v8830_v29, %v7273_v57  ;;  %v9196_v41 = vmax.f32 %v2264_v62, %v7345_v9  ;;  %7463 = vmatprep.mubr.bf16.mxu1 %v7923_v50  ;;  %7535 = vmatprep.mubr.bf16.mxu0 %v7924_v16  ;;  %v7926_v29 = vld [vmem:[%s9947_s0 + $0x668] sm:$0xff]  }
 0x1ac   :  { %v2063_v59 = vpop.f32.mrf.mxu1  ;;  %v2621_v53 = vpop.f32.mrf.mxu0 }
 0x1ad   :  { %v2266_v8 = vmax.f32 %v8833_v12, %v2063_v59  ;;  %v9199_v38 = vmax.f32 %v2262_v48, %v2621_v53  ;;  %v7927_v12 = vld [vmem:[%s9947_s0 + $0x590] sm:$0xff]  }
 0x1ae   :  { %v7274_v55 = vpop.f32.mrf.mxu1  ;;  %v7346_v1 = vpop.f32.mrf.mxu0  ;;  %v7928_v48 = vld [vmem:[%s9947_s0 + $0x670] sm:$0xff]  }
 0x1af   :  { %v2269_v62 = vmax.f32 %v8842_v35, %v7274_v55  ;;  %v9208_v43 = vmax.f32 %v2265_v0, %v7346_v1 }
 0x1b0   :  { %v2066_v61 = vpop.f32.mrf.mxu1  ;;  %v2624_v31 = vpop.f32.mrf.mxu0 }
 0x1b1   :  { %v2267_v50 = vmax.f32 %v8851_v14, %v2066_v61  ;;  %v9217_v16 = vmax.f32 %v2263_v37, %v2624_v31  ;;  %v7929_v37 = vld [vmem:[%s9947_s0 + $0x598] sm:$0xff]  }
 0x1b2   :  { %v7277_v49 = vpop.f32.mrf.mxu1  ;;  %v7349_v15 = vpop.f32.mrf.mxu0  ;;  %7464 = vmatmul.mubr.bf16.gmra.mxu1 %v7925_v19  ;;  %7536 = vmatmul.mubr.bf16.gmra.mxu0 %v7926_v29 }
 0x1b3   :  { %v2272_v35 = vmax.f32 %v8854_v7, %v7277_v49  ;;  %v9220_v0 = vmax.f32 %v2268_v22, %v7349_v15  ;;  %7467 = vmatprep.mubr.bf16.mxu1 %v7927_v12  ;;  %7539 = vmatprep.mubr.bf16.mxu0 %v7928_v48  ;;  %v7930_v7 = vld [vmem:[%s9947_s0 + $0x678] sm:$0xff]  }
 0x1b4   :  { %v2079_v57 = vpop.f32.mrf.mxu1  ;;  %v2637_v9 = vpop.f32.mrf.mxu0 }
 0x1b5   :  { %v2270_v59 = vmax.f32 %v8857_v24, %v2079_v57  ;;  %v9223_v53 = vmax.f32 %v2266_v8, %v2637_v9  ;;  %v7931_v24 = vld [vmem:[%s9947_s0 + $0x680] sm:$0xff]   ;;  %v7932_v8 = vld [vmem:[%s9947_s0 + $0x690] sm:$0xff]  }
 0x1b6   :  { %v7278_v55 = vpop.f32.mrf.mxu1  ;;  %v7350_v14 = vpop.f32.mrf.mxu0 }
 0x1b7   :  { %v2273_v22 = vmax.f32 %v8866_v27, %v7278_v55  ;;  %v9232_v1 = vmax.f32 %v2269_v62, %v7350_v14 }
 0x1b8   :  { %v2082_v19 = vpop.f32.mrf.mxu1  ;;  %v2640_v29 = vpop.f32.mrf.mxu0 }
 0x1b9   :  { %v2271_v12 = vmax.f32 %v8875_v26, %v2082_v19  ;;  %v9241_v48 = vmax.f32 %v2267_v50, %v2640_v29  ;;  %v7933_v50 = vld [vmem:[%s9947_s0 + $0x688] sm:$0xff]  }
 0x1ba   :  { %v7281_v61 = vpop.f32.mrf.mxu1  ;;  %v7353_v31 = vpop.f32.mrf.mxu0  ;;  %7468 = vmatmul.mubr.bf16.gmra.mxu1 %v7929_v37  ;;  %7540 = vmatmul.mubr.bf16.gmra.mxu0 %v7930_v7 }
 0x1bb   :  { %v2276_v27 = vmax.f32 %v8878_v18, %v7281_v61  ;;  %v9244_v62 = vmax.f32 %v2272_v35, %v7353_v31  ;;  %7543 = vmatprep.mubr.bf16.mxu0 %v7931_v24  ;;  %7563 = vmatprep.mubr.bf16.mxu1 %v7932_v8  ;;  %v7934_v18 = vld [vmem:[%s9947_s0 + $0x698] sm:$0xff]  }
 0x1bc   :  { %v2095_v49 = vpop.f32.mrf.mxu1  ;;  %v2653_v15 = vpop.f32.mrf.mxu0 }
 0x1bd   :  { %v2274_v57 = vmax.f32 %v8882_v36, %v2095_v49  ;;  %v9247_v9 = vmax.f32 %v2270_v59, %v2653_v15  ;;  %v7935_v36 = vld [vmem:[%s9947_s0 + $0x6a0] sm:$0xff]  }
 0x1be   :  { %v7282_v55 = vpop.f32.mrf.mxu1  ;;  %v7354_v26 = vpop.f32.mrf.mxu0  ;;  %v7936_v59 = vld [vmem:[%s9947_s0 + $0x780] sm:$0xff]  }
 0x1bf   :  { %v2277_v35 = vmax.f32 %v8892_v25, %v7282_v55  ;;  %v9256_v14 = vmax.f32 %v2273_v22, %v7354_v26 }
 0x1c0   :  { %v2098_v37 = vpop.f32.mrf.mxu1  ;;  %v2656_v7 = vpop.f32.mrf.mxu0 }
 0x1c1   :  { %v2275_v24 = vmax.f32 %v8902_v39, %v2098_v37  ;;  %v9265_v8 = vmax.f32 %v2271_v12, %v2656_v7  ;;  %v7937_v12 = vld [vmem:[%s9947_s0 + $0x6a8] sm:$0xff]  }
 0x1c2   :  { %v7285_v19 = vpop.f32.mrf.mxu1  ;;  %v7357_v29 = vpop.f32.mrf.mxu0  ;;  %7544 = vmatmul.mubr.bf16.gmra.mxu0 %v7933_v50  ;;  %7564 = vmatmul.mubr.bf16.vlgmr.msra.gmra.mxu1 %v7934_v18 }
 0x1c3   :  { %v2280_v25 = vmax.f32 %v8906_v28, %v7285_v19  ;;  %v9268_v22 = vmax.f32 %v2276_v27, %v7357_v29  ;;  %7567 = vmatprep.mubr.bf16.mxu1 %v7935_v36  ;;  %7639 = vmatprep.mubr.bf16.mxu0 %v7936_v59  ;;  %v7938_v28 = vld [vmem:[%s9947_s0 + $0x788] sm:$0xff]  }
 0x1c4   :  { %v2111_v61 = vpop.f32.mrf.mxu1  ;;  %v2669_v31 = vpop.f32.mrf.mxu0 }
 0x1c5   :  { %v2278_v49 = vmax.f32 %v8911_v17, %v2111_v61  ;;  %v9271_v15 = vmax.f32 %v2274_v57, %v2669_v31  ;;  %v7939_v17 = vld [vmem:[%s9947_s0 + $0x6b0] sm:$0xff]  }
 0x1c6   :  { %v7286_v55 = vpop.f32.mrf.mxu1  ;;  %v7358_v39 = vpop.f32.mrf.mxu0  ;;  %v7940_v57 = vld [vmem:[%s9947_s0 + $0x790] sm:$0xff]  }
 0x1c7   :  { %v2281_v27 = vmax.f32 %v8922_v23, %v7286_v55  ;;  %v9280_v26 = vmax.f32 %v2277_v35, %v7358_v39 }
 0x1c8   :  { %v2114_v50 = vpop.f32.mrf.mxu1  ;;  %v2672_v18 = vpop.f32.mrf.mxu0 }
 0x1c9   :  { %v2279_v36 = vmax.f32 %v8933_v5, %v2114_v50  ;;  %v9289_v59 = vmax.f32 %v2275_v24, %v2672_v18  ;;  %v7941_v24 = vld [vmem:[%s9947_s0 + $0x6b8] sm:$0xff]  }
 0x1ca   :  { %v7289_v37 = vpop.f32.mrf.mxu1  ;;  %v7361_v7 = vpop.f32.mrf.mxu0  ;;  %7568 = vmatmul.mubr.bf16.gmra.mxu1 %v7937_v12  ;;  %7640 = vmatmul.mubr.bf16.vlgmr.msra.gmra.mxu0 %v7938_v28 }
 0x1cb   :  { %v2284_v23 = vmax.f32 %v8936_v4, %v7289_v37  ;;  %v9292_v35 = vmax.f32 %v2280_v25, %v7361_v7  ;;  %7571 = vmatprep.mubr.bf16.mxu1 %v7939_v17  ;;  %7643 = vmatprep.mubr.bf16.mxu0 %v7940_v57  ;;  %v7942_v4 = vld [vmem:[%s9947_s0 + $0x798] sm:$0xff]  }
 0x1cc   :  { %v2127_v19 = vpop.f32.mrf.mxu1  ;;  %v2685_v29 = vpop.f32.mrf.mxu0 }
 0x1cd   :  { %v2282_v61 = vmax.f32 %v8940_v21, %v2127_v19  ;;  %v9295_v31 = vmax.f32 %v2278_v49, %v2685_v29  ;;  %v7943_v21 = vld [vmem:[%s9947_s0 + $0x6c0] sm:$0xff]  }
 0x1ce   :  { %v7290_v55 = vpop.f32.mrf.mxu1  ;;  %v7362_v5 = vpop.f32.mrf.mxu0  ;;  %v7944_v49 = vld [vmem:[%s9947_s0 + $0x7a0] sm:$0xff]  }
 0x1cf   :  { %v2285_v25 = vmax.f32 %v8951_v44, %v7290_v55  ;;  %v9304_v39 = vmax.f32 %v2281_v27, %v7362_v5 }
 0x1d0   :  { %v2130_v12 = vpop.f32.mrf.mxu1  ;;  %v2688_v28 = vpop.f32.mrf.mxu0 }
 0x1d1   :  { %v2283_v17 = vmax.f32 %v8961_v11, %v2130_v12  ;;  %v9313_v57 = vmax.f32 %v2279_v36, %v2688_v28  ;;  %v7945_v36 = vld [vmem:[%s9947_s0 + $0x6c8] sm:$0xff]  }
 0x1d2   :  { %v7293_v50 = vpop.f32.mrf.mxu1  ;;  %v7365_v18 = vpop.f32.mrf.mxu0  ;;  %7572 = vmatmul.mubr.bf16.gmra.mxu1 %v7941_v24  ;;  %7644 = vmatmul.mubr.bf16.gmra.mxu0 %v7942_v4 }
 0x1d3   :  { %v2288_v44 = vmax.f32 %v8966_v52, %v7293_v50  ;;  %v9316_v27 = vmax.f32 %v2284_v23, %v7365_v18  ;;  %7575 = vmatprep.mubr.bf16.mxu1 %v7943_v21  ;;  %7647 = vmatprep.mubr.bf16.mxu0 %v7944_v49  ;;  %v7946_v52 = vld [vmem:[%s9947_s0 + $0x7a8] sm:$0xff]  }
 0x1d4   :  { %v2143_v37 = vpop.f32.mrf.mxu1  ;;  %v2701_v7 = vpop.f32.mrf.mxu0 }
 0x1d5   :  { %v2286_v19 = vmax.f32 %v8971_v45, %v2143_v37  ;;  %v9319_v29 = vmax.f32 %v2282_v61, %v2701_v7  ;;  %v7947_v45 = vld [vmem:[%s9947_s0 + $0x6d0] sm:$0xff]  }
 0x1d6   :  { %v7294_v55 = vpop.f32.mrf.mxu1  ;;  %v7366_v11 = vpop.f32.mrf.mxu0  ;;  %v7948_v61 = vld [vmem:[%s9947_s0 + $0x7b0] sm:$0xff]  }
 0x1d7   :  { %v2289_v23 = vmax.f32 %v8983_v60, %v7294_v55  ;;  %v9328_v5 = vmax.f32 %v2285_v25, %v7366_v11 }
 0x1d8   :  { %v2146_v24 = vpop.f32.mrf.mxu1  ;;  %v2704_v4 = vpop.f32.mrf.mxu0 }
 0x1d9   :  { %v2287_v21 = vmax.f32 %v8993_v42, %v2146_v24  ;;  %v9337_v49 = vmax.f32 %v2283_v17, %v2704_v4  ;;  %v7949_v17 = vld [vmem:[%s9947_s0 + $0x6d8] sm:$0xff]  }
 0x1da   :  { %v7297_v12 = vpop.f32.mrf.mxu1  ;;  %v7369_v28 = vpop.f32.mrf.mxu0  ;;  %7576 = vmatmul.mubr.bf16.gmra.mxu1 %v7945_v36  ;;  %7648 = vmatmul.mubr.bf16.gmra.mxu0 %v7946_v52 }
 0x1db   :  { %v2292_v60 = vmax.f32 %v8998_v32, %v7297_v12  ;;  %v9340_v25 = vmax.f32 %v2288_v44, %v7369_v28  ;;  %7579 = vmatprep.mubr.bf16.mxu1 %v7947_v45  ;;  %7651 = vmatprep.mubr.bf16.mxu0 %v7948_v61  ;;  %v7950_v32 = vld [vmem:[%s9947_s0 + $0x7b8] sm:$0xff]  }
 0x1dc   :  { %v2159_v50 = vpop.f32.mrf.mxu1  ;;  %v2717_v18 = vpop.f32.mrf.mxu0 }
 0x1dd   :  { %v2290_v37 = vmax.f32 %v9002_v34, %v2159_v50  ;;  %v9343_v7 = vmax.f32 %v2286_v19, %v2717_v18  ;;  %v7951_v34 = vld [vmem:[%s9947_s0 + $0x6e0] sm:$0xff]  }
 0x1de   :  { %v7298_v55 = vpop.f32.mrf.mxu1  ;;  %v7370_v42 = vpop.f32.mrf.mxu0  ;;  %v7952_v19 = vld [vmem:[%s9947_s0 + $0x7c0] sm:$0xff]  }
 0x1df   :  { %v2293_v44 = vmax.f32 %v9012_v47, %v7298_v55  ;;  %v9352_v11 = vmax.f32 %v2289_v23, %v7370_v42  ;;  %v10008_v50 = vld [vmem:[#allocation2_spill] sm:$0xff] }
 0x1e0   :  { %v2162_v36 = vpop.f32.mrf.mxu1  ;;  %v2720_v52 = vpop.f32.mrf.mxu0 }
 0x1e1   :  { %v2291_v45 = vmax.f32 %v9022_v56, %v2162_v36  ;;  %v9361_v61 = vmax.f32 %v2287_v21, %v2720_v52  ;;  %v7953_v21 = vld [vmem:[%s9947_s0 + $0x6e8] sm:$0xff]   ;;  %v10012_v52 = vld [vmem:[#allocation4_spill] sm:$0xff] }
 0x1e2   :  { %v7301_v24 = vpop.f32.mrf.mxu1  ;;  %v7373_v4 = vpop.f32.mrf.mxu0  ;;  %7580 = vmatmul.mubr.bf16.gmra.mxu1 %v7949_v17  ;;  %7652 = vmatmul.mubr.bf16.gmra.mxu0 %v7950_v32 }
 0x1e3   :  { %10006 = vst [vmem:[#allocation16_spill] sm:$0xff] %v9361_v61  ;;  %v2296_v47 = vmax.f32 %v9025_v46, %v7301_v24  ;;  %v9364_v23 = vmax.f32 %v2292_v60, %v7373_v4  ;;  %7583 = vmatprep.mubr.bf16.mxu1 %v7951_v34  ;;  %7655 = vmatprep.mubr.bf16.mxu0 %v7952_v19  ;;  %v7954_v46 = vld [vmem:[%s9947_s0 + $0x7c8] sm:$0xff]   ;;  %v7955_v34 = vld [vmem:[%s9947_s0 + $0x6f0] sm:$0xff]  }
 0x1e4   :  { %v2175_v12 = vpop.f32.mrf.mxu1  ;;  %v2733_v28 = vpop.f32.mrf.mxu0  ;;  %v10010_v60 = vld [vmem:[#allocation3_spill] sm:$0xff] }
 0x1e5   :  { %10007 = vst [vmem:[#allocation17_spill] sm:$0xff] %v9364_v23  ;;  %v2294_v18 = vmax.f32 %v10008_v50, %v2175_v12  ;;  %v9367_v55 = vmax.f32 %v2290_v37, %v2733_v28  ;;  %v7956_v37 = vld [vmem:[%s9947_s0 + $0x7d0] sm:$0xff]  }
 0x1e6   :  { %v7302_v42 = vpop.f32.mrf.mxu1  ;;  %v7374_v56 = vpop.f32.mrf.mxu0 }
 0x1e7   :  { %10009 = vst [vmem:[#allocation18_spill] sm:$0xff] %v9367_v55  ;;  %v2297_v17 = vmax.f32 %v10010_v60, %v7302_v42  ;;  %v9376_v32 = vmax.f32 %v2293_v44, %v7374_v56  ;;  %v10014_v44 = vld [vmem:[#allocation5_spill] sm:$0xff] }
 0x1e8   :  { %v2178_v19 = vpop.f32.mrf.mxu1  ;;  %v2736_v36 = vpop.f32.mrf.mxu0 }
 0x1e9   :  { %10011 = vst [vmem:[#allocation19_spill] sm:$0xff] %v9376_v32  ;;  %v2295_v24 = vmax.f32 %v10012_v52, %v2178_v19  ;;  %v9385_v4 = vmax.f32 %v2291_v45, %v2736_v36  ;;  %v10016_v32 = vld [vmem:[#allocation6_spill] sm:$0xff]  ;;  %v7957_v45 = vld [vmem:[%s9947_s0 + $0x6f8] sm:$0xff]   ;;  %v10020_v52 = vld [vmem:[#allocation8_spill] sm:$0xff] }
 0x1ea   :  { %v7305_v12 = vpop.f32.mrf.mxu1  ;;  %v7377_v28 = vpop.f32.mrf.mxu0  ;;  %7584 = vmatmul.mubr.bf16.gmra.mxu1 %v7953_v21  ;;  %7656 = vmatmul.mubr.bf16.gmra.mxu0 %v7954_v46  ;;  %v7958_v21 = vld [vmem:[%s9947_s0 + $0x7d8] sm:$0xff]  }
 0x1eb   :  { %10013 = vst [vmem:[#allocation20_spill] sm:$0xff] %v9385_v4  ;;  %v2300_v50 = vmax.f32 %v10014_v44, %v7305_v12  ;;  %v9388_v42 = vmax.f32 %v2296_v47, %v7377_v28  ;;  %7587 = vmatprep.mubr.bf16.mxu1 %v7955_v34  ;;  %7659 = vmatprep.mubr.bf16.mxu0 %v7956_v37  ;;  %v10018_v47 = vld [vmem:[#allocation7_spill] sm:$0xff] }
 0x1ec   :  { %v2191_v56 = vpop.f32.mrf.mxu1  ;;  %v2749_v60 = vpop.f32.mrf.mxu0 }
 0x1ed   :  { %10015 = vst [vmem:[#allocation21_spill] sm:$0xff] %v9388_v42  ;;  %v2298_v55 = vmax.f32 %v10016_v32, %v2191_v56  ;;  %v9391_v23 = vmax.f32 %v2294_v18, %v2749_v60  ;;  %v7959_v32 = vld [vmem:[%s9947_s0 + $0x700] sm:$0xff]  }
 0x1ee   :  { %v7306_v61 = vpop.f32.mrf.mxu1  ;;  %v7378_v19 = vpop.f32.mrf.mxu0  ;;  %v7960_v18 = vld [vmem:[%s9947_s0 + $0x7e0] sm:$0xff]  }
 0x1ef   :  { %10017 = vst [vmem:[#allocation22_spill] sm:$0xff] %v9391_v23  ;;  %v2301_v46 = vmax.f32 %v10018_v47, %v7306_v61  ;;  %v9400_v34 = vmax.f32 %v2297_v17, %v7378_v19  ;;  %v10022_v61 = vld [vmem:[#allocation9_spill] sm:$0xff] }
 0x1f0   :  { %v2194_v37 = vpop.f32.mrf.mxu1  ;;  %v2752_v36 = vpop.f32.mrf.mxu0 }
 0x1f1   :  { %10019 = vst [vmem:[#allocation2_spill] sm:$0xff] %v9400_v34  ;;  %v2299_v12 = vmax.f32 %v10020_v52, %v2194_v37  ;;  %v9409_v28 = vmax.f32 %v2295_v24, %v2752_v36  ;;  %v10024_v34 = vld [vmem:[#allocation10_spill] sm:$0xff]  ;;  %v7961_v24 = vld [vmem:[%s9947_s0 + $0x708] sm:$0xff]   ;;  %v10028_v52 = vld [vmem:[#allocation12_spill] sm:$0xff] }
 0x1f2   :  { %v7309_v44 = vpop.f32.mrf.mxu1  ;;  %v7381_v56 = vpop.f32.mrf.mxu0  ;;  %7588 = vmatmul.mubr.bf16.gmra.mxu1 %v7957_v45  ;;  %7660 = vmatmul.mubr.bf16.gmra.mxu0 %v7958_v21  ;;  %v7962_v45 = vld [vmem:[%s9947_s0 + $0x7e8] sm:$0xff]  }
 0x1f3   :  { %10021 = vst [vmem:[#allocation3_spill] sm:$0xff] %v9409_v28  ;;  %v2304_v17 = vmax.f32 %v10022_v61, %v7309_v44  ;;  %v9412_v60 = vmax.f32 %v2300_v50, %v7381_v56  ;;  %7591 = vmatprep.mubr.bf16.mxu1 %v7959_v32  ;;  %7663 = vmatprep.mubr.bf16.mxu0 %v7960_v18  ;;  %v10026_v50 = vld [vmem:[#allocation11_spill] sm:$0xff] }
 0x1f4   :  { %v2207_v19 = vpop.f32.mrf.mxu1  ;;  %v2765_v47 = vpop.f32.mrf.mxu0 }
 0x1f5   :  { %10023 = vst [vmem:[#allocation4_spill] sm:$0xff] %v9412_v60  ;;  %v2302_v23 = vmax.f32 %v10024_v34, %v2207_v19  ;;  %v9415_v42 = vmax.f32 %v2298_v55, %v2765_v47  ;;  %v7963_v34 = vld [vmem:[%s9947_s0 + $0x710] sm:$0xff]  }
 0x1f6   :  { %v7310_v4 = vpop.f32.mrf.mxu1  ;;  %v7382_v37 = vpop.f32.mrf.mxu0  ;;  %v7964_v55 = vld [vmem:[%s9947_s0 + $0x7f0] sm:$0xff]  }
 0x1f7   :  { %10025 = vst [vmem:[#allocation5_spill] sm:$0xff] %v9415_v42  ;;  %v2305_v21 = vmax.f32 %v10026_v50, %v7310_v4  ;;  %v9424_v32 = vmax.f32 %v2301_v46, %v7382_v37  ;;  %v10029_v4 = vld [vmem:[#allocation13_spill] sm:$0xff] }
 0x1f8   :  { %v2210_v18 = vpop.f32.mrf.mxu1  ;;  %v2768_v36 = vpop.f32.mrf.mxu0 }
 0x1f9   :  { %10027 = vst [vmem:[#allocation6_spill] sm:$0xff] %v9424_v32  ;;  %v2303_v44 = vmax.f32 %v10028_v52, %v2210_v18  ;;  %v9433_v56 = vmax.f32 %v2299_v12, %v2768_v36  ;;  %v10030_v32 = vld [vmem:[#allocation14_spill] sm:$0xff]  ;;  %v7965_v12 = vld [vmem:[%s9947_s0 + $0x718] sm:$0xff]  }
 0x1fa   :  { %v7313_v61 = vpop.f32.mrf.mxu1  ;;  %v7385_v19 = vpop.f32.mrf.mxu0  ;;  %7592 = vmatmul.mubr.bf16.gmra.mxu1 %v7961_v24  ;;  %7664 = vmatmul.mubr.bf16.gmra.mxu0 %v7962_v45  ;;  %v7966_v24 = vld [vmem:[%s9947_s0 + $0x7f8] sm:$0xff]  }
 0x1fb   :  { %v2308_v46 = vmax.f32 %v10029_v4, %v7313_v61  ;;  %v9436_v47 = vmax.f32 %v2304_v17, %v7385_v19  ;;  %7595 = vmatprep.mubr.bf16.mxu1 %v7963_v34  ;;  %7667 = vmatprep.mubr.bf16.mxu0 %v7964_v55  ;;  %v10031_v17 = vld [vmem:[#allocation15_spill] sm:$0xff] }
 0x1fc   :  { %v2223_v37 = vpop.f32.mrf.mxu1  ;;  %v2781_v50 = vpop.f32.mrf.mxu0 }
 0x1fd   :  { %v2306_v42 = vmax.f32 %v10030_v32, %v2223_v37  ;;  %v9439_v60 = vmax.f32 %v2302_v23, %v2781_v50  ;;  %v7967_v32 = vld [vmem:[%s9947_s0 + $0x720] sm:$0xff]  }
 0x1fe   :  { %v7314_v28 = vpop.f32.mrf.mxu1  ;;  %v7386_v18 = vpop.f32.mrf.mxu0  ;;  %v7968_v23 = vld [vmem:[%s9947_s0 + $0x800] sm:$0xff]  }
 0x1ff   :  { %v2309_v45 = vmax.f32 %v10031_v17, %v7314_v28  ;;  %v9448_v34 = vmax.f32 %v2305_v21, %v7386_v18 }
 0x200   :  { %v2226_v55 = vpop.f32.mrf.mxu1  ;;  %v2784_v36 = vpop.f32.mrf.mxu0 }
 0x201   :  { %10032 = vst [vmem:[#allocation7_spill] sm:$0xff] %v9448_v34  ;;  %v2307_v52 = vmax.f32 %v9118_v63, %v2226_v55  ;;  %v9457_v61 = vmax.f32 %v2303_v44, %v2784_v36  ;;  %v7969_v44 = vld [vmem:[%s9947_s0 + $0x728] sm:$0xff]  }
 0x202   :  { %v7317_v19 = vpop.f32.mrf.mxu1  ;;  %v7389_v4 = vpop.f32.mrf.mxu0  ;;  %7596 = vmatmul.mubr.bf16.gmra.mxu1 %v7965_v12  ;;  %7668 = vmatmul.mubr.bf16.gmra.mxu0 %v7966_v24 }
 0x203   :  { %v2312_v28 = vmax.f32 %v9121_v3, %v7317_v19  ;;  %v9460_v21 = vmax.f32 %v2308_v46, %v7389_v4  ;;  %7599 = vmatprep.mubr.bf16.mxu1 %v7967_v32  ;;  %7671 = vmatprep.mubr.bf16.mxu0 %v7968_v23  ;;  %v7970_v3 = vld [vmem:[%s9947_s0 + $0x808] sm:$0xff]  }
 0x204   :  { %v2239_v37 = vpop.f32.mrf.mxu1  ;;  %v2797_v50 = vpop.f32.mrf.mxu0 }
 0x205   :  { %v2310_v18 = vmax.f32 %v9125_v2, %v2239_v37  ;;  %v9463_v17 = vmax.f32 %v2306_v42, %v2797_v50  ;;  %v7971_v2 = vld [vmem:[%s9947_s0 + $0x730] sm:$0xff]  }
 0x206   :  { %v7318_v34 = vpop.f32.mrf.mxu1  ;;  %v7390_v63 = vpop.f32.mrf.mxu0  ;;  %v7972_v42 = vld [vmem:[%s9947_s0 + $0x810] sm:$0xff]  }
 0x207   :  { %v2313_v46 = vmax.f32 %v9135_v40, %v7318_v34  ;;  %v9472_v12 = vmax.f32 %v2309_v45, %v7390_v63 }
 0x208   :  { %v2242_v24 = vpop.f32.mrf.mxu1  ;;  %v2800_v32 = vpop.f32.mrf.mxu0 }
 0x209   :  { %v2311_v23 = vmax.f32 %v9144_v10, %v2242_v24  ;;  %v9481_v55 = vmax.f32 %v2307_v52, %v2800_v32  ;;  %v7973_v52 = vld [vmem:[%s9947_s0 + $0x738] sm:$0xff]  }
 0x20a   :  { %v7393_v36 = vpop.f32.mrf.mxu0  ;;  %v7413_v19 = vpop.f32.mrf.mxu1  ;;  %7600 = vmatmul.mubr.bf16.gmra.mxu1 %v7969_v44  ;;  %7672 = vmatmul.mubr.bf16.gmra.mxu0 %v7970_v3 }
 0x20b   :  { %v9483_v40 = vmax.f32 %v2312_v28, %v7393_v36  ;;  %v3404_v45 = vmax.f32 %v9148_v30, %v7413_v19  ;;  %7603 = vmatprep.mubr.bf16.mxu1 %v7971_v2  ;;  %7675 = vmatprep.mubr.bf16.mxu0 %v7972_v42  ;;  %v7974_v28 = vld [vmem:[%s9947_s0 + $0x818] sm:$0xff]  }
 0x20c   :  { %v2813_v34 = vpop.f32.mrf.mxu0  ;;  %v3163_v4 = vpop.f32.mrf.mxu1 }
 0x20d   :  { %v9486_v37 = vmax.f32 %v2310_v18, %v2813_v34  ;;  %v3402_v50 = vmax.f32 %v9151_v54, %v3163_v4  ;;  %v7975_v18 = vld [vmem:[%s9947_s0 + $0x740] sm:$0xff]  }
 0x20e   :  { %v7394_v63 = vpop.f32.mrf.mxu0  ;;  %v7414_v10 = vpop.f32.mrf.mxu1  ;;  %v7976_v54 = vld [vmem:[%s9947_s0 + $0x820] sm:$0xff]  }
 0x20f   :  { %v9495_v44 = vmax.f32 %v2313_v46, %v7394_v63  ;;  %v3405_v30 = vmax.f32 %v9160_v13, %v7414_v10 }
 0x210   :  { %v2816_v3 = vpop.f32.mrf.mxu0  ;;  %v3166_v2 = vpop.f32.mrf.mxu1 }
 0x211   :  { %v9504_v42 = vmax.f32 %v2311_v23, %v2816_v3  ;;  %v3403_v24 = vmax.f32 %v9169_v20, %v3166_v2  ;;  %v7977_v20 = vld [vmem:[%s9947_s0 + $0x748] sm:$0xff]  }
 0x212   :  { %v7417_v32 = vpop.f32.mrf.mxu1  ;;  %v7489_v36 = vpop.f32.mrf.mxu0  ;;  %7604 = vmatmul.mubr.bf16.gmra.mxu1 %v7973_v52  ;;  %7676 = vmatmul.mubr.bf16.gmra.mxu0 %v7974_v28 }
 0x213   :  { %v3408_v13 = vmax.f32 %v9172_v51, %v7417_v32  ;;  %v9508_v46 = vmax.f32 %v3404_v45, %v7489_v36  ;;  %7607 = vmatprep.mubr.bf16.mxu1 %v7975_v18  ;;  %7679 = vmatprep.mubr.bf16.mxu0 %v7976_v54  ;;  %v7978_v51 = vld [vmem:[%s9947_s0 + $0x828] sm:$0xff]  }
 0x214   :  { %v3179_v19 = vpop.f32.mrf.mxu1  ;;  %v3737_v34 = vpop.f32.mrf.mxu0 }
 0x215   :  { %v3406_v4 = vmax.f32 %v9175_v33, %v3179_v19  ;;  %v9511_v63 = vmax.f32 %v3402_v50, %v3737_v34  ;;  %v7979_v33 = vld [vmem:[%s9947_s0 + $0x750] sm:$0xff]  }
 0x216   :  { %v7418_v23 = vpop.f32.mrf.mxu1  ;;  %v7490_v10 = vpop.f32.mrf.mxu0  ;;  %v7980_v50 = vld [vmem:[%s9947_s0 + $0x830] sm:$0xff]  }
 0x217   :  { %v3409_v45 = vmax.f32 %v9184_v58, %v7418_v23  ;;  %v9520_v52 = vmax.f32 %v3405_v30, %v7490_v10 }
 0x218   :  { %v3182_v28 = vpop.f32.mrf.mxu1  ;;  %v3740_v18 = vpop.f32.mrf.mxu0 }
 0x219   :  { %v3407_v54 = vmax.f32 %v9193_v6, %v3182_v28  ;;  %v9529_v3 = vmax.f32 %v3403_v24, %v3740_v18  ;;  %v7981_v24 = vld [vmem:[%s9947_s0 + $0x758] sm:$0xff]  }
 0x21a   :  { %v7421_v2 = vpop.f32.mrf.mxu1  ;;  %v7493_v32 = vpop.f32.mrf.mxu0  ;;  %7608 = vmatmul.mubr.bf16.gmra.mxu1 %v7977_v20  ;;  %7680 = vmatmul.mubr.bf16.gmra.mxu0 %v7978_v51 }
 0x21b   :  { %v3412_v58 = vmax.f32 %v9196_v41, %v7421_v2  ;;  %v9532_v30 = vmax.f32 %v3408_v13, %v7493_v32  ;;  %7611 = vmatprep.mubr.bf16.mxu1 %v7979_v33  ;;  %7683 = vmatprep.mubr.bf16.mxu0 %v7980_v50  ;;  %v7982_v41 = vld [vmem:[%s9947_s0 + $0x838] sm:$0xff]  }
 0x21c   :  { %v3195_v36 = vpop.f32.mrf.mxu1  ;;  %v3753_v19 = vpop.f32.mrf.mxu0 }
 0x21d   :  { %v3410_v34 = vmax.f32 %v9199_v38, %v3195_v36  ;;  %v9535_v23 = vmax.f32 %v3406_v4, %v3753_v19  ;;  %v7983_v38 = vld [vmem:[%s9947_s0 + $0x760] sm:$0xff]  }
 0x21e   :  { %v7422_v10 = vpop.f32.mrf.mxu1  ;;  %v7494_v6 = vpop.f32.mrf.mxu0  ;;  %v7984_v4 = vld [vmem:[%s9947_s0 + $0x840] sm:$0xff]  }
 0x21f   :  { %v3413_v13 = vmax.f32 %v9208_v43, %v7422_v10  ;;  %v9544_v20 = vmax.f32 %v3409_v45, %v7494_v6 }
 0x220   :  { %v3198_v51 = vpop.f32.mrf.mxu1  ;;  %v3756_v33 = vpop.f32.mrf.mxu0 }
 0x221   :  { %v3411_v50 = vmax.f32 %v9217_v16, %v3198_v51  ;;  %v9553_v28 = vmax.f32 %v3407_v54, %v3756_v33  ;;  %v7985_v54 = vld [vmem:[%s9947_s0 + $0x768] sm:$0xff]  }
 0x222   :  { %v7425_v18 = vpop.f32.mrf.mxu1  ;;  %v7497_v2 = vpop.f32.mrf.mxu0  ;;  %7612 = vmatmul.mubr.bf16.gmra.mxu1 %v7981_v24  ;;  %7684 = vmatmul.mubr.bf16.gmra.mxu0 %v7982_v41 }
 0x223   :  { %v3416_v43 = vmax.f32 %v9220_v0, %v7425_v18  ;;  %v9556_v45 = vmax.f32 %v3412_v58, %v7497_v2  ;;  %7615 = vmatprep.mubr.bf16.mxu1 %v7983_v38  ;;  %7687 = vmatprep.mubr.bf16.mxu0 %v7984_v4  ;;  %v7986_v0 = vld [vmem:[%s9947_s0 + $0x848] sm:$0xff]  }
 0x224   :  { %v3211_v32 = vpop.f32.mrf.mxu1  ;;  %v3769_v36 = vpop.f32.mrf.mxu0 }
 0x225   :  { %v3414_v19 = vmax.f32 %v9223_v53, %v3211_v32  ;;  %v9559_v10 = vmax.f32 %v3410_v34, %v3769_v36  ;;  %v7987_v53 = vld [vmem:[%s9947_s0 + $0x770] sm:$0xff]  }
 0x226   :  { %v7426_v6 = vpop.f32.mrf.mxu1  ;;  %v7498_v16 = vpop.f32.mrf.mxu0  ;;  %v7988_v34 = vld [vmem:[%s9947_s0 + $0x850] sm:$0xff]  }
 0x227   :  { %v3417_v58 = vmax.f32 %v9232_v1, %v7426_v6  ;;  %v9568_v24 = vmax.f32 %v3413_v13, %v7498_v16 }
 0x228   :  { %v3214_v41 = vpop.f32.mrf.mxu1  ;;  %v3772_v38 = vpop.f32.mrf.mxu0 }
 0x229   :  { %v3415_v4 = vmax.f32 %v9241_v48, %v3214_v41  ;;  %v9577_v51 = vmax.f32 %v3411_v50, %v3772_v38  ;;  %v7989_v50 = vld [vmem:[%s9947_s0 + $0x778] sm:$0xff]  }
 0x22a   :  { %v7429_v33 = vpop.f32.mrf.mxu1  ;;  %v7501_v18 = vpop.f32.mrf.mxu0  ;;  %7616 = vmatmul.mubr.bf16.gmra.mxu1 %v7985_v54  ;;  %7688 = vmatmul.mubr.bf16.gmra.mxu0 %v7986_v0 }
 0x22b   :  { %v3420_v1 = vmax.f32 %v9244_v62, %v7429_v33  ;;  %v9580_v13 = vmax.f32 %v3416_v43, %v7501_v18  ;;  %7619 = vmatprep.mubr.bf16.mxu1 %v7987_v53  ;;  %7691 = vmatprep.mubr.bf16.mxu0 %v7988_v34  ;;  %v7990_v62 = vld [vmem:[%s9947_s0 + $0x858] sm:$0xff]  }
 0x22c   :  { %v3227_v2 = vpop.f32.mrf.mxu1  ;;  %v3785_v32 = vpop.f32.mrf.mxu0 }
 0x22d   :  { %v3418_v36 = vmax.f32 %v9247_v9, %v3227_v2  ;;  %v9583_v6 = vmax.f32 %v3414_v19, %v3785_v32  ;;  %v7991_v9 = vld [vmem:[%s9947_s0 + $0x860] sm:$0xff]  }
 0x22e   :  { %v7430_v16 = vpop.f32.mrf.mxu1  ;;  %v7502_v48 = vpop.f32.mrf.mxu0 }
 0x22f   :  { %v3421_v43 = vmax.f32 %v9256_v14, %v7430_v16  ;;  %v9592_v54 = vmax.f32 %v3417_v58, %v7502_v48 }
 0x230   :  { %v3230_v19 = vpop.f32.mrf.mxu1  ;;  %v3788_v0 = vpop.f32.mrf.mxu0 }
 0x231   :  { %v3419_v53 = vmax.f32 %v9265_v8, %v3230_v19  ;;  %v9598_v34 = vmax.f32 %v3415_v4, %v3788_v0  ;;  %v7992_v8 = vld [vmem:[%s9947_s0 + $0x868] sm:$0xff]  }
 0x232   :  { %v7433_v41 = vpop.f32.mrf.mxu1  ;;  %v7505_v38 = vpop.f32.mrf.mxu0  ;;  %7620 = vmatmul.mubr.bf16.gmra.mxu1 %v7989_v50  ;;  %7692 = vmatmul.mubr.bf16.gmra.mxu0 %v7990_v62 }
 0x233   :  { %v3424_v33 = vmax.f32 %v9268_v22, %v7433_v41  ;;  %v9601_v18 = vmax.f32 %v3420_v1, %v7505_v38  ;;  %7695 = vmatprep.mubr.bf16.mxu0 %v7991_v9 }
 0x234   :  { %v3243_v14 = vpop.f32.mrf.mxu1  ;;  %v3801_v58 = vpop.f32.mrf.mxu0 }
 0x235   :  { %v3422_v2 = vmax.f32 %v9271_v15, %v3243_v14  ;;  %v9604_v32 = vmax.f32 %v3418_v36, %v3801_v58 }
 0x236   :  { %v7434_v16 = vpop.f32.mrf.mxu1  ;;  %v7506_v48 = vpop.f32.mrf.mxu0 }
 0x237   :  { %v3425_v4 = vmax.f32 %v9280_v26, %v7434_v16  ;;  %v9610_v50 = vmax.f32 %v3421_v43, %v7506_v48 }
 0x238   :  { %v3246_v22 = vpop.f32.mrf.mxu1  ;;  %v3804_v1 = vpop.f32.mrf.mxu0 }
 0x239   :  { %v3423_v62 = vmax.f32 %v9289_v59, %v3246_v22  ;;  %v9613_v9 = vmax.f32 %v3419_v53, %v3804_v1 }
 0x23a   :  { %v7437_v19 = vpop.f32.mrf.mxu1  ;;  %v7509_v15 = vpop.f32.mrf.mxu0  ;;  %7696 = vmatmul.mubr.bf16.gmra.mxu0 %v7992_v8 }
 0x23b   :  { %v3428_v36 = vmax.f32 %v9292_v35, %v7437_v19  ;;  %v9616_v0 = vmax.f32 %v3424_v33, %v7509_v15 }
 0x23c   :  { %v3259_v41 = vpop.f32.mrf.mxu1  ;;  %v3817_v38 = vpop.f32.mrf.mxu0 }
 0x23d   :  { %v3426_v14 = vmax.f32 %v9295_v31, %v3259_v41  ;;  %v9619_v26 = vmax.f32 %v3422_v2, %v3817_v38 }
 0x23e   :  { %v7438_v43 = vpop.f32.mrf.mxu1  ;;  %v7510_v58 = vpop.f32.mrf.mxu0 }
 0x23f   :  { %v3429_v16 = vmax.f32 %v9304_v39, %v7438_v43  ;;  %v9622_v59 = vmax.f32 %v3425_v4, %v7510_v58 }
 0x240   :  { %v3262_v53 = vpop.f32.mrf.mxu1  ;;  %v3820_v48 = vpop.f32.mrf.mxu0 }
 0x241   :  { %v3427_v8 = vmax.f32 %v9313_v57, %v3262_v53  ;;  %v9625_v22 = vmax.f32 %v3423_v62, %v3820_v48 }
 0x242   :  { %v7441_v35 = vpop.f32.mrf.mxu1  ;;  %v7513_v33 = vpop.f32.mrf.mxu0 }
 0x243   :  { %v3432_v1 = vmax.f32 %v9316_v27, %v7441_v35  ;;  %v9628_v19 = vmax.f32 %v3428_v36, %v7513_v33 }
 0x244   :  { %v3275_v31 = vpop.f32.mrf.mxu1  ;;  %v3833_v2 = vpop.f32.mrf.mxu0 }
 0x245   :  { %v3430_v15 = vmax.f32 %v9319_v29, %v3275_v31  ;;  %v9631_v41 = vmax.f32 %v3426_v14, %v3833_v2 }
 0x246   :  { %v7442_v39 = vpop.f32.mrf.mxu1  ;;  %v7514_v4 = vpop.f32.mrf.mxu0 }
 0x247   :  { %v3433_v38 = vmax.f32 %v9328_v5, %v7442_v39  ;;  %v9634_v43 = vmax.f32 %v3429_v16, %v7514_v4  ;;  %v10036_v4 = vld [vmem:[#allocation16_spill] sm:$0xff] }
 0x248   :  { %v3278_v57 = vpop.f32.mrf.mxu1  ;;  %v3836_v62 = vpop.f32.mrf.mxu0 }
 0x249   :  { %v3431_v58 = vmax.f32 %v9337_v49, %v3278_v57  ;;  %v9637_v53 = vmax.f32 %v3427_v8, %v3836_v62 }
 0x24a   :  { %v7445_v27 = vpop.f32.mrf.mxu1  ;;  %v7517_v36 = vpop.f32.mrf.mxu0 }
 0x24b   :  { %v3436_v48 = vmax.f32 %v9340_v25, %v7445_v27  ;;  %v9640_v35 = vmax.f32 %v3432_v1, %v7517_v36  ;;  %v10038_v27 = vld [vmem:[#allocation17_spill] sm:$0xff] }
 0x24c   :  { %v3291_v29 = vpop.f32.mrf.mxu1  ;;  %v3849_v14 = vpop.f32.mrf.mxu0 }
 0x24d   :  { %10033 = vst [vmem:[#allocation8_spill] sm:$0xff] %v9640_v35  ;;  %v3434_v33 = vmax.f32 %v9343_v7, %v3291_v29  ;;  %v9643_v31 = vmax.f32 %v3430_v15, %v3849_v14  ;;  %v10040_v29 = vld [vmem:[#allocation18_spill] sm:$0xff] }
 0x24e   :  { %v7446_v5 = vpop.f32.mrf.mxu1  ;;  %v7518_v16 = vpop.f32.mrf.mxu0 }
 0x24f   :  { %10034 = vst [vmem:[#allocation9_spill] sm:$0xff] %v9643_v31  ;;  %v3437_v2 = vmax.f32 %v9352_v11, %v7446_v5  ;;  %v9646_v39 = vmax.f32 %v3433_v38, %v7518_v16  ;;  %v10042_v5 = vld [vmem:[#allocation19_spill] sm:$0xff] }
 0x250   :  { %v3294_v49 = vpop.f32.mrf.mxu1  ;;  %v3852_v8 = vpop.f32.mrf.mxu0 }
 0x251   :  { %10035 = vst [vmem:[#allocation10_spill] sm:$0xff] %v9646_v39  ;;  %v3435_v57 = vmax.f32 %v10036_v4, %v3294_v49  ;;  %v9649_v62 = vmax.f32 %v3431_v58, %v3852_v8  ;;  %v10044_v8 = vld [vmem:[#allocation20_spill] sm:$0xff] }
 0x252   :  { %v7449_v25 = vpop.f32.mrf.mxu1  ;;  %v7521_v1 = vpop.f32.mrf.mxu0 }
 0x253   :  { %10037 = vst [vmem:[#allocation11_spill] sm:$0xff] %v9649_v62  ;;  %v3440_v36 = vmax.f32 %v10038_v27, %v7449_v25  ;;  %v9652_v35 = vmax.f32 %v3436_v48, %v7521_v1  ;;  %v10046_v1 = vld [vmem:[#allocation21_spill] sm:$0xff] }
 0x254   :  { %v3307_v7 = vpop.f32.mrf.mxu1  ;;  %v3865_v15 = vpop.f32.mrf.mxu0 }
 0x255   :  { %10039 = vst [vmem:[#allocation12_spill] sm:$0xff] %v9652_v35  ;;  %v3438_v14 = vmax.f32 %v10040_v29, %v3307_v7  ;;  %v9655_v31 = vmax.f32 %v3434_v33, %v3865_v15  ;;  %v10048_v15 = vld [vmem:[#allocation22_spill] sm:$0xff] }
 0x256   :  { %v7450_v11 = vpop.f32.mrf.mxu1  ;;  %v7522_v38 = vpop.f32.mrf.mxu0 }
 0x257   :  { %10041 = vst [vmem:[#allocation13_spill] sm:$0xff] %v9655_v31  ;;  %v3441_v16 = vmax.f32 %v10042_v5, %v7450_v11  ;;  %v9658_v39 = vmax.f32 %v3437_v2, %v7522_v38  ;;  %v10050_v38 = vld [vmem:[#allocation2_spill] sm:$0xff] }
 0x258   :  { %v3310_v58 = vpop.f32.mrf.mxu1  ;;  %v3868_v49 = vpop.f32.mrf.mxu0 }
 0x259   :  { %10043 = vst [vmem:[#allocation14_spill] sm:$0xff] %v9658_v39  ;;  %v3439_v4 = vmax.f32 %v10044_v8, %v3310_v58  ;;  %v9661_v62 = vmax.f32 %v3435_v57, %v3868_v49  ;;  %v10052_v49 = vld [vmem:[#allocation3_spill] sm:$0xff] }
 0x25a   :  { %v7453_v48 = vpop.f32.mrf.mxu1  ;;  %v7525_v25 = vpop.f32.mrf.mxu0 }
 0x25b   :  { %10045 = vst [vmem:[#allocation15_spill] sm:$0xff] %v9661_v62  ;;  %v3444_v27 = vmax.f32 %v10046_v1, %v7453_v48  ;;  %v9664_v35 = vmax.f32 %v3440_v36, %v7525_v25  ;;  %v10053_v25 = vld [vmem:[#allocation4_spill] sm:$0xff] }
 0x25c   :  { %v3323_v33 = vpop.f32.mrf.mxu1  ;;  %v3881_v7 = vpop.f32.mrf.mxu0 }
 0x25d   :  { %10047 = vst [vmem:[#allocation16_spill] sm:$0xff] %v9664_v35  ;;  %v3442_v29 = vmax.f32 %v10048_v15, %v3323_v33  ;;  %v9667_v31 = vmax.f32 %v3438_v14, %v3881_v7  ;;  %v10054_v7 = vld [vmem:[#allocation5_spill] sm:$0xff] }
 0x25e   :  { %v7454_v2 = vpop.f32.mrf.mxu1  ;;  %v7526_v11 = vpop.f32.mrf.mxu0 }
 0x25f   :  { %10049 = vst [vmem:[#allocation17_spill] sm:$0xff] %v9667_v31  ;;  %v3445_v5 = vmax.f32 %v10050_v38, %v7454_v2  ;;  %v9670_v39 = vmax.f32 %v3441_v16, %v7526_v11  ;;  %v10055_v11 = vld [vmem:[#allocation6_spill] sm:$0xff] }
 0x260   :  { %v3326_v57 = vpop.f32.mrf.mxu1  ;;  %v3884_v58 = vpop.f32.mrf.mxu0 }
 0x261   :  { %10051 = vst [vmem:[#allocation18_spill] sm:$0xff] %v9670_v39  ;;  %v3443_v8 = vmax.f32 %v10052_v49, %v3326_v57  ;;  %v9673_v62 = vmax.f32 %v3439_v4, %v3884_v58 }
 0x262   :  { %v7457_v36 = vpop.f32.mrf.mxu1  ;;  %v7529_v48 = vpop.f32.mrf.mxu0 }
 0x263   :  { %v3448_v1 = vmax.f32 %v10053_v25, %v7457_v36  ;;  %v9676_v35 = vmax.f32 %v3444_v27, %v7529_v48 }
 0x264   :  { %v3339_v14 = vpop.f32.mrf.mxu1  ;;  %v3897_v33 = vpop.f32.mrf.mxu0 }
 0x265   :  { %v3446_v15 = vmax.f32 %v10054_v7, %v3339_v14  ;;  %v9679_v31 = vmax.f32 %v3442_v29, %v3897_v33 }
 0x266   :  { %v7458_v16 = vpop.f32.mrf.mxu1  ;;  %v7530_v2 = vpop.f32.mrf.mxu0 }
 0x267   :  { %v3449_v38 = vmax.f32 %v10055_v11, %v7458_v16  ;;  %v9682_v39 = vmax.f32 %v3445_v5, %v7530_v2  ;;  %v10057_v2 = vld [vmem:[#allocation7_spill] sm:$0xff] }
 0x268   :  { %v3342_v4 = vpop.f32.mrf.mxu1  ;;  %v3900_v57 = vpop.f32.mrf.mxu0 }
 0x269   :  { %10056 = vst [vmem:[#allocation19_spill] sm:$0xff] %v9682_v39  ;;  %v3447_v58 = vmax.f32 %v9433_v56, %v3342_v4  ;;  %v9685_v49 = vmax.f32 %v3443_v8, %v3900_v57 }
 0x26a   :  { %v7461_v27 = vpop.f32.mrf.mxu1  ;;  %v7533_v36 = vpop.f32.mrf.mxu0 }
 0x26b   :  { %v3452_v48 = vmax.f32 %v9436_v47, %v7461_v27  ;;  %v9688_v25 = vmax.f32 %v3448_v1, %v7533_v36 }
 0x26c   :  { %v3355_v29 = vpop.f32.mrf.mxu1  ;;  %v3913_v14 = vpop.f32.mrf.mxu0 }
 0x26d   :  { %v3450_v33 = vmax.f32 %v9439_v60, %v3355_v29  ;;  %v9691_v7 = vmax.f32 %v3446_v15, %v3913_v14 }
 0x26e   :  { %v7462_v5 = vpop.f32.mrf.mxu1  ;;  %v7534_v16 = vpop.f32.mrf.mxu0 }
 0x26f   :  { %v3453_v11 = vmax.f32 %v10057_v2, %v7462_v5  ;;  %v9694_v39 = vmax.f32 %v3449_v38, %v7534_v16 }
 0x270   :  { %v3358_v56 = vpop.f32.mrf.mxu1  ;;  %v3916_v8 = vpop.f32.mrf.mxu0 }
 0x271   :  { %v3451_v4 = vmax.f32 %v9457_v61, %v3358_v56  ;;  %v9697_v57 = vmax.f32 %v3447_v58, %v3916_v8 }
 0x272   :  { %v7465_v47 = vpop.f32.mrf.mxu1  ;;  %v7537_v1 = vpop.f32.mrf.mxu0 }
 0x273   :  { %v3456_v27 = vmax.f32 %v9460_v21, %v7465_v47  ;;  %v9700_v36 = vmax.f32 %v3452_v48, %v7537_v1 }
 0x274   :  { %v3371_v60 = vpop.f32.mrf.mxu1  ;;  %v3929_v15 = vpop.f32.mrf.mxu0 }
 0x275   :  { %v3454_v29 = vmax.f32 %v9463_v17, %v3371_v60  ;;  %v9703_v14 = vmax.f32 %v3450_v33, %v3929_v15 }
 0x276   :  { %v7466_v38 = vpop.f32.mrf.mxu1  ;;  %v7538_v5 = vpop.f32.mrf.mxu0 }
 0x277   :  { %v3457_v16 = vmax.f32 %v9472_v12, %v7466_v38  ;;  %v9706_v2 = vmax.f32 %v3453_v11, %v7538_v5 }
 0x278   :  { %v3374_v61 = vpop.f32.mrf.mxu1  ;;  %v3932_v58 = vpop.f32.mrf.mxu0 }
 0x279   :  { %v3455_v56 = vmax.f32 %v9481_v55, %v3374_v61  ;;  %v9709_v8 = vmax.f32 %v3451_v4, %v3932_v58 }
 0x27a   :  { %v7469_v21 = vpop.f32.mrf.mxu1  ;;  %v7541_v48 = vpop.f32.mrf.mxu0 }
 0x27b   :  { %v3460_v47 = vmax.f32 %v9483_v40, %v7469_v21  ;;  %v9712_v1 = vmax.f32 %v3456_v27, %v7541_v48 }
 0x27c   :  { %v3387_v17 = vpop.f32.mrf.mxu1  ;;  %v3945_v33 = vpop.f32.mrf.mxu0 }
 0x27d   :  { %v3458_v60 = vmax.f32 %v9486_v37, %v3387_v17  ;;  %v9715_v15 = vmax.f32 %v3454_v29, %v3945_v33 }
 0x27e   :  { %v7470_v12 = vpop.f32.mrf.mxu1  ;;  %v7542_v11 = vpop.f32.mrf.mxu0 }
 0x27f   :  { %10058 = vst [vmem:[#allocation20_spill] sm:$0xff] %v9715_v15  ;;  %v3461_v38 = vmax.f32 %v9495_v44, %v7470_v12  ;;  %v9718_v5 = vmax.f32 %v3457_v16, %v7542_v11 }
 0x280   :  { %v3390_v55 = vpop.f32.mrf.mxu1  ;;  %v3948_v4 = vpop.f32.mrf.mxu0 }
 0x281   :  { %v3459_v61 = vmax.f32 %v9504_v42, %v3390_v55  ;;  %v9721_v58 = vmax.f32 %v3455_v56, %v3948_v4 }
 0x282   :  { %v7545_v40 = vpop.f32.mrf.mxu0  ;;  %v7565_v27 = vpop.f32.mrf.mxu1 }
 0x283   :  { %10059 = vst [vmem:[#allocation21_spill] sm:$0xff] %v9721_v58  ;;  %v9723_v21 = vmax.f32 %v3460_v47, %v7545_v40  ;;  %v4552_v12 = vmax.f32 %v9508_v46, %v7565_v27 }
 0x284   :  { %v3961_v48 = vpop.f32.mrf.mxu0  ;;  %v4311_v37 = vpop.f32.mrf.mxu1 }
 0x285   :  { %10060 = vst [vmem:[#allocation22_spill] sm:$0xff] %v9723_v21  ;;  %v9725_v29 = vmax.f32 %v3458_v60, %v3961_v48  ;;  %v4550_v55 = vmax.f32 %v9511_v63, %v4311_v37  ;;  %v9736_v60 = vld [vmem:[%s9948_s2] ss:$0 sm:$0xff] }
 0x286   :  { %v7546_v17 = vpop.f32.mrf.mxu0  ;;  %v7566_v33 = vpop.f32.mrf.mxu1 }
 0x287   :  { %10061 = vst [vmem:[#allocation2_spill] sm:$0xff] %v9725_v29  ;;  %v9727_v15 = vmax.f32 %v3461_v38, %v7546_v17  ;;  %v4553_v38 = vmax.f32 %v9520_v52, %v7566_v33 }
 0x288   :  { %v3964_v44 = vpop.f32.mrf.mxu0  ;;  %v4314_v16 = vpop.f32.mrf.mxu1 }
 0x289   :  { %10062 = vst [vmem:[#allocation3_spill] sm:$0xff] %v9727_v15  ;;  %v9730_v11 = vmax.f32 %v3459_v61, %v3964_v44  ;;  %v4551_v46 = vmax.f32 %v9529_v3, %v4314_v16 }
 0x28a   :  { %v7569_v42 = vpop.f32.mrf.mxu1  ;;  %v7641_v56 = vpop.f32.mrf.mxu0 }
 0x28b   :  { %10063 = vst [vmem:[#allocation4_spill] sm:$0xff] %v9730_v11  ;;  %v5126_v47 = vmax.f32 %v4552_v12, %v7641_v56  ;;  %v4556_v37 = vmax.f32 %v9532_v30, %v7569_v42 }
 0x28c   :  { %v4327_v4 = vpop.f32.mrf.mxu1  ;;  %v4885_v40 = vpop.f32.mrf.mxu0 }
 0x28d   :  { %v5124_v48 = vmax.f32 %v4550_v55, %v4885_v40  ;;  %v5193_v61 = vadd.f32 %v9736_v60, %v5126_v47  ;;  %v4554_v3 = vmax.f32 %v9535_v23, %v4327_v4 }
 0x28e   :  { %v7570_v17 = vpop.f32.mrf.mxu1  ;;  %v7642_v15 = vpop.f32.mrf.mxu0 }
 0x28f   :  { %v5127_v27 = vmax.f32 %v4553_v38, %v7642_v15  ;;  %v5191_v12 = vadd.f32 %v9736_v60, %v5124_v48  ;;  %v5253_v52 = vmax.f32 %v5193_v61, 0.0  ;;  %v4557_v38 = vmax.f32 %v9544_v20, %v7570_v17 }
 0x290   :  { %v4330_v44 = vpop.f32.mrf.mxu1  ;;  %v4888_v63 = vpop.f32.mrf.mxu0 }
 0x291   :  { %v5194_v56 = vadd.f32 %v9736_v60, %v5127_v27  ;;  %v5125_v11 = vmax.f32 %v4551_v46, %v4888_v63  ;;  %v5251_v47 = vmax.f32 %v5191_v12, 0.0  ;;  %v4555_v46 = vmax.f32 %v9553_v28, %v4330_v44 }
 0x292   :  { %v7573_v29 = vpop.f32.mrf.mxu1  ;;  %v7645_v21 = vpop.f32.mrf.mxu0 }
 0x293   :  { %v5254_v33 = vmax.f32 %v5194_v56, 0.0  ;;  %v5192_v55 = vadd.f32 %v9736_v60, %v5125_v11  ;;  %v5130_v40 = vmax.f32 %v4556_v37, %v7645_v21  ;;  %v4560_v20 = vmax.f32 %v9556_v45, %v7573_v29 }
 0x294   :  { %v4343_v16 = vpop.f32.mrf.mxu1  ;;  %v4901_v15 = vpop.f32.mrf.mxu0 }
 0x295   :  { %v6502_v30 = vpack.c.bf16 %v5254_v33, %v5253_v52  ;;  %v5252_v42 = vmax.f32 %v5192_v55, 0.0  ;;  %v5128_v48 = vmax.f32 %v4554_v3, %v4901_v15  ;;  %v5197_v21 = vadd.f32 %v9736_v60, %v5130_v40 }
 0x296   :  { %v7574_v58 = vpop.f32.mrf.mxu1  ;;  %v7646_v27 = vpop.f32.mrf.mxu0  ;;  %v4558_v55 = vmax.f32 %v9559_v10, %v4343_v16 }
 0x297   :  { %6644 = vst [vmem:[%s9949_s3 + $0x8] sm:$0xff] %v6502_v30   ;;  %v6497_v11 = vpack.c.bf16 %v5252_v42, %v5251_v47  ;;  %v5131_v23 = vmax.f32 %v4557_v38, %v7646_v27  ;;  %v5195_v17 = vadd.f32 %v9736_v60, %v5128_v48  ;;  %v5257_v28 = vmax.f32 %v5197_v21, 0.0 }
 0x298   :  { %v4346_v4 = vpop.f32.mrf.mxu1  ;;  %v4904_v61 = vpop.f32.mrf.mxu0  ;;  %v4561_v47 = vmax.f32 %v9568_v24, %v7574_v58 }
 0x299   :  { %6498 = vst [vmem:[%s9949_s3] sm:$0xff] %v6497_v11   ;;  %v5198_v63 = vadd.f32 %v9736_v60, %v5131_v23  ;;  %v5129_v37 = vmax.f32 %v4555_v46, %v4904_v61  ;;  %v5255_v15 = vmax.f32 %v5195_v17, 0.0  ;;  %v4559_v48 = vmax.f32 %v9577_v51, %v4346_v4 }
 0x29a   :  { %v7577_v12 = vpop.f32.mrf.mxu1  ;;  %v7649_v56 = vpop.f32.mrf.mxu0 }
 0x29b   :  { %v5258_v44 = vmax.f32 %v5198_v63, 0.0  ;;  %v5196_v52 = vadd.f32 %v9736_v60, %v5129_v37  ;;  %v5134_v33 = vmax.f32 %v4560_v20, %v7649_v56  ;;  %v4564_v24 = vmax.f32 %v9580_v13, %v7577_v12 }
 0x29c   :  { %v4359_v40 = vpop.f32.mrf.mxu1  ;;  %v4917_v3 = vpop.f32.mrf.mxu0 }
 0x29d   :  { %v6512_v45 = vpack.c.bf16 %v5258_v44, %v5257_v28  ;;  %v5256_v29 = vmax.f32 %v5196_v52, 0.0  ;;  %v5132_v38 = vmax.f32 %v4558_v55, %v4917_v3  ;;  %v5201_v46 = vadd.f32 %v9736_v60, %v5134_v33 }
 0x29e   :  { %v7578_v30 = vpop.f32.mrf.mxu1  ;;  %v7650_v42 = vpop.f32.mrf.mxu0  ;;  %v4562_v37 = vmax.f32 %v9583_v6, %v4359_v40 }
 0x29f   :  { %6646 = vst [vmem:[%s9949_s3 + $0x18] sm:$0xff] %v6512_v45   ;;  %v6507_v27 = vpack.c.bf16 %v5256_v29, %v5255_v15  ;;  %v5135_v10 = vmax.f32 %v4561_v47, %v7650_v42  ;;  %v5199_v58 = vadd.f32 %v9736_v60, %v5132_v38  ;;  %v5261_v51 = vmax.f32 %v5201_v46, 0.0 }
 0x2a0   :  { %v4362_v16 = vpop.f32.mrf.mxu1  ;;  %v4920_v11 = vpop.f32.mrf.mxu0  ;;  %v4565_v52 = vmax.f32 %v9592_v54, %v7578_v30 }
 0x2a1   :  { %6645 = vst [vmem:[%s9949_s3 + $0x10] sm:$0xff] %v6507_v27   ;;  %v5202_v21 = vadd.f32 %v9736_v60, %v5135_v10  ;;  %v5133_v23 = vmax.f32 %v4559_v48, %v4920_v11  ;;  %v5259_v44 = vmax.f32 %v5199_v58, 0.0  ;;  %v4563_v15 = vmax.f32 %v9598_v34, %v4362_v16 }
 0x2a2   :  { %v7581_v61 = vpop.f32.mrf.mxu1  ;;  %v7653_v20 = vpop.f32.mrf.mxu0 }
 0x2a3   :  { %v5262_v4 = vmax.f32 %v5202_v21, 0.0  ;;  %v5200_v17 = vadd.f32 %v9736_v60, %v5133_v23  ;;  %v5138_v63 = vmax.f32 %v4564_v24, %v7653_v20  ;;  %v4568_v54 = vmax.f32 %v9601_v18, %v7581_v61 }
 0x2a4   :  { %v4375_v56 = vpop.f32.mrf.mxu1  ;;  %v4933_v28 = vpop.f32.mrf.mxu0 }
 0x2a5   :  { %v6522_v13 = vpack.c.bf16 %v5262_v4, %v5261_v51  ;;  %v5260_v12 = vmax.f32 %v5200_v17, 0.0  ;;  %v5136_v33 = vmax.f32 %v4562_v37, %v4933_v28  ;;  %v5205_v45 = vadd.f32 %v9736_v60, %v5138_v63 }
 0x2a6   :  { %v7582_v55 = vpop.f32.mrf.mxu1  ;;  %v7654_v3 = vpop.f32.mrf.mxu0  ;;  %v4566_v11 = vmax.f32 %v9604_v32, %v4375_v56 }
 0x2a7   :  { %6648 = vst [vmem:[%s9949_s3 + $0x28] sm:$0xff] %v6522_v13   ;;  %v6517_v47 = vpack.c.bf16 %v5260_v12, %v5259_v44  ;;  %v5139_v6 = vmax.f32 %v4565_v52, %v7654_v3  ;;  %v5203_v38 = vadd.f32 %v9736_v60, %v5136_v33  ;;  %v5265_v34 = vmax.f32 %v5205_v45, 0.0 }
 0x2a8   :  { %v4378_v40 = vpop.f32.mrf.mxu1  ;;  %v4936_v29 = vpop.f32.mrf.mxu0  ;;  %v4569_v23 = vmax.f32 %v9610_v50, %v7582_v55 }
 0x2a9   :  { %6647 = vst [vmem:[%s9949_s3 + $0x20] sm:$0xff] %v6517_v47   ;;  %v5206_v30 = vadd.f32 %v9736_v60, %v5139_v6  ;;  %v5137_v42 = vmax.f32 %v4563_v15, %v4936_v29  ;;  %v5263_v21 = vmax.f32 %v5203_v38, 0.0  ;;  %v4567_v17 = vmax.f32 %v9613_v9, %v4378_v40 }
 0x2aa   :  { %v7585_v48 = vpop.f32.mrf.mxu1  ;;  %v7657_v27 = vpop.f32.mrf.mxu0 }
 0x2ab   :  { %v5266_v46 = vmax.f32 %v5206_v30, 0.0  ;;  %v5204_v10 = vadd.f32 %v9736_v60, %v5137_v42  ;;  %v5142_v16 = vmax.f32 %v4568_v54, %v7657_v27  ;;  %v4572_v50 = vmax.f32 %v9616_v0, %v7585_v48 }
 0x2ac   :  { %v4391_v24 = vpop.f32.mrf.mxu1  ;;  %v4949_v58 = vpop.f32.mrf.mxu0 }
 0x2ad   :  { %v6532_v18 = vpack.c.bf16 %v5266_v46, %v5265_v34  ;;  %v5264_v61 = vmax.f32 %v5204_v10, 0.0  ;;  %v5140_v20 = vmax.f32 %v4566_v11, %v4949_v58  ;;  %v5209_v37 = vadd.f32 %v9736_v60, %v5142_v16 }
 0x2ae   :  { %v7586_v51 = vpop.f32.mrf.mxu1  ;;  %v7658_v4 = vpop.f32.mrf.mxu0  ;;  %v4570_v47 = vmax.f32 %v9619_v26, %v4391_v24 }
 0x2af   :  { %6650 = vst [vmem:[%s9949_s3 + $0x38] sm:$0xff] %v6532_v18   ;;  %v6527_v63 = vpack.c.bf16 %v5264_v61, %v5263_v21  ;;  %v5143_v32 = vmax.f32 %v4569_v23, %v7658_v4  ;;  %v5207_v44 = vadd.f32 %v9736_v60, %v5140_v20  ;;  %v5269_v9 = vmax.f32 %v5209_v37, 0.0 }
 0x2b0   :  { %v4394_v56 = vpop.f32.mrf.mxu1  ;;  %v4952_v28 = vpop.f32.mrf.mxu0  ;;  %v4573_v29 = vmax.f32 %v9622_v59, %v7586_v51 }
 0x2b1   :  { %6649 = vst [vmem:[%s9949_s3 + $0x30] sm:$0xff] %v6527_v63   ;;  %v5210_v52 = vadd.f32 %v9736_v60, %v5143_v32  ;;  %v5141_v13 = vmax.f32 %v4567_v17, %v4952_v28  ;;  %v5267_v40 = vmax.f32 %v5207_v44, 0.0  ;;  %v4571_v48 = vmax.f32 %v9625_v22, %v4394_v56 }
 0x2b2   :  { %v7589_v12 = vpop.f32.mrf.mxu1  ;;  %v7661_v33 = vpop.f32.mrf.mxu0 }
 0x2b3   :  { %v5270_v55 = vmax.f32 %v5210_v52, 0.0  ;;  %v5208_v3 = vadd.f32 %v9736_v60, %v5141_v13  ;;  %v5146_v15 = vmax.f32 %v4572_v50, %v7661_v33  ;;  %v4576_v59 = vmax.f32 %v9628_v19, %v7589_v12 }
 0x2b4   :  { %v4407_v45 = vpop.f32.mrf.mxu1  ;;  %v4965_v6 = vpop.f32.mrf.mxu0 }
 0x2b5   :  { %v6542_v0 = vpack.c.bf16 %v5270_v55, %v5269_v9  ;;  %v5268_v54 = vmax.f32 %v5208_v3, 0.0  ;;  %v5144_v38 = vmax.f32 %v4570_v47, %v4965_v6  ;;  %v5213_v34 = vadd.f32 %v9736_v60, %v5146_v15 }
 0x2b6   :  { %v7590_v30 = vpop.f32.mrf.mxu1  ;;  %v7662_v42 = vpop.f32.mrf.mxu0  ;;  %v4574_v20 = vmax.f32 %v9631_v41, %v4407_v45 }
 0x2b7   :  { %6652 = vst [vmem:[%s9949_s3 + $0x48] sm:$0xff] %v6542_v0   ;;  %v6537_v27 = vpack.c.bf16 %v5268_v54, %v5267_v40  ;;  %v5147_v26 = vmax.f32 %v4573_v29, %v7662_v42  ;;  %v5211_v16 = vadd.f32 %v9736_v60, %v5144_v38  ;;  %v5273_v22 = vmax.f32 %v5213_v34, 0.0  ;;  %v10065_v29 = vld [vmem:[#allocation9_spill] sm:$0xff]  ;;  %v10066_v42 = vld [vmem:[#allocation10_spill] sm:$0xff] }
 0x2b8   :  { %v4410_v46 = vpop.f32.mrf.mxu1  ;;  %v4968_v10 = vpop.f32.mrf.mxu0  ;;  %v4577_v63 = vmax.f32 %v9634_v43, %v7590_v30  ;;  %v10064_v43 = vld [vmem:[#allocation8_spill] sm:$0xff] }
 0x2b9   :  { %6651 = vst [vmem:[%s9949_s3 + $0x40] sm:$0xff] %v6537_v27   ;;  %v5214_v11 = vadd.f32 %v9736_v60, %v5147_v26  ;;  %v5145_v24 = vmax.f32 %v4571_v48, %v4968_v10  ;;  %v5271_v17 = vmax.f32 %v5211_v16, 0.0  ;;  %v4575_v50 = vmax.f32 %v9637_v53, %v4410_v46 }
 0x2ba   :  { %v7593_v58 = vpop.f32.mrf.mxu1  ;;  %v7665_v21 = vpop.f32.mrf.mxu0 }
 0x2bb   :  { %v5274_v23 = vmax.f32 %v5214_v11, 0.0  ;;  %v5212_v18 = vadd.f32 %v9736_v60, %v5145_v24  ;;  %v5150_v61 = vmax.f32 %v4576_v59, %v7665_v21  ;;  %v4580_v33 = vmax.f32 %v10064_v43, %v7593_v58  ;;  %v10067_v59 = vld [vmem:[#allocation11_spill] sm:$0xff] }
 0x2bc   :  { %v4423_v51 = vpop.f32.mrf.mxu1  ;;  %v4981_v4 = vpop.f32.mrf.mxu0 }
 0x2bd   :  { %v6552_v19 = vpack.c.bf16 %v5274_v23, %v5273_v22  ;;  %v5272_v37 = vmax.f32 %v5212_v18, 0.0  ;;  %v5148_v32 = vmax.f32 %v4574_v20, %v4981_v4  ;;  %v5217_v52 = vadd.f32 %v9736_v60, %v5150_v61  ;;  %v10068_v23 = vld [vmem:[#allocation12_spill] sm:$0xff] }
 0x2be   :  { %v7594_v56 = vpop.f32.mrf.mxu1  ;;  %v7666_v28 = vpop.f32.mrf.mxu0  ;;  %v4578_v0 = vmax.f32 %v10065_v29, %v4423_v51  ;;  %v10072_v29 = vld [vmem:[#allocation16_spill] sm:$0xff] }
 0x2bf   :  { %6654 = vst [vmem:[%s9949_s3 + $0x58] sm:$0xff] %v6552_v19   ;;  %v6547_v44 = vpack.c.bf16 %v5272_v37, %v5271_v17  ;;  %v5151_v41 = vmax.f32 %v4577_v63, %v7666_v28  ;;  %v5215_v9 = vadd.f32 %v9736_v60, %v5148_v32  ;;  %v5277_v53 = vmax.f32 %v5217_v52, 0.0 }
 0x2c0   :  { %v4426_v13 = vpop.f32.mrf.mxu1  ;;  %v4984_v12 = vpop.f32.mrf.mxu0  ;;  %v4581_v48 = vmax.f32 %v10066_v42, %v7594_v56  ;;  %v10069_v56 = vld [vmem:[#allocation13_spill] sm:$0xff] }
 0x2c1   :  { %6653 = vst [vmem:[%s9949_s3 + $0x50] sm:$0xff] %v6547_v44   ;;  %v5218_v55 = vadd.f32 %v9736_v60, %v5151_v41  ;;  %v5149_v3 = vmax.f32 %v4575_v50, %v4984_v12  ;;  %v5275_v30 = vmax.f32 %v5215_v9, 0.0  ;;  %v4579_v16 = vmax.f32 %v10067_v59, %v4426_v13  ;;  %v10070_v41 = vld [vmem:[#allocation14_spill] sm:$0xff] }
 0x2c2   :  { %v7597_v15 = vpop.f32.mrf.mxu1  ;;  %v7669_v47 = vpop.f32.mrf.mxu0 }
 0x2c3   :  { %v5278_v45 = vmax.f32 %v5218_v55, 0.0  ;;  %v5216_v6 = vadd.f32 %v9736_v60, %v5149_v3  ;;  %v5154_v40 = vmax.f32 %v4580_v33, %v7669_v47  ;;  %v4584_v18 = vmax.f32 %v10068_v23, %v7597_v15  ;;  %v10071_v3 = vld [vmem:[#allocation15_spill] sm:$0xff] }
 0x2c4   :  { %v4439_v54 = vpop.f32.mrf.mxu1  ;;  %v4997_v38 = vpop.f32.mrf.mxu0 }
 0x2c5   :  { %v6562_v27 = vpack.c.bf16 %v5278_v45, %v5277_v53  ;;  %v5276_v34 = vmax.f32 %v5216_v6, 0.0  ;;  %v5152_v26 = vmax.f32 %v4578_v0, %v4997_v38  ;;  %v5221_v24 = vadd.f32 %v9736_v60, %v5154_v40 }
 0x2c6   :  { %v7598_v46 = vpop.f32.mrf.mxu1  ;;  %v7670_v10 = vpop.f32.mrf.mxu0  ;;  %v4582_v28 = vmax.f32 %v10069_v56, %v4439_v54 }
 0x2c7   :  { %6656 = vst [vmem:[%s9949_s3 + $0x68] sm:$0xff] %v6562_v27   ;;  %v6557_v11 = vpack.c.bf16 %v5276_v34, %v5275_v30  ;;  %v5155_v58 = vmax.f32 %v4581_v48, %v7670_v10  ;;  %v5219_v61 = vadd.f32 %v9736_v60, %v5152_v26  ;;  %v5281_v63 = vmax.f32 %v5221_v24, 0.0  ;;  %v10073_v10 = vld [vmem:[#allocation17_spill] sm:$0xff] }
 0x2c8   :  { %v4442_v21 = vpop.f32.mrf.mxu1  ;;  %v5000_v22 = vpop.f32.mrf.mxu0  ;;  %v4585_v13 = vmax.f32 %v10070_v41, %v7598_v46 }
 0x2c9   :  { %6655 = vst [vmem:[%s9949_s3 + $0x60] sm:$0xff] %v6557_v11   ;;  %v5222_v20 = vadd.f32 %v9736_v60, %v5155_v58  ;;  %v5153_v51 = vmax.f32 %v4579_v16, %v5000_v22  ;;  %v5279_v52 = vmax.f32 %v5219_v61, 0.0  ;;  %v4583_v15 = vmax.f32 %v10071_v3, %v4442_v21  ;;  %v10074_v58 = vld [vmem:[#allocation18_spill] sm:$0xff]  ;;  %v10075_v3 = vld [vmem:[#allocation19_spill] sm:$0xff] }
 0x2ca   :  { %v7601_v4 = vpop.f32.mrf.mxu1  ;;  %v7673_v17 = vpop.f32.mrf.mxu0 }
 0x2cb   :  { %v5282_v19 = vmax.f32 %v5222_v20, 0.0  ;;  %v5220_v37 = vadd.f32 %v9736_v60, %v5153_v51  ;;  %v5158_v32 = vmax.f32 %v4584_v18, %v7673_v17  ;;  %v4588_v0 = vmax.f32 %v10072_v29, %v7601_v4 }
 0x2cc   :  { %v4455_v50 = vpop.f32.mrf.mxu1  ;;  %v5013_v44 = vpop.f32.mrf.mxu0 }
 0x2cd   :  { %v6572_v12 = vpack.c.bf16 %v5282_v19, %v5281_v63  ;;  %v5280_v43 = vmax.f32 %v5220_v37, 0.0  ;;  %v5156_v33 = vmax.f32 %v4582_v28, %v5013_v44  ;;  %v5225_v53 = vadd.f32 %v9736_v60, %v5158_v32 }
 0x2ce   :  { %v7602_v9 = vpop.f32.mrf.mxu1  ;;  %v7674_v55 = vpop.f32.mrf.mxu0  ;;  %v4586_v59 = vmax.f32 %v10073_v10, %v4455_v50 }
 0x2cf   :  { %6658 = vst [vmem:[%s9949_s3 + $0x78] sm:$0xff] %v6572_v12   ;;  %v6567_v47 = vpack.c.bf16 %v5280_v43, %v5279_v52  ;;  %v5159_v45 = vmax.f32 %v4585_v13, %v7674_v55  ;;  %v5223_v54 = vadd.f32 %v9736_v60, %v5156_v33  ;;  %v5285_v27 = vmax.f32 %v5225_v53, 0.0 }
 0x2d0   :  { %v4458_v6 = vpop.f32.mrf.mxu1  ;;  %v5016_v40 = vpop.f32.mrf.mxu0  ;;  %v4589_v21 = vmax.f32 %v10074_v58, %v7602_v9 }
 0x2d1   :  { %6657 = vst [vmem:[%s9949_s3 + $0x70] sm:$0xff] %v6567_v47   ;;  %v5226_v38 = vadd.f32 %v9736_v60, %v5159_v45  ;;  %v5157_v30 = vmax.f32 %v4583_v15, %v5016_v40  ;;  %v5283_v24 = vmax.f32 %v5223_v54, 0.0  ;;  %v4587_v51 = vmax.f32 %v9673_v62, %v4458_v6 }
 0x2d2   :  { %v7605_v42 = vpop.f32.mrf.mxu1  ;;  %v7677_v48 = vpop.f32.mrf.mxu0 }
 0x2d3   :  { %v5286_v34 = vmax.f32 %v5226_v38, 0.0  ;;  %v5224_v26 = vadd.f32 %v9736_v60, %v5157_v30  ;;  %v5162_v46 = vmax.f32 %v4588_v0, %v7677_v48  ;;  %v4592_v32 = vmax.f32 %v9676_v35, %v7605_v42 }
 0x2d4   :  { %v4471_v16 = vpop.f32.mrf.mxu1  ;;  %v5029_v11 = vpop.f32.mrf.mxu0 }
 0x2d5   :  { %v6582_v22 = vpack.c.bf16 %v5286_v34, %v5285_v27  ;;  %v5284_v23 = vmax.f32 %v5224_v26, 0.0  ;;  %v5160_v18 = vmax.f32 %v4586_v59, %v5029_v11  ;;  %v5229_v17 = vadd.f32 %v9736_v60, %v5162_v46 }
 0x2d6   :  { %v7606_v61 = vpop.f32.mrf.mxu1  ;;  %v7678_v20 = vpop.f32.mrf.mxu0  ;;  %v4590_v43 = vmax.f32 %v9679_v31, %v4471_v16 }
 0x2d7   :  { %6660 = vst [vmem:[%s9949_s3 + $0x88] sm:$0xff] %v6582_v22   ;;  %v6577_v4 = vpack.c.bf16 %v5284_v23, %v5283_v24  ;;  %v5163_v63 = vmax.f32 %v4589_v21, %v7678_v20  ;;  %v5227_v56 = vadd.f32 %v9736_v60, %v5160_v18  ;;  %v5289_v62 = vmax.f32 %v5229_v17, 0.0 }
 0x2d8   :  { %v4474_v19 = vpop.f32.mrf.mxu1  ;;  %v5032_v37 = vpop.f32.mrf.mxu0  ;;  %v4593_v15 = vmax.f32 %v10075_v3, %v7606_v61 }
 0x2d9   :  { %6659 = vst [vmem:[%s9949_s3 + $0x80] sm:$0xff] %v6577_v4   ;;  %v5230_v28 = vadd.f32 %v9736_v60, %v5163_v63  ;;  %v5161_v50 = vmax.f32 %v4587_v51, %v5032_v37  ;;  %v5287_v55 = vmax.f32 %v5227_v56, 0.0  ;;  %v4591_v40 = vmax.f32 %v9685_v49, %v4474_v19 }
 0x2da   :  { %v7609_v44 = vpop.f32.mrf.mxu1  ;;  %v7681_v52 = vpop.f32.mrf.mxu0 }
 0x2db   :  { %v5290_v41 = vmax.f32 %v5230_v28, 0.0  ;;  %v5228_v13 = vadd.f32 %v9736_v60, %v5161_v50  ;;  %v5166_v12 = vmax.f32 %v4592_v32, %v7681_v52  ;;  %v4596_v30 = vmax.f32 %v9688_v25, %v7609_v44 }
 0x2dc   :  { %v4487_v33 = vpop.f32.mrf.mxu1  ;;  %v5045_v9 = vpop.f32.mrf.mxu0 }
 0x2dd   :  { %v6592_v35 = vpack.c.bf16 %v5290_v41, %v5289_v62  ;;  %v5288_v47 = vmax.f32 %v5228_v13, 0.0  ;;  %v5164_v53 = vmax.f32 %v4590_v43, %v5045_v9  ;;  %v5233_v0 = vadd.f32 %v9736_v60, %v5166_v12 }
 0x2de   :  { %v7610_v45 = vpop.f32.mrf.mxu1  ;;  %v7682_v6 = vpop.f32.mrf.mxu0  ;;  %v4594_v16 = vmax.f32 %v9691_v7, %v4487_v33 }
 0x2df   :  { %6662 = vst [vmem:[%s9949_s3 + $0x98] sm:$0xff] %v6592_v35   ;;  %v6587_v29 = vpack.c.bf16 %v5288_v47, %v5287_v55  ;;  %v5167_v31 = vmax.f32 %v4593_v15, %v7682_v6  ;;  %v5231_v42 = vadd.f32 %v9736_v60, %v5164_v53  ;;  %v5293_v49 = vmax.f32 %v5233_v0, 0.0 }
 0x2e0   :  { %v4490_v54 = vpop.f32.mrf.mxu1  ;;  %v5048_v38 = vpop.f32.mrf.mxu0  ;;  %v4597_v21 = vmax.f32 %v9694_v39, %v7610_v45 }
 0x2e1   :  { %6661 = vst [vmem:[%s9949_s3 + $0x90] sm:$0xff] %v6587_v29   ;;  %v5234_v48 = vadd.f32 %v9736_v60, %v5167_v31  ;;  %v5165_v27 = vmax.f32 %v4591_v40, %v5048_v38  ;;  %v5291_v58 = vmax.f32 %v5231_v42, 0.0  ;;  %v4595_v20 = vmax.f32 %v9697_v57, %v4490_v54  ;;  %v10076_v42 = vld [vmem:[#allocation20_spill] sm:$0xff] }
 0x2e2   :  { %v7613_v34 = vpop.f32.mrf.mxu1  ;;  %v7685_v26 = vpop.f32.mrf.mxu0 }
 0x2e3   :  { %v5294_v46 = vmax.f32 %v5234_v48, 0.0  ;;  %v5232_v10 = vadd.f32 %v9736_v60, %v5165_v27  ;;  %v5170_v59 = vmax.f32 %v4596_v30, %v7685_v26  ;;  %v4600_v39 = vmax.f32 %v9700_v36, %v7613_v34 }
 0x2e4   :  { %v4503_v11 = vpop.f32.mrf.mxu1  ;;  %v5061_v24 = vpop.f32.mrf.mxu0 }
 0x2e5   :  { %v6602_v25 = vpack.c.bf16 %v5294_v46, %v5293_v49  ;;  %v5292_v22 = vmax.f32 %v5232_v10, 0.0  ;;  %v5168_v23 = vmax.f32 %v4594_v16, %v5061_v24  ;;  %v5237_v4 = vadd.f32 %v9736_v60, %v5170_v59  ;;  %v10077_v16 = vld [vmem:[#allocation21_spill] sm:$0xff] }
 0x2e6   :  { %v7614_v18 = vpop.f32.mrf.mxu1  ;;  %v7686_v61 = vpop.f32.mrf.mxu0  ;;  %v4598_v62 = vmax.f32 %v9703_v14, %v4503_v11 }
 0x2e7   :  { %6664 = vst [vmem:[%s9949_s3 + $0xa8] sm:$0xff] %v6602_v25   ;;  %v6597_v51 = vpack.c.bf16 %v5292_v22, %v5291_v58  ;;  %v5171_v7 = vmax.f32 %v4597_v21, %v7686_v61  ;;  %v5235_v19 = vadd.f32 %v9736_v60, %v5168_v23  ;;  %v5297_v57 = vmax.f32 %v5237_v4, 0.0 }
 0x2e8   :  { %v4506_v17 = vpop.f32.mrf.mxu1  ;;  %v5064_v63 = vpop.f32.mrf.mxu0  ;;  %v4601_v43 = vmax.f32 %v9706_v2, %v7614_v18 }
 0x2e9   :  { %6663 = vst [vmem:[%s9949_s3 + $0xa0] sm:$0xff] %v6597_v51   ;;  %v5238_v37 = vadd.f32 %v9736_v60, %v5171_v7  ;;  %v5169_v32 = vmax.f32 %v4595_v20, %v5064_v63  ;;  %v5295_v12 = vmax.f32 %v5235_v19, 0.0  ;;  %v4599_v15 = vmax.f32 %v9709_v8, %v4506_v17  ;;  %v10079_v51 = vld [vmem:[#allocation2_spill] sm:$0xff] }
 0x2ea   :  { %v7617_v56 = vpop.f32.mrf.mxu1  ;;  %v7689_v28 = vpop.f32.mrf.mxu0 }
 0x2eb   :  { %v5298_v50 = vmax.f32 %v5238_v37, 0.0  ;;  %v5236_v44 = vadd.f32 %v9736_v60, %v5169_v32  ;;  %v5174_v52 = vmax.f32 %v4600_v39, %v7689_v28  ;;  %v4604_v2 = vmax.f32 %v9712_v1, %v7617_v56  ;;  %v10080_v37 = vld [vmem:[#allocation3_spill] sm:$0xff] }
 0x2ec   :  { %v4519_v41 = vpop.f32.mrf.mxu1  ;;  %v5077_v13 = vpop.f32.mrf.mxu0 }
 0x2ed   :  { %v6612_v36 = vpack.c.bf16 %v5298_v50, %v5297_v57  ;;  %v5296_v33 = vmax.f32 %v5236_v44, 0.0  ;;  %v5172_v9 = vmax.f32 %v4598_v62, %v5077_v13  ;;  %v5241_v47 = vadd.f32 %v9736_v60, %v5174_v52 }
 0x2ee   :  { %v7618_v55 = vpop.f32.mrf.mxu1  ;;  %v7690_v3 = vpop.f32.mrf.mxu0  ;;  %v4602_v48 = vmax.f32 %v10076_v42, %v4519_v41  ;;  %v10081_v41 = vld [vmem:[#allocation4_spill] sm:$0xff] }
 0x2ef   :  { %6666 = vst [vmem:[%s9949_s3 + $0xb8] sm:$0xff] %v6612_v36   ;;  %v6607_v35 = vpack.c.bf16 %v5296_v33, %v5295_v12  ;;  %v5175_v14 = vmax.f32 %v4601_v43, %v7690_v3  ;;  %v5239_v6 = vadd.f32 %v9736_v60, %v5172_v9  ;;  %v5301_v8 = vmax.f32 %v5241_v47, 0.0 }
 0x2f0   :  { %v4522_v53 = vpop.f32.mrf.mxu1  ;;  %v5080_v45 = vpop.f32.mrf.mxu0  ;;  %v4605_v49 = vmax.f32 %v9718_v5, %v7618_v55  ;;  %v10078_v5 = vld [vmem:[#allocation22_spill] sm:$0xff] }
 0x2f1   :  { %6665 = vst [vmem:[%s9949_s3 + $0xb0] sm:$0xff] %v6607_v35   ;;  %v5242_v40 = vadd.f32 %v9736_v60, %v5175_v14  ;;  %v5173_v29 = vmax.f32 %v4599_v15, %v5080_v45  ;;  %v5299_v26 = vmax.f32 %v5239_v6, 0.0  ;;  %v4603_v11 = vmax.f32 %v10077_v16, %v4522_v53 }
 0x2f2   :  { %v7621_v0 = vpop.f32.mrf.mxu1  ;;  %v7693_v31 = vpop.f32.mrf.mxu0 }
 0x2f3   :  { %v5302_v54 = vmax.f32 %v5242_v40, 0.0  ;;  %v5240_v38 = vadd.f32 %v9736_v60, %v5173_v29  ;;  %v5178_v30 = vmax.f32 %v4604_v2, %v7693_v31  ;;  %v4608_v23 = vmax.f32 %v10078_v5, %v7621_v0 }
 0x2f4   :  { %v4535_v27 = vpop.f32.mrf.mxu1  ;;  %v5093_v34 = vpop.f32.mrf.mxu0 }
 0x2f5   :  { %v6622_v1 = vpack.c.bf16 %v5302_v54, %v5301_v8  ;;  %v5300_v46 = vmax.f32 %v5240_v38, 0.0  ;;  %v5176_v10 = vmax.f32 %v4602_v48, %v5093_v34  ;;  %v5245_v58 = vadd.f32 %v9736_v60, %v5178_v30 }
 0x2f6   :  { %v7694_v59 = vpop.f32.mrf.mxu0  ;;  %v7622_v25 = vpop.f32.mrf.mxu1  ;;  %v4606_v4 = vmax.f32 %v10079_v51, %v4535_v27 }
 0x2f7   :  { %6668 = vst [vmem:[%s9949_s3 + $0xc8] sm:$0xff] %v6622_v1   ;;  %v6617_v24 = vpack.c.bf16 %v5300_v46, %v5299_v26  ;;  %v5179_v21 = vmax.f32 %v4605_v49, %v7694_v59  ;;  %v5243_v18 = vadd.f32 %v9736_v60, %v5176_v10  ;;  %v5305_v17 = vmax.f32 %v5245_v58, 0.0 }
 0x2f8   :  { %v5096_v22 = vpop.f32.mrf.mxu0  ;;  %v4609_v32 = vmax.f32 %v10080_v37, %v7622_v25  ;;  %v4538_v56 = vpop.f32.mrf.mxu1 }
 0x2f9   :  { %6667 = vst [vmem:[%s9949_s3 + $0xc0] sm:$0xff] %v6617_v24   ;;  %v5246_v61 = vadd.f32 %v9736_v60, %v5179_v21  ;;  %v5177_v20 = vmax.f32 %v4603_v11, %v5096_v22  ;;  %v5303_v57 = vmax.f32 %v5243_v18, 0.0  ;;  %v4607_v13 = vmax.f32 %v10081_v41, %v4538_v56 }
 0x2fa   :  { %v7697_v7 = vpop.f32.mrf.mxu0 }
 0x2fb   :  { %v5306_v63 = vmax.f32 %v5246_v61, 0.0  ;;  %v5244_v39 = vadd.f32 %v9736_v60, %v5177_v20  ;;  %v5182_v19 = vmax.f32 %v4608_v23, %v7697_v7 }
 0x2fc   :  { %v5109_v28 = vpop.f32.mrf.mxu0 }
 0x2fd   :  { %v6632_v50 = vpack.c.bf16 %v5306_v63, %v5305_v17  ;;  %v5304_v44 = vmax.f32 %v5244_v39, 0.0  ;;  %v5180_v52 = vmax.f32 %v4606_v4, %v5109_v28  ;;  %v5249_v43 = vadd.f32 %v9736_v60, %v5182_v19 }
 0x2fe   :  { %v7698_v62 = vpop.f32.mrf.mxu0 }
 0x2ff   :  { %6670 = vst [vmem:[%s9949_s3 + $0xd8] sm:$0xff] %v6632_v50   ;;  %v6627_v12 = vpack.c.bf16 %v5304_v44, %v5303_v57  ;;  %v5183_v36 = vmax.f32 %v4609_v32, %v7698_v62  ;;  %v5247_v9 = vadd.f32 %v9736_v60, %v5180_v52  ;;  %v5309_v15 = vmax.f32 %v5249_v43, 0.0 }
 0x300   :  { %v5112_v33 = vpop.f32.mrf.mxu0 }
 0x301   :  { %6669 = vst [vmem:[%s9949_s3 + $0xd0] sm:$0xff] %v6627_v12   ;;  %v5250_v55 = vadd.f32 %v9736_v60, %v5183_v36  ;;  %v5181_v3 = vmax.f32 %v4607_v13, %v5112_v33  ;;  %v5307_v14 = vmax.f32 %v5247_v9, 0.0 }
 0x303   :  { %v5310_v35 = vmax.f32 %v5250_v55, 0.0  ;;  %v5248_v47 = vadd.f32 %v9736_v60, %v5181_v3 }
 0x305   :  { %v6642_v53 = vpack.c.bf16 %v5310_v35, %v5309_v15  ;;  %v5308_v45 = vmax.f32 %v5248_v47, 0.0 }
 0x307   :  { %6672 = vst [vmem:[%s9949_s3 + $0xe8] sm:$0xff] %v6642_v53   ;;  %v6637_v2 = vpack.c.bf16 %v5308_v45, %v5307_v14 }
 0x309   :  { %6671 = vst [vmem:[%s9949_s3 + $0xe0] sm:$0xff] %v6637_v2  }

// kernel: model2_forward.7
= control target key start
LH: loop header
LB: loop body
LE: loop exit
PB: predicated region body
PF: predicated region fallthrough
CT: control target
= control target key end

     0   :  { %v81_v0 = vlaneseq  ;;  %v569_v1 = vmov 0.0   ;;  %vm570_vm0 = vmmov 0   ;;  %vm113_vm1 = vcmask 1041409   ;;  %s855_s1 = inlined_call_operand.vmem [shape: f32[128,128], index: 1, kind: input, shape index: {}]   ;;  %s856_s0 = inlined_call_operand.vmem [shape: bf16[8,1,128], index: 0, kind: input, shape index: {}]   ;;  %s857_s3 = inlined_call_operand.vmem [shape: f32[128,128], index: 3, kind: input, shape index: {}]   ;;  %s858_s5 = inlined_call_operand.vmem [shape: f32[128,128], index: 5, kind: input, shape index: {}]   ;;  %s859_s2 = inlined_call_operand.vmem [shape: f32[1,128], index: 2, kind: input, shape index: {}]   ;;  %s860_s4 = inlined_call_operand.vmem [shape: f32[1,128], index: 4, kind: input, shape index: {}]   ;;  %s861_s6 = inlined_call_operand.vmem [shape: f32[1,128], index: 6, kind: input, shape index: {}]   ;;  %s862_s7 = inlined_call_operand.vmem [shape: f32[8,128], index: 7, kind: output, shape index: {}]  }
   0x1   :  { %454 = vmatprep.subr.mxu0 %v569_v1  ;;  %v65_v2 = vld [vmem:[%s855_s1 + $0x78] sm:$0xff]  ;;  %v64_v3 = vld [vmem:[%s855_s1 + $0x70] sm:$0xff]  ;;  %486 = vmatprep.mubr.msk.f32.mxu0 %vm570_vm0, %v569_v1  ;;  %v63_v5 = vld [vmem:[%s855_s1 + $0x68] sm:$0xff]  ;;  %vm115_vm2 = vcmask 1042434   ;;  %vm117_vm3 = vcmask 1043459   ;;  %vm119_vm4 = vcmask 1044484  }
   0x2   :  { %455 = vmatpush3.msra.mxu0 %v65_v2  ;;  %v82_v4 = vshrl.u32 %v81_v0, 7  ;;  %489 = vmatprep.subr.mxu1 %v569_v1  ;;  %v62_v6 = vld [vmem:[%s855_s1 + $0x60] sm:$0xff]  ;;  %v61_v10 = vld [vmem:[%s855_s1 + $0x58] sm:$0xff]  ;;  %v60_v16 = vld [vmem:[%s855_s1 + $0x50] sm:$0xff]  ;;  %vm121_vm5 = vcmask 1045509   ;;  %vm123_vm6 = vcmask 1046534  }
   0x3   :  { %456 = vmatprep.subr.mxu0 %v569_v1  ;;  %521 = vmatprep.mubr.msk.f32.mxu1 %vm570_vm0, %v569_v1  ;;  %v26_v8 = vld [vmem:[%s856_s0] sm:$0x1]  ;;  %v27_v9 = vld [vmem:[%s856_s0 + $0x1] sm:$0x1]  ;;  %v28_v11 = vld [vmem:[%s856_s0 + $0x2] sm:$0x1] }
   0x4   :  { %457 = vmatpush3.msra.mxu0 %v64_v3  ;;  %v631_v7 = vsub.s32 0, %v82_v4  ;;  %v29_v12 = vld [vmem:[%s856_s0 + $0x3] sm:$0x1]  ;;  %v34_v13 = vunpack.c.l.bf16 %v26_v8  ;;  %v35_v14 = vunpack.c.l.bf16 %v27_v9  ;;  %v36_v15 = vunpack.c.l.bf16 %v28_v11  ;;  %v214_v18 = vld [vmem:[%s857_s3 + $0x78] sm:$0xff]  ;;  %v30_v19 = vld [vmem:[%s856_s0 + $0x4] sm:$0x1] }
   0x5   :  { %458 = vmatprep.subr.mxu0 %v569_v1  ;;  %v37_v20 = vunpack.c.l.bf16 %v29_v12  ;;  %v213_v22 = vld [vmem:[%s857_s3 + $0x70] sm:$0xff]  ;;  %v59_v23 = vld [vmem:[%s855_s1 + $0x48] sm:$0xff]  ;;  %490 = vmatpush3.msra.mxu1 %v214_v18  ;;  %v58_v27 = vld [vmem:[%s855_s1 + $0x40] sm:$0xff]  ;;  %v38_v29 = vunpack.c.l.bf16 %v30_v19  ;;  %vm125_vm7 = vcmask 1047559  }
   0x6   :  { %459 = vmatpush3.msra.mxu0 %v63_v5  ;;  %v84_v17 = vrot.slane %v34_v13, %v631_v7  ;;  %v88_v21 = vrot.slane %v35_v14, %v631_v7  ;;  %v92_v24 = vrot.slane %v36_v15, %v631_v7  ;;  %491 = vmatprep.subr.mxu1 %v569_v1  ;;  %v212_v26 = vld [vmem:[%s857_s3 + $0x68] sm:$0xff]  ;;  %v31_v28 = vld [vmem:[%s856_s0 + $0x5] sm:$0x1]  ;;  %v57_v32 = vld [vmem:[%s855_s1 + $0x38] sm:$0xff] }
   0x7   :  { %460 = vmatprep.subr.mxu0 %v569_v1  ;;  %492 = vmatpush3.msra.mxu1 %v213_v22  ;;  %v96_v30 = vrot.slane %v37_v20, %v631_v7  ;;  %v211_v31 = vld [vmem:[%s857_s3 + $0x60] sm:$0xff]  ;;  %v39_v35 = vunpack.c.l.bf16 %v31_v28  ;;  %v210_v36 = vld [vmem:[%s857_s3 + $0x58] sm:$0xff]  ;;  %v56_v37 = vld [vmem:[%s855_s1 + $0x30] sm:$0xff]  ;;  %v100_v38 = vrot.slane %v38_v29, %v631_v7 }
   0x8   :  { %461 = vmatpush3.msra.mxu0 %v62_v6  ;;  %v114_v25 = vsel %vm113_vm1, %v88_v21, %v84_v17  ;;  %493 = vmatprep.subr.mxu1 %v569_v1  ;;  %v32_v34 = vld [vmem:[%s856_s0 + $0x6] sm:$0x1]  ;;  %v209_v40 = vld [vmem:[%s857_s3 + $0x50] sm:$0xff]  ;;  %v55_v41 = vld [vmem:[%s855_s1 + $0x28] sm:$0xff] }
   0x9   :  { %462 = vmatprep.subr.mxu0 %v569_v1  ;;  %v116_v33 = vsel %vm115_vm2, %v92_v24, %v114_v25  ;;  %494 = vmatpush3.msra.mxu1 %v212_v26  ;;  %v33_v42 = vld [vmem:[%s856_s0 + $0x7] sm:$0x1]  ;;  %v40_v43 = vunpack.c.l.bf16 %v32_v34  ;;  %v104_v44 = vrot.slane %v39_v35, %v631_v7  ;;  %v208_v45 = vld [vmem:[%s857_s3 + $0x48] sm:$0xff]  ;;  %v53_v49 = vld [vmem:[%s855_s1 + $0x18] sm:$0xff] }
   0xa   :  { %463 = vmatpush3.msra.mxu0 %v61_v10  ;;  %495 = vmatprep.subr.mxu1 %v569_v1  ;;  %v118_v39 = vsel %vm117_vm3, %v96_v30, %v116_v33  ;;  %v54_v46 = vld [vmem:[%s855_s1 + $0x20] sm:$0xff]  ;;  %v41_v48 = vunpack.c.l.bf16 %v33_v42  ;;  %v52_v52 = vld [vmem:[%s855_s1 + $0x10] sm:$0xff]  ;;  %v51_v54 = vld [vmem:[%s855_s1 + $0x8] sm:$0xff] }
   0xb   :  { %464 = vmatprep.subr.mxu0 %v569_v1  ;;  %496 = vmatpush3.msra.mxu1 %v211_v31  ;;  %v120_v47 = vsel %vm119_vm4, %v100_v38, %v118_v39  ;;  %v108_v50 = vrot.slane %v40_v43, %v631_v7  ;;  %v50_v56 = vld [vmem:[%s855_s1] sm:$0xff]  ;;  %v206_v59 = vld [vmem:[%s857_s3 + $0x38] sm:$0xff]  ;;  %v205_v60 = vld [vmem:[%s857_s3 + $0x30] sm:$0xff] }
   0xc   :  { %465 = vmatpush3.msra.mxu0 %v60_v16  ;;  %497 = vmatprep.subr.mxu1 %v569_v1  ;;  %v122_v51 = vsel %vm121_vm5, %v104_v44, %v120_v47  ;;  %v112_v53 = vrot.slane %v41_v48, %v631_v7  ;;  %v207_v58 = vld [vmem:[%s857_s3 + $0x40] sm:$0xff]  ;;  %v204_v61 = vld [vmem:[%s857_s3 + $0x28] sm:$0xff]  ;;  %v202_v63 = vld [vmem:[%s857_s3 + $0x18] sm:$0xff] }
   0xd   :  { %466 = vmatprep.subr.mxu0 %v569_v1  ;;  %498 = vmatpush3.msra.mxu1 %v210_v36  ;;  %v124_v55 = vsel %vm123_vm6, %v108_v50, %v122_v51  ;;  %v203_v62 = vld [vmem:[%s857_s3 + $0x20] sm:$0xff]  ;;  %v201_v0 = vld [vmem:[%s857_s3 + $0x10] sm:$0xff]  ;;  %v200_v2 = vld [vmem:[%s857_s3 + $0x8] sm:$0xff] }
   0xe   :  { %467 = vmatpush3.msra.mxu0 %v59_v23  ;;  %499 = vmatprep.subr.mxu1 %v569_v1  ;;  %v126_v57 = vsel %vm125_vm7, %v112_v53, %v124_v55  ;;  %v199_v3 = vld [vmem:[%s857_s3] sm:$0xff]  ;;  %v308_v4 = vld [vmem:[%s858_s5 + $0x78] sm:$0xff]  ;;  %v307_v5 = vld [vmem:[%s858_s5 + $0x70] sm:$0xff] }
   0xf   :  { %468 = vmatprep.subr.mxu0 %v569_v1  ;;  %500 = vmatpush3.msra.mxu1 %v209_v40  ;;  %v306_v6 = vld [vmem:[%s858_s5 + $0x68] sm:$0xff]  ;;  %v305_v7 = vld [vmem:[%s858_s5 + $0x60] sm:$0xff]  ;;  %v304_v8 = vld [vmem:[%s858_s5 + $0x58] sm:$0xff] }
  0x10   :  { %469 = vmatpush3.msra.mxu0 %v58_v27  ;;  %501 = vmatprep.subr.mxu1 %v569_v1  ;;  %v303_v9 = vld [vmem:[%s858_s5 + $0x50] sm:$0xff]  ;;  %v302_v10 = vld [vmem:[%s858_s5 + $0x48] sm:$0xff]  ;;  %v400_v11 = vld [vmem:[%s859_s2] ss:$0 sm:$0xff] }
  0x11   :  { %470 = vmatprep.subr.mxu0 %v569_v1  ;;  %502 = vmatpush3.msra.mxu1 %v208_v45  ;;  %v301_v16 = vld [vmem:[%s858_s5 + $0x40] sm:$0xff]  ;;  %v300_v17 = vld [vmem:[%s858_s5 + $0x38] sm:$0xff]  ;;  %v299_v18 = vld [vmem:[%s858_s5 + $0x30] sm:$0xff] }
  0x12   :  { %471 = vmatpush3.msra.mxu0 %v57_v32  ;;  %503 = vmatprep.subr.mxu1 %v569_v1  ;;  %v298_v19 = vld [vmem:[%s858_s5 + $0x28] sm:$0xff]  ;;  %v297_v20 = vld [vmem:[%s858_s5 + $0x20] sm:$0xff]  ;;  %v296_v21 = vld [vmem:[%s858_s5 + $0x18] sm:$0xff] }
  0x13   :  { %472 = vmatprep.subr.mxu0 %v569_v1  ;;  %504 = vmatpush3.msra.mxu1 %v207_v58  ;;  %v295_v22 = vld [vmem:[%s858_s5 + $0x10] sm:$0xff]  ;;  %v294_v23 = vld [vmem:[%s858_s5 + $0x8] sm:$0xff]  ;;  %v293_v24 = vld [vmem:[%s858_s5] sm:$0xff] }
  0x14   :  { %473 = vmatpush3.msra.mxu0 %v56_v37  ;;  %505 = vmatprep.subr.mxu1 %v569_v1  ;;  %v401_v25 = vld [vmem:[%s860_s4] ss:$0 sm:$0xff] }
  0x15   :  { %474 = vmatprep.subr.mxu0 %v569_v1  ;;  %506 = vmatpush3.msra.mxu1 %v206_v59  ;;  %v402_v30 = vld [vmem:[%s861_s6] ss:$0 sm:$0xff] }
  0x16   :  { %475 = vmatpush3.msra.mxu0 %v55_v41  ;;  %507 = vmatprep.subr.mxu1 %v569_v1 }
  0x17   :  { %476 = vmatprep.subr.mxu0 %v569_v1  ;;  %508 = vmatpush3.msra.mxu1 %v205_v60 }
  0x18   :  { %477 = vmatpush3.msra.mxu0 %v54_v46  ;;  %509 = vmatprep.subr.mxu1 %v569_v1 }
  0x19   :  { %478 = vmatprep.subr.mxu0 %v569_v1  ;;  %510 = vmatpush3.msra.mxu1 %v204_v61 }
  0x1a   :  { %479 = vmatpush3.msra.mxu0 %v53_v49  ;;  %511 = vmatprep.subr.mxu1 %v569_v1 }
  0x1b   :  { %480 = vmatprep.subr.mxu0 %v569_v1  ;;  %512 = vmatpush3.msra.mxu1 %v203_v62 }
  0x1c   :  { %481 = vmatpush3.msra.mxu0 %v52_v52  ;;  %513 = vmatprep.subr.mxu1 %v569_v1 }
  0x1d   :  { %482 = vmatprep.subr.mxu0 %v569_v1  ;;  %514 = vmatpush3.msra.mxu1 %v202_v63 }
  0x1e   :  { %483 = vmatpush3.msra.mxu0 %v51_v54  ;;  %515 = vmatprep.subr.mxu1 %v569_v1 }
  0x1f   :  { %484 = vmatprep.subr.mxu0 %v569_v1  ;;  %516 = vmatpush3.msra.mxu1 %v201_v0 }
  0x20   :  { %485 = vmatpush3.msra.mxu0 %v50_v56  ;;  %517 = vmatprep.subr.mxu1 %v569_v1 }
  0x21   :  { %487 = vmatmul.mubr.f32.vlgmr.msra.gmra.mxu0 %v126_v57  ;;  %524 = vmatprep.subr.mxu0 %v569_v1 }
  0x22   :  { %556 = vmatprep.mubr.msk.f32.mxu0 %vm570_vm0, %v569_v1  ;;  %518 = vmatpush3.msra.mxu1 %v200_v2 }
  0x23   :  { %519 = vmatprep.subr.mxu1 %v569_v1  ;;  %525 = vmatpush3.msra.mxu0 %v308_v4 }
  0x24   :  { %520 = vmatpush3.msra.mxu1 %v199_v3  ;;  %526 = vmatprep.subr.mxu0 %v569_v1 }
  0x25   :  { %527 = vmatpush3.msra.mxu0 %v307_v5 }
  0x26   :  { %528 = vmatprep.subr.mxu0 %v569_v1 }
  0x27   :  { %529 = vmatpush3.msra.mxu0 %v306_v6 }
  0x28   :  { %530 = vmatprep.subr.mxu0 %v569_v1 }
  0x29   :  { %531 = vmatpush3.msra.mxu0 %v305_v7 }
  0x2a   :  { %532 = vmatprep.subr.mxu0 %v569_v1 }
  0x2b   :  { %533 = vmatpush3.msra.mxu0 %v304_v8 }
  0x2c   :  { %534 = vmatprep.subr.mxu0 %v569_v1 }
  0x2d   :  { %535 = vmatpush3.msra.mxu0 %v303_v9 }
  0x2e   :  { %536 = vmatprep.subr.mxu0 %v569_v1 }
  0x2f   :  { %537 = vmatpush3.msra.mxu0 %v302_v10 }
  0x30   :  { %538 = vmatprep.subr.mxu0 %v569_v1 }
  0x31   :  { %539 = vmatpush3.msra.mxu0 %v301_v16 }
  0x32   :  { %540 = vmatprep.subr.mxu0 %v569_v1 }
  0x33   :  { %541 = vmatpush3.msra.mxu0 %v300_v17 }
  0x34   :  { %542 = vmatprep.subr.mxu0 %v569_v1 }
  0x35   :  { %543 = vmatpush3.msra.mxu0 %v299_v18 }
  0x36   :  { %544 = vmatprep.subr.mxu0 %v569_v1 }
  0x37   :  { %545 = vmatpush3.msra.mxu0 %v298_v19 }
  0x38   :  { %546 = vmatprep.subr.mxu0 %v569_v1 }
  0x39   :  { %547 = vmatpush3.msra.mxu0 %v297_v20 }
  0x3a   :  { %548 = vmatprep.subr.mxu0 %v569_v1 }
  0x3b   :  { %549 = vmatpush3.msra.mxu0 %v296_v21 }
  0x3c   :  { %550 = vmatprep.subr.mxu0 %v569_v1 }
  0x3d   :  { %551 = vmatpush3.msra.mxu0 %v295_v22 }
  0x3e   :  { %552 = vmatprep.subr.mxu0 %v569_v1 }
  0x3f   :  { %553 = vmatpush3.msra.mxu0 %v294_v23 }
  0x40   :  { %554 = vmatprep.subr.mxu0 %v569_v1 }
  0x41   :  { %555 = vmatpush3.msra.mxu0 %v293_v24 }
  0xe1   :  { %v194_v12 = vpop.f32.mrf.mxu0 }
  0xe2   :  { %v195_v13 = vadd.f32 %v400_v11, %v194_v12 }
  0xe3   :  { %v488_v14 = vpop.f32.mrf.mxu0 }
  0xe4   :  { %561 = vtanh.f32 %v195_v13 }
  0xf1   :  { %v562_v15 = vpop.eup %561 }
  0xf2   :  { %522 = vmatmul.mubr.f32.vlgmr.msra.gmra.mxu1 %v562_v15 }
 0x1b2   :  { %v288_v26 = vpop.f32.mrf.mxu1 }
 0x1b3   :  { %v289_v27 = vadd.f32 %v401_v25, %v288_v26 }
 0x1b4   :  { %v523_v28 = vpop.f32.mrf.mxu1 }
 0x1b5   :  { %563 = vtanh.f32 %v289_v27 }
 0x1c2   :  { %v564_v29 = vpop.eup %563 }
 0x1c3   :  { %557 = vmatmul.mubr.f32.vlgmr.msra.gmra.mxu0 %v564_v29 }
 0x283   :  { %v382_v31 = vpop.f32.mrf.mxu0 }
 0x284   :  { %v383_v32 = vadd.f32 %v402_v30, %v382_v31 }
 0x285   :  { %v558_v33 = vpop.f32.mrf.mxu0 }
 0x286   :  { %386 = vmax.xlane.f32.xlu0 %v383_v32 }
 0x30f   :  { %v387_v1 = vpop.xlane.xlu0 %386 }
 0x310   :  { %v388_v34 = vsub.f32 %v383_v32, %v387_v1 }
 0x312   :  { %v389_v35 = vmul.f32 1.442695, %v388_v34 }
 0x314   :  { %565 = vpow2.f32 %v389_v35 }
 0x321   :  { %v566_v36 = vpop.eup %565 }
 0x322   :  { %391 = vadd.xlane.f32.xlu0 %v566_v36 }
 0x3ab   :  { %v392_v37 = vpop.xlane.xlu0 %391 }
 0x3ac   :  { %567 = vrcp.f32 %v392_v37 }
 0x3b9   :  { %v568_v38 = vpop.eup %567 }
 0x3ba   :  { %v394_v39 = vmul.f32 %v568_v38, %v566_v36 }
 0x3bc   :  { %395 = vst [vmem:[%s862_s7] sm:$0xff] %v394_v39 }

// kernel: model2_forward.5
= control target key start
LH: loop header
LB: loop body
LE: loop exit
PB: predicated region body
PF: predicated region fallthrough
CT: control target
= control target key end

     0   :  { %s8116_s1 = inlined_call_operand.vmem [shape: bf16[1152,128], index: 1, kind: input, shape index: {}]   ;;  %s8117_s0 = inlined_call_operand.vmem [shape: bf16[9,24,1152], index: 0, kind: input, shape index: {}]   ;;  %s8118_s2 = inlined_call_operand.vmem [shape: f32[1,128], index: 2, kind: input, shape index: {}]   ;;  %s8119_s3 = inlined_call_operand.vmem [shape: bf16[24,128], index: 3, kind: output, shape index: {}]  }
   0x1   :  { %v5734_v0 = vld [vmem:[%s8116_s1 + $0x78] sm:$0xff]   ;;  %v5757_v4 = vld [vmem:[%s8116_s1 + $0x70] sm:$0xff]   ;;  %v5781_v8 = vld [vmem:[%s8116_s1 + $0x68] sm:$0xff]  }
   0x2   :  { %v5739_v1 = vld [vmem:[%s8116_s1 + $0xf8] sm:$0xff]   ;;  %4019 = vmatprep.subr.bf16.mxu0 %v5734_v0  ;;  %v5763_v5 = vld [vmem:[%s8116_s1 + $0xf0] sm:$0xff]   ;;  %v5787_v9 = vld [vmem:[%s8116_s1 + $0xe8] sm:$0xff]  }
   0x3   :  { %v5745_v2 = vld [vmem:[%s8116_s1 + $0x38] sm:$0xff]   ;;  %4047 = vmatprep.subr.bf16.mxu1 %v5739_v1  ;;  %v5769_v6 = vld [vmem:[%s8116_s1 + $0x30] sm:$0xff]   ;;  %v5793_v10 = vld [vmem:[%s8116_s1 + $0x28] sm:$0xff]  }
   0x4   :  { %v5751_v3 = vld [vmem:[%s8116_s1 + $0xb8] sm:$0xff]   ;;  %4020 = vmatpush3.bf16.msra.mxu0 %v5745_v2  ;;  %v5775_v7 = vld [vmem:[%s8116_s1 + $0xb0] sm:$0xff]   ;;  %v5799_v11 = vld [vmem:[%s8116_s1 + $0xa8] sm:$0xff]  }
   0x5   :  { %4048 = vmatpush3.bf16.msra.mxu1 %v5751_v3  ;;  %4021 = vmatprep.subr.bf16.mxu0 %v5757_v4  ;;  %v5805_v12 = vld [vmem:[%s8116_s1 + $0x60] sm:$0xff]   ;;  %v5829_v16 = vld [vmem:[%s8116_s1 + $0x58] sm:$0xff]   ;;  %v5853_v20 = vld [vmem:[%s8116_s1 + $0x50] sm:$0xff]  }
   0x6   :  { %4049 = vmatprep.subr.bf16.mxu1 %v5763_v5  ;;  %v5811_v13 = vld [vmem:[%s8116_s1 + $0xe0] sm:$0xff]   ;;  %v5835_v17 = vld [vmem:[%s8116_s1 + $0xd8] sm:$0xff]   ;;  %v5859_v21 = vld [vmem:[%s8116_s1 + $0xd0] sm:$0xff]  }
   0x7   :  { %v5817_v14 = vld [vmem:[%s8116_s1 + $0x20] sm:$0xff]   ;;  %v5841_v18 = vld [vmem:[%s8116_s1 + $0x18] sm:$0xff]   ;;  %v5865_v22 = vld [vmem:[%s8116_s1 + $0x10] sm:$0xff]  }
   0x8   :  { %4022 = vmatpush3.bf16.msra.mxu0 %v5769_v6  ;;  %v5823_v15 = vld [vmem:[%s8116_s1 + $0xa0] sm:$0xff]   ;;  %v5847_v19 = vld [vmem:[%s8116_s1 + $0x98] sm:$0xff]   ;;  %v5871_v23 = vld [vmem:[%s8116_s1 + $0x90] sm:$0xff]  }
   0x9   :  { %4050 = vmatpush3.bf16.msra.mxu1 %v5775_v7  ;;  %4023 = vmatprep.subr.bf16.mxu0 %v5781_v8  ;;  %v5877_v24 = vld [vmem:[%s8116_s1 + $0x48] sm:$0xff]   ;;  %v5901_v28 = vld [vmem:[%s8116_s1 + $0x40] sm:$0xff]   ;;  %v5938_v36 = vld [vmem:[%s8116_s1 + $0x178] sm:$0xff]  }
   0xa   :  { %4051 = vmatprep.subr.bf16.mxu1 %v5787_v9  ;;  %v5883_v25 = vld [vmem:[%s8116_s1 + $0xc8] sm:$0xff]   ;;  %v5907_v29 = vld [vmem:[%s8116_s1 + $0xc0] sm:$0xff]   ;;  %v5943_v37 = vld [vmem:[%s8116_s1 + $0x1f8] sm:$0xff]  }
   0xb   :  { %v5889_v26 = vld [vmem:[%s8116_s1 + $0x8] sm:$0xff]   ;;  %v5913_v30 = vld [vmem:[%s8116_s1] sm:$0xff]   ;;  %v5949_v38 = vld [vmem:[%s8116_s1 + $0x138] sm:$0xff]  }
   0xc   :  { %4024 = vmatpush3.bf16.msra.mxu0 %v5793_v10  ;;  %v5895_v27 = vld [vmem:[%s8116_s1 + $0x88] sm:$0xff]   ;;  %v5919_v31 = vld [vmem:[%s8116_s1 + $0x80] sm:$0xff]   ;;  %v5955_v39 = vld [vmem:[%s8116_s1 + $0x1b8] sm:$0xff]  }
   0xd   :  { %4052 = vmatpush3.bf16.msra.mxu1 %v5799_v11  ;;  %4025 = vmatprep.subr.bf16.mxu0 %v5805_v12  ;;  %v5329_v32 = vld [vmem:[%s8117_s0] ss:$36 sps:$4 sm:$0xff]   ;;  %v5332_v34 = vld [vmem:[%s8117_s0 + $0x8] ss:$36 sps:$4 sm:$0xff]   ;;  %v5961_v40 = vld [vmem:[%s8116_s1 + $0x170] sm:$0xff]  }
   0xe   :  { %4053 = vmatprep.subr.bf16.mxu1 %v5811_v13  ;;  %v5331_v33 = vld [vmem:[%s8117_s0 + $0x4] ss:$36 sps:$4 sm:$0xff]   ;;  %v5334_v35 = vld [vmem:[%s8117_s0 + $0xc] ss:$36 sps:$4 sm:$0xff]   ;;  %v6033_v52 = vld [vmem:[%s8116_s1 + $0x158] sm:$0xff]  }
   0xf   :  { %716 = vmatprep.mubr.bf16.mxu0 %v5331_v33  ;;  %764 = vmatprep.mubr.bf16.mxu1 %v5334_v35  ;;  %v5967_v41 = vld [vmem:[%s8116_s1 + $0x1f0] sm:$0xff]   ;;  %v5985_v44 = vld [vmem:[%s8116_s1 + $0x168] sm:$0xff]   ;;  %v6009_v48 = vld [vmem:[%s8116_s1 + $0x160] sm:$0xff]  }
  0x10   :  { %4026 = vmatpush3.bf16.msra.mxu0 %v5817_v14  ;;  %v5973_v42 = vld [vmem:[%s8116_s1 + $0x130] sm:$0xff]   ;;  %v5991_v45 = vld [vmem:[%s8116_s1 + $0x1e8] sm:$0xff]   ;;  %v6015_v49 = vld [vmem:[%s8116_s1 + $0x1e0] sm:$0xff]  }
  0x11   :  { %4054 = vmatpush3.bf16.msra.mxu1 %v5823_v15  ;;  %4027 = vmatprep.subr.bf16.mxu0 %v5829_v16  ;;  %v5979_v43 = vld [vmem:[%s8116_s1 + $0x1b0] sm:$0xff]   ;;  %v5997_v46 = vld [vmem:[%s8116_s1 + $0x128] sm:$0xff]   ;;  %v6021_v50 = vld [vmem:[%s8116_s1 + $0x120] sm:$0xff]  }
  0x12   :  { %4055 = vmatprep.subr.bf16.mxu1 %v5835_v17  ;;  %v6003_v47 = vld [vmem:[%s8116_s1 + $0x1a8] sm:$0xff]   ;;  %v6027_v51 = vld [vmem:[%s8116_s1 + $0x1a0] sm:$0xff]   ;;  %v6039_v53 = vld [vmem:[%s8116_s1 + $0x1d8] sm:$0xff]  }
  0x13   :  { %8264 = vst [vmem:[#allocation2_spill] sm:$0xff] %v6039_v53  ;;  %v6045_v54 = vld [vmem:[%s8116_s1 + $0x118] sm:$0xff]   ;;  %v169_v56 = vld [vmem:[%s8117_s0 + $0x48] sm:$0xff]  ;;  %v6060_v59 = vld [vmem:[%s8116_s1 + $0x150] sm:$0xff]  }
  0x14   :  { %4028 = vmatpush3.bf16.msra.mxu0 %v5841_v18  ;;  %v6051_v55 = vld [vmem:[%s8116_s1 + $0x198] sm:$0xff]   ;;  %v3663_v57 = vcombine.high %v169_v56, %v169_v56  ;;  %v3662_v58 = vcombine.low %v169_v56, %v169_v56  ;;  %v6066_v60 = vld [vmem:[%s8116_s1 + $0x1d0] sm:$0xff]   ;;  %v6093_v35 = vld [vmem:[%s8116_s1 + $0x1c8] sm:$0xff]  }
  0x15   :  { %4056 = vmatpush3.bf16.msra.mxu1 %v5847_v19  ;;  %4029 = vmatprep.subr.bf16.mxu0 %v5853_v20  ;;  %8265 = vst [vmem:[#allocation3_spill] sm:$0xff] %v6051_v55  ;;  %8266 = vst [vmem:[#allocation4_spill] sm:$0xff] %v6066_v60  ;;  %v6072_v61 = vld [vmem:[%s8116_s1 + $0x110] sm:$0xff]   ;;  %v6099_v56 = vld [vmem:[%s8116_s1 + $0x108] sm:$0xff]  }
  0x16   :  { %4057 = vmatprep.subr.bf16.mxu1 %v5859_v21  ;;  %v6078_v62 = vld [vmem:[%s8116_s1 + $0x190] sm:$0xff]   ;;  %8268 = vst [vmem:[#allocation6_spill] sm:$0xff] %v6093_v35 }
  0x17   :  { %8267 = vst [vmem:[#allocation5_spill] sm:$0xff] %v6078_v62  ;;  %v170_v63 = vld [vmem:[%s8117_s0 + $0x50] sm:$0xff] }
  0x18   :  { %4030 = vmatpush3.bf16.msra.mxu0 %v5865_v22  ;;  %v3664_v33 = vcombine.low %v170_v63, %v170_v63 }
  0x19   :  { %4058 = vmatpush3.bf16.msra.mxu1 %v5871_v23  ;;  %4031 = vmatprep.subr.bf16.mxu0 %v5877_v24 }
  0x1a   :  { %4059 = vmatprep.subr.bf16.mxu1 %v5883_v25 }
  0x1c   :  { %4032 = vmatpush3.bf16.msra.mxu0 %v5889_v26 }
  0x1d   :  { %4060 = vmatpush3.bf16.msra.mxu1 %v5895_v27  ;;  %4033 = vmatprep.subr.bf16.mxu0 %v5901_v28 }
  0x1e   :  { %4061 = vmatprep.subr.bf16.mxu1 %v5907_v29 }
  0x20   :  { %4034 = vmatpush3.bf16.msra.mxu0 %v5913_v30 }
  0x21   :  { %4062 = vmatpush3.bf16.msra.mxu1 %v5919_v31  ;;  %4075 = vmatprep.subr.bf16.mxu0 %v5938_v36 }
  0x22   :  { %4103 = vmatprep.subr.bf16.mxu1 %v5943_v37 }
  0x23   :  { %717 = vmatmul.mubr.bf16.vlgmr.msra.gmra.mxu0 %v5329_v32  ;;  %v3665_v32 = vcombine.high %v170_v63, %v170_v63  ;;  %v6117_v63 = vld [vmem:[%s8116_s1 + $0x1c0] sm:$0xff]  }
  0x24   :  { %765 = vmatmul.mubr.bf16.vlgmr.msra.gmra.mxu1 %v5332_v34  ;;  %4076 = vmatpush3.bf16.msra.mxu0 %v5949_v38  ;;  %v6088_v34 = vld [vmem:[%s8116_s1 + $0x148] sm:$0xff]   ;;  %8270 = vst [vmem:[#allocation8_spill] sm:$0xff] %v6117_v63 }
  0x25   :  { %4104 = vmatpush3.bf16.msra.mxu1 %v5955_v39  ;;  %4077 = vmatprep.subr.bf16.mxu0 %v5961_v40 }
  0x26   :  { %4105 = vmatprep.subr.bf16.mxu1 %v5967_v41  ;;  %724 = vmatprep.mubr.bf16.mxu0 %v3663_v57  ;;  %v6105_v57 = vld [vmem:[%s8116_s1 + $0x188] sm:$0xff]  }
  0x27   :  { %772 = vmatprep.mubr.bf16.mxu1 %v3665_v32  ;;  %8269 = vst [vmem:[#allocation7_spill] sm:$0xff] %v6105_v57  ;;  %v6123_v32 = vld [vmem:[%s8116_s1 + $0x100] sm:$0xff]  }
  0x28   :  { %4078 = vmatpush3.bf16.msra.mxu0 %v5973_v42 }
  0x29   :  { %4106 = vmatpush3.bf16.msra.mxu1 %v5979_v43  ;;  %4079 = vmatprep.subr.bf16.mxu0 %v5985_v44 }
  0x2a   :  { %4107 = vmatprep.subr.bf16.mxu1 %v5991_v45 }
  0x2b   :  { %725 = vmatmul.mubr.bf16.gmra.mxu0 %v3662_v58  ;;  %v6111_v58 = vld [vmem:[%s8116_s1 + $0x140] sm:$0xff]  }
  0x2c   :  { %4080 = vmatpush3.bf16.msra.mxu0 %v5997_v46  ;;  %773 = vmatmul.mubr.bf16.gmra.mxu1 %v3664_v33  ;;  %v6129_v33 = vld [vmem:[%s8116_s1 + $0x180] sm:$0xff]  }
  0x2d   :  { %4108 = vmatpush3.bf16.msra.mxu1 %v6003_v47  ;;  %4081 = vmatprep.subr.bf16.mxu0 %v6009_v48  ;;  %8271 = vst [vmem:[#allocation9_spill] sm:$0xff] %v6129_v33 }
  0x2e   :  { %4109 = vmatprep.subr.bf16.mxu1 %v6015_v49 }
  0x30   :  { %4082 = vmatpush3.bf16.msra.mxu0 %v6021_v50 }
  0x31   :  { %4110 = vmatpush3.bf16.msra.mxu1 %v6027_v51  ;;  %4083 = vmatprep.subr.bf16.mxu0 %v6033_v52 }
  0x32   :  { %4111 = vmatprep.subr.bf16.mxu1 %v6039_v53 }
  0x34   :  { %4084 = vmatpush3.bf16.msra.mxu0 %v6045_v54 }
  0x35   :  { %4112 = vmatpush3.bf16.msra.mxu1 %v6051_v55  ;;  %4085 = vmatprep.subr.bf16.mxu0 %v6060_v59 }
  0x36   :  { %4113 = vmatprep.subr.bf16.mxu1 %v6066_v60  ;;  %v6148_v60 = vld [vmem:[%s8116_s1 + $0x238] sm:$0xff]  }
  0x38   :  { %4086 = vmatpush3.bf16.msra.mxu0 %v6072_v61 }
  0x39   :  { %4114 = vmatpush3.bf16.msra.mxu1 %v6078_v62  ;;  %4087 = vmatprep.subr.bf16.mxu0 %v6088_v34  ;;  %v5376_v62 = vld [vmem:[%s8117_s0 + $0x1c] ss:$36 sps:$4 sm:$0xff]  }
  0x3a   :  { %4115 = vmatprep.subr.bf16.mxu1 %v6093_v35  ;;  %v5373_v35 = vld [vmem:[%s8117_s0 + $0x14] ss:$36 sps:$4 sm:$0xff]   ;;  %860 = vmatprep.mubr.bf16.mxu1 %v5376_v62  ;;  %v6170_v62 = vld [vmem:[%s8116_s1 + $0x228] sm:$0xff]  }
  0x3b   :  { %812 = vmatprep.mubr.bf16.mxu0 %v5373_v35  ;;  %v171_v35 = vld [vmem:[%s8117_s0 + $0x58] sm:$0xff] }
  0x3c   :  { %4088 = vmatpush3.bf16.msra.mxu0 %v6099_v56  ;;  %v3667_v55 = vcombine.high %v171_v35, %v171_v35 }
  0x3d   :  { %4116 = vmatpush3.bf16.msra.mxu1 %v6105_v57  ;;  %4089 = vmatprep.subr.bf16.mxu0 %v6111_v58  ;;  %v5371_v57 = vld [vmem:[%s8117_s0 + $0x10] ss:$36 sps:$4 sm:$0xff]  }
  0x3e   :  { %4117 = vmatprep.subr.bf16.mxu1 %v6117_v63  ;;  %v5374_v63 = vld [vmem:[%s8117_s0 + $0x18] ss:$36 sps:$4 sm:$0xff]  }
  0x40   :  { %4090 = vmatpush3.bf16.msra.mxu0 %v6123_v32 }
  0x41   :  { %4118 = vmatpush3.bf16.msra.mxu1 %v6129_v33  ;;  %v6154_v33 = vld [vmem:[%s8116_s1 + $0x230] sm:$0xff]   ;;  %5117 = vmatprep.subr.bf16.mxu0 %v6148_v60 }
  0x42   :  { %4141 = vmatprep.subr.bf16.mxu1 %v5734_v0  ;;  %v172_v0 = vld [vmem:[%s8117_s0 + $0x60] sm:$0xff] }
  0x43   :  { %813 = vmatmul.mubr.bf16.vlgmr.msra.gmra.mxu0 %v5371_v57  ;;  %v3669_v57 = vcombine.high %v172_v0, %v172_v0  ;;  %v3668_v53 = vcombine.low %v172_v0, %v172_v0 }
  0x44   :  { %861 = vmatmul.mubr.bf16.vlgmr.msra.gmra.mxu1 %v5374_v63  ;;  %5118 = vmatpush3.bf16.msra.mxu0 %v6148_v60  ;;  %v3666_v63 = vcombine.low %v171_v35, %v171_v35  ;;  %v3753_v35 = vld [vmem:[%s8117_s0 + $0xb4] sm:$0xff] }
  0x45   :  { %4142 = vmatpush3.bf16.msra.mxu1 %v5745_v2  ;;  %5119 = vmatprep.subr.bf16.mxu0 %v6154_v33  ;;  %v6179_v2 = vld [vmem:[%s8116_s1 + $0x220] sm:$0xff]   ;;  %v3768_v0 = vcombine.high %v3753_v35, %v3753_v35 }
  0x46   :  { %4143 = vmatprep.subr.bf16.mxu1 %v5757_v4  ;;  %820 = vmatprep.mubr.bf16.mxu0 %v3667_v55  ;;  %v5389_v4 = vld [vmem:[%s8117_s0 + $0x20] ss:$36 sps:$4 sm:$0xff]   ;;  %v5391_v55 = vld [vmem:[%s8117_s0 + $0x6c] ss:$36 sps:$4 sm:$0xff]  }
  0x47   :  { %868 = vmatprep.mubr.bf16.mxu1 %v3669_v57  ;;  %v5398_v57 = vld [vmem:[%s8117_s0 + $0x78] ss:$36 sps:$4 sm:$0xff]  }
  0x48   :  { %5120 = vmatpush3.bf16.msra.mxu0 %v6154_v33 }
  0x49   :  { %4144 = vmatpush3.bf16.msra.mxu1 %v5769_v6  ;;  %5121 = vmatprep.subr.bf16.mxu0 %v6170_v62  ;;  %v5393_v6 = vld [vmem:[%s8117_s0 + $0x70] ss:$36 sps:$4 sm:$0xff]  }
  0x4a   :  { %4145 = vmatprep.subr.bf16.mxu1 %v5781_v8  ;;  %v6194_v8 = vld [vmem:[%s8116_s1 + $0x218] sm:$0xff]  }
  0x4b   :  { %821 = vmatmul.mubr.bf16.gmra.mxu0 %v3666_v63 }
  0x4c   :  { %869 = vmatmul.mubr.bf16.gmra.mxu1 %v3668_v53  ;;  %5122 = vmatpush3.bf16.msra.mxu0 %v6170_v62  ;;  %v5390_v53 = vld [vmem:[%s8117_s0 + $0x68] ss:$0 sps:$4 sm:$0xff]  }
  0x4d   :  { %4146 = vmatpush3.bf16.msra.mxu1 %v5793_v10  ;;  %5123 = vmatprep.subr.bf16.mxu0 %v6179_v2  ;;  %v6203_v10 = vld [vmem:[%s8116_s1 + $0x210] sm:$0xff]  }
  0x4e   :  { %4147 = vmatprep.subr.bf16.mxu1 %v5805_v12  ;;  %5133 = vmatprep.mubr.bf16.mxu0 %v5389_v4  ;;  %8272 = vst [vmem:[#allocation10_spill] sm:$0xff] %v6203_v10  ;;  %v6212_v12 = vld [vmem:[%s8116_s1 + $0x208] sm:$0xff]  }
  0x4f   :  { %1050 = vmatprep.mubr.bf16.mxu1 %v5393_v6  ;;  %8273 = vst [vmem:[#allocation11_spill] sm:$0xff] %v6212_v12  ;;  %v5408_v6 = vld [vmem:[%s8117_s0 + $0x88] ss:$36 sps:$4 sm:$0xff]  }
  0x50   :  { %5124 = vmatpush3.bf16.msra.mxu0 %v6179_v2 }
  0x51   :  { %4148 = vmatpush3.bf16.msra.mxu1 %v5817_v14  ;;  %5125 = vmatprep.subr.bf16.mxu0 %v6194_v8  ;;  %v6217_v14 = vld [vmem:[%s8116_s1 + $0x200] sm:$0xff]  }
  0x52   :  { %4149 = vmatprep.subr.bf16.mxu1 %v5829_v16  ;;  %8274 = vst [vmem:[#allocation12_spill] sm:$0xff] %v6217_v14 }
  0x54   :  { %5126 = vmatpush3.bf16.msra.mxu0 %v6194_v8 }
  0x55   :  { %4150 = vmatpush3.bf16.msra.mxu1 %v5841_v18  ;;  %5127 = vmatprep.subr.bf16.mxu0 %v6203_v10 }
  0x56   :  { %4151 = vmatprep.subr.bf16.mxu1 %v5853_v20 }
  0x58   :  { %5128 = vmatpush3.bf16.msra.mxu0 %v6203_v10 }
  0x59   :  { %4152 = vmatpush3.bf16.msra.mxu1 %v5865_v22  ;;  %5129 = vmatprep.subr.bf16.mxu0 %v6212_v12 }
  0x5a   :  { %4153 = vmatprep.subr.bf16.mxu1 %v5877_v24 }
  0x5c   :  { %5130 = vmatpush3.bf16.msra.mxu0 %v6212_v12 }
  0x5d   :  { %4154 = vmatpush3.bf16.msra.mxu1 %v5889_v26  ;;  %5131 = vmatprep.subr.bf16.mxu0 %v6217_v14 }
  0x5e   :  { %4155 = vmatprep.subr.bf16.mxu1 %v5901_v28 }
  0x60   :  { %5132 = vmatpush3.bf16.msra.mxu0 %v6217_v14 }
  0x61   :  { %4156 = vmatpush3.bf16.msra.mxu1 %v5913_v30  ;;  %4169 = vmatprep.subr.bf16.mxu0 %v5739_v1  ;;  %v3767_v1 = vcombine.low %v3753_v35, %v3753_v35  ;;  %v8276_v35 = vld [vmem:[#allocation3_spill] sm:$0xff] }
  0x62   :  { %4197 = vmatprep.subr.bf16.mxu1 %v5938_v36 }
  0x63   :  { %5134 = vmatmul.mubr.bf16.vlgmr.msra.gmra.mxu0 %v5390_v53  ;;  %v5409_v53 = vld [vmem:[%s8117_s0 + $0x8c] ss:$36 sps:$4 sm:$0xff]  }
  0x64   :  { %1051 = vmatmul.mubr.bf16.vlgmr.msra.gmra.mxu1 %v5391_v55  ;;  %4170 = vmatpush3.bf16.msra.mxu0 %v5751_v3  ;;  %v5401_v3 = vld [vmem:[%s8117_s0 + $0x80] ss:$36 sps:$4 sm:$0xff]  }
  0x65   :  { %4198 = vmatpush3.bf16.msra.mxu1 %v5949_v38  ;;  %4171 = vmatprep.subr.bf16.mxu0 %v5763_v5  ;;  %v5396_v5 = vld [vmem:[%s8117_s0 + $0x74] ss:$36 sps:$4 sm:$0xff]   ;;  %v8275_v55 = vld [vmem:[#allocation2_spill] sm:$0xff] }
  0x66   :  { %4199 = vmatprep.subr.bf16.mxu1 %v5961_v40  ;;  %1058 = vmatprep.mubr.bf16.mxu1 %v3768_v0  ;;  %v8277_v0 = vld [vmem:[#allocation4_spill] sm:$0xff] }
  0x67   :  { %1098 = vmatprep.mubr.bf16.mxu0 %v5398_v57  ;;  %v8278_v57 = vld [vmem:[#allocation5_spill] sm:$0xff] }
  0x68   :  { %4172 = vmatpush3.bf16.msra.mxu0 %v5775_v7  ;;  %v5399_v7 = vld [vmem:[%s8117_s0 + $0x7c] ss:$36 sps:$4 sm:$0xff]  }
  0x69   :  { %4200 = vmatpush3.bf16.msra.mxu1 %v5973_v42  ;;  %4173 = vmatprep.subr.bf16.mxu0 %v5787_v9  ;;  %v3754_v9 = vld [vmem:[%s8117_s0 + $0xbc] sm:$0xff] }
  0x6a   :  { %4201 = vmatprep.subr.bf16.mxu1 %v5985_v44  ;;  %v3769_v63 = vcombine.low %v3754_v9, %v3754_v9 }
  0x6c   :  { %1059 = vmatmul.mubr.bf16.gmra.mxu1 %v3767_v1  ;;  %4174 = vmatpush3.bf16.msra.mxu0 %v5799_v11  ;;  %v3755_v11 = vld [vmem:[%s8117_s0 + $0xc4] sm:$0xff] }
  0x6d   :  { %4202 = vmatpush3.bf16.msra.mxu1 %v5997_v46  ;;  %4175 = vmatprep.subr.bf16.mxu0 %v5811_v13  ;;  %v3770_v13 = vcombine.high %v3754_v9, %v3754_v9  ;;  %v3771_v4 = vcombine.low %v3755_v11, %v3755_v11  ;;  %v8279_v1 = vld [vmem:[#allocation6_spill] sm:$0xff]  ;;  %v5410_v9 = vld [vmem:[%s8117_s0 + $0xd4] ss:$0 sps:$4 sm:$0xff]  }
  0x6e   :  { %4203 = vmatprep.subr.bf16.mxu1 %v6009_v48  ;;  %1146 = vmatprep.mubr.bf16.mxu1 %v5401_v3  ;;  %v8280_v3 = vld [vmem:[#allocation7_spill] sm:$0xff] }
  0x70   :  { %4176 = vmatpush3.bf16.msra.mxu0 %v5823_v15  ;;  %v3772_v15 = vcombine.high %v3755_v11, %v3755_v11  ;;  %v3756_v11 = vld [vmem:[%s8117_s0 + $0xcc] sm:$0xff] }
  0x71   :  { %4204 = vmatpush3.bf16.msra.mxu1 %v6021_v50  ;;  %4177 = vmatprep.subr.bf16.mxu0 %v5835_v17 }
  0x72   :  { %4205 = vmatprep.subr.bf16.mxu1 %v6033_v52 }
  0x74   :  { %4178 = vmatpush3.bf16.msra.mxu0 %v5847_v19 }
  0x75   :  { %4206 = vmatpush3.bf16.msra.mxu1 %v6045_v54  ;;  %4179 = vmatprep.subr.bf16.mxu0 %v5859_v21 }
  0x76   :  { %4207 = vmatprep.subr.bf16.mxu1 %v6060_v59 }
  0x78   :  { %4180 = vmatpush3.bf16.msra.mxu0 %v5871_v23 }
  0x79   :  { %4208 = vmatpush3.bf16.msra.mxu1 %v6072_v61  ;;  %4181 = vmatprep.subr.bf16.mxu0 %v5883_v25 }
  0x7a   :  { %4209 = vmatprep.subr.bf16.mxu1 %v6088_v34 }
  0x7c   :  { %4182 = vmatpush3.bf16.msra.mxu0 %v5895_v27 }
  0x7d   :  { %4210 = vmatpush3.bf16.msra.mxu1 %v6099_v56  ;;  %4183 = vmatprep.subr.bf16.mxu0 %v5907_v29 }
  0x7e   :  { %4211 = vmatprep.subr.bf16.mxu1 %v6111_v58 }
  0x80   :  { %4184 = vmatpush3.bf16.msra.mxu0 %v5919_v31 }
  0x81   :  { %4212 = vmatpush3.bf16.msra.mxu1 %v6123_v32  ;;  %4225 = vmatprep.subr.bf16.mxu0 %v5943_v37 }
  0x82   :  { %5137 = vmatprep.subr.bf16.mxu1 %v6148_v60 }
  0x83   :  { %1099 = vmatmul.mubr.bf16.vlgmr.msra.gmra.mxu0 %v5396_v5  ;;  %v8281_v5 = vld [vmem:[#allocation8_spill] sm:$0xff] }
  0x84   :  { %1147 = vmatmul.mubr.bf16.vlgmr.msra.gmra.mxu1 %v5399_v7  ;;  %4226 = vmatpush3.bf16.msra.mxu0 %v5955_v39  ;;  %v5406_v7 = vld [vmem:[%s8117_s0 + $0x84] ss:$36 sps:$4 sm:$0xff]  }
  0x85   :  { %5138 = vmatpush3.bf16.msra.mxu1 %v6148_v60  ;;  %4227 = vmatprep.subr.bf16.mxu0 %v5967_v41 }
  0x86   :  { %5139 = vmatprep.subr.bf16.mxu1 %v6154_v33  ;;  %1106 = vmatprep.mubr.bf16.mxu0 %v3770_v13  ;;  %v8282_v13 = vld [vmem:[#allocation9_spill] sm:$0xff] }
  0x87   :  { %1154 = vmatprep.mubr.bf16.mxu1 %v3772_v15  ;;  %v6338_v15 = vld [vmem:[%s8116_s1 + $0x78] sm:$0xff]  }
  0x88   :  { %4228 = vmatpush3.bf16.msra.mxu0 %v5979_v43  ;;  %8283 = vst [vmem:[#allocation2_spill] sm:$0xff] %v6338_v15 }
  0x89   :  { %5140 = vmatpush3.bf16.msra.mxu1 %v6154_v33  ;;  %4229 = vmatprep.subr.bf16.mxu0 %v5991_v45 }
  0x8a   :  { %5141 = vmatprep.subr.bf16.mxu1 %v6170_v62 }
  0x8b   :  { %1107 = vmatmul.mubr.bf16.gmra.mxu0 %v3769_v63  ;;  %v6344_v63 = vld [vmem:[%s8116_s1 + $0xf8] sm:$0xff]  }
  0x8c   :  { %1155 = vmatmul.mubr.bf16.gmra.mxu1 %v3771_v4  ;;  %4230 = vmatpush3.bf16.msra.mxu0 %v6003_v47  ;;  %8284 = vst [vmem:[#allocation3_spill] sm:$0xff] %v6344_v63  ;;  %v3774_v4 = vcombine.high %v3756_v11, %v3756_v11 }
  0x8d   :  { %5142 = vmatpush3.bf16.msra.mxu1 %v6170_v62  ;;  %4231 = vmatprep.subr.bf16.mxu0 %v6015_v49 }
  0x8e   :  { %5143 = vmatprep.subr.bf16.mxu1 %v6179_v2  ;;  %1194 = vmatprep.mubr.bf16.mxu0 %v5408_v6  ;;  %v5418_v6 = vld [vmem:[%s8117_s0 + $0xe4] ss:$36 sps:$4 sm:$0xff]  }
  0x8f   :  { %5153 = vmatprep.mubr.bf16.mxu1 %v5409_v53  ;;  %v6353_v53 = vld [vmem:[%s8116_s1 + $0x38] sm:$0xff]  }
  0x90   :  { %4232 = vmatpush3.bf16.msra.mxu0 %v6027_v51 }
  0x91   :  { %5144 = vmatpush3.bf16.msra.mxu1 %v6179_v2  ;;  %4233 = vmatprep.subr.bf16.mxu0 %v8275_v55 }
  0x92   :  { %5145 = vmatprep.subr.bf16.mxu1 %v6194_v8 }
  0x94   :  { %4234 = vmatpush3.bf16.msra.mxu0 %v8276_v35 }
  0x95   :  { %5146 = vmatpush3.bf16.msra.mxu1 %v6194_v8  ;;  %4235 = vmatprep.subr.bf16.mxu0 %v8277_v0 }
  0x96   :  { %5147 = vmatprep.subr.bf16.mxu1 %v6203_v10 }
  0x98   :  { %4236 = vmatpush3.bf16.msra.mxu0 %v8278_v57 }
  0x99   :  { %5148 = vmatpush3.bf16.msra.mxu1 %v6203_v10  ;;  %4237 = vmatprep.subr.bf16.mxu0 %v8279_v1  ;;  %v6428_v10 = vld [vmem:[%s8116_s1 + $0x20] sm:$0xff]  }
  0x9a   :  { %5149 = vmatprep.subr.bf16.mxu1 %v6212_v12 }
  0x9c   :  { %4238 = vmatpush3.bf16.msra.mxu0 %v8280_v3 }
  0x9d   :  { %5150 = vmatpush3.bf16.msra.mxu1 %v6212_v12  ;;  %4239 = vmatprep.subr.bf16.mxu0 %v8281_v5  ;;  %v6383_v12 = vld [vmem:[%s8116_s1 + $0xb0] sm:$0xff]  }
  0x9e   :  { %5151 = vmatprep.subr.bf16.mxu1 %v6217_v14  ;;  %8287 = vst [vmem:[#allocation6_spill] sm:$0xff] %v6383_v12 }
  0xa0   :  { %4240 = vmatpush3.bf16.msra.mxu0 %v8282_v13 }
  0xa1   :  { %5152 = vmatpush3.bf16.msra.mxu1 %v6217_v14  ;;  %4263 = vmatprep.subr.bf16.mxu0 %v6338_v15  ;;  %v6359_v14 = vld [vmem:[%s8116_s1 + $0xb8] sm:$0xff]  }
  0xa2   :  { %4291 = vmatprep.subr.bf16.mxu1 %v6344_v63  ;;  %8285 = vst [vmem:[#allocation4_spill] sm:$0xff] %v6359_v14  ;;  %v6365_v63 = vld [vmem:[%s8116_s1 + $0x70] sm:$0xff]  }
  0xa3   :  { %1195 = vmatmul.mubr.bf16.vlgmr.msra.gmra.mxu0 %v5406_v7  ;;  %v6371_v7 = vld [vmem:[%s8116_s1 + $0xf0] sm:$0xff]  }
  0xa4   :  { %5154 = vmatmul.mubr.bf16.vlgmr.msra.gmra.mxu1 %v5410_v9  ;;  %4264 = vmatpush3.bf16.msra.mxu0 %v6353_v53  ;;  %8286 = vst [vmem:[#allocation5_spill] sm:$0xff] %v6371_v7  ;;  %v3773_v9 = vcombine.low %v3756_v11, %v3756_v11  ;;  %v6395_v11 = vld [vmem:[%s8116_s1 + $0xe8] sm:$0xff]  }
  0xa5   :  { %4292 = vmatpush3.bf16.msra.mxu1 %v6359_v14  ;;  %4265 = vmatprep.subr.bf16.mxu0 %v6365_v63  ;;  %v6377_v14 = vld [vmem:[%s8116_s1 + $0x30] sm:$0xff]   ;;  %8288 = vst [vmem:[#allocation7_spill] sm:$0xff] %v6395_v11 }
  0xa6   :  { %4293 = vmatprep.subr.bf16.mxu1 %v6371_v7  ;;  %1202 = vmatprep.mubr.bf16.mxu0 %v3774_v4  ;;  %v6389_v4 = vld [vmem:[%s8116_s1 + $0x68] sm:$0xff]  }
  0xa7   :  { %1435 = vmatprep.mubr.bf16.mxu1 %v5418_v6  ;;  %v5415_v6 = vld [vmem:[%s8117_s0 + $0xdc] ss:$36 sps:$4 sm:$0xff]   ;;  %v6410_v7 = vld [vmem:[%s8116_s1 + $0xa8] sm:$0xff]  }
  0xa8   :  { %4266 = vmatpush3.bf16.msra.mxu0 %v6377_v14  ;;  %8289 = vst [vmem:[#allocation8_spill] sm:$0xff] %v6410_v7 }
  0xa9   :  { %4294 = vmatpush3.bf16.msra.mxu1 %v6383_v12  ;;  %4267 = vmatprep.subr.bf16.mxu0 %v6389_v4  ;;  %v6404_v12 = vld [vmem:[%s8116_s1 + $0x28] sm:$0xff]  }
  0xaa   :  { %4295 = vmatprep.subr.bf16.mxu1 %v6395_v11  ;;  %v6416_v11 = vld [vmem:[%s8116_s1 + $0x60] sm:$0xff]  }
  0xab   :  { %1203 = vmatmul.mubr.bf16.gmra.mxu0 %v3773_v9  ;;  %v6422_v9 = vld [vmem:[%s8116_s1 + $0xe0] sm:$0xff]  }
  0xac   :  { %4268 = vmatpush3.bf16.msra.mxu0 %v6404_v12  ;;  %1387 = vmatprep.mubr.bf16.mxu0 %v5415_v6  ;;  %v6580_v6 = vld [vmem:[%s8116_s1 + $0x8] sm:$0xff]  }
  0xad   :  { %4296 = vmatpush3.bf16.msra.mxu1 %v6410_v7  ;;  %4269 = vmatprep.subr.bf16.mxu0 %v6416_v11  ;;  %v6434_v7 = vld [vmem:[%s8116_s1 + $0xa0] sm:$0xff]  }
  0xae   :  { %4297 = vmatprep.subr.bf16.mxu1 %v6422_v9 }
  0xb0   :  { %4270 = vmatpush3.bf16.msra.mxu0 %v6428_v10 }
  0xb1   :  { %4298 = vmatpush3.bf16.msra.mxu1 %v6434_v7  ;;  %4271 = vmatprep.subr.bf16.mxu0 %v5829_v16  ;;  %v5413_v16 = vld [vmem:[%s8117_s0 + $0xd8] ss:$36 sps:$4 sm:$0xff]  }
  0xb2   :  { %4299 = vmatprep.subr.bf16.mxu1 %v5835_v17  ;;  %v5416_v17 = vld [vmem:[%s8117_s0 + $0xe0] ss:$36 sps:$4 sm:$0xff]  }
  0xb4   :  { %4272 = vmatpush3.bf16.msra.mxu0 %v5841_v18  ;;  %v3786_v18 = vld [vmem:[%s8117_s0 + $0x120] sm:$0xff] }
  0xb5   :  { %4300 = vmatpush3.bf16.msra.mxu1 %v5847_v19  ;;  %4273 = vmatprep.subr.bf16.mxu0 %v5853_v20  ;;  %v3787_v19 = vld [vmem:[%s8117_s0 + $0x128] sm:$0xff]  ;;  %v3801_v20 = vcombine.high %v3786_v18, %v3786_v18 }
  0xb6   :  { %4301 = vmatprep.subr.bf16.mxu1 %v5859_v21  ;;  %v3803_v21 = vcombine.high %v3787_v19, %v3787_v19 }
  0xb8   :  { %4274 = vmatpush3.bf16.msra.mxu0 %v5865_v22  ;;  %v3800_v22 = vcombine.low %v3786_v18, %v3786_v18  ;;  %v6587_v18 = vld [vmem:[%s8116_s1 + $0x40] sm:$0xff]  }
  0xb9   :  { %4302 = vmatpush3.bf16.msra.mxu1 %v5871_v23  ;;  %4275 = vmatprep.subr.bf16.mxu0 %v5877_v24  ;;  %v3802_v23 = vcombine.low %v3787_v19, %v3787_v19  ;;  %v5425_v24 = vld [vmem:[%s8117_s0 + $0xec] ss:$36 sps:$4 sm:$0xff]  }
  0xba   :  { %4303 = vmatprep.subr.bf16.mxu1 %v5883_v25  ;;  %v5428_v25 = vld [vmem:[%s8117_s0 + $0xf4] ss:$36 sps:$4 sm:$0xff]  }
  0xbc   :  { %4276 = vmatpush3.bf16.msra.mxu0 %v5889_v26  ;;  %v5423_v26 = vld [vmem:[%s8117_s0 + $0xe8] ss:$36 sps:$4 sm:$0xff]  }
  0xbd   :  { %4304 = vmatpush3.bf16.msra.mxu1 %v5895_v27  ;;  %4277 = vmatprep.subr.bf16.mxu0 %v5901_v28  ;;  %v5426_v28 = vld [vmem:[%s8117_s0 + $0xf0] ss:$36 sps:$4 sm:$0xff]  }
  0xbe   :  { %4305 = vmatprep.subr.bf16.mxu1 %v5907_v29  ;;  %v3788_v29 = vld [vmem:[%s8117_s0 + $0x130] sm:$0xff] }
  0xc0   :  { %4278 = vmatpush3.bf16.msra.mxu0 %v5913_v30  ;;  %v3789_v30 = vld [vmem:[%s8117_s0 + $0x138] sm:$0xff] }
  0xc1   :  { %4306 = vmatpush3.bf16.msra.mxu1 %v5919_v31  ;;  %4319 = vmatprep.subr.bf16.mxu0 %v5938_v36 }
  0xc2   :  { %4347 = vmatprep.subr.bf16.mxu1 %v5943_v37 }
  0xc3   :  { %1388 = vmatmul.mubr.bf16.vlgmr.msra.gmra.mxu0 %v5413_v16 }
  0xc4   :  { %1436 = vmatmul.mubr.bf16.vlgmr.msra.gmra.mxu1 %v5416_v17  ;;  %4320 = vmatpush3.bf16.msra.mxu0 %v5949_v38  ;;  %v8292_v17 = vld [vmem:[#allocation12_spill] sm:$0xff] }
  0xc5   :  { %4348 = vmatpush3.bf16.msra.mxu1 %v5955_v39  ;;  %4321 = vmatprep.subr.bf16.mxu0 %v5961_v40  ;;  %v3805_v39 = vcombine.high %v3788_v29, %v3788_v29  ;;  %v3807_v40 = vcombine.high %v3789_v30, %v3789_v30 }
  0xc6   :  { %4349 = vmatprep.subr.bf16.mxu1 %v5967_v41  ;;  %1395 = vmatprep.mubr.bf16.mxu0 %v3801_v20 }
  0xc7   :  { %1443 = vmatprep.mubr.bf16.mxu1 %v3803_v21  ;;  %v5434_v21 = vld [vmem:[%s8117_s0 + $0x140] ss:$0 sps:$4 sm:$0xff]  }
  0xc8   :  { %4322 = vmatpush3.bf16.msra.mxu0 %v5973_v42 }
  0xc9   :  { %4350 = vmatpush3.bf16.msra.mxu1 %v5979_v43  ;;  %4323 = vmatprep.subr.bf16.mxu0 %v5985_v44 }
  0xca   :  { %4351 = vmatprep.subr.bf16.mxu1 %v5991_v45 }
  0xcb   :  { %1396 = vmatmul.mubr.bf16.gmra.mxu0 %v3800_v22  ;;  %v5435_v22 = vld [vmem:[%s8117_s0 + $0x144] ss:$36 sps:$4 sm:$0xff]  }
  0xcc   :  { %1444 = vmatmul.mubr.bf16.gmra.mxu1 %v3802_v23  ;;  %4324 = vmatpush3.bf16.msra.mxu0 %v5997_v46  ;;  %v3819_v23 = vld [vmem:[%s8117_s0 + $0x18c] sm:$0xff] }
  0xcd   :  { %4352 = vmatpush3.bf16.msra.mxu1 %v6003_v47  ;;  %4325 = vmatprep.subr.bf16.mxu0 %v6009_v48 }
  0xce   :  { %4353 = vmatprep.subr.bf16.mxu1 %v6015_v49  ;;  %1483 = vmatprep.mubr.bf16.mxu0 %v5425_v24  ;;  %v3804_v49 = vcombine.low %v3788_v29, %v3788_v29  ;;  %v6603_v24 = vld [vmem:[%s8116_s1] sm:$0xff]   ;;  %v3834_v29 = vcombine.high %v3819_v23, %v3819_v23 }
  0xcf   :  { %1531 = vmatprep.mubr.bf16.mxu1 %v5428_v25 }
  0xd0   :  { %4326 = vmatpush3.bf16.msra.mxu0 %v6021_v50  ;;  %v3806_v50 = vcombine.low %v3789_v30, %v3789_v30  ;;  %v5442_v30 = vld [vmem:[%s8117_s0 + $0x150] ss:$36 sps:$4 sm:$0xff]  }
  0xd1   :  { %4354 = vmatpush3.bf16.msra.mxu1 %v6027_v51  ;;  %4327 = vmatprep.subr.bf16.mxu0 %v6033_v52  ;;  %v5433_v52 = vld [vmem:[%s8117_s0 + $0xf8] ss:$36 sps:$4 sm:$0xff]  }
  0xd2   :  { %4355 = vmatprep.subr.bf16.mxu1 %v8275_v55 }
  0xd4   :  { %4328 = vmatpush3.bf16.msra.mxu0 %v6045_v54  ;;  %v5437_v54 = vld [vmem:[%s8117_s0 + $0x148] ss:$36 sps:$4 sm:$0xff]  }
  0xd5   :  { %4356 = vmatpush3.bf16.msra.mxu1 %v8276_v35  ;;  %4329 = vmatprep.subr.bf16.mxu0 %v6060_v59  ;;  %v6545_v59 = vld [vmem:[%s8116_s1 + $0x58] sm:$0xff]   ;;  %v6566_v35 = vld [vmem:[%s8116_s1 + $0x10] sm:$0xff]  }
  0xd6   :  { %4357 = vmatprep.subr.bf16.mxu1 %v8277_v0 }
  0xd8   :  { %4330 = vmatpush3.bf16.msra.mxu0 %v6072_v61  ;;  %v6552_v61 = vld [vmem:[%s8116_s1 + $0x18] sm:$0xff]  }
  0xd9   :  { %4358 = vmatpush3.bf16.msra.mxu1 %v8278_v57  ;;  %4331 = vmatprep.subr.bf16.mxu0 %v6088_v34  ;;  %v8291_v57 = vld [vmem:[#allocation11_spill] sm:$0xff] }
  0xda   :  { %4359 = vmatprep.subr.bf16.mxu1 %v8279_v1  ;;  %v6573_v1 = vld [vmem:[%s8116_s1 + $0x48] sm:$0xff]  }
  0xdc   :  { %4332 = vmatpush3.bf16.msra.mxu0 %v6099_v56  ;;  %v8290_v56 = vld [vmem:[#allocation10_spill] sm:$0xff] }
  0xdd   :  { %4360 = vmatpush3.bf16.msra.mxu1 %v8280_v3  ;;  %4333 = vmatprep.subr.bf16.mxu0 %v6111_v58  ;;  %v6559_v58 = vld [vmem:[%s8116_s1 + $0x50] sm:$0xff]  }
  0xde   :  { %4361 = vmatprep.subr.bf16.mxu1 %v8281_v5 }
  0xe0   :  { %4334 = vmatpush3.bf16.msra.mxu0 %v6123_v32 }
  0xe1   :  { %4362 = vmatpush3.bf16.msra.mxu1 %v8282_v13  ;;  %5157 = vmatprep.subr.bf16.mxu0 %v6148_v60 }
  0xe2   :  { %4385 = vmatprep.subr.bf16.mxu1 %v6338_v15 }
  0xe3   :  { %v4035_v27 = vpop.f32.mrf.mxu0  ;;  %1484 = vmatmul.mubr.bf16.vlgmr.msra.gmra.mxu0 %v5423_v26  ;;  %v8293_v26 = vld [vmem:[#allocation3_spill] sm:$0xff] }
  0xe4   :  { %v4063_v31 = vpop.f32.mrf.mxu1  ;;  %1532 = vmatmul.mubr.bf16.vlgmr.msra.gmra.mxu1 %v5426_v28  ;;  %5158 = vmatpush3.bf16.msra.mxu0 %v6148_v60 }
  0xe5   :  { %v4036_v36 = vpop.f32.mrf.mxu0  ;;  %4386 = vmatpush3.bf16.msra.mxu1 %v6353_v53  ;;  %5159 = vmatprep.subr.bf16.mxu0 %v6154_v33 }
  0xe6   :  { %v4037_v37 = vadd.f32 %v4036_v36, %v4035_v27  ;;  %v4064_v38 = vpop.f32.mrf.mxu1  ;;  %4387 = vmatprep.subr.bf16.mxu1 %v6365_v63  ;;  %1491 = vmatprep.mubr.bf16.mxu0 %v3805_v39  ;;  %v6610_v27 = vld [vmem:[%s8116_s1 + $0x178] sm:$0xff]   ;;  %v8294_v36 = vld [vmem:[#allocation4_spill] sm:$0xff] }
  0xe7   :  { %v4065_v41 = vadd.f32 %v4064_v38, %v4063_v31  ;;  %v4038_v42 = vpop.f32.mrf.mxu0  ;;  %1539 = vmatprep.mubr.bf16.mxu1 %v3807_v40 }
  0xe8   :  { %v4066_v43 = vpop.f32.mrf.mxu1  ;;  %5160 = vmatpush3.bf16.msra.mxu0 %v6154_v33 }
  0xe9   :  { %v6519_v44 = vadd.f32 %v4065_v41, %v4037_v37  ;;  %v4039_v45 = vpop.f32.mrf.mxu0  ;;  %4388 = vmatpush3.bf16.msra.mxu1 %v6377_v14  ;;  %5161 = vmatprep.subr.bf16.mxu0 %v6170_v62  ;;  %v6620_v37 = vld [vmem:[%s8116_s1 + $0x138] sm:$0xff]  }
  0xea   :  { %v4040_v46 = vadd.f32 %v4039_v45, %v4038_v42  ;;  %v4067_v47 = vpop.f32.mrf.mxu1  ;;  %4389 = vmatprep.subr.bf16.mxu1 %v6389_v4  ;;  %v8295_v41 = vld [vmem:[#allocation5_spill] sm:$0xff]  ;;  %v6627_v42 = vld [vmem:[%s8116_s1 + $0x170] sm:$0xff]  }
  0xeb   :  { %v4068_v48 = vadd.f32 %v4067_v47, %v4066_v43  ;;  %1492 = vmatmul.mubr.bf16.gmra.mxu0 %v3804_v49  ;;  %v4041_v34 = vpop.f32.mrf.mxu0  ;;  %v8296_v49 = vld [vmem:[#allocation6_spill] sm:$0xff] }
  0xec   :  { %1540 = vmatmul.mubr.bf16.gmra.mxu1 %v3806_v50  ;;  %5162 = vmatpush3.bf16.msra.mxu0 %v6170_v62  ;;  %v4069_v3 = vpop.f32.mrf.mxu1  ;;  %v6635_v50 = vld [vmem:[%s8116_s1 + $0x130] sm:$0xff]  }
  0xed   :  { %v6525_v51 = vadd.f32 %v4068_v48, %v4040_v46  ;;  %4390 = vmatpush3.bf16.msra.mxu1 %v6404_v12  ;;  %5163 = vmatprep.subr.bf16.mxu0 %v6179_v2  ;;  %v4042_v32 = vpop.f32.mrf.mxu0  ;;  %v3833_v48 = vcombine.low %v3819_v23, %v3819_v23 }
  0xee   :  { %4391 = vmatprep.subr.bf16.mxu1 %v6416_v11  ;;  %5173 = vmatprep.mubr.bf16.mxu0 %v5433_v52  ;;  %v4043_v55 = vadd.f32 %v4042_v32, %v4041_v34  ;;  %v4070_v13 = vpop.f32.mrf.mxu1  ;;  %v8297_v32 = vld [vmem:[#allocation7_spill] sm:$0xff] }
  0xef   :  { %1724 = vmatprep.mubr.bf16.mxu1 %v5437_v54  ;;  %v4044_v0 = vpop.f32.mrf.mxu0  ;;  %v4071_v16 = vadd.f32 %v4070_v13, %v4069_v3 }
  0xf0   :  { %5164 = vmatpush3.bf16.msra.mxu0 %v6179_v2  ;;  %v4072_v19 = vpop.f32.mrf.mxu1 }
  0xf1   :  { %4392 = vmatpush3.bf16.msra.mxu1 %v6428_v10  ;;  %5165 = vmatprep.subr.bf16.mxu0 %v6194_v8  ;;  %v4045_v5 = vpop.f32.mrf.mxu0  ;;  %v775_v20 = vadd.f32 %v4071_v16, %v4043_v55  ;;  %v8298_v19 = vld [vmem:[#allocation8_spill] sm:$0xff] }
  0xf2   :  { %4393 = vmatprep.subr.bf16.mxu1 %v6545_v59  ;;  %v4073_v25 = vpop.f32.mrf.mxu1  ;;  %v5445_v5 = vld [vmem:[%s8117_s0 + $0x158] ss:$36 sps:$4 sm:$0xff]  }
  0xf4   :  { %5166 = vmatpush3.bf16.msra.mxu0 %v6194_v8 }
  0xf5   :  { %4394 = vmatpush3.bf16.msra.mxu1 %v6552_v61  ;;  %5167 = vmatprep.subr.bf16.mxu0 %v8290_v56 }
  0xf6   :  { %4395 = vmatprep.subr.bf16.mxu1 %v6559_v58 }
  0xf8   :  { %5168 = vmatpush3.bf16.msra.mxu0 %v8290_v56 }
  0xf9   :  { %4396 = vmatpush3.bf16.msra.mxu1 %v6566_v35  ;;  %5169 = vmatprep.subr.bf16.mxu0 %v8291_v57 }
  0xfa   :  { %4397 = vmatprep.subr.bf16.mxu1 %v6573_v1 }
  0xfc   :  { %5170 = vmatpush3.bf16.msra.mxu0 %v8291_v57 }
  0xfd   :  { %4398 = vmatpush3.bf16.msra.mxu1 %v6580_v6  ;;  %5171 = vmatprep.subr.bf16.mxu0 %v8292_v17 }
  0xfe   :  { %4399 = vmatprep.subr.bf16.mxu1 %v6587_v18 }
 0x100   :  { %5172 = vmatpush3.bf16.msra.mxu0 %v8292_v17 }
 0x101   :  { %4400 = vmatpush3.bf16.msra.mxu1 %v6603_v24  ;;  %4413 = vmatprep.subr.bf16.mxu0 %v8293_v26 }
 0x102   :  { %4441 = vmatprep.subr.bf16.mxu1 %v6610_v27 }
 0x103   :  { %v4091_v28 = vpop.f32.mrf.mxu0  ;;  %5174 = vmatmul.mubr.bf16.vlgmr.msra.gmra.mxu0 %v5434_v21  ;;  %v6655_v21 = vld [vmem:[%s8116_s1 + $0x128] sm:$0xff]  }
 0x104   :  { %1725 = vmatmul.mubr.bf16.vlgmr.msra.gmra.mxu1 %v5435_v22  ;;  %v4119_v31 = vpop.f32.mrf.mxu1  ;;  %4414 = vmatpush3.bf16.msra.mxu0 %v8294_v36 }
 0x105   :  { %4442 = vmatpush3.bf16.msra.mxu1 %v6620_v37  ;;  %v4092_v38 = vpop.f32.mrf.mxu0  ;;  %4415 = vmatprep.subr.bf16.mxu0 %v8295_v41 }
 0x106   :  { %v4093_v39 = vadd.f32 %v4092_v38, %v4091_v28  ;;  %v4120_v40 = vpop.f32.mrf.mxu1  ;;  %4443 = vmatprep.subr.bf16.mxu1 %v6627_v42  ;;  %1732 = vmatprep.mubr.bf16.mxu1 %v3834_v29 }
 0x107   :  { %v4094_v43 = vpop.f32.mrf.mxu0  ;;  %v4121_v45 = vadd.f32 %v4120_v40, %v4119_v31  ;;  %1772 = vmatprep.mubr.bf16.mxu0 %v5442_v30 }
 0x108   :  { %v815_v46 = vadd.f32 %v4093_v39, %v6519_v44  ;;  %v4122_v47 = vpop.f32.mrf.mxu1  ;;  %4416 = vmatpush3.bf16.msra.mxu0 %v8296_v49  ;;  %v6642_v44 = vld [vmem:[%s8116_s1 + $0x168] sm:$0xff]   ;;  %v6671_v39 = vld [vmem:[%s8116_s1 + $0x120] sm:$0xff]  }
 0x109   :  { %4444 = vmatpush3.bf16.msra.mxu1 %v6635_v50  ;;  %v4095_v52 = vpop.f32.mrf.mxu0  ;;  %4417 = vmatprep.subr.bf16.mxu0 %v8297_v32  ;;  %8300 = vst [vmem:[#allocation10_spill] sm:$0xff] %v6671_v39 }
 0x10a   :  { %v4096_v54 = vadd.f32 %v4095_v52, %v4094_v43  ;;  %v4123_v34 = vpop.f32.mrf.mxu1  ;;  %4445 = vmatprep.subr.bf16.mxu1 %v6642_v44  ;;  %v6645_v55 = vadd.f32 %v4121_v45, %v815_v46  ;;  %v6677_v43 = vld [vmem:[%s8116_s1 + $0xd8] sm:$0xff]   ;;  %v6701_v52 = vld [vmem:[%s8116_s1 + $0xd0] sm:$0xff]  }
 0x10b   :  { %v4097_v0 = vpop.f32.mrf.mxu0  ;;  %v4124_v3 = vadd.f32 %v4123_v34, %v4122_v47  ;;  %v6689_v47 = vld [vmem:[%s8116_s1 + $0x98] sm:$0xff]   ;;  %v6713_v34 = vld [vmem:[%s8116_s1 + $0x90] sm:$0xff]  }
 0x10c   :  { %v818_v13 = vadd.f32 %v4096_v54, %v6525_v51  ;;  %v4125_v16 = vpop.f32.mrf.mxu1  ;;  %1733 = vmatmul.mubr.bf16.gmra.mxu1 %v3833_v48  ;;  %4418 = vmatpush3.bf16.msra.mxu0 %v8298_v19  ;;  %v6662_v51 = vld [vmem:[%s8116_s1 + $0x160] sm:$0xff]   ;;  %v6695_v48 = vld [vmem:[%s8116_s1 + $0x118] sm:$0xff]   ;;  %v6707_v54 = vld [vmem:[%s8116_s1 + $0x150] sm:$0xff]  }
 0x10d   :  { %4446 = vmatpush3.bf16.msra.mxu1 %v6655_v21  ;;  %v4098_v22 = vpop.f32.mrf.mxu0  ;;  %4419 = vmatprep.subr.bf16.mxu0 %v6422_v9  ;;  %8302 = vst [vmem:[#allocation12_spill] sm:$0xff] %v6695_v48  ;;  %8303 = vst [vmem:[#allocation3_spill] sm:$0xff] %v6707_v54 }
 0x10e   :  { %v4099_v23 = vadd.f32 %v4098_v22, %v4097_v0  ;;  %v4126_v25 = vpop.f32.mrf.mxu1  ;;  %4447 = vmatprep.subr.bf16.mxu1 %v6662_v51  ;;  %v6665_v28 = vadd.f32 %v4124_v3, %v818_v13  ;;  %1820 = vmatprep.mubr.bf16.mxu1 %v5445_v5  ;;  %v6719_v0 = vld [vmem:[%s8116_s1 + $0x110] sm:$0xff]   ;;  %v6725_v3 = vld [vmem:[%s8116_s1 + $0xc8] sm:$0xff]   ;;  %v6749_v22 = vld [vmem:[%s8116_s1 + $0xc0] sm:$0xff]  }
 0x10f   :  { %v4127_v29 = vadd.f32 %v4126_v25, %v4125_v16  ;;  %v4100_v30 = vpop.f32.mrf.mxu0  ;;  %8304 = vst [vmem:[#allocation4_spill] sm:$0xff] %v6719_v0  ;;  %v6731_v5 = vld [vmem:[%s8116_s1 + $0x148] sm:$0xff]  }
 0x110   :  { %8299 = vst [vmem:[#allocation9_spill] sm:$0xff] %v6665_v28  ;;  %v823_v31 = vadd.f32 %v4099_v23, %v775_v20  ;;  %v4128_v38 = vpop.f32.mrf.mxu1  ;;  %4420 = vmatpush3.bf16.msra.mxu0 %v6434_v7  ;;  %v6683_v20 = vld [vmem:[%s8116_s1 + $0x158] sm:$0xff]   ;;  %8305 = vst [vmem:[#allocation5_spill] sm:$0xff] %v6731_v5  ;;  %v6737_v13 = vld [vmem:[%s8116_s1 + $0x88] sm:$0xff]  }
 0x111   :  { %4448 = vmatpush3.bf16.msra.mxu1 %v6671_v39  ;;  %v4101_v40 = vpop.f32.mrf.mxu0  ;;  %4421 = vmatprep.subr.bf16.mxu0 %v6677_v43  ;;  %8301 = vst [vmem:[#allocation11_spill] sm:$0xff] %v6683_v20  ;;  %v6743_v16 = vld [vmem:[%s8116_s1 + $0x108] sm:$0xff]   ;;  %v6755_v23 = vld [vmem:[%s8116_s1 + $0x140] sm:$0xff]   ;;  %v3820_v30 = vld [vmem:[%s8117_s0 + $0x194] sm:$0xff] }
 0x112   :  { %4449 = vmatprep.subr.bf16.mxu1 %v6683_v20  ;;  %v871_v45 = vadd.f32 %v4127_v29, %v823_v31  ;;  %v4129_v46 = vpop.f32.mrf.mxu1  ;;  %8306 = vst [vmem:[#allocation6_spill] sm:$0xff] %v6743_v16  ;;  %8307 = vst [vmem:[#allocation7_spill] sm:$0xff] %v6755_v23  ;;  %v5440_v25 = vld [vmem:[%s8117_s0 + $0x14c] ss:$36 sps:$4 sm:$0xff]   ;;  %v5443_v29 = vld [vmem:[%s8117_s0 + $0x154] ss:$36 sps:$4 sm:$0xff]  }
 0x113   :  { %v3821_v31 = vld [vmem:[%s8117_s0 + $0x19c] sm:$0xff]  ;;  %v6820_v28 = vld [vmem:[%s8116_s1 + $0x1b0] sm:$0xff]  }
 0x114   :  { %4422 = vmatpush3.bf16.msra.mxu0 %v6689_v47  ;;  %v6773_v38 = vld [vmem:[%s8116_s1 + $0x80] sm:$0xff]   ;;  %v6785_v46 = vld [vmem:[%s8116_s1 + $0x1f8] sm:$0xff]   ;;  %v3837_v20 = vcombine.low %v3821_v31, %v3821_v31  ;;  %8311 = vst [vmem:[#allocation15_spill] sm:$0xff] %v6820_v28 }
 0x115   :  { %4450 = vmatpush3.bf16.msra.mxu1 %v6695_v48  ;;  %4423 = vmatprep.subr.bf16.mxu0 %v6701_v52  ;;  %v6779_v40 = vld [vmem:[%s8116_s1 + $0x100] sm:$0xff]   ;;  %v6800_v48 = vld [vmem:[%s8116_s1 + $0x238] sm:$0xff]  }
 0x116   :  { %4451 = vmatprep.subr.bf16.mxu1 %v6707_v54  ;;  %8308 = vst [vmem:[#allocation8_spill] sm:$0xff] %v6779_v40  ;;  %8310 = vst [vmem:[#allocation14_spill] sm:$0xff] %v6800_v48 }
 0x118   :  { %4424 = vmatpush3.bf16.msra.mxu0 %v6713_v34 }
 0x119   :  { %4452 = vmatpush3.bf16.msra.mxu1 %v6719_v0  ;;  %4425 = vmatprep.subr.bf16.mxu0 %v6725_v3 }
 0x11a   :  { %4453 = vmatprep.subr.bf16.mxu1 %v6731_v5 }
 0x11c   :  { %4426 = vmatpush3.bf16.msra.mxu0 %v6737_v13 }
 0x11d   :  { %4454 = vmatpush3.bf16.msra.mxu1 %v6743_v16  ;;  %4427 = vmatprep.subr.bf16.mxu0 %v6749_v22  ;;  %v3838_v16 = vcombine.high %v3821_v31, %v3821_v31 }
 0x11e   :  { %4455 = vmatprep.subr.bf16.mxu1 %v6755_v23  ;;  %v3836_v23 = vcombine.high %v3820_v30, %v3820_v30 }
 0x120   :  { %4428 = vmatpush3.bf16.msra.mxu0 %v6773_v38 }
 0x121   :  { %4456 = vmatpush3.bf16.msra.mxu1 %v6779_v40  ;;  %4469 = vmatprep.subr.bf16.mxu0 %v6785_v46  ;;  %v6794_v40 = vld [vmem:[%s8116_s1 + $0x1b8] sm:$0xff]  }
 0x122   :  { %5177 = vmatprep.subr.bf16.mxu1 %v6148_v60 }
 0x123   :  { %v5135_v5 = vpop.f32.mrf.mxu0  ;;  %1773 = vmatmul.mubr.bf16.vlgmr.msra.gmra.mxu0 %v5440_v25 }
 0x124   :  { %1821 = vmatmul.mubr.bf16.vlgmr.msra.gmra.mxu1 %v5443_v29  ;;  %v4157_v0 = vpop.f32.mrf.mxu1  ;;  %v6789_v54 = vadd.f32 %v5135_v5, %v871_v45  ;;  %4470 = vmatpush3.bf16.msra.mxu0 %v6794_v40  ;;  %v6806_v45 = vld [vmem:[%s8116_s1 + $0x1f0] sm:$0xff]  }
 0x125   :  { %5178 = vmatpush3.bf16.msra.mxu1 %v6800_v48  ;;  %v910_v60 = vpop.f32.mrf.mxu0  ;;  %4471 = vmatprep.subr.bf16.mxu0 %v6806_v45  ;;  %v3835_v48 = vcombine.low %v3820_v30, %v3820_v30  ;;  %v6847_v30 = vld [vmem:[%s8116_s1 + $0x1a8] sm:$0xff]  }
 0x126   :  { %8309 = vst [vmem:[#allocation13_spill] sm:$0xff] %v6789_v54  ;;  %5179 = vmatprep.subr.bf16.mxu1 %v6154_v33  ;;  %v4158_v5 = vpop.f32.mrf.mxu1  ;;  %v6811_v25 = vadd.f32 %v910_v60, %v6645_v55  ;;  %1780 = vmatprep.mubr.bf16.mxu0 %v3836_v23  ;;  %v6826_v33 = vld [vmem:[%s8116_s1 + $0x230] sm:$0xff]   ;;  %v6832_v55 = vld [vmem:[%s8116_s1 + $0x1e8] sm:$0xff]   ;;  %8314 = vst [vmem:[#allocation18_spill] sm:$0xff] %v6847_v30 }
 0x127   :  { %1828 = vmatprep.mubr.bf16.mxu1 %v3838_v16  ;;  %v6813_v29 = vadd.f32 %v4158_v5, %v4157_v0  ;;  %v5136_v54 = vpop.f32.mrf.mxu0  ;;  %8312 = vst [vmem:[#allocation16_spill] sm:$0xff] %v6826_v33  ;;  %8313 = vst [vmem:[#allocation17_spill] sm:$0xff] %v6832_v55  ;;  %v5452_v0 = vld [vmem:[%s8117_s0 + $0x160] ss:$36 sps:$4 sm:$0xff]  }
 0x128   :  { %v6815_v39 = vpop.f32.mrf.mxu1  ;;  %4472 = vmatpush3.bf16.msra.mxu0 %v6820_v28  ;;  %v5453_v16 = vld [vmem:[%s8117_s0 + $0x164] ss:$36 sps:$4 sm:$0xff]  }
 0x129   :  { %5180 = vmatpush3.bf16.msra.mxu1 %v6826_v33  ;;  %4473 = vmatprep.subr.bf16.mxu0 %v6832_v55  ;;  %v6868_v5 = vld [vmem:[%s8116_s1 + $0x1a0] sm:$0xff]  }
 0x12a   :  { %5181 = vmatprep.subr.bf16.mxu1 %v6170_v62  ;;  %v6836_v54 = vpop.f32.mrf.mxu1  ;;  %v6853_v62 = vld [vmem:[%s8116_s1 + $0x228] sm:$0xff]   ;;  %8317 = vst [vmem:[#allocation21_spill] sm:$0xff] %v6868_v5  ;;  %v6933_v33 = vld [vmem:[%s8116_s1 + $0x180] sm:$0xff]  }
 0x12b   :  { %1781 = vmatmul.mubr.bf16.gmra.mxu0 %v3835_v48  ;;  %8315 = vst [vmem:[#allocation19_spill] sm:$0xff] %v6853_v62  ;;  %v6859_v48 = vld [vmem:[%s8116_s1 + $0x1e0] sm:$0xff]   ;;  %8325 = vst [vmem:[#allocation29_spill] sm:$0xff] %v6933_v33 }
 0x12c   :  { %1829 = vmatmul.mubr.bf16.gmra.mxu1 %v3837_v20  ;;  %v4163_v23 = vpop.f32.mrf.mxu1  ;;  %4474 = vmatpush3.bf16.msra.mxu0 %v6847_v30  ;;  %8316 = vst [vmem:[#allocation20_spill] sm:$0xff] %v6859_v48 }
 0x12d   :  { %5182 = vmatpush3.bf16.msra.mxu1 %v6853_v62  ;;  %4475 = vmatprep.subr.bf16.mxu0 %v6859_v48  ;;  %v6875_v62 = vld [vmem:[%s8116_s1 + $0x1d8] sm:$0xff]  }
 0x12e   :  { %5183 = vmatprep.subr.bf16.mxu1 %v6179_v2  ;;  %v4164_v20 = vpop.f32.mrf.mxu1  ;;  %1868 = vmatprep.mubr.bf16.mxu0 %v5452_v0  ;;  %8318 = vst [vmem:[#allocation22_spill] sm:$0xff] %v6875_v62 }
 0x12f   :  { %v6863_v31 = vadd.f32 %v4164_v20, %v4163_v23  ;;  %5193 = vmatprep.mubr.bf16.mxu1 %v5453_v16  ;;  %v6882_v16 = vld [vmem:[%s8116_s1 + $0x198] sm:$0xff]   ;;  %v6896_v23 = vld [vmem:[%s8116_s1 + $0x190] sm:$0xff]   ;;  %v6910_v20 = vld [vmem:[%s8116_s1 + $0x188] sm:$0xff]  }
 0x130   :  { %v4166_v60 = vpop.f32.mrf.mxu1  ;;  %4476 = vmatpush3.bf16.msra.mxu0 %v6868_v5  ;;  %8319 = vst [vmem:[#allocation23_spill] sm:$0xff] %v6882_v16  ;;  %8321 = vst [vmem:[#allocation25_spill] sm:$0xff] %v6896_v23 }
 0x131   :  { %5184 = vmatpush3.bf16.msra.mxu1 %v6179_v2  ;;  %4477 = vmatprep.subr.bf16.mxu0 %v6875_v62  ;;  %v6889_v2 = vld [vmem:[%s8116_s1 + $0x1d0] sm:$0xff]   ;;  %8323 = vst [vmem:[#allocation27_spill] sm:$0xff] %v6910_v20  ;;  %v5450_v60 = vld [vmem:[%s8117_s0 + $0x15c] ss:$36 sps:$4 sm:$0xff]  }
 0x132   :  { %5185 = vmatprep.subr.bf16.mxu1 %v6194_v8  ;;  %v4167_v0 = vpop.f32.mrf.mxu1  ;;  %8320 = vst [vmem:[#allocation24_spill] sm:$0xff] %v6889_v2 }
 0x133   :  { %v5454_v0 = vld [vmem:[%s8117_s0 + $0x1ac] ss:$0 sps:$4 sm:$0xff]  }
 0x134   :  { %4478 = vmatpush3.bf16.msra.mxu0 %v6882_v16 }
 0x135   :  { %5186 = vmatpush3.bf16.msra.mxu1 %v6194_v8  ;;  %4479 = vmatprep.subr.bf16.mxu0 %v6889_v2  ;;  %v6903_v8 = vld [vmem:[%s8116_s1 + $0x1c8] sm:$0xff]  }
 0x136   :  { %5187 = vmatprep.subr.bf16.mxu1 %v8290_v56  ;;  %8322 = vst [vmem:[#allocation26_spill] sm:$0xff] %v6903_v8 }
 0x138   :  { %4480 = vmatpush3.bf16.msra.mxu0 %v6896_v23 }
 0x139   :  { %5188 = vmatpush3.bf16.msra.mxu1 %v8290_v56  ;;  %4481 = vmatprep.subr.bf16.mxu0 %v6903_v8  ;;  %v6917_v56 = vld [vmem:[%s8116_s1 + $0x1c0] sm:$0xff]  }
 0x13a   :  { %5189 = vmatprep.subr.bf16.mxu1 %v8291_v57  ;;  %8324 = vst [vmem:[#allocation28_spill] sm:$0xff] %v6917_v56  ;;  %v5462_v8 = vld [vmem:[%s8117_s0 + $0x1bc] ss:$36 sps:$4 sm:$0xff]  }
 0x13c   :  { %4482 = vmatpush3.bf16.msra.mxu0 %v6910_v20 }
 0x13d   :  { %5190 = vmatpush3.bf16.msra.mxu1 %v8291_v57  ;;  %4483 = vmatprep.subr.bf16.mxu0 %v6917_v56  ;;  %v3822_v57 = vld [vmem:[%s8117_s0 + $0x1a4] sm:$0xff]  ;;  %v6937_v56 = vpop.f32.mrf.mxu0 }
 0x13e   :  { %5191 = vmatprep.subr.bf16.mxu1 %v8292_v17  ;;  %v3840_v20 = vcombine.high %v3822_v57, %v3822_v57  ;;  %v3839_v5 = vcombine.low %v3822_v57, %v3822_v57 }
 0x140   :  { %4484 = vmatpush3.bf16.msra.mxu0 %v6933_v33 }
 0x141   :  { %5192 = vmatpush3.bf16.msra.mxu1 %v8292_v17  ;;  %4507 = vmatprep.subr.bf16.mxu0 %v6338_v15 }
 0x142   :  { %4535 = vmatprep.subr.bf16.mxu1 %v8293_v26 }
 0x143   :  { %v4185_v23 = vpop.f32.mrf.mxu0  ;;  %1869 = vmatmul.mubr.bf16.vlgmr.msra.gmra.mxu0 %v5450_v60 }
 0x144   :  { %5194 = vmatmul.mubr.bf16.vlgmr.msra.gmra.mxu1 %v5454_v0  ;;  %v4213_v2 = vpop.f32.mrf.mxu1  ;;  %4508 = vmatpush3.bf16.msra.mxu0 %v6353_v53 }
 0x145   :  { %4536 = vmatpush3.bf16.msra.mxu1 %v8294_v36  ;;  %v4186_v17 = vpop.f32.mrf.mxu0  ;;  %4509 = vmatprep.subr.bf16.mxu0 %v6365_v63 }
 0x146   :  { %v4214_v33 = vpop.f32.mrf.mxu1  ;;  %4537 = vmatprep.subr.bf16.mxu1 %v8295_v41  ;;  %v4187_v26 = vadd.f32 %v4186_v17, %v4185_v23  ;;  %1876 = vmatprep.mubr.bf16.mxu0 %v3840_v20  ;;  %v4162_v41 = vadd.f32 %v6836_v54, %v6815_v39 }
 0x147   :  { %v4215_v15 = vadd.f32 %v4214_v33, %v4213_v2  ;;  %2109 = vmatprep.mubr.bf16.mxu1 %v5462_v8  ;;  %v4188_v16 = vpop.f32.mrf.mxu0 }
 0x148   :  { %v4216_v62 = vpop.f32.mrf.mxu1  ;;  %v1101_v60 = vadd.f32 %v4187_v26, %v6813_v29  ;;  %4510 = vmatpush3.bf16.msra.mxu0 %v6377_v14  ;;  %v5459_v29 = vld [vmem:[%s8117_s0 + $0x1b4] ss:$36 sps:$4 sm:$0xff]  }
 0x149   :  { %4538 = vmatpush3.bf16.msra.mxu1 %v8296_v49  ;;  %v4189_v36 = vpop.f32.mrf.mxu0  ;;  %4511 = vmatprep.subr.bf16.mxu0 %v6389_v4  ;;  %v3852_v26 = vld [vmem:[%s8117_s0 + $0x1f8] sm:$0xff] }
 0x14a   :  { %v4217_v0 = vpop.f32.mrf.mxu1  ;;  %4539 = vmatprep.subr.bf16.mxu1 %v8297_v32  ;;  %v6955_v33 = vadd.f32 %v4215_v15, %v1101_v60  ;;  %v4190_v2 = vadd.f32 %v4189_v36, %v4188_v16  ;;  %v3853_v60 = vld [vmem:[%s8117_s0 + $0x200] sm:$0xff]  ;;  %v3867_v36 = vcombine.high %v3852_v26, %v3852_v26 }
 0x14b   :  { %v4218_v23 = vadd.f32 %v4217_v0, %v4216_v62  ;;  %1877 = vmatmul.mubr.bf16.gmra.mxu0 %v3839_v5  ;;  %v4191_v8 = vpop.f32.mrf.mxu0  ;;  %v3869_v0 = vcombine.high %v3853_v60, %v3853_v60 }
 0x14c   :  { %v4219_v49 = vpop.f32.mrf.mxu1  ;;  %v1104_v20 = vadd.f32 %v4190_v2, %v4162_v41  ;;  %4512 = vmatpush3.bf16.msra.mxu0 %v6404_v12  ;;  %2061 = vmatprep.mubr.bf16.mxu0 %v5459_v29 }
 0x14d   :  { %4540 = vmatpush3.bf16.msra.mxu1 %v8298_v19  ;;  %4513 = vmatprep.subr.bf16.mxu0 %v6416_v11  ;;  %v4192_v15 = vpop.f32.mrf.mxu0 }
 0x14e   :  { %4541 = vmatprep.subr.bf16.mxu1 %v6422_v9  ;;  %v4220_v32 = vpop.f32.mrf.mxu1  ;;  %v6964_v39 = vadd.f32 %v4218_v23, %v1104_v20  ;;  %v4193_v54 = vadd.f32 %v4192_v15, %v4191_v8  ;;  %v3866_v15 = vcombine.low %v3852_v26, %v3852_v26 }
 0x14f   :  { %v4221_v62 = vadd.f32 %v4220_v32, %v4219_v49  ;;  %v4194_v16 = vpop.f32.mrf.mxu0  ;;  %v3868_v32 = vcombine.low %v3853_v60, %v3853_v60  ;;  %v8327_v60 = vld [vmem:[#allocation9_spill] sm:$0xff] }
 0x150   :  { %v4222_v5 = vpop.f32.mrf.mxu1  ;;  %4514 = vmatpush3.bf16.msra.mxu0 %v6428_v10  ;;  %v1109_v57 = vadd.f32 %v4193_v54, %v6863_v31  ;;  %v5460_v31 = vld [vmem:[%s8117_s0 + $0x1b8] ss:$36 sps:$4 sm:$0xff]  }
 0x151   :  { %4542 = vmatpush3.bf16.msra.mxu1 %v6434_v7  ;;  %4515 = vmatprep.subr.bf16.mxu0 %v6545_v59  ;;  %v4195_v9 = vpop.f32.mrf.mxu0  ;;  %v5457_v7 = vld [vmem:[%s8117_s0 + $0x1b0] ss:$36 sps:$4 sm:$0xff]  }
 0x152   :  { %4543 = vmatprep.subr.bf16.mxu1 %v6677_v43  ;;  %v4223_v19 = vpop.f32.mrf.mxu1  ;;  %v6971_v17 = vadd.f32 %v4221_v62, %v1109_v57  ;;  %v5469_v57 = vld [vmem:[%s8117_s0 + $0x1c4] ss:$36 sps:$4 sm:$0xff]   ;;  %v5472_v9 = vld [vmem:[%s8117_s0 + $0x1cc] ss:$36 sps:$4 sm:$0xff]  }
 0x154   :  { %4516 = vmatpush3.bf16.msra.mxu0 %v6552_v61 }
 0x155   :  { %4544 = vmatpush3.bf16.msra.mxu1 %v6689_v47  ;;  %4517 = vmatprep.subr.bf16.mxu0 %v6559_v58 }
 0x156   :  { %4545 = vmatprep.subr.bf16.mxu1 %v6701_v52 }
 0x158   :  { %4518 = vmatpush3.bf16.msra.mxu0 %v6566_v35 }
 0x159   :  { %4546 = vmatpush3.bf16.msra.mxu1 %v6713_v34  ;;  %4519 = vmatprep.subr.bf16.mxu0 %v6573_v1 }
 0x15a   :  { %4547 = vmatprep.subr.bf16.mxu1 %v6725_v3 }
 0x15c   :  { %4520 = vmatpush3.bf16.msra.mxu0 %v6580_v6 }
 0x15d   :  { %4548 = vmatpush3.bf16.msra.mxu1 %v6737_v13  ;;  %4521 = vmatprep.subr.bf16.mxu0 %v6587_v18 }
 0x15e   :  { %4549 = vmatprep.subr.bf16.mxu1 %v6749_v22 }
 0x160   :  { %4522 = vmatpush3.bf16.msra.mxu0 %v6603_v24 }
 0x161   :  { %4550 = vmatpush3.bf16.msra.mxu1 %v6773_v38  ;;  %4563 = vmatprep.subr.bf16.mxu0 %v6610_v27 }
 0x162   :  { %4591 = vmatprep.subr.bf16.mxu1 %v6785_v46 }
 0x163   :  { %v4241_v41 = vpop.f32.mrf.mxu0  ;;  %2062 = vmatmul.mubr.bf16.vlgmr.msra.gmra.mxu0 %v5457_v7 }
 0x164   :  { %2110 = vmatmul.mubr.bf16.vlgmr.msra.gmra.mxu1 %v5460_v31  ;;  %v5155_v2 = vpop.f32.mrf.mxu1  ;;  %4564 = vmatpush3.bf16.msra.mxu0 %v6620_v37 }
 0x165   :  { %4592 = vmatpush3.bf16.msra.mxu1 %v6794_v40  ;;  %v4242_v23 = vpop.f32.mrf.mxu0  ;;  %4565 = vmatprep.subr.bf16.mxu0 %v6627_v42 }
 0x166   :  { %4593 = vmatprep.subr.bf16.mxu1 %v6806_v45  ;;  %v1244_v29 = vpop.f32.mrf.mxu1  ;;  %v4243_v8 = vadd.f32 %v4242_v23, %v4241_v41  ;;  %2069 = vmatprep.mubr.bf16.mxu0 %v3867_v36  ;;  %v7027_v36 = vadd.f32 %v6937_v56, %v8327_v60  ;;  %v8344_v60 = vld [vmem:[#allocation27_spill] sm:$0xff] }
 0x167   :  { %2117 = vmatprep.mubr.bf16.mxu1 %v3869_v0  ;;  %v4244_v49 = vpop.f32.mrf.mxu0 }
 0x168   :  { %v5156_v20 = vpop.f32.mrf.mxu1  ;;  %4566 = vmatpush3.bf16.msra.mxu0 %v6635_v50  ;;  %v1197_v54 = vadd.f32 %v4243_v8, %v6955_v33  ;;  %8328 = vst [vmem:[#allocation9_spill] sm:$0xff] %v7027_v36  ;;  %v8330_v8 = vld [vmem:[#allocation10_spill] sm:$0xff]  ;;  %v3855_v33 = vld [vmem:[%s8117_s0 + $0x210] sm:$0xff] }
 0x169   :  { %4594 = vmatpush3.bf16.msra.mxu1 %v6820_v28  ;;  %v4245_v62 = vpop.f32.mrf.mxu0  ;;  %4567 = vmatprep.subr.bf16.mxu0 %v6642_v44  ;;  %v8332_v20 = vld [vmem:[#allocation11_spill] sm:$0xff]  ;;  %v3872_v28 = vcombine.low %v3855_v33, %v3855_v33 }
 0x16a   :  { %4595 = vmatprep.subr.bf16.mxu1 %v6832_v55  ;;  %v4246_v16 = vadd.f32 %v4245_v62, %v4244_v49  ;;  %v7010_v5 = vadd.f32 %v1244_v29, %v1197_v54  ;;  %v1247_v7 = vpop.f32.mrf.mxu1  ;;  %v8331_v49 = vld [vmem:[#allocation21_spill] sm:$0xff]  ;;  %v8334_v54 = vld [vmem:[#allocation12_spill] sm:$0xff]  ;;  %v8335_v62 = vld [vmem:[#allocation23_spill] sm:$0xff] }
 0x16b   :  { %v4247_v19 = vpop.f32.mrf.mxu0  ;;  %2070 = vmatmul.mubr.bf16.gmra.mxu0 %v3866_v15  ;;  %v8333_v15 = vld [vmem:[#allocation22_spill] sm:$0xff] }
 0x16c   :  { %8326 = vst [vmem:[#allocation30_spill] sm:$0xff] %v7010_v5  ;;  %2118 = vmatmul.mubr.bf16.gmra.mxu1 %v3868_v32  ;;  %4568 = vmatpush3.bf16.msra.mxu0 %v6655_v21  ;;  %v1200_v31 = vadd.f32 %v4246_v16, %v6964_v39  ;;  %v3854_v39 = vld [vmem:[%s8117_s0 + $0x208] sm:$0xff]  ;;  %v8347_v16 = vld [vmem:[#allocation8_spill] sm:$0xff] }
 0x16d   :  { %4596 = vmatpush3.bf16.msra.mxu1 %v6847_v30  ;;  %v4248_v26 = vpop.f32.mrf.mxu0  ;;  %4569 = vmatprep.subr.bf16.mxu0 %v6662_v51  ;;  %v8351_v30 = vld [vmem:[#allocation16_spill] sm:$0xff]  ;;  %v3870_v55 = vcombine.low %v3854_v39, %v3854_v39  ;;  %v8352_v5 = vld [vmem:[#allocation19_spill] sm:$0xff] }
 0x16e   :  { %4597 = vmatprep.subr.bf16.mxu1 %v6859_v48  ;;  %v4249_v0 = vadd.f32 %v4248_v26, %v4247_v19  ;;  %v7029_v41 = vadd.f32 %v1247_v7, %v1200_v31  ;;  %2157 = vmatprep.mubr.bf16.mxu0 %v5469_v57  ;;  %v8337_v57 = vld [vmem:[#allocation3_spill] sm:$0xff]  ;;  %v8339_v19 = vld [vmem:[#allocation4_spill] sm:$0xff]  ;;  %v8340_v7 = vld [vmem:[#allocation25_spill] sm:$0xff] }
 0x16f   :  { %2205 = vmatprep.mubr.bf16.mxu1 %v5472_v9  ;;  %v4250_v23 = vpop.f32.mrf.mxu0  ;;  %v8338_v9 = vld [vmem:[#allocation24_spill] sm:$0xff]  ;;  %v8341_v31 = vld [vmem:[#allocation5_spill] sm:$0xff]  ;;  %v8342_v26 = vld [vmem:[#allocation26_spill] sm:$0xff] }
 0x170   :  { %8329 = vst [vmem:[#allocation31_spill] sm:$0xff] %v7029_v41  ;;  %v1205_v29 = vadd.f32 %v4249_v0, %v6971_v17  ;;  %4570 = vmatpush3.bf16.msra.mxu0 %v8330_v8  ;;  %v8336_v17 = vld [vmem:[#allocation13_spill] sm:$0xff]  ;;  %v8345_v0 = vld [vmem:[#allocation7_spill] sm:$0xff]  ;;  %v8346_v23 = vld [vmem:[#allocation28_spill] sm:$0xff] }
 0x171   :  { %4598 = vmatpush3.bf16.msra.mxu1 %v8331_v49  ;;  %4571 = vmatprep.subr.bf16.mxu0 %v8332_v20  ;;  %v4251_v56 = vpop.f32.mrf.mxu0 }
 0x172   :  { %4599 = vmatprep.subr.bf16.mxu1 %v8333_v15  ;;  %v7038_v32 = vadd.f32 %v5155_v2, %v1205_v29  ;;  %v8343_v2 = vld [vmem:[#allocation6_spill] sm:$0xff]  ;;  %v5470_v56 = vld [vmem:[%s8117_s0 + $0x1c8] ss:$36 sps:$4 sm:$0xff]  }
 0x173   :  { %v5467_v29 = vld [vmem:[%s8117_s0 + $0x1c0] ss:$36 sps:$4 sm:$0xff]  }
 0x174   :  { %4572 = vmatpush3.bf16.msra.mxu0 %v8334_v54 }
 0x175   :  { %4600 = vmatpush3.bf16.msra.mxu1 %v8335_v62  ;;  %4573 = vmatprep.subr.bf16.mxu0 %v8337_v57 }
 0x176   :  { %4601 = vmatprep.subr.bf16.mxu1 %v8338_v9  ;;  %v3873_v9 = vcombine.high %v3855_v33, %v3855_v33  ;;  %v5481_v33 = vld [vmem:[%s8117_s0 + $0x220] ss:$36 sps:$4 sm:$0xff]  }
 0x178   :  { %4574 = vmatpush3.bf16.msra.mxu0 %v8339_v19 }
 0x179   :  { %4602 = vmatpush3.bf16.msra.mxu1 %v8340_v7  ;;  %4575 = vmatprep.subr.bf16.mxu0 %v8341_v31  ;;  %v3871_v7 = vcombine.high %v3854_v39, %v3854_v39 }
 0x17a   :  { %4603 = vmatprep.subr.bf16.mxu1 %v8342_v26  ;;  %v8350_v26 = vld [vmem:[#allocation2_spill] sm:$0xff] }
 0x17c   :  { %4576 = vmatpush3.bf16.msra.mxu0 %v8343_v2 }
 0x17d   :  { %4604 = vmatpush3.bf16.msra.mxu1 %v8344_v60  ;;  %4577 = vmatprep.subr.bf16.mxu0 %v8345_v0  ;;  %v8348_v60 = vld [vmem:[#allocation29_spill] sm:$0xff] }
 0x17e   :  { %4605 = vmatprep.subr.bf16.mxu1 %v8346_v23  ;;  %v8349_v23 = vld [vmem:[#allocation14_spill] sm:$0xff] }
 0x180   :  { %4578 = vmatpush3.bf16.msra.mxu0 %v8347_v16 }
 0x181   :  { %4606 = vmatpush3.bf16.msra.mxu1 %v8348_v60  ;;  %5197 = vmatprep.subr.bf16.mxu0 %v8349_v23 }
 0x182   :  { %4629 = vmatprep.subr.bf16.mxu1 %v8350_v26 }
 0x183   :  { %v4279_v62 = vpop.f32.mrf.mxu0  ;;  %2158 = vmatmul.mubr.bf16.vlgmr.msra.gmra.mxu0 %v5467_v29 }
 0x184   :  { %v4307_v15 = vpop.f32.mrf.mxu1  ;;  %2206 = vmatmul.mubr.bf16.vlgmr.msra.gmra.mxu1 %v5470_v56  ;;  %5198 = vmatpush3.bf16.msra.mxu0 %v8349_v23 }
 0x185   :  { %4630 = vmatpush3.bf16.msra.mxu1 %v6353_v53  ;;  %v4280_v49 = vpop.f32.mrf.mxu0  ;;  %5199 = vmatprep.subr.bf16.mxu0 %v8351_v30 }
 0x186   :  { %v4308_v48 = vpop.f32.mrf.mxu1  ;;  %4631 = vmatprep.subr.bf16.mxu1 %v6365_v63  ;;  %v4281_v60 = vadd.f32 %v4280_v49, %v4279_v62  ;;  %2165 = vmatprep.mubr.bf16.mxu0 %v3871_v7  ;;  %v5477_v49 = vld [vmem:[%s8117_s0 + $0x1d0] ss:$36 sps:$4 sm:$0xff]   ;;  %v7104_v7 = vld [vmem:[%s8116_s1 + $0x218] sm:$0xff]  }
 0x187   :  { %v4309_v41 = vadd.f32 %v4308_v48, %v4307_v15  ;;  %2213 = vmatprep.mubr.bf16.mxu1 %v3873_v9  ;;  %v4282_v26 = vpop.f32.mrf.mxu0 }
 0x188   :  { %v4310_v36 = vpop.f32.mrf.mxu1  ;;  %5200 = vmatpush3.bf16.msra.mxu0 %v8351_v30 }
 0x189   :  { %v7074_v29 = vadd.f32 %v4309_v41, %v4281_v60  ;;  %4632 = vmatpush3.bf16.msra.mxu1 %v6377_v14  ;;  %v4283_v53 = vpop.f32.mrf.mxu0  ;;  %5201 = vmatprep.subr.bf16.mxu0 %v8352_v5 }
 0x18a   :  { %v4311_v56 = vpop.f32.mrf.mxu1  ;;  %4633 = vmatprep.subr.bf16.mxu1 %v6389_v4  ;;  %v4284_v63 = vadd.f32 %v4283_v53, %v4282_v26  ;;  %v7093_v4 = vld [vmem:[%s8116_s1 + $0x220] sm:$0xff]   ;;  %v5486_v26 = vld [vmem:[%s8117_s0 + $0x228] ss:$36 sps:$4 sm:$0xff]  }
 0x18b   :  { %v4312_v48 = vadd.f32 %v4311_v56, %v4310_v36  ;;  %2166 = vmatmul.mubr.bf16.gmra.mxu0 %v3870_v55  ;;  %v4285_v41 = vpop.f32.mrf.mxu0 }
 0x18c   :  { %2214 = vmatmul.mubr.bf16.gmra.mxu1 %v3872_v28  ;;  %v4313_v14 = vpop.f32.mrf.mxu1  ;;  %5202 = vmatpush3.bf16.msra.mxu0 %v8352_v5 }
 0x18d   :  { %v7086_v39 = vadd.f32 %v4312_v48, %v4284_v63  ;;  %4634 = vmatpush3.bf16.msra.mxu1 %v6404_v12  ;;  %5203 = vmatprep.subr.bf16.mxu0 %v7093_v4  ;;  %v4286_v36 = vpop.f32.mrf.mxu0  ;;  %v7166_v48 = vld [vmem:[%s8116_s1 + $0xf0] sm:$0xff]  }
 0x18e   :  { %4635 = vmatprep.subr.bf16.mxu1 %v6416_v11  ;;  %v4314_v55 = vpop.f32.mrf.mxu1  ;;  %v4287_v28 = vadd.f32 %v4286_v36, %v4285_v41  ;;  %5213 = vmatprep.mubr.bf16.mxu0 %v5477_v49 }
 0x18f   :  { %v4315_v15 = vadd.f32 %v4314_v55, %v4313_v14  ;;  %2398 = vmatprep.mubr.bf16.mxu1 %v5481_v33  ;;  %v4288_v62 = vpop.f32.mrf.mxu0  ;;  %v7174_v55 = vld [vmem:[%s8116_s1 + $0xb0] sm:$0xff]  }
 0x190   :  { %v4316_v9 = vpop.f32.mrf.mxu1  ;;  %5204 = vmatpush3.bf16.msra.mxu0 %v7093_v4 }
 0x191   :  { %4636 = vmatpush3.bf16.msra.mxu1 %v6428_v10  ;;  %v7099_v12 = vadd.f32 %v4315_v15, %v4287_v28  ;;  %5205 = vmatprep.subr.bf16.mxu0 %v7104_v7  ;;  %v4289_v11 = vpop.f32.mrf.mxu0  ;;  %v7113_v10 = vld [vmem:[%s8116_s1 + $0x210] sm:$0xff]   ;;  %v7181_v15 = vld [vmem:[%s8116_s1 + $0xe8] sm:$0xff]  }
 0x192   :  { %4637 = vmatprep.subr.bf16.mxu1 %v6545_v59  ;;  %v4317_v60 = vpop.f32.mrf.mxu1  ;;  %v7122_v59 = vld [vmem:[%s8116_s1 + $0x208] sm:$0xff]   ;;  %v5489_v9 = vld [vmem:[%s8117_s0 + $0x230] ss:$36 sps:$4 sm:$0xff]  }
 0x194   :  { %5206 = vmatpush3.bf16.msra.mxu0 %v7104_v7 }
 0x195   :  { %4638 = vmatpush3.bf16.msra.mxu1 %v6552_v61  ;;  %5207 = vmatprep.subr.bf16.mxu0 %v7113_v10  ;;  %v7131_v61 = vld [vmem:[%s8116_s1 + $0x200] sm:$0xff]  }
 0x196   :  { %4639 = vmatprep.subr.bf16.mxu1 %v6559_v58  ;;  %v5478_v58 = vld [vmem:[%s8117_s0 + $0x218] ss:$0 sps:$4 sm:$0xff]  }
 0x198   :  { %5208 = vmatpush3.bf16.msra.mxu0 %v7113_v10 }
 0x199   :  { %4640 = vmatpush3.bf16.msra.mxu1 %v6566_v35  ;;  %5209 = vmatprep.subr.bf16.mxu0 %v7122_v59  ;;  %v5479_v35 = vld [vmem:[%s8117_s0 + $0x21c] ss:$36 sps:$4 sm:$0xff]  }
 0x19a   :  { %4641 = vmatprep.subr.bf16.mxu1 %v6573_v1  ;;  %v3885_v1 = vld [vmem:[%s8117_s0 + $0x264] sm:$0xff] }
 0x19b   :  { %v3899_v36 = vcombine.low %v3885_v1, %v3885_v1 }
 0x19c   :  { %5210 = vmatpush3.bf16.msra.mxu0 %v7122_v59 }
 0x19d   :  { %4642 = vmatpush3.bf16.msra.mxu1 %v6580_v6  ;;  %5211 = vmatprep.subr.bf16.mxu0 %v7131_v61  ;;  %v7149_v6 = vld [vmem:[%s8116_s1 + $0xf8] sm:$0xff]  }
 0x19e   :  { %4643 = vmatprep.subr.bf16.mxu1 %v6587_v18  ;;  %v3900_v18 = vcombine.high %v3885_v1, %v3885_v1 }
 0x1a0   :  { %5212 = vmatpush3.bf16.msra.mxu0 %v7131_v61 }
 0x1a1   :  { %4644 = vmatpush3.bf16.msra.mxu1 %v6603_v24  ;;  %4657 = vmatprep.subr.bf16.mxu0 %v7149_v6  ;;  %v7159_v24 = vld [vmem:[%s8116_s1 + $0xb8] sm:$0xff]  }
 0x1a2   :  { %4685 = vmatprep.subr.bf16.mxu1 %v6610_v27 }
 0x1a3   :  { %v4335_v53 = vpop.f32.mrf.mxu0  ;;  %5214 = vmatmul.mubr.bf16.vlgmr.msra.gmra.mxu0 %v5478_v58 }
 0x1a4   :  { %2399 = vmatmul.mubr.bf16.vlgmr.msra.gmra.mxu1 %v5479_v35  ;;  %v4363_v56 = vpop.f32.mrf.mxu1  ;;  %4658 = vmatpush3.bf16.msra.mxu0 %v7159_v24  ;;  %v7192_v35 = vld [vmem:[%s8116_s1 + $0xa8] sm:$0xff]  }
 0x1a5   :  { %4686 = vmatpush3.bf16.msra.mxu1 %v6620_v37  ;;  %v4336_v63 = vpop.f32.mrf.mxu0  ;;  %4659 = vmatprep.subr.bf16.mxu0 %v7166_v48 }
 0x1a6   :  { %v4364_v27 = vpop.f32.mrf.mxu1  ;;  %4687 = vmatprep.subr.bf16.mxu1 %v6627_v42  ;;  %v4337_v49 = vadd.f32 %v4336_v63, %v4335_v53  ;;  %2406 = vmatprep.mubr.bf16.mxu1 %v3900_v18  ;;  %v7199_v18 = vld [vmem:[%s8116_s1 + $0xe0] sm:$0xff]  }
 0x1a7   :  { %v4365_v33 = vadd.f32 %v4364_v27, %v4363_v56  ;;  %2446 = vmatprep.mubr.bf16.mxu0 %v5486_v26  ;;  %v4338_v41 = vpop.f32.mrf.mxu0 }
 0x1a8   :  { %v4366_v14 = vpop.f32.mrf.mxu1  ;;  %v1486_v37 = vadd.f32 %v4337_v49, %v7074_v29  ;;  %4660 = vmatpush3.bf16.msra.mxu0 %v7174_v55 }
 0x1a9   :  { %4688 = vmatpush3.bf16.msra.mxu1 %v6635_v50  ;;  %v4339_v28 = vpop.f32.mrf.mxu0  ;;  %4661 = vmatprep.subr.bf16.mxu0 %v7181_v15 }
 0x1aa   :  { %v4367_v42 = vpop.f32.mrf.mxu1  ;;  %4689 = vmatprep.subr.bf16.mxu1 %v6642_v44  ;;  %v4340_v29 = vadd.f32 %v4339_v28, %v4338_v41  ;;  %v1534_v11 = vadd.f32 %v4365_v33, %v1486_v37 }
 0x1ab   :  { %v4368_v62 = vadd.f32 %v4367_v42, %v4366_v14  ;;  %v4341_v60 = vpop.f32.mrf.mxu0  ;;  %v8353_v14 = vmax.f32 %v8336_v17, %v7038_v32  ;;  %v8358_v17 = vld [vmem:[#allocation17_spill] sm:$0xff] }
 0x1ac   :  { %v4369_v50 = vpop.f32.mrf.mxu1  ;;  %2407 = vmatmul.mubr.bf16.gmra.mxu1 %v3899_v36  ;;  %v1489_v58 = vadd.f32 %v4340_v29, %v7086_v39  ;;  %4662 = vmatpush3.bf16.msra.mxu0 %v7192_v35 }
 0x1ad   :  { %4690 = vmatpush3.bf16.msra.mxu1 %v6655_v21  ;;  %v4342_v44 = vpop.f32.mrf.mxu0  ;;  %4663 = vmatprep.subr.bf16.mxu0 %v7199_v18  ;;  %v7207_v21 = vld [vmem:[%s8116_s1 + $0xa0] sm:$0xff]  }
 0x1ae   :  { %v4370_v1 = vpop.f32.mrf.mxu1  ;;  %4691 = vmatprep.subr.bf16.mxu1 %v6662_v51  ;;  %v4343_v39 = vadd.f32 %v4342_v44, %v4341_v60  ;;  %2494 = vmatprep.mubr.bf16.mxu1 %v5489_v9  ;;  %v1537_v53 = vadd.f32 %v4368_v62, %v1489_v58  ;;  %v8354_v9 = vld [vmem:[#allocation30_spill] sm:$0xff]  ;;  %v8357_v58 = vld [vmem:[#allocation15_spill] sm:$0xff] }
 0x1af   :  { %v4371_v26 = vadd.f32 %v4370_v1, %v4369_v50  ;;  %v4344_v56 = vpop.f32.mrf.mxu0  ;;  %v8355_v60 = vmax.f32 %v6811_v25, %v8354_v9  ;;  %v5497_v25 = vld [vmem:[%s8117_s0 + $0x23c] ss:$36 sps:$4 sm:$0xff]  }
 0x1b0   :  { %v4372_v63 = vpop.f32.mrf.mxu1  ;;  %v1494_v27 = vadd.f32 %v4343_v39, %v7099_v12  ;;  %4664 = vmatpush3.bf16.msra.mxu0 %v7207_v21  ;;  %v5496_v39 = vld [vmem:[%s8117_s0 + $0x238] ss:$36 sps:$4 sm:$0xff]   ;;  %v8360_v56 = vld [vmem:[#allocation31_spill] sm:$0xff] }
 0x1b1   :  { %4692 = vmatpush3.bf16.msra.mxu1 %v8330_v8  ;;  %4665 = vmatprep.subr.bf16.mxu0 %v6677_v43  ;;  %v4345_v51 = vpop.f32.mrf.mxu0  ;;  %v5484_v8 = vld [vmem:[%s8117_s0 + $0x224] ss:$36 sps:$4 sm:$0xff]  }
 0x1b2   :  { %4693 = vmatprep.subr.bf16.mxu1 %v8332_v20  ;;  %v4373_v49 = vpop.f32.mrf.mxu1  ;;  %v1542_v33 = vadd.f32 %v4371_v26, %v1494_v27  ;;  %v5487_v20 = vld [vmem:[%s8117_s0 + $0x22c] ss:$36 sps:$4 sm:$0xff]   ;;  %v8359_v26 = vld [vmem:[#allocation9_spill] sm:$0xff]  ;;  %v8363_v51 = vld [vmem:[#allocation18_spill] sm:$0xff] }
 0x1b3   :  { %v8361_v63 = vmax.f32 %v8359_v26, %v8360_v56 }
 0x1b4   :  { %4666 = vmatpush3.bf16.msra.mxu0 %v6689_v47 }
 0x1b5   :  { %4694 = vmatpush3.bf16.msra.mxu1 %v8334_v54  ;;  %4667 = vmatprep.subr.bf16.mxu0 %v6701_v52  ;;  %v3886_v54 = vld [vmem:[%s8117_s0 + $0x26c] sm:$0xff] }
 0x1b6   :  { %4695 = vmatprep.subr.bf16.mxu1 %v8337_v57  ;;  %v3887_v57 = vld [vmem:[%s8117_s0 + $0x274] sm:$0xff]  ;;  %v3901_v29 = vcombine.low %v3886_v54, %v3886_v54 }
 0x1b7   :  { %v3903_v62 = vcombine.low %v3887_v57, %v3887_v57 }
 0x1b8   :  { %4668 = vmatpush3.bf16.msra.mxu0 %v6713_v34 }
 0x1b9   :  { %4696 = vmatpush3.bf16.msra.mxu1 %v8339_v19  ;;  %4669 = vmatprep.subr.bf16.mxu0 %v6725_v3  ;;  %v3902_v19 = vcombine.high %v3886_v54, %v3886_v54  ;;  %v8366_v54 = vld [vmem:[#allocation22_spill] sm:$0xff] }
 0x1ba   :  { %4697 = vmatprep.subr.bf16.mxu1 %v8341_v31  ;;  %v3904_v31 = vcombine.high %v3887_v57, %v3887_v57 }
 0x1bc   :  { %4670 = vmatpush3.bf16.msra.mxu0 %v6737_v13 }
 0x1bd   :  { %4698 = vmatpush3.bf16.msra.mxu1 %v8343_v2  ;;  %4671 = vmatprep.subr.bf16.mxu0 %v6749_v22 }
 0x1be   :  { %4699 = vmatprep.subr.bf16.mxu1 %v8345_v0 }
 0x1c0   :  { %4672 = vmatpush3.bf16.msra.mxu0 %v6773_v38 }
 0x1c1   :  { %4700 = vmatpush3.bf16.msra.mxu1 %v8347_v16  ;;  %4713 = vmatprep.subr.bf16.mxu0 %v6785_v46 }
 0x1c2   :  { %5217 = vmatprep.subr.bf16.mxu1 %v8349_v23 }
 0x1c3   :  { %v5175_v2 = vpop.f32.mrf.mxu0  ;;  %2447 = vmatmul.mubr.bf16.vlgmr.msra.gmra.mxu0 %v5484_v8 }
 0x1c4   :  { %2495 = vmatmul.mubr.bf16.vlgmr.msra.gmra.mxu1 %v5487_v20  ;;  %v4401_v0 = vpop.f32.mrf.mxu1  ;;  %v1590_v12 = vadd.f32 %v5175_v2, %v1542_v33  ;;  %4714 = vmatpush3.bf16.msra.mxu0 %v6794_v40  ;;  %v8365_v20 = vld [vmem:[#allocation21_spill] sm:$0xff]  ;;  %v8370_v2 = vld [vmem:[#allocation26_spill] sm:$0xff] }
 0x1c5   :  { %5218 = vmatpush3.bf16.msra.mxu1 %v8349_v23  ;;  %v1581_v41 = vpop.f32.mrf.mxu0  ;;  %4715 = vmatprep.subr.bf16.mxu0 %v6806_v45 }
 0x1c6   :  { %5219 = vmatprep.subr.bf16.mxu1 %v8351_v30  ;;  %v4402_v16 = vpop.f32.mrf.mxu1  ;;  %v7248_v36 = vmax.f32 %v8353_v14, %v1590_v12  ;;  %v1582_v37 = vadd.f32 %v1581_v41, %v1534_v11  ;;  %2454 = vmatprep.mubr.bf16.mxu0 %v3902_v19  ;;  %v8368_v19 = vld [vmem:[#allocation24_spill] sm:$0xff]  ;;  %v3888_v14 = vld [vmem:[%s8117_s0 + $0x27c] sm:$0xff] }
 0x1c7   :  { %2502 = vmatprep.mubr.bf16.mxu1 %v3904_v31  ;;  %v7250_v28 = vadd.f32 %v4402_v16, %v4401_v0  ;;  %v5176_v42 = vpop.f32.mrf.mxu0  ;;  %v8369_v31 = vld [vmem:[#allocation25_spill] sm:$0xff]  ;;  %v8371_v0 = vld [vmem:[#allocation27_spill] sm:$0xff]  ;;  %v8372_v12 = vld [vmem:[#allocation28_spill] sm:$0xff]  ;;  %v3905_v56 = vcombine.low %v3888_v14, %v3888_v14 }
 0x1c8   :  { %v4404_v23 = vpop.f32.mrf.mxu1  ;;  %v7255_v50 = vmax.f32 %v8355_v60, %v1582_v37  ;;  %4716 = vmatpush3.bf16.msra.mxu0 %v8357_v58  ;;  %v5494_v41 = vld [vmem:[%s8117_s0 + $0x234] ss:$36 sps:$4 sm:$0xff]   ;;  %v5498_v16 = vld [vmem:[%s8117_s0 + $0x284] ss:$0 sps:$4 sm:$0xff]  }
 0x1c9   :  { %5220 = vmatpush3.bf16.msra.mxu1 %v8351_v30  ;;  %v1584_v32 = vpop.f32.mrf.mxu0  ;;  %4717 = vmatprep.subr.bf16.mxu0 %v8358_v17  ;;  %v8373_v37 = vld [vmem:[#allocation29_spill] sm:$0xff] }
 0x1ca   :  { %8356 = vst [vmem:[#allocation10_spill] sm:$0xff] %v7255_v50  ;;  %5221 = vmatprep.subr.bf16.mxu1 %v8352_v5  ;;  %v4405_v11 = vpop.f32.mrf.mxu1  ;;  %v1585_v44 = vadd.f32 %v1584_v32, %v1537_v53  ;;  %v8364_v53 = vld [vmem:[#allocation20_spill] sm:$0xff]  ;;  %v7310_v42 = vld [vmem:[%s8116_s1 + $0x78] sm:$0xff]  }
 0x1cb   :  { %v7261_v1 = vadd.f32 %v4405_v11, %v4404_v23  ;;  %2455 = vmatmul.mubr.bf16.gmra.mxu0 %v3901_v29  ;;  %8374 = vst [vmem:[#allocation12_spill] sm:$0xff] %v7310_v42  ;;  %v3906_v29 = vcombine.high %v3888_v14, %v3888_v14  ;;  %v7320_v60 = vld [vmem:[%s8116_s1 + $0x38] sm:$0xff]  }
 0x1cc   :  { %2503 = vmatmul.mubr.bf16.gmra.mxu1 %v3903_v62  ;;  %v4407_v30 = vpop.f32.mrf.mxu1  ;;  %v7272_v27 = vmax.f32 %v8361_v63, %v1585_v44  ;;  %4718 = vmatpush3.bf16.msra.mxu0 %v8363_v51  ;;  %v5506_v62 = vld [vmem:[%s8117_s0 + $0x294] ss:$36 sps:$4 sm:$0xff]   ;;  %8375 = vst [vmem:[#allocation13_spill] sm:$0xff] %v7320_v60 }
 0x1cd   :  { %5222 = vmatpush3.bf16.msra.mxu1 %v8352_v5  ;;  %4719 = vmatprep.subr.bf16.mxu0 %v8364_v53  ;;  %v8367_v5 = vld [vmem:[#allocation23_spill] sm:$0xff]  ;;  %v7327_v44 = vld [vmem:[%s8116_s1 + $0x70] sm:$0xff]  }
 0x1ce   :  { %8362 = vst [vmem:[#allocation11_spill] sm:$0xff] %v7272_v27  ;;  %5223 = vmatprep.subr.bf16.mxu1 %v7093_v4  ;;  %v4408_v49 = vpop.f32.mrf.mxu1  ;;  %2542 = vmatprep.mubr.bf16.mxu0 %v5496_v39  ;;  %8376 = vst [vmem:[#allocation3_spill] sm:$0xff] %v7327_v44  ;;  %v7335_v53 = vld [vmem:[%s8116_s1 + $0x30] sm:$0xff]  }
 0x1cf   :  { %v7278_v33 = vadd.f32 %v4408_v49, %v4407_v30  ;;  %5233 = vmatprep.mubr.bf16.mxu1 %v5497_v25 }
 0x1d0   :  { %v4410_v8 = vpop.f32.mrf.mxu1  ;;  %4720 = vmatpush3.bf16.msra.mxu0 %v8365_v20  ;;  %v7342_v20 = vld [vmem:[%s8116_s1 + $0x68] sm:$0xff]  }
 0x1d1   :  { %5224 = vmatpush3.bf16.msra.mxu1 %v7093_v4  ;;  %4721 = vmatprep.subr.bf16.mxu0 %v8366_v54 }
 0x1d2   :  { %5225 = vmatprep.subr.bf16.mxu1 %v7104_v7  ;;  %v4411_v57 = vpop.f32.mrf.mxu1 }
 0x1d4   :  { %4722 = vmatpush3.bf16.msra.mxu0 %v8367_v5  ;;  %v5503_v5 = vld [vmem:[%s8117_s0 + $0x28c] ss:$36 sps:$4 sm:$0xff]  }
 0x1d5   :  { %5226 = vmatpush3.bf16.msra.mxu1 %v7104_v7  ;;  %4723 = vmatprep.subr.bf16.mxu0 %v8368_v19 }
 0x1d6   :  { %5227 = vmatprep.subr.bf16.mxu1 %v7113_v10 }
 0x1d8   :  { %4724 = vmatpush3.bf16.msra.mxu0 %v8369_v31 }
 0x1d9   :  { %5228 = vmatpush3.bf16.msra.mxu1 %v7113_v10  ;;  %4725 = vmatprep.subr.bf16.mxu0 %v8370_v2 }
 0x1da   :  { %5229 = vmatprep.subr.bf16.mxu1 %v7122_v59 }
 0x1dc   :  { %4726 = vmatpush3.bf16.msra.mxu0 %v8371_v0  ;;  %v7355_v0 = vld [vmem:[%s8116_s1 + $0x28] sm:$0xff]  }
 0x1dd   :  { %5230 = vmatpush3.bf16.msra.mxu1 %v7122_v59  ;;  %4727 = vmatprep.subr.bf16.mxu0 %v8372_v12  ;;  %v7362_v12 = vld [vmem:[%s8116_s1 + $0x60] sm:$0xff]  }
 0x1de   :  { %5231 = vmatprep.subr.bf16.mxu1 %v7131_v61 }
 0x1e0   :  { %4728 = vmatpush3.bf16.msra.mxu0 %v8373_v37 }
 0x1e1   :  { %5232 = vmatpush3.bf16.msra.mxu1 %v7131_v61  ;;  %4751 = vmatprep.subr.bf16.mxu0 %v7310_v42 }
 0x1e2   :  { %4779 = vmatprep.subr.bf16.mxu1 %v7149_v6 }
 0x1e3   :  { %v4429_v23 = vpop.f32.mrf.mxu0  ;;  %2543 = vmatmul.mubr.bf16.vlgmr.msra.gmra.mxu0 %v5494_v41 }
 0x1e4   :  { %5234 = vmatmul.mubr.bf16.vlgmr.msra.gmra.mxu1 %v5498_v16  ;;  %v4457_v9 = vpop.f32.mrf.mxu1  ;;  %4752 = vmatpush3.bf16.msra.mxu0 %v7320_v60 }
 0x1e5   :  { %4780 = vmatpush3.bf16.msra.mxu1 %v7159_v24  ;;  %v4430_v32 = vpop.f32.mrf.mxu0  ;;  %4753 = vmatprep.subr.bf16.mxu0 %v7327_v44 }
 0x1e6   :  { %v4458_v11 = vpop.f32.mrf.mxu1  ;;  %4781 = vmatprep.subr.bf16.mxu1 %v7166_v48  ;;  %v4431_v39 = vadd.f32 %v4430_v32, %v4429_v23  ;;  %2550 = vmatprep.mubr.bf16.mxu0 %v3906_v29  ;;  %v7371_v23 = vld [vmem:[%s8116_s1 + $0x20] sm:$0xff]   ;;  %v7379_v32 = vld [vmem:[%s8116_s1 + $0x58] sm:$0xff]  }
 0x1e7   :  { %v4459_v25 = vadd.f32 %v4458_v11, %v4457_v9  ;;  %2783 = vmatprep.mubr.bf16.mxu1 %v5506_v62  ;;  %v4432_v30 = vpop.f32.mrf.mxu0 }
 0x1e8   :  { %v4460_v26 = vpop.f32.mrf.mxu1  ;;  %v1775_v63 = vadd.f32 %v4431_v39, %v7250_v28  ;;  %4754 = vmatpush3.bf16.msra.mxu0 %v7335_v53 }
 0x1e9   :  { %4782 = vmatpush3.bf16.msra.mxu1 %v7174_v55  ;;  %v4433_v49 = vpop.f32.mrf.mxu0  ;;  %4755 = vmatprep.subr.bf16.mxu0 %v7342_v20 }
 0x1ea   :  { %v4461_v8 = vpop.f32.mrf.mxu1  ;;  %4783 = vmatprep.subr.bf16.mxu1 %v7181_v15  ;;  %v7346_v28 = vadd.f32 %v4459_v25, %v1775_v63  ;;  %v4434_v54 = vadd.f32 %v4433_v49, %v4432_v30  ;;  %v7388_v30 = vld [vmem:[%s8116_s1 + $0x18] sm:$0xff]  }
 0x1eb   :  { %v4462_v57 = vadd.f32 %v4461_v8, %v4460_v26  ;;  %2551 = vmatmul.mubr.bf16.gmra.mxu0 %v3905_v56  ;;  %v4435_v19 = vpop.f32.mrf.mxu0  ;;  %v5504_v26 = vld [vmem:[%s8117_s0 + $0x290] ss:$36 sps:$4 sm:$0xff]   ;;  %v3919_v56 = vld [vmem:[%s8117_s0 + $0x2d8] sm:$0xff] }
 0x1ec   :  { %v4463_v31 = vpop.f32.mrf.mxu1  ;;  %v1778_v2 = vadd.f32 %v4434_v54, %v7261_v1  ;;  %4756 = vmatpush3.bf16.msra.mxu0 %v7355_v0  ;;  %2735 = vmatprep.mubr.bf16.mxu0 %v5503_v5  ;;  %v7449_v63 = vld [vmem:[%s8116_s1 + $0x178] sm:$0xff]   ;;  %v3935_v8 = vcombine.high %v3919_v56, %v3919_v56 }
 0x1ed   :  { %4784 = vmatpush3.bf16.msra.mxu1 %v7192_v35  ;;  %4757 = vmatprep.subr.bf16.mxu0 %v7362_v12  ;;  %v4436_v41 = vpop.f32.mrf.mxu0  ;;  %v7456_v5 = vld [vmem:[%s8116_s1 + $0x138] sm:$0xff]  }
 0x1ee   :  { %4785 = vmatprep.subr.bf16.mxu1 %v7199_v18  ;;  %v4464_v1 = vpop.f32.mrf.mxu1  ;;  %v7366_v16 = vadd.f32 %v4462_v57, %v1778_v2  ;;  %v4437_v14 = vadd.f32 %v4436_v41, %v4435_v19 }
 0x1ef   :  { %v4465_v37 = vadd.f32 %v4464_v1, %v4463_v31  ;;  %v4438_v29 = vpop.f32.mrf.mxu0 }
 0x1f0   :  { %v4466_v62 = vpop.f32.mrf.mxu1  ;;  %4758 = vmatpush3.bf16.msra.mxu0 %v7371_v23  ;;  %v1783_v9 = vadd.f32 %v4437_v14, %v7278_v33  ;;  %v7395_v33 = vld [vmem:[%s8116_s1 + $0x50] sm:$0xff]   ;;  %v3934_v14 = vcombine.low %v3919_v56, %v3919_v56  ;;  %v7478_v29 = vld [vmem:[%s8116_s1 + $0x168] sm:$0xff]   ;;  %v7503_v56 = vld [vmem:[%s8116_s1 + $0x160] sm:$0xff]  }
 0x1f1   :  { %4786 = vmatpush3.bf16.msra.mxu1 %v7207_v21  ;;  %4759 = vmatprep.subr.bf16.mxu0 %v7379_v32  ;;  %v4439_v11 = vpop.f32.mrf.mxu0  ;;  %8378 = vst [vmem:[#allocation5_spill] sm:$0xff] %v7478_v29  ;;  %8381 = vst [vmem:[#allocation8_spill] sm:$0xff] %v7503_v56 }
 0x1f2   :  { %4787 = vmatprep.subr.bf16.mxu1 %v6677_v43  ;;  %v4467_v39 = vpop.f32.mrf.mxu1  ;;  %v7383_v25 = vadd.f32 %v4465_v37, %v1783_v9  ;;  %v7402_v43 = vld [vmem:[%s8116_s1 + $0x10] sm:$0xff]   ;;  %v5513_v11 = vld [vmem:[%s8117_s0 + $0x29c] ss:$36 sps:$4 sm:$0xff]  }
 0x1f4   :  { %4760 = vmatpush3.bf16.msra.mxu0 %v7388_v30 }
 0x1f5   :  { %4788 = vmatpush3.bf16.msra.mxu1 %v6689_v47  ;;  %4761 = vmatprep.subr.bf16.mxu0 %v7395_v33  ;;  %v7409_v47 = vld [vmem:[%s8116_s1 + $0x48] sm:$0xff]  }
 0x1f6   :  { %4789 = vmatprep.subr.bf16.mxu1 %v6701_v52  ;;  %v7416_v52 = vld [vmem:[%s8116_s1 + $0x8] sm:$0xff]  }
 0x1f8   :  { %4762 = vmatpush3.bf16.msra.mxu0 %v7402_v43 }
 0x1f9   :  { %4790 = vmatpush3.bf16.msra.mxu1 %v6713_v34  ;;  %4763 = vmatprep.subr.bf16.mxu0 %v7409_v47  ;;  %v7423_v34 = vld [vmem:[%s8116_s1 + $0x40] sm:$0xff]  }
 0x1fa   :  { %4791 = vmatprep.subr.bf16.mxu1 %v6725_v3  ;;  %v5501_v3 = vld [vmem:[%s8117_s0 + $0x288] ss:$36 sps:$4 sm:$0xff]  }
 0x1fc   :  { %4764 = vmatpush3.bf16.msra.mxu0 %v7416_v52 }
 0x1fd   :  { %4792 = vmatpush3.bf16.msra.mxu1 %v6737_v13  ;;  %4765 = vmatprep.subr.bf16.mxu0 %v7423_v34  ;;  %v3918_v13 = vld [vmem:[%s8117_s0 + $0x2d0] sm:$0xff] }
 0x1fe   :  { %4793 = vmatprep.subr.bf16.mxu1 %v6749_v22  ;;  %v7442_v22 = vld [vmem:[%s8116_s1] sm:$0xff]   ;;  %v3933_v49 = vcombine.high %v3918_v13, %v3918_v13  ;;  %v3932_v1 = vcombine.low %v3918_v13, %v3918_v13 }
 0x200   :  { %4766 = vmatpush3.bf16.msra.mxu0 %v7442_v22 }
 0x201   :  { %4794 = vmatpush3.bf16.msra.mxu1 %v6773_v38  ;;  %4807 = vmatprep.subr.bf16.mxu0 %v7449_v63 }
 0x202   :  { %4835 = vmatprep.subr.bf16.mxu1 %v6785_v46  ;;  %v7463_v46 = vld [vmem:[%s8116_s1 + $0x170] sm:$0xff]  }
 0x203   :  { %v4485_v54 = vpop.f32.mrf.mxu0  ;;  %2736 = vmatmul.mubr.bf16.vlgmr.msra.gmra.mxu0 %v5501_v3  ;;  %v3921_v3 = vld [vmem:[%s8117_s0 + $0x2e8] sm:$0xff] }
 0x204   :  { %2784 = vmatmul.mubr.bf16.vlgmr.msra.gmra.mxu1 %v5504_v26  ;;  %v5195_v57 = vpop.f32.mrf.mxu1  ;;  %4808 = vmatpush3.bf16.msra.mxu0 %v7456_v5  ;;  %v3938_v27 = vcombine.low %v3921_v3, %v3921_v3 }
 0x205   :  { %4836 = vmatpush3.bf16.msra.mxu1 %v6794_v40  ;;  %v4486_v38 = vpop.f32.mrf.mxu0  ;;  %4809 = vmatprep.subr.bf16.mxu0 %v7463_v46  ;;  %v7470_v40 = vld [vmem:[%s8116_s1 + $0x130] sm:$0xff]  }
 0x206   :  { %4837 = vmatprep.subr.bf16.mxu1 %v6806_v45  ;;  %v1918_v19 = vpop.f32.mrf.mxu1  ;;  %v4487_v31 = vadd.f32 %v4486_v38, %v4485_v54  ;;  %2743 = vmatprep.mubr.bf16.mxu0 %v3933_v49  ;;  %8377 = vst [vmem:[#allocation4_spill] sm:$0xff] %v7470_v40  ;;  %v7509_v49 = vld [vmem:[%s8116_s1 + $0x1e0] sm:$0xff]  }
 0x207   :  { %2791 = vmatprep.mubr.bf16.mxu1 %v3935_v8  ;;  %v4488_v2 = vpop.f32.mrf.mxu0  ;;  %8382 = vst [vmem:[#allocation14_spill] sm:$0xff] %v7509_v49  ;;  %v3920_v38 = vld [vmem:[%s8117_s0 + $0x2e0] sm:$0xff] }
 0x208   :  { %v5196_v41 = vpop.f32.mrf.mxu1  ;;  %4810 = vmatpush3.bf16.msra.mxu0 %v7470_v40  ;;  %v1871_v37 = vadd.f32 %v4487_v31, %v7346_v28  ;;  %v7526_v31 = vld [vmem:[%s8116_s1 + $0x1a0] sm:$0xff]  }
 0x209   :  { %4838 = vmatpush3.bf16.msra.mxu1 %v8357_v58  ;;  %v4489_v45 = vpop.f32.mrf.mxu0  ;;  %4811 = vmatprep.subr.bf16.mxu0 %v7478_v29  ;;  %v5516_v58 = vld [vmem:[%s8117_s0 + $0x2a4] ss:$36 sps:$4 sm:$0xff]   ;;  %8385 = vst [vmem:[#allocation19_spill] sm:$0xff] %v7526_v31 }
 0x20a   :  { %4839 = vmatprep.subr.bf16.mxu1 %v8358_v17  ;;  %v4490_v62 = vadd.f32 %v4489_v45, %v4488_v2  ;;  %v7482_v9 = vadd.f32 %v1918_v19, %v1871_v37  ;;  %v1921_v39 = vpop.f32.mrf.mxu1  ;;  %v7495_v17 = vld [vmem:[%s8116_s1 + $0x128] sm:$0xff]   ;;  %v7520_v19 = vld [vmem:[%s8116_s1 + $0x120] sm:$0xff]   ;;  %v7538_v2 = vld [vmem:[%s8116_s1 + $0x1d8] sm:$0xff]  }
 0x20b   :  { %v4491_v28 = vpop.f32.mrf.mxu0  ;;  %2744 = vmatmul.mubr.bf16.gmra.mxu0 %v3932_v1  ;;  %8380 = vst [vmem:[#allocation7_spill] sm:$0xff] %v7495_v17  ;;  %8384 = vst [vmem:[#allocation16_spill] sm:$0xff] %v7520_v19  ;;  %v7552_v37 = vld [vmem:[%s8116_s1 + $0x198] sm:$0xff]   ;;  %v7632_v45 = vld [vmem:[%s8116_s1 + $0x100] sm:$0xff]  }
 0x20c   :  { %8379 = vst [vmem:[#allocation6_spill] sm:$0xff] %v7482_v9  ;;  %2792 = vmatmul.mubr.bf16.gmra.mxu1 %v3934_v14  ;;  %4812 = vmatpush3.bf16.msra.mxu0 %v7495_v17  ;;  %v1874_v26 = vadd.f32 %v4490_v62, %v7366_v16  ;;  %8387 = vst [vmem:[#allocation15_spill] sm:$0xff] %v7538_v2  ;;  %v7546_v14 = vld [vmem:[%s8116_s1 + $0x118] sm:$0xff]   ;;  %v7566_v62 = vld [vmem:[%s8116_s1 + $0x1d0] sm:$0xff]  }
 0x20d   :  { %4840 = vmatpush3.bf16.msra.mxu1 %v8363_v51  ;;  %v4492_v13 = vpop.f32.mrf.mxu0  ;;  %4813 = vmatprep.subr.bf16.mxu0 %v7503_v56  ;;  %8388 = vst [vmem:[#allocation17_spill] sm:$0xff] %v7546_v14  ;;  %8389 = vst [vmem:[#allocation9_spill] sm:$0xff] %v7552_v37 }
 0x20e   :  { %4841 = vmatprep.subr.bf16.mxu1 %v7509_v49  ;;  %v4493_v8 = vadd.f32 %v4492_v13, %v4491_v28  ;;  %v7512_v54 = vadd.f32 %v1921_v39, %v1874_v26  ;;  %2831 = vmatprep.mubr.bf16.mxu0 %v5513_v11  ;;  %8391 = vst [vmem:[#allocation18_spill] sm:$0xff] %v7566_v62  ;;  %v7572_v11 = vld [vmem:[%s8116_s1 + $0x110] sm:$0xff]   ;;  %v7584_v28 = vld [vmem:[%s8116_s1 + $0x148] sm:$0xff]   ;;  %8400 = vst [vmem:[#allocation28_spill] sm:$0xff] %v7632_v45 }
 0x20f   :  { %2879 = vmatprep.mubr.bf16.mxu1 %v5516_v58  ;;  %v4494_v51 = vpop.f32.mrf.mxu0  ;;  %8392 = vst [vmem:[#allocation20_spill] sm:$0xff] %v7572_v11  ;;  %v7578_v58 = vld [vmem:[%s8116_s1 + $0x190] sm:$0xff]   ;;  %8394 = vst [vmem:[#allocation22_spill] sm:$0xff] %v7584_v28  ;;  %v7590_v39 = vld [vmem:[%s8116_s1 + $0x1c8] sm:$0xff]  }
 0x210   :  { %8383 = vst [vmem:[#allocation2_spill] sm:$0xff] %v7512_v54  ;;  %v1879_v16 = vadd.f32 %v4493_v8, %v7383_v25  ;;  %4814 = vmatpush3.bf16.msra.mxu0 %v7520_v19  ;;  %v7532_v25 = vld [vmem:[%s8116_s1 + $0x158] sm:$0xff]   ;;  %8393 = vst [vmem:[#allocation21_spill] sm:$0xff] %v7578_v58  ;;  %v7596_v26 = vld [vmem:[%s8116_s1 + $0x108] sm:$0xff]   ;;  %v3936_v54 = vcombine.low %v3920_v38, %v3920_v38 }
 0x211   :  { %4842 = vmatpush3.bf16.msra.mxu1 %v7526_v31  ;;  %8386 = vst [vmem:[#allocation30_spill] sm:$0xff] %v7532_v25  ;;  %4815 = vmatprep.subr.bf16.mxu0 %v7532_v25  ;;  %v4495_v41 = vpop.f32.mrf.mxu0  ;;  %8395 = vst [vmem:[#allocation23_spill] sm:$0xff] %v7590_v39  ;;  %v7602_v13 = vld [vmem:[%s8116_s1 + $0x188] sm:$0xff]   ;;  %v7608_v8 = vld [vmem:[%s8116_s1 + $0x140] sm:$0xff]  }
 0x212   :  { %4843 = vmatprep.subr.bf16.mxu1 %v7538_v2  ;;  %v7541_v1 = vadd.f32 %v5195_v57, %v1879_v16  ;;  %v7560_v57 = vld [vmem:[%s8116_s1 + $0x150] sm:$0xff]   ;;  %8396 = vst [vmem:[#allocation24_spill] sm:$0xff] %v7596_v26  ;;  %8397 = vst [vmem:[#allocation25_spill] sm:$0xff] %v7602_v13  ;;  %v7614_v51 = vld [vmem:[%s8116_s1 + $0x1c0] sm:$0xff]  }
 0x213   :  { %8390 = vst [vmem:[#allocation31_spill] sm:$0xff] %v7560_v57  ;;  %8398 = vst [vmem:[#allocation26_spill] sm:$0xff] %v7608_v8  ;;  %v5511_v16 = vld [vmem:[%s8117_s0 + $0x298] ss:$36 sps:$4 sm:$0xff]   ;;  %v5514_v41 = vld [vmem:[%s8117_s0 + $0x2a0] ss:$36 sps:$4 sm:$0xff]  }
 0x214   :  { %4816 = vmatpush3.bf16.msra.mxu0 %v7546_v14  ;;  %8399 = vst [vmem:[#allocation27_spill] sm:$0xff] %v7614_v51  ;;  %v7653_v31 = vld [vmem:[%s8116_s1 + $0x230] sm:$0xff]  }
 0x215   :  { %4844 = vmatpush3.bf16.msra.mxu1 %v7552_v37  ;;  %4817 = vmatprep.subr.bf16.mxu0 %v7560_v57  ;;  %8403 = vst [vmem:[#allocation33_spill] sm:$0xff] %v7653_v31 }
 0x216   :  { %4845 = vmatprep.subr.bf16.mxu1 %v7566_v62 }
 0x218   :  { %4818 = vmatpush3.bf16.msra.mxu0 %v7572_v11 }
 0x219   :  { %4846 = vmatpush3.bf16.msra.mxu1 %v7578_v58  ;;  %4819 = vmatprep.subr.bf16.mxu0 %v7584_v28  ;;  %v3939_v58 = vcombine.high %v3921_v3, %v3921_v3  ;;  %v5525_v3 = vld [vmem:[%s8117_s0 + $0x2f8] ss:$36 sps:$4 sm:$0xff]  }
 0x21a   :  { %4847 = vmatprep.subr.bf16.mxu1 %v7590_v39  ;;  %v3937_v39 = vcombine.high %v3920_v38, %v3920_v38 }
 0x21c   :  { %4820 = vmatpush3.bf16.msra.mxu0 %v7596_v26 }
 0x21d   :  { %4848 = vmatpush3.bf16.msra.mxu1 %v7602_v13  ;;  %4821 = vmatprep.subr.bf16.mxu0 %v7608_v8  ;;  %v7644_v13 = vld [vmem:[%s8116_s1 + $0x238] sm:$0xff]  }
 0x21e   :  { %4849 = vmatprep.subr.bf16.mxu1 %v7614_v51  ;;  %v7638_v51 = vld [vmem:[%s8116_s1 + $0x180] sm:$0xff]   ;;  %8402 = vst [vmem:[#allocation32_spill] sm:$0xff] %v7644_v13 }
 0x21f   :  { %8401 = vst [vmem:[#allocation29_spill] sm:$0xff] %v7638_v51 }
 0x220   :  { %4822 = vmatpush3.bf16.msra.mxu0 %v7632_v45 }
 0x221   :  { %4850 = vmatpush3.bf16.msra.mxu1 %v7638_v51  ;;  %5237 = vmatprep.subr.bf16.mxu0 %v7644_v13 }
 0x222   :  { %4873 = vmatprep.subr.bf16.mxu1 %v7310_v42 }
 0x223   :  { %v4523_v62 = vpop.f32.mrf.mxu0  ;;  %2832 = vmatmul.mubr.bf16.vlgmr.msra.gmra.mxu0 %v5511_v16 }
 0x224   :  { %v4551_v37 = vpop.f32.mrf.mxu1  ;;  %2880 = vmatmul.mubr.bf16.vlgmr.msra.gmra.mxu1 %v5514_v41  ;;  %5238 = vmatpush3.bf16.msra.mxu0 %v7644_v13 }
 0x225   :  { %4874 = vmatpush3.bf16.msra.mxu1 %v7320_v60  ;;  %v4524_v51 = vpop.f32.mrf.mxu0  ;;  %5239 = vmatprep.subr.bf16.mxu0 %v7653_v31 }
 0x226   :  { %v4552_v2 = vpop.f32.mrf.mxu1  ;;  %4875 = vmatprep.subr.bf16.mxu1 %v7327_v44  ;;  %v4525_v42 = vadd.f32 %v4524_v51, %v4523_v62  ;;  %2839 = vmatprep.mubr.bf16.mxu0 %v3937_v39  ;;  %v7664_v44 = vld [vmem:[%s8116_s1 + $0x228] sm:$0xff]  }
 0x227   :  { %v4553_v49 = vadd.f32 %v4552_v2, %v4551_v37  ;;  %2887 = vmatprep.mubr.bf16.mxu1 %v3939_v58  ;;  %v4526_v16 = vpop.f32.mrf.mxu0  ;;  %8404 = vst [vmem:[#allocation34_spill] sm:$0xff] %v7664_v44 }
 0x228   :  { %v4554_v41 = vpop.f32.mrf.mxu1  ;;  %5240 = vmatpush3.bf16.msra.mxu0 %v7653_v31 }
 0x229   :  { %v7657_v60 = vadd.f32 %v4553_v49, %v4525_v42  ;;  %4876 = vmatpush3.bf16.msra.mxu1 %v7335_v53  ;;  %v4527_v9 = vpop.f32.mrf.mxu0  ;;  %5241 = vmatprep.subr.bf16.mxu0 %v7664_v44  ;;  %v5521_v42 = vld [vmem:[%s8117_s0 + $0x2a8] ss:$36 sps:$4 sm:$0xff]  }
 0x22a   :  { %v4555_v50 = vpop.f32.mrf.mxu1  ;;  %4877 = vmatprep.subr.bf16.mxu1 %v7342_v20  ;;  %v4528_v2 = vadd.f32 %v4527_v9, %v4526_v16 }
 0x22b   :  { %v4556_v38 = vadd.f32 %v4555_v50, %v4554_v41  ;;  %2840 = vmatmul.mubr.bf16.gmra.mxu0 %v3936_v54  ;;  %v4529_v49 = vpop.f32.mrf.mxu0 }
 0x22c   :  { %2888 = vmatmul.mubr.bf16.gmra.mxu1 %v3938_v27  ;;  %v4557_v37 = vpop.f32.mrf.mxu1  ;;  %5242 = vmatpush3.bf16.msra.mxu0 %v7664_v44 }
 0x22d   :  { %v7674_v62 = vadd.f32 %v4556_v38, %v4528_v2  ;;  %4878 = vmatpush3.bf16.msra.mxu1 %v7355_v0  ;;  %5243 = vmatprep.subr.bf16.mxu0 %v7093_v4  ;;  %v4530_v50 = vpop.f32.mrf.mxu0  ;;  %v3951_v2 = vld [vmem:[%s8117_s0 + $0x33c] sm:$0xff] }
 0x22e   :  { %4879 = vmatprep.subr.bf16.mxu1 %v7362_v12  ;;  %v4558_v9 = vpop.f32.mrf.mxu1  ;;  %v4531_v58 = vadd.f32 %v4530_v50, %v4529_v49  ;;  %5253 = vmatprep.mubr.bf16.mxu0 %v5521_v42  ;;  %v3966_v38 = vcombine.high %v3951_v2, %v3951_v2  ;;  %v5530_v42 = vld [vmem:[%s8117_s0 + $0x300] ss:$36 sps:$4 sm:$0xff]  }
 0x22f   :  { %v4559_v39 = vadd.f32 %v4558_v9, %v4557_v37  ;;  %3072 = vmatprep.mubr.bf16.mxu1 %v5525_v3  ;;  %v4532_v54 = vpop.f32.mrf.mxu0 }
 0x230   :  { %v4560_v27 = vpop.f32.mrf.mxu1  ;;  %5244 = vmatpush3.bf16.msra.mxu0 %v7093_v4  ;;  %v5522_v4 = vld [vmem:[%s8117_s0 + $0x2f0] ss:$0 sps:$4 sm:$0xff]  }
 0x231   :  { %4880 = vmatpush3.bf16.msra.mxu1 %v7371_v23  ;;  %v7682_v51 = vadd.f32 %v4559_v39, %v4531_v58  ;;  %5245 = vmatprep.subr.bf16.mxu0 %v7104_v7  ;;  %v4533_v16 = vpop.f32.mrf.mxu0  ;;  %v3965_v27 = vcombine.low %v3951_v2, %v3951_v2 }
 0x232   :  { %4881 = vmatprep.subr.bf16.mxu1 %v7379_v32  ;;  %v4561_v41 = vpop.f32.mrf.mxu1 }
 0x234   :  { %5246 = vmatpush3.bf16.msra.mxu0 %v7104_v7  ;;  %v5523_v7 = vld [vmem:[%s8117_s0 + $0x2f4] ss:$36 sps:$4 sm:$0xff]  }
 0x235   :  { %4882 = vmatpush3.bf16.msra.mxu1 %v7388_v30  ;;  %5247 = vmatprep.subr.bf16.mxu0 %v7113_v10 }
 0x236   :  { %4883 = vmatprep.subr.bf16.mxu1 %v7395_v33 }
 0x238   :  { %5248 = vmatpush3.bf16.msra.mxu0 %v7113_v10 }
 0x239   :  { %4884 = vmatpush3.bf16.msra.mxu1 %v7402_v43  ;;  %5249 = vmatprep.subr.bf16.mxu0 %v7122_v59 }
 0x23a   :  { %4885 = vmatprep.subr.bf16.mxu1 %v7409_v47 }
 0x23c   :  { %5250 = vmatpush3.bf16.msra.mxu0 %v7122_v59 }
 0x23d   :  { %4886 = vmatpush3.bf16.msra.mxu1 %v7416_v52  ;;  %5251 = vmatprep.subr.bf16.mxu0 %v7131_v61 }
 0x23e   :  { %4887 = vmatprep.subr.bf16.mxu1 %v7423_v34 }
 0x240   :  { %5252 = vmatpush3.bf16.msra.mxu0 %v7131_v61 }
 0x241   :  { %4888 = vmatpush3.bf16.msra.mxu1 %v7442_v22  ;;  %4901 = vmatprep.subr.bf16.mxu0 %v7149_v6 }
 0x242   :  { %4929 = vmatprep.subr.bf16.mxu1 %v7449_v63 }
 0x243   :  { %v4579_v3 = vpop.f32.mrf.mxu0  ;;  %5254 = vmatmul.mubr.bf16.vlgmr.msra.gmra.mxu0 %v5522_v4 }
 0x244   :  { %3073 = vmatmul.mubr.bf16.vlgmr.msra.gmra.mxu1 %v5523_v7  ;;  %v4607_v49 = vpop.f32.mrf.mxu1  ;;  %4902 = vmatpush3.bf16.msra.mxu0 %v7159_v24 }
 0x245   :  { %4930 = vmatpush3.bf16.msra.mxu1 %v7456_v5  ;;  %v4580_v37 = vpop.f32.mrf.mxu0  ;;  %4903 = vmatprep.subr.bf16.mxu0 %v7166_v48 }
 0x246   :  { %v4608_v50 = vpop.f32.mrf.mxu1  ;;  %4931 = vmatprep.subr.bf16.mxu1 %v7463_v46  ;;  %v4581_v9 = vadd.f32 %v4580_v37, %v4579_v3  ;;  %3080 = vmatprep.mubr.bf16.mxu1 %v3966_v38  ;;  %v5533_v38 = vld [vmem:[%s8117_s0 + $0x308] ss:$36 sps:$4 sm:$0xff]  }
 0x247   :  { %v4609_v58 = vadd.f32 %v4608_v50, %v4607_v49  ;;  %3120 = vmatprep.mubr.bf16.mxu0 %v5530_v42  ;;  %v4582_v39 = vpop.f32.mrf.mxu0 }
 0x248   :  { %v4610_v54 = vpop.f32.mrf.mxu1  ;;  %v2160_v16 = vadd.f32 %v4581_v9, %v7657_v60  ;;  %4904 = vmatpush3.bf16.msra.mxu0 %v7174_v55 }
 0x249   :  { %4932 = vmatpush3.bf16.msra.mxu1 %v7470_v40  ;;  %v4583_v41 = vpop.f32.mrf.mxu0  ;;  %4905 = vmatprep.subr.bf16.mxu0 %v7181_v15 }
 0x24a   :  { %v4611_v4 = vpop.f32.mrf.mxu1  ;;  %4933 = vmatprep.subr.bf16.mxu1 %v7478_v29  ;;  %v4584_v7 = vadd.f32 %v4583_v41, %v4582_v39  ;;  %v7726_v42 = vadd.f32 %v4609_v58, %v2160_v16 }
 0x24b   :  { %v4612_v3 = vadd.f32 %v4611_v4, %v4610_v54  ;;  %v4585_v2 = vpop.f32.mrf.mxu0 }
 0x24c   :  { %v4613_v60 = vpop.f32.mrf.mxu1  ;;  %3081 = vmatmul.mubr.bf16.gmra.mxu1 %v3965_v27  ;;  %v2163_v49 = vadd.f32 %v4584_v7, %v7674_v62  ;;  %4906 = vmatpush3.bf16.msra.mxu0 %v7192_v35  ;;  %v7741_v62 = vld [vmem:[%s8116_s1 + $0xd8] sm:$0xff]  }
 0x24d   :  { %4934 = vmatpush3.bf16.msra.mxu1 %v7495_v17  ;;  %v4586_v37 = vpop.f32.mrf.mxu0  ;;  %4907 = vmatprep.subr.bf16.mxu0 %v7199_v18  ;;  %v8407_v17 = vld [vmem:[#allocation6_spill] sm:$0xff] }
 0x24e   :  { %v4614_v50 = vpop.f32.mrf.mxu1  ;;  %4935 = vmatprep.subr.bf16.mxu1 %v7503_v56  ;;  %v4587_v9 = vadd.f32 %v4586_v37, %v4585_v2  ;;  %3168 = vmatprep.mubr.bf16.mxu1 %v5533_v38  ;;  %v7733_v58 = vadd.f32 %v4612_v3, %v2163_v49  ;;  %v7755_v3 = vld [vmem:[%s8116_s1 + $0xd0] sm:$0xff]   ;;  %v7769_v2 = vld [vmem:[%s8116_s1 + $0xc8] sm:$0xff]   ;;  %v7783_v49 = vld [vmem:[%s8116_s1 + $0xc0] sm:$0xff]  }
 0x24f   :  { %v4615_v39 = vadd.f32 %v4614_v50, %v4613_v60  ;;  %v4588_v54 = vpop.f32.mrf.mxu0  ;;  %v7762_v38 = vld [vmem:[%s8116_s1 + $0x90] sm:$0xff]   ;;  %v7776_v60 = vld [vmem:[%s8116_s1 + $0x88] sm:$0xff]   ;;  %v5528_v37 = vld [vmem:[%s8117_s0 + $0x2fc] ss:$36 sps:$4 sm:$0xff]  }
 0x250   :  { %v4616_v16 = vpop.f32.mrf.mxu1  ;;  %v2168_v27 = vadd.f32 %v4587_v9, %v7682_v51  ;;  %4908 = vmatpush3.bf16.msra.mxu0 %v7207_v21  ;;  %v7748_v51 = vld [vmem:[%s8116_s1 + $0x98] sm:$0xff]   ;;  %v5531_v50 = vld [vmem:[%s8117_s0 + $0x304] ss:$36 sps:$4 sm:$0xff]  }
 0x251   :  { %4936 = vmatpush3.bf16.msra.mxu1 %v7520_v19  ;;  %4909 = vmatprep.subr.bf16.mxu0 %v7741_v62  ;;  %v4589_v41 = vpop.f32.mrf.mxu0  ;;  %v3952_v9 = vld [vmem:[%s8117_s0 + $0x344] sm:$0xff]  ;;  %v7809_v16 = vld [vmem:[%s8116_s1 + $0x1f8] sm:$0xff]  }
 0x252   :  { %4937 = vmatprep.subr.bf16.mxu1 %v7532_v25  ;;  %v4617_v4 = vpop.f32.mrf.mxu1  ;;  %v2216_v7 = vadd.f32 %v4615_v39, %v2168_v27  ;;  %v3953_v39 = vld [vmem:[%s8117_s0 + $0x34c] sm:$0xff]  ;;  %v7802_v54 = vld [vmem:[%s8116_s1 + $0x80] sm:$0xff]   ;;  %v3968_v27 = vcombine.high %v3952_v9, %v3952_v9 }
 0x253   :  { %v3970_v41 = vcombine.high %v3953_v39, %v3953_v39  ;;  %v3969_v25 = vcombine.low %v3953_v39, %v3953_v39  ;;  %v8406_v56 = vld [vmem:[#allocation10_spill] sm:$0xff] }
 0x254   :  { %4910 = vmatpush3.bf16.msra.mxu0 %v7748_v51  ;;  %v8408_v29 = vmax.f32 %v8406_v56, %v8407_v17 }
 0x255   :  { %4938 = vmatpush3.bf16.msra.mxu1 %v7546_v14  ;;  %4911 = vmatprep.subr.bf16.mxu0 %v7755_v3  ;;  %v3967_v14 = vcombine.low %v3952_v9, %v3952_v9  ;;  %v8410_v9 = vld [vmem:[#allocation2_spill] sm:$0xff] }
 0x256   :  { %4939 = vmatprep.subr.bf16.mxu1 %v7560_v57 }
 0x258   :  { %4912 = vmatpush3.bf16.msra.mxu0 %v7762_v38 }
 0x259   :  { %4940 = vmatpush3.bf16.msra.mxu1 %v7572_v11  ;;  %4913 = vmatprep.subr.bf16.mxu0 %v7769_v2  ;;  %v7823_v11 = vld [vmem:[%s8116_s1 + $0x1f0] sm:$0xff]  }
 0x25a   :  { %4941 = vmatprep.subr.bf16.mxu1 %v7584_v28 }
 0x25c   :  { %4914 = vmatpush3.bf16.msra.mxu0 %v7776_v60 }
 0x25d   :  { %4942 = vmatpush3.bf16.msra.mxu1 %v7596_v26  ;;  %4915 = vmatprep.subr.bf16.mxu0 %v7783_v49 }
 0x25e   :  { %4943 = vmatprep.subr.bf16.mxu1 %v7608_v8 }
 0x260   :  { %4916 = vmatpush3.bf16.msra.mxu0 %v7802_v54 }
 0x261   :  { %4944 = vmatpush3.bf16.msra.mxu1 %v7632_v45  ;;  %4957 = vmatprep.subr.bf16.mxu0 %v7809_v16  ;;  %v7816_v45 = vld [vmem:[%s8116_s1 + $0x1b8] sm:$0xff]  }
 0x262   :  { %5257 = vmatprep.subr.bf16.mxu1 %v7644_v13 }
 0x263   :  { %v5215_v4 = vpop.f32.mrf.mxu0  ;;  %3121 = vmatmul.mubr.bf16.vlgmr.msra.gmra.mxu0 %v5528_v37  ;;  %v8405_v37 = vmax.f32 %v7248_v36, %v7541_v1  ;;  %v7843_v36 = vld [vmem:[%s8116_s1 + $0x1b0] sm:$0xff]  }
 0x264   :  { %3169 = vmatmul.mubr.bf16.vlgmr.msra.gmra.mxu1 %v5531_v50  ;;  %v4645_v8 = vpop.f32.mrf.mxu1  ;;  %v2264_v26 = vadd.f32 %v5215_v4, %v2216_v7  ;;  %4958 = vmatpush3.bf16.msra.mxu0 %v7816_v45 }
 0x265   :  { %5258 = vmatpush3.bf16.msra.mxu1 %v7644_v13  ;;  %v2255_v28 = vpop.f32.mrf.mxu0  ;;  %4959 = vmatprep.subr.bf16.mxu0 %v7823_v11 }
 0x266   :  { %5259 = vmatprep.subr.bf16.mxu1 %v7653_v31  ;;  %v4646_v7 = vpop.f32.mrf.mxu1  ;;  %v7830_v50 = vmax.f32 %v8405_v37, %v2264_v26  ;;  %v2256_v4 = vadd.f32 %v2255_v28, %v7726_v42  ;;  %3128 = vmatprep.mubr.bf16.mxu0 %v3968_v27  ;;  %v5540_v28 = vld [vmem:[%s8117_s0 + $0x310] ss:$36 sps:$4 sm:$0xff]   ;;  %v8409_v42 = vld [vmem:[#allocation11_spill] sm:$0xff] }
 0x267   :  { %3176 = vmatprep.mubr.bf16.mxu1 %v3970_v41  ;;  %v7833_v13 = vadd.f32 %v4646_v7, %v4645_v8  ;;  %v5216_v57 = vpop.f32.mrf.mxu0  ;;  %v5541_v26 = vld [vmem:[%s8117_s0 + $0x314] ss:$36 sps:$4 sm:$0xff]   ;;  %v8411_v39 = vmax.f32 %v8409_v42, %v8410_v9  ;;  %v8414_v37 = vld [vmem:[#allocation19_spill] sm:$0xff] }
 0x268   :  { %v4648_v19 = vpop.f32.mrf.mxu1  ;;  %v7838_v40 = vmax.f32 %v8408_v29, %v2256_v4  ;;  %4960 = vmatpush3.bf16.msra.mxu0 %v7843_v36  ;;  %v7850_v57 = vld [vmem:[%s8116_s1 + $0x1e8] sm:$0xff]   ;;  %v8422_v9 = vld [vmem:[#allocation25_spill] sm:$0xff] }
 0x269   :  { %5260 = vmatpush3.bf16.msra.mxu1 %v7653_v31  ;;  %v2258_v1 = vpop.f32.mrf.mxu0  ;;  %4961 = vmatprep.subr.bf16.mxu0 %v7850_v57  ;;  %v8415_v4 = vld [vmem:[#allocation15_spill] sm:$0xff]  ;;  %v8428_v31 = vld [vmem:[#allocation13_spill] sm:$0xff] }
 0x26a   :  { %5261 = vmatprep.subr.bf16.mxu1 %v7664_v44  ;;  %v4649_v29 = vpop.f32.mrf.mxu1  ;;  %v2259_v17 = vadd.f32 %v2258_v1, %v7733_v58  ;;  %v8412_v58 = vld [vmem:[#allocation14_spill] sm:$0xff]  ;;  %v7890_v1 = vld [vmem:[%s8116_s1 + $0x218] sm:$0xff]   ;;  %v8421_v42 = vld [vmem:[#allocation23_spill] sm:$0xff] }
 0x26b   :  { %v7855_v56 = vadd.f32 %v4649_v29, %v4648_v19  ;;  %3129 = vmatmul.mubr.bf16.gmra.mxu0 %v3967_v14  ;;  %v7871_v19 = vld [vmem:[%s8116_s1 + $0x1a8] sm:$0xff]   ;;  %8416 = vst [vmem:[#allocation6_spill] sm:$0xff] %v7890_v1 }
 0x26c   :  { %3177 = vmatmul.mubr.bf16.gmra.mxu1 %v3969_v25  ;;  %v4651_v8 = vpop.f32.mrf.mxu1  ;;  %v7866_v27 = vmax.f32 %v8411_v39, %v2259_v17  ;;  %4962 = vmatpush3.bf16.msra.mxu0 %v7871_v19  ;;  %v7879_v25 = vld [vmem:[%s8116_s1 + $0x220] sm:$0xff]   ;;  %v8417_v17 = vld [vmem:[#allocation9_spill] sm:$0xff]  ;;  %v7910_v39 = vld [vmem:[%s8116_s1 + $0x208] sm:$0xff]  }
 0x26d   :  { %5262 = vmatpush3.bf16.msra.mxu1 %v7664_v44  ;;  %4963 = vmatprep.subr.bf16.mxu0 %v8412_v58  ;;  %8413 = vst [vmem:[#allocation10_spill] sm:$0xff] %v7879_v25  ;;  %8423 = vst [vmem:[#allocation2_spill] sm:$0xff] %v7910_v39 }
 0x26e   :  { %5263 = vmatprep.subr.bf16.mxu1 %v7879_v25  ;;  %v4652_v14 = vpop.f32.mrf.mxu1  ;;  %3216 = vmatprep.mubr.bf16.mxu0 %v5540_v28  ;;  %v8418_v28 = vld [vmem:[#allocation18_spill] sm:$0xff] }
 0x26f   :  { %v7882_v41 = vadd.f32 %v4652_v14, %v4651_v8  ;;  %5273 = vmatprep.mubr.bf16.mxu1 %v5541_v26  ;;  %v8419_v26 = vld [vmem:[#allocation21_spill] sm:$0xff]  ;;  %v7901_v8 = vld [vmem:[%s8116_s1 + $0x210] sm:$0xff]  }
 0x270   :  { %v4654_v7 = vpop.f32.mrf.mxu1  ;;  %4964 = vmatpush3.bf16.msra.mxu0 %v8414_v37  ;;  %8420 = vst [vmem:[#allocation11_spill] sm:$0xff] %v7901_v8  ;;  %v5538_v14 = vld [vmem:[%s8117_s0 + $0x30c] ss:$36 sps:$4 sm:$0xff]  }
 0x271   :  { %5264 = vmatpush3.bf16.msra.mxu1 %v7879_v25  ;;  %4965 = vmatprep.subr.bf16.mxu0 %v8415_v4  ;;  %v3954_v7 = vld [vmem:[%s8117_s0 + $0x354] sm:$0xff] }
 0x272   :  { %5265 = vmatprep.subr.bf16.mxu1 %v7890_v1  ;;  %v4655_v29 = vpop.f32.mrf.mxu1 }
 0x273   :  { %v8425_v29 = vld [vmem:[#allocation29_spill] sm:$0xff] }
 0x274   :  { %4966 = vmatpush3.bf16.msra.mxu0 %v8417_v17 }
 0x275   :  { %5266 = vmatpush3.bf16.msra.mxu1 %v7890_v1  ;;  %4967 = vmatprep.subr.bf16.mxu0 %v8418_v28  ;;  %v5550_v1 = vld [vmem:[%s8117_s0 + $0x36c] ss:$36 sps:$4 sm:$0xff]  }
 0x276   :  { %5267 = vmatprep.subr.bf16.mxu1 %v7113_v10  ;;  %v8424_v10 = vld [vmem:[#allocation27_spill] sm:$0xff] }
 0x278   :  { %4968 = vmatpush3.bf16.msra.mxu0 %v8419_v26  ;;  %v3971_v26 = vcombine.low %v3954_v7, %v3954_v7 }
 0x279   :  { %5268 = vmatpush3.bf16.msra.mxu1 %v7901_v8  ;;  %4969 = vmatprep.subr.bf16.mxu0 %v8421_v42  ;;  %v3972_v8 = vcombine.high %v3954_v7, %v3954_v7 }
 0x27a   :  { %5269 = vmatprep.subr.bf16.mxu1 %v7122_v59  ;;  %v5542_v59 = vld [vmem:[%s8117_s0 + $0x35c] ss:$0 sps:$4 sm:$0xff]  }
 0x27c   :  { %4970 = vmatpush3.bf16.msra.mxu0 %v8422_v9 }
 0x27d   :  { %5270 = vmatpush3.bf16.msra.mxu1 %v7910_v39  ;;  %4971 = vmatprep.subr.bf16.mxu0 %v8424_v10  ;;  %v7928_v39 = vld [vmem:[%s8116_s1 + $0x200] sm:$0xff]  }
 0x27e   :  { %5271 = vmatprep.subr.bf16.mxu1 %v7131_v61  ;;  %8426 = vst [vmem:[#allocation14_spill] sm:$0xff] %v7928_v39  ;;  %v8427_v61 = vld [vmem:[#allocation12_spill] sm:$0xff] }
 0x280   :  { %4972 = vmatpush3.bf16.msra.mxu0 %v8425_v29 }
 0x281   :  { %5272 = vmatpush3.bf16.msra.mxu1 %v7928_v39  ;;  %4995 = vmatprep.subr.bf16.mxu0 %v8427_v61  ;;  %v8429_v39 = vld [vmem:[#allocation3_spill] sm:$0xff] }
 0x282   :  { %5023 = vmatprep.subr.bf16.mxu1 %v7149_v6 }
 0x283   :  { %v4673_v25 = vpop.f32.mrf.mxu0  ;;  %3217 = vmatmul.mubr.bf16.vlgmr.msra.gmra.mxu0 %v5538_v14 }
 0x284   :  { %5274 = vmatmul.mubr.bf16.vlgmr.msra.gmra.mxu1 %v5542_v59  ;;  %v4701_v44 = vpop.f32.mrf.mxu1  ;;  %4996 = vmatpush3.bf16.msra.mxu0 %v8428_v31  ;;  %v8433_v59 = vld [vmem:[#allocation8_spill] sm:$0xff] }
 0x285   :  { %5024 = vmatpush3.bf16.msra.mxu1 %v7159_v24  ;;  %v4674_v29 = vpop.f32.mrf.mxu0  ;;  %4997 = vmatprep.subr.bf16.mxu0 %v8429_v39 }
 0x286   :  { %v4702_v10 = vpop.f32.mrf.mxu1  ;;  %5025 = vmatprep.subr.bf16.mxu1 %v7166_v48  ;;  %v4675_v6 = vadd.f32 %v4674_v29, %v4673_v25  ;;  %3224 = vmatprep.mubr.bf16.mxu0 %v3972_v8 }
 0x287   :  { %v4703_v61 = vadd.f32 %v4702_v10, %v4701_v44  ;;  %3457 = vmatprep.mubr.bf16.mxu1 %v5550_v1  ;;  %v4676_v9 = vpop.f32.mrf.mxu0  ;;  %v5547_v1 = vld [vmem:[%s8117_s0 + $0x364] ss:$36 sps:$4 sm:$0xff]  }
 0x288   :  { %v4704_v42 = vpop.f32.mrf.mxu1  ;;  %v2449_v14 = vadd.f32 %v4675_v6, %v7833_v13  ;;  %4998 = vmatpush3.bf16.msra.mxu0 %v7335_v53 }
 0x289   :  { %5026 = vmatpush3.bf16.msra.mxu1 %v7174_v55  ;;  %v4677_v24 = vpop.f32.mrf.mxu0  ;;  %4999 = vmatprep.subr.bf16.mxu0 %v7342_v20 }
 0x28a   :  { %v4705_v31 = vpop.f32.mrf.mxu1  ;;  %5027 = vmatprep.subr.bf16.mxu1 %v7181_v15  ;;  %v7945_v48 = vadd.f32 %v4703_v61, %v2449_v14  ;;  %v4678_v44 = vadd.f32 %v4677_v24, %v4676_v9  ;;  %v8434_v24 = vld [vmem:[#allocation16_spill] sm:$0xff] }
 0x28b   :  { %v4706_v25 = vadd.f32 %v4705_v31, %v4704_v42  ;;  %3225 = vmatmul.mubr.bf16.gmra.mxu0 %v3971_v26  ;;  %v4679_v13 = vpop.f32.mrf.mxu0 }
 0x28c   :  { %v4707_v8 = vpop.f32.mrf.mxu1  ;;  %v2452_v53 = vadd.f32 %v4678_v44, %v7855_v56  ;;  %5000 = vmatpush3.bf16.msra.mxu0 %v7355_v0  ;;  %3409 = vmatprep.mubr.bf16.mxu0 %v5547_v1  ;;  %v8438_v1 = vld [vmem:[#allocation20_spill] sm:$0xff] }
 0x28d   :  { %5028 = vmatpush3.bf16.msra.mxu1 %v7192_v35  ;;  %5001 = vmatprep.subr.bf16.mxu0 %v7362_v12  ;;  %v4680_v55 = vpop.f32.mrf.mxu0 }
 0x28e   :  { %5029 = vmatprep.subr.bf16.mxu1 %v7199_v18  ;;  %v4708_v15 = vpop.f32.mrf.mxu1  ;;  %v7955_v20 = vadd.f32 %v4706_v25, %v2452_v53  ;;  %v4681_v42 = vadd.f32 %v4680_v55, %v4679_v13  ;;  %v8437_v25 = vld [vmem:[#allocation31_spill] sm:$0xff]  ;;  %v8440_v13 = vld [vmem:[#allocation22_spill] sm:$0xff]  ;;  %v8443_v53 = vld [vmem:[#allocation25_spill] sm:$0xff] }
 0x28f   :  { %v4709_v9 = vadd.f32 %v4708_v15, %v4707_v8  ;;  %v4682_v26 = vpop.f32.mrf.mxu0  ;;  %v8442_v8 = vld [vmem:[#allocation24_spill] sm:$0xff]  ;;  %v8445_v55 = vld [vmem:[#allocation27_spill] sm:$0xff]  ;;  %v3987_v15 = vld [vmem:[%s8117_s0 + $0x3c0] sm:$0xff] }
 0x290   :  { %v4710_v39 = vpop.f32.mrf.mxu1  ;;  %5002 = vmatpush3.bf16.msra.mxu0 %v7371_v23  ;;  %v2457_v0 = vadd.f32 %v4681_v42, %v7882_v41  ;;  %v5548_v23 = vld [vmem:[%s8117_s0 + $0x368] ss:$36 sps:$4 sm:$0xff]   ;;  %v5558_v42 = vld [vmem:[%s8117_s0 + $0x378] ss:$36 sps:$4 sm:$0xff]  }
 0x291   :  { %5030 = vmatpush3.bf16.msra.mxu1 %v7207_v21  ;;  %5003 = vmatprep.subr.bf16.mxu0 %v7379_v32  ;;  %v4683_v35 = vpop.f32.mrf.mxu0  ;;  %v5545_v21 = vld [vmem:[%s8117_s0 + $0x360] ss:$36 sps:$4 sm:$0xff]   ;;  %v3984_v32 = vld [vmem:[%s8117_s0 + $0x3a8] sm:$0xff]  ;;  %v8447_v26 = vld [vmem:[#allocation29_spill] sm:$0xff] }
 0x292   :  { %5031 = vmatprep.subr.bf16.mxu1 %v7741_v62  ;;  %v4711_v18 = vpop.f32.mrf.mxu1  ;;  %v7962_v12 = vadd.f32 %v4709_v9, %v2457_v0  ;;  %v8432_v41 = vld [vmem:[#allocation7_spill] sm:$0xff]  ;;  %v8446_v9 = vld [vmem:[#allocation28_spill] sm:$0xff]  ;;  %v4005_v35 = vcombine.high %v3987_v15, %v3987_v15 }
 0x293   :  { %v8448_v0 = vld [vmem:[#allocation32_spill] sm:$0xff] }
 0x294   :  { %5004 = vmatpush3.bf16.msra.mxu0 %v7388_v30  ;;  %v3985_v30 = vld [vmem:[%s8117_s0 + $0x3b0] sm:$0xff] }
 0x295   :  { %5032 = vmatpush3.bf16.msra.mxu1 %v7748_v51  ;;  %5005 = vmatprep.subr.bf16.mxu0 %v7395_v33  ;;  %v3999_v33 = vcombine.high %v3984_v32, %v3984_v32 }
 0x296   :  { %5033 = vmatprep.subr.bf16.mxu1 %v7755_v3  ;;  %v3998_v3 = vcombine.low %v3984_v32, %v3984_v32  ;;  %v8449_v32 = vld [vmem:[#allocation33_spill] sm:$0xff] }
 0x298   :  { %5006 = vmatpush3.bf16.msra.mxu0 %v7402_v43  ;;  %v4001_v43 = vcombine.high %v3985_v30, %v3985_v30 }
 0x299   :  { %5034 = vmatpush3.bf16.msra.mxu1 %v7762_v38  ;;  %5007 = vmatprep.subr.bf16.mxu0 %v7409_v47  ;;  %v4000_v38 = vcombine.low %v3985_v30, %v3985_v30 }
 0x29a   :  { %5035 = vmatprep.subr.bf16.mxu1 %v7769_v2  ;;  %v8430_v2 = vld [vmem:[#allocation4_spill] sm:$0xff] }
 0x29c   :  { %5008 = vmatpush3.bf16.msra.mxu0 %v7416_v52 }
 0x29d   :  { %5036 = vmatpush3.bf16.msra.mxu1 %v7776_v60  ;;  %5009 = vmatprep.subr.bf16.mxu0 %v7423_v34 }
 0x29e   :  { %5037 = vmatprep.subr.bf16.mxu1 %v7783_v49  ;;  %v5557_v49 = vld [vmem:[%s8117_s0 + $0x374] ss:$36 sps:$4 sm:$0xff]  }
 0x2a0   :  { %5010 = vmatpush3.bf16.msra.mxu0 %v7442_v22 }
 0x2a1   :  { %5038 = vmatpush3.bf16.msra.mxu1 %v7802_v54  ;;  %5051 = vmatprep.subr.bf16.mxu0 %v7449_v63  ;;  %v5560_v54 = vld [vmem:[%s8117_s0 + $0x37c] ss:$36 sps:$4 sm:$0xff]  }
 0x2a2   :  { %5079 = vmatprep.subr.bf16.mxu1 %v7809_v16 }
 0x2a3   :  { %v4729_v47 = vpop.f32.mrf.mxu0  ;;  %3410 = vmatmul.mubr.bf16.vlgmr.msra.gmra.mxu0 %v5545_v21 }
 0x2a4   :  { %3458 = vmatmul.mubr.bf16.vlgmr.msra.gmra.mxu1 %v5548_v23  ;;  %v5235_v52 = vpop.f32.mrf.mxu1  ;;  %5052 = vmatpush3.bf16.msra.mxu0 %v7456_v5 }
 0x2a5   :  { %5080 = vmatpush3.bf16.msra.mxu1 %v7816_v45  ;;  %v4730_v34 = vpop.f32.mrf.mxu0  ;;  %5053 = vmatprep.subr.bf16.mxu0 %v7463_v46  ;;  %v8431_v45 = vld [vmem:[#allocation5_spill] sm:$0xff] }
 0x2a6   :  { %v2592_v22 = vpop.f32.mrf.mxu1  ;;  %5081 = vmatprep.subr.bf16.mxu1 %v7823_v11  ;;  %v4731_v62 = vadd.f32 %v4730_v34, %v4729_v47  ;;  %3417 = vmatprep.mubr.bf16.mxu0 %v3999_v33  ;;  %v4004_v34 = vcombine.low %v3987_v15, %v3987_v15 }
 0x2a7   :  { %3465 = vmatprep.mubr.bf16.mxu1 %v4001_v43  ;;  %v4732_v63 = vpop.f32.mrf.mxu0 }
 0x2a8   :  { %v5236_v51 = vpop.f32.mrf.mxu1  ;;  %5054 = vmatpush3.bf16.msra.mxu0 %v8430_v2  ;;  %v2545_v60 = vadd.f32 %v4731_v62, %v7945_v48  ;;  %v8436_v48 = vld [vmem:[#allocation17_spill] sm:$0xff]  ;;  %v5565_v62 = vld [vmem:[%s8117_s0 + $0x380] ss:$36 sps:$4 sm:$0xff]  }
 0x2a9   :  { %5082 = vmatpush3.bf16.msra.mxu1 %v7843_v36  ;;  %v4733_v5 = vpop.f32.mrf.mxu0  ;;  %5055 = vmatprep.subr.bf16.mxu0 %v8431_v45 }
 0x2aa   :  { %5083 = vmatprep.subr.bf16.mxu1 %v7850_v57  ;;  %v4734_v46 = vadd.f32 %v4733_v5, %v4732_v63  ;;  %v8001_v11 = vadd.f32 %v2592_v22, %v2545_v60  ;;  %v2595_v56 = vpop.f32.mrf.mxu1 }
 0x2ab   :  { %v4735_v16 = vpop.f32.mrf.mxu0  ;;  %3418 = vmatmul.mubr.bf16.gmra.mxu0 %v3998_v3  ;;  %v8450_v3 = vld [vmem:[#allocation34_spill] sm:$0xff] }
 0x2ac   :  { %3466 = vmatmul.mubr.bf16.gmra.mxu1 %v4000_v38  ;;  %v2606_v36 = vmax.f32 %v7838_v40, %v8001_v11  ;;  %5056 = vmatpush3.bf16.msra.mxu0 %v8432_v41  ;;  %v2548_v57 = vadd.f32 %v4734_v46, %v7955_v20  ;;  %v5555_v20 = vld [vmem:[%s8117_s0 + $0x370] ss:$36 sps:$4 sm:$0xff]   ;;  %v8451_v46 = vld [vmem:[#allocation10_spill] sm:$0xff] }
 0x2ad   :  { %5084 = vmatpush3.bf16.msra.mxu1 %v7871_v19  ;;  %v4736_v10 = vpop.f32.mrf.mxu0  ;;  %5057 = vmatprep.subr.bf16.mxu0 %v8433_v59  ;;  %v8435_v19 = vld [vmem:[#allocation30_spill] sm:$0xff] }
 0x2ae   :  { %5085 = vmatprep.subr.bf16.mxu1 %v8412_v58  ;;  %v4737_v7 = vadd.f32 %v4736_v10, %v4735_v16  ;;  %v8016_v29 = vadd.f32 %v2595_v56, %v2548_v57  ;;  %3505 = vmatprep.mubr.bf16.mxu0 %v5557_v49  ;;  %v8452_v59 = vld [vmem:[#allocation6_spill] sm:$0xff] }
 0x2af   :  { %3553 = vmatprep.mubr.bf16.mxu1 %v5560_v54  ;;  %v4738_v6 = vpop.f32.mrf.mxu0 }
 0x2b0   :  { %v2553_v61 = vadd.f32 %v4737_v7, %v7962_v12  ;;  %v2607_v14 = vmax.f32 %v7866_v27, %v8016_v29  ;;  %5058 = vmatpush3.bf16.msra.mxu0 %v8434_v24  ;;  %v8454_v24 = vld [vmem:[#allocation2_spill] sm:$0xff] }
 0x2b1   :  { %5086 = vmatpush3.bf16.msra.mxu1 %v8414_v37  ;;  %5059 = vmatprep.subr.bf16.mxu0 %v8435_v19  ;;  %v4739_v58 = vpop.f32.mrf.mxu0  ;;  %v8439_v37 = vld [vmem:[#allocation21_spill] sm:$0xff]  ;;  %v8455_v19 = vld [vmem:[#allocation14_spill] sm:$0xff] }
 0x2b2   :  { %5087 = vmatprep.subr.bf16.mxu1 %v8415_v4  ;;  %v8025_v31 = vadd.f32 %v5235_v52, %v2553_v61  ;;  %v8441_v4 = vld [vmem:[#allocation23_spill] sm:$0xff] }
 0x2b3   :  { %v8453_v61 = vld [vmem:[#allocation11_spill] sm:$0xff] }
 0x2b4   :  { %5060 = vmatpush3.bf16.msra.mxu0 %v8436_v48  ;;  %v2608_v44 = vmax.f32 %v7830_v50, %v8025_v31  ;;  %v5566_v58 = vld [vmem:[%s8117_s0 + $0x3c8] ss:$0 sps:$4 sm:$0xff]  }
 0x2b5   :  { %5088 = vmatpush3.bf16.msra.mxu1 %v8417_v17  ;;  %5061 = vmatprep.subr.bf16.mxu0 %v8437_v25  ;;  %v8444_v17 = vld [vmem:[#allocation26_spill] sm:$0xff] }
 0x2b6   :  { %5089 = vmatprep.subr.bf16.mxu1 %v8418_v28  ;;  %v3986_v28 = vld [vmem:[%s8117_s0 + $0x3b8] sm:$0xff] }
 0x2b7   :  { %v4003_v39 = vcombine.high %v3986_v28, %v3986_v28  ;;  %v4002_v52 = vcombine.low %v3986_v28, %v3986_v28 }
 0x2b8   :  { %5062 = vmatpush3.bf16.msra.mxu0 %v8438_v1 }
 0x2b9   :  { %5090 = vmatpush3.bf16.msra.mxu1 %v8439_v37  ;;  %5063 = vmatprep.subr.bf16.mxu0 %v8440_v13 }
 0x2ba   :  { %5091 = vmatprep.subr.bf16.mxu1 %v8441_v4 }
 0x2bc   :  { %5064 = vmatpush3.bf16.msra.mxu0 %v8442_v8 }
 0x2bd   :  { %5092 = vmatpush3.bf16.msra.mxu1 %v8443_v53  ;;  %5065 = vmatprep.subr.bf16.mxu0 %v8444_v17 }
 0x2be   :  { %5093 = vmatprep.subr.bf16.mxu1 %v8445_v55 }
 0x2c0   :  { %5066 = vmatpush3.bf16.msra.mxu0 %v8446_v9 }
 0x2c1   :  { %5094 = vmatpush3.bf16.msra.mxu1 %v8447_v26  ;;  %5277 = vmatprep.subr.bf16.mxu0 %v8448_v0 }
 0x2c3   :  { %v4767_v18 = vpop.f32.mrf.mxu0  ;;  %3506 = vmatmul.mubr.bf16.vlgmr.msra.gmra.mxu0 %v5555_v20 }
 0x2c4   :  { %v4795_v12 = vpop.f32.mrf.mxu1  ;;  %3554 = vmatmul.mubr.bf16.vlgmr.msra.gmra.mxu1 %v5558_v42  ;;  %5278 = vmatpush3.bf16.msra.mxu0 %v8448_v0 }
 0x2c5   :  { %3513 = vmatprep.mubr.bf16.mxu0 %v4003_v39  ;;  %v4768_v21 = vpop.f32.mrf.mxu0  ;;  %5279 = vmatprep.subr.bf16.mxu0 %v8449_v32 }
 0x2c6   :  { %v4796_v23 = vpop.f32.mrf.mxu1  ;;  %3561 = vmatprep.mubr.bf16.mxu1 %v4005_v35  ;;  %v4769_v30 = vadd.f32 %v4768_v21, %v4767_v18 }
 0x2c7   :  { %v4797_v33 = vadd.f32 %v4796_v23, %v4795_v12  ;;  %v4770_v43 = vpop.f32.mrf.mxu0 }
 0x2c8   :  { %v4798_v47 = vpop.f32.mrf.mxu1  ;;  %5280 = vmatpush3.bf16.msra.mxu0 %v8449_v32 }
 0x2c9   :  { %v2786_v22 = vadd.f32 %v4797_v33, %v4769_v30  ;;  %v4771_v63 = vpop.f32.mrf.mxu0  ;;  %5281 = vmatprep.subr.bf16.mxu0 %v8450_v3 }
 0x2ca   :  { %v4799_v51 = vpop.f32.mrf.mxu1  ;;  %v4772_v38 = vadd.f32 %v4771_v63, %v4770_v43 }
 0x2cb   :  { %v4800_v2 = vadd.f32 %v4799_v51, %v4798_v47  ;;  %3514 = vmatmul.mubr.bf16.gmra.mxu0 %v4002_v52  ;;  %v4773_v60 = vpop.f32.mrf.mxu0 }
 0x2cc   :  { %3562 = vmatmul.mubr.bf16.gmra.mxu1 %v4004_v34  ;;  %v4801_v5 = vpop.f32.mrf.mxu1  ;;  %5282 = vmatpush3.bf16.msra.mxu0 %v8450_v3 }
 0x2cd   :  { %v2789_v45 = vadd.f32 %v4800_v2, %v4772_v38  ;;  %5293 = vmatprep.mubr.bf16.mxu0 %v5565_v62  ;;  %5283 = vmatprep.subr.bf16.mxu0 %v8451_v46  ;;  %v4774_v49 = vpop.f32.mrf.mxu0 }
 0x2ce   :  { %v4802_v54 = vpop.f32.mrf.mxu1  ;;  %v4775_v16 = vadd.f32 %v4774_v49, %v4773_v60 }
 0x2cf   :  { %v4803_v56 = vadd.f32 %v4802_v54, %v4801_v5  ;;  %v4776_v41 = vpop.f32.mrf.mxu0 }
 0x2d0   :  { %v4804_v57 = vpop.f32.mrf.mxu1  ;;  %5284 = vmatpush3.bf16.msra.mxu0 %v8451_v46 }
 0x2d1   :  { %v2794_v10 = vadd.f32 %v4803_v56, %v4775_v16  ;;  %5285 = vmatprep.subr.bf16.mxu0 %v8452_v59  ;;  %v4777_v7 = vpop.f32.mrf.mxu0 }
 0x2d2   :  { %v4805_v6 = vpop.f32.mrf.mxu1 }
 0x2d4   :  { %5286 = vmatpush3.bf16.msra.mxu0 %v8452_v59 }
 0x2d5   :  { %5287 = vmatprep.subr.bf16.mxu0 %v8453_v61 }
 0x2d8   :  { %5288 = vmatpush3.bf16.msra.mxu0 %v8453_v61 }
 0x2d9   :  { %5289 = vmatprep.subr.bf16.mxu0 %v8454_v24 }
 0x2dc   :  { %5290 = vmatpush3.bf16.msra.mxu0 %v8454_v24 }
 0x2dd   :  { %5291 = vmatprep.subr.bf16.mxu0 %v8455_v19 }
 0x2e0   :  { %5292 = vmatpush3.bf16.msra.mxu0 %v8455_v19 }
 0x2e3   :  { %v4823_v48 = vpop.f32.mrf.mxu0  ;;  %5294 = vmatmul.mubr.bf16.vlgmr.msra.gmra.mxu0 %v5566_v58 }
 0x2e4   :  { %v4851_v25 = vpop.f32.mrf.mxu1 }
 0x2e5   :  { %v4824_v1 = vpop.f32.mrf.mxu0 }
 0x2e6   :  { %v4852_v37 = vpop.f32.mrf.mxu1  ;;  %v4825_v13 = vadd.f32 %v4824_v1, %v4823_v48 }
 0x2e7   :  { %v4853_v4 = vadd.f32 %v4852_v37, %v4851_v25  ;;  %v4826_v8 = vpop.f32.mrf.mxu0 }
 0x2e8   :  { %v4854_v53 = vpop.f32.mrf.mxu1  ;;  %v2834_v17 = vadd.f32 %v4825_v13, %v2786_v22 }
 0x2e9   :  { %v4827_v55 = vpop.f32.mrf.mxu0 }
 0x2ea   :  { %v4855_v28 = vpop.f32.mrf.mxu1  ;;  %v4828_v15 = vadd.f32 %v4827_v55, %v4826_v8  ;;  %v2882_v42 = vadd.f32 %v4853_v4, %v2834_v17 }
 0x2eb   :  { %v4856_v20 = vadd.f32 %v4855_v28, %v4854_v53  ;;  %v4829_v9 = vpop.f32.mrf.mxu0 }
 0x2ec   :  { %v4857_v26 = vpop.f32.mrf.mxu1  ;;  %v2837_v39 = vadd.f32 %v4828_v15, %v2789_v45 }
 0x2ed   :  { %v4830_v0 = vpop.f32.mrf.mxu0 }
 0x2ee   :  { %v4858_v35 = vpop.f32.mrf.mxu1  ;;  %v4831_v18 = vadd.f32 %v4830_v0, %v4829_v9  ;;  %v2885_v21 = vadd.f32 %v4856_v20, %v2837_v39 }
 0x2ef   :  { %v4859_v12 = vadd.f32 %v4858_v35, %v4857_v26  ;;  %v4832_v23 = vpop.f32.mrf.mxu0 }
 0x2f0   :  { %v4860_v32 = vpop.f32.mrf.mxu1  ;;  %v2842_v30 = vadd.f32 %v4831_v18, %v2794_v10 }
 0x2f1   :  { %v4833_v33 = vpop.f32.mrf.mxu0 }
 0x2f2   :  { %v4861_v43 = vpop.f32.mrf.mxu1  ;;  %v2890_v47 = vadd.f32 %v4859_v12, %v2842_v30 }
 0x303   :  { %v5255_v52 = vpop.f32.mrf.mxu0 }
 0x304   :  { %v4889_v34 = vpop.f32.mrf.mxu1  ;;  %v2938_v22 = vadd.f32 %v5255_v52, %v2890_v47 }
 0x305   :  { %v2929_v62 = vpop.f32.mrf.mxu0 }
 0x306   :  { %v4890_v63 = vpop.f32.mrf.mxu1  ;;  %v8080_v51 = vmax.f32 %v2608_v44, %v2938_v22  ;;  %v2930_v3 = vadd.f32 %v2929_v62, %v2882_v42 }
 0x307   :  { %v4891_v38 = vadd.f32 %v4890_v63, %v4889_v34  ;;  %v5256_v2 = vpop.f32.mrf.mxu0 }
 0x308   :  { %v4892_v60 = vpop.f32.mrf.mxu1  ;;  %v8085_v5 = vmax.f32 %v2606_v36, %v2930_v3 }
 0x309   :  { %v2932_v45 = vpop.f32.mrf.mxu0 }
 0x30a   :  { %v4893_v46 = vpop.f32.mrf.mxu1  ;;  %v2933_v49 = vadd.f32 %v2932_v45, %v2885_v21 }
 0x30b   :  { %v4894_v54 = vadd.f32 %v4893_v46, %v4892_v60 }
 0x30c   :  { %v4895_v16 = vpop.f32.mrf.mxu1  ;;  %v8090_v50 = vmax.f32 %v2607_v14, %v2933_v49 }
 0x30e   :  { %v4896_v31 = vpop.f32.mrf.mxu1 }
 0x30f   :  { %v4897_v44 = vadd.f32 %v4896_v31, %v4895_v16 }
 0x310   :  { %v4898_v56 = vpop.f32.mrf.mxu1 }
 0x312   :  { %v4899_v41 = vpop.f32.mrf.mxu1 }
 0x323   :  { %v4917_v57 = vpop.f32.mrf.mxu0 }
 0x324   :  { %v4945_v10 = vpop.f32.mrf.mxu1 }
 0x325   :  { %v4918_v59 = vpop.f32.mrf.mxu0 }
 0x326   :  { %v4946_v40 = vpop.f32.mrf.mxu1  ;;  %v4919_v11 = vadd.f32 %v4918_v59, %v4917_v57 }
 0x327   :  { %v4947_v36 = vadd.f32 %v4946_v40, %v4945_v10  ;;  %v4920_v7 = vpop.f32.mrf.mxu0 }
 0x328   :  { %v4948_v6 = vpop.f32.mrf.mxu1  ;;  %v3123_v61 = vadd.f32 %v4919_v11, %v4891_v38 }
 0x329   :  { %v4921_v24 = vpop.f32.mrf.mxu0 }
 0x32a   :  { %v4949_v19 = vpop.f32.mrf.mxu1  ;;  %v3171_v58 = vadd.f32 %v4947_v36, %v3123_v61  ;;  %v4922_v48 = vadd.f32 %v4921_v24, %v4920_v7 }
 0x32b   :  { %v4950_v27 = vadd.f32 %v4949_v19, %v4948_v6  ;;  %v4923_v29 = vpop.f32.mrf.mxu0 }
 0x32c   :  { %v4951_v14 = vpop.f32.mrf.mxu1  ;;  %v3126_v25 = vadd.f32 %v4922_v48, %v4894_v54 }
 0x32d   :  { %v4924_v1 = vpop.f32.mrf.mxu0 }
 0x32e   :  { %v4952_v37 = vpop.f32.mrf.mxu1  ;;  %v3174_v13 = vadd.f32 %v4950_v27, %v3126_v25  ;;  %v4925_v4 = vadd.f32 %v4924_v1, %v4923_v29 }
 0x32f   :  { %v4953_v8 = vadd.f32 %v4952_v37, %v4951_v14  ;;  %v4926_v53 = vpop.f32.mrf.mxu0 }
 0x330   :  { %v4954_v17 = vpop.f32.mrf.mxu1  ;;  %v3131_v55 = vadd.f32 %v4925_v4, %v4897_v44 }
 0x331   :  { %v4927_v28 = vpop.f32.mrf.mxu0 }
 0x332   :  { %v4955_v15 = vpop.f32.mrf.mxu1  ;;  %v3179_v20 = vadd.f32 %v4953_v8, %v3131_v55 }
 0x343   :  { %v4973_v42 = vpop.f32.mrf.mxu0 }
 0x344   :  { %v5275_v9 = vpop.f32.mrf.mxu1 }
 0x345   :  { %v4974_v26 = vpop.f32.mrf.mxu0 }
 0x346   :  { %v3266_v39 = vpop.f32.mrf.mxu1  ;;  %v4975_v0 = vadd.f32 %v4974_v26, %v4973_v42 }
 0x347   :  { %v4976_v35 = vpop.f32.mrf.mxu0 }
 0x348   :  { %v5276_v18 = vpop.f32.mrf.mxu1  ;;  %v3219_v12 = vadd.f32 %v4975_v0, %v3171_v58 }
 0x349   :  { %v4977_v21 = vpop.f32.mrf.mxu0 }
 0x34a   :  { %v4978_v23 = vadd.f32 %v4977_v21, %v4976_v35  ;;  %v8092_v32 = vadd.f32 %v3266_v39, %v3219_v12  ;;  %v3269_v33 = vpop.f32.mrf.mxu1 }
 0x34b   :  { %v4979_v30 = vpop.f32.mrf.mxu0 }
 0x34c   :  { %v3280_v43 = vmax.f32 %v8085_v5, %v8092_v32  ;;  %v3222_v47 = vadd.f32 %v4978_v23, %v3174_v13 }
 0x34d   :  { %v4980_v52 = vpop.f32.mrf.mxu0 }
 0x34e   :  { %v4981_v34 = vadd.f32 %v4980_v52, %v4979_v30  ;;  %v8096_v22 = vadd.f32 %v3269_v33, %v3222_v47 }
 0x34f   :  { %v4982_v62 = vpop.f32.mrf.mxu0 }
 0x350   :  { %v3227_v63 = vadd.f32 %v4981_v34, %v3179_v20  ;;  %v3281_v3 = vmax.f32 %v8090_v50, %v8096_v22 }
 0x351   :  { %v4983_v38 = vpop.f32.mrf.mxu0 }
 0x352   :  { %v3275_v2 = vadd.f32 %v5275_v9, %v3227_v63  ;;  %v4007_v63 = vld [vmem:[%s8118_s2] ss:$0 sm:$0xff] }
 0x354   :  { %v3282_v60 = vmax.f32 %v8080_v51, %v3275_v2 }
 0x363   :  { %v5011_v45 = vpop.f32.mrf.mxu0 }
 0x364   :  { %v5039_v46 = vpop.f32.mrf.mxu1 }
 0x365   :  { %v5012_v49 = vpop.f32.mrf.mxu0 }
 0x366   :  { %v5040_v54 = vpop.f32.mrf.mxu1  ;;  %v5013_v55 = vadd.f32 %v5012_v49, %v5011_v45 }
 0x367   :  { %v5014_v16 = vpop.f32.mrf.mxu0  ;;  %v5041_v28 = vadd.f32 %v5040_v54, %v5039_v46 }
 0x368   :  { %v5042_v31 = vpop.f32.mrf.mxu1 }
 0x369   :  { %v5015_v44 = vpop.f32.mrf.mxu0  ;;  %v3460_v9 = vadd.f32 %v5041_v28, %v5013_v55 }
 0x36a   :  { %v5043_v56 = vpop.f32.mrf.mxu1  ;;  %v5016_v26 = vadd.f32 %v5015_v44, %v5014_v16 }
 0x36b   :  { %v5017_v41 = vpop.f32.mrf.mxu0  ;;  %v5044_v39 = vadd.f32 %v5043_v56, %v5042_v31 }
 0x36c   :  { %v5045_v57 = vpop.f32.mrf.mxu1 }
 0x36d   :  { %v5018_v10 = vpop.f32.mrf.mxu0  ;;  %v3463_v23 = vadd.f32 %v5044_v39, %v5016_v26 }
 0x36e   :  { %v5046_v59 = vpop.f32.mrf.mxu1  ;;  %v5019_v53 = vadd.f32 %v5018_v10, %v5017_v41 }
 0x36f   :  { %v5020_v40 = vpop.f32.mrf.mxu0  ;;  %v5047_v17 = vadd.f32 %v5046_v59, %v5045_v57 }
 0x370   :  { %v5048_v11 = vpop.f32.mrf.mxu1 }
 0x371   :  { %v5021_v36 = vpop.f32.mrf.mxu0  ;;  %v3468_v20 = vadd.f32 %v5047_v17, %v5019_v53 }
 0x372   :  { %v5049_v7 = vpop.f32.mrf.mxu1 }
 0x383   :  { %v5067_v6 = vpop.f32.mrf.mxu0 }
 0x384   :  { %v5095_v61 = vpop.f32.mrf.mxu1 }
 0x385   :  { %v5068_v24 = vpop.f32.mrf.mxu0 }
 0x386   :  { %v5096_v51 = vpop.f32.mrf.mxu1  ;;  %v5069_v42 = vadd.f32 %v5068_v24, %v5067_v6 }
 0x387   :  { %v5070_v19 = vpop.f32.mrf.mxu0  ;;  %v5097_v12 = vadd.f32 %v5096_v51, %v5095_v61 }
 0x388   :  { %v5098_v58 = vpop.f32.mrf.mxu1  ;;  %v3508_v18 = vadd.f32 %v5069_v42, %v3460_v9 }
 0x389   :  { %v5071_v48 = vpop.f32.mrf.mxu0 }
 0x38a   :  { %v5099_v27 = vpop.f32.mrf.mxu1  ;;  %v5072_v21 = vadd.f32 %v5071_v48, %v5070_v19  ;;  %v3556_v62 = vadd.f32 %v5097_v12, %v3508_v18 }
 0x38b   :  { %v5073_v29 = vpop.f32.mrf.mxu0  ;;  %v5100_v52 = vadd.f32 %v5099_v27, %v5098_v58 }
 0x38c   :  { %v5101_v14 = vpop.f32.mrf.mxu1  ;;  %v3511_v47 = vadd.f32 %v5072_v21, %v3463_v23 }
 0x38d   :  { %v5074_v25 = vpop.f32.mrf.mxu0 }
 0x38e   :  { %v5102_v1 = vpop.f32.mrf.mxu1  ;;  %v5075_v15 = vadd.f32 %v5074_v25, %v5073_v29  ;;  %v3559_v16 = vadd.f32 %v5100_v52, %v3511_v47 }
 0x38f   :  { %v5076_v37 = vpop.f32.mrf.mxu0  ;;  %v5103_v35 = vadd.f32 %v5102_v1, %v5101_v14 }
 0x390   :  { %v5104_v13 = vpop.f32.mrf.mxu1  ;;  %v3516_v0 = vadd.f32 %v5075_v15, %v3468_v20 }
 0x391   :  { %v5077_v4 = vpop.f32.mrf.mxu0 }
 0x392   :  { %v5105_v8 = vpop.f32.mrf.mxu1  ;;  %v3564_v30 = vadd.f32 %v5103_v35, %v3516_v0 }
 0x3a3   :  { %v5295_v33 = vpop.f32.mrf.mxu0 }
 0x3a4   :  { %v3612_v34 = vadd.f32 %v5295_v33, %v3564_v30 }
 0x3a5   :  { %v3603_v38 = vpop.f32.mrf.mxu0 }
 0x3a6   :  { %v3619_v2 = vmax.f32 %v3282_v60, %v3612_v34  ;;  %v3604_v45 = vadd.f32 %v3603_v38, %v3556_v62 }
 0x3a7   :  { %v5296_v46 = vpop.f32.mrf.mxu0 }
 0x3a8   :  { %v3629_v49 = vadd.f32 %v4007_v63, %v3619_v2  ;;  %v3617_v54 = vmax.f32 %v3280_v43, %v3604_v45 }
 0x3a9   :  { %v3606_v31 = vpop.f32.mrf.mxu0 }
 0x3aa   :  { %v3632_v44 = vmax.f32 %v3629_v49, 0.0  ;;  %v3607_v56 = vadd.f32 %v3606_v31, %v3559_v16  ;;  %v3627_v57 = vadd.f32 %v4007_v63, %v3617_v54 }
 0x3ac   :  { %v4013_v41 = vpack.c.bf16 %v3632_v44, %v3632_v44  ;;  %v3618_v10 = vmax.f32 %v3281_v3, %v3607_v56  ;;  %v3630_v59 = vmax.f32 %v3627_v57, 0.0 }
 0x3ae   :  { %3648 = vst [vmem:[%s8119_s3 + $0x8] sm:$0xf] %v4013_v41  ;;  %v3628_v60 = vadd.f32 %v4007_v63, %v3618_v10 }
 0x3b0   :  { %v3631_v40 = vmax.f32 %v3628_v60, 0.0 }
 0x3b2   :  { %v4017_v11 = vpack.c.bf16 %v3631_v40, %v3630_v59 }
 0x3b4   :  { %4018 = vst [vmem:[%s8119_s3] sm:$0xff] %v4017_v11  }

// kernel: model2_forward.6
= control target key start
LH: loop header
LB: loop body
LE: loop exit
PB: predicated region body
PF: predicated region fallthrough
CT: control target
= control target key end

     0   :  { %vm4294_vm0 = vmmov 0   ;;  %s6246_s1 = inlined_call_operand.vmem [shape: bf16[1152,128], index: 1, kind: input, shape index: {}]   ;;  %s6247_s0 = inlined_call_operand.vmem [shape: bf16[9,8,1152], index: 0, kind: input, shape index: {}]   ;;  %s6248_s2 = inlined_call_operand.vmem [shape: f32[1,128], index: 2, kind: input, shape index: {}]   ;;  %s6249_s3 = inlined_call_operand.vmem [shape: bf16[8,128], index: 3, kind: output, shape index: {}]  }
   0x1   :  { %v4318_v0 = vld [vmem:[%s6246_s1 + $0x78] sm:$0xff]   ;;  %v4341_v4 = vld [vmem:[%s6246_s1 + $0x70] sm:$0xff]   ;;  %v4365_v8 = vld [vmem:[%s6246_s1 + $0x68] sm:$0xff]  }
   0x2   :  { %v4323_v1 = vld [vmem:[%s6246_s1 + $0xf8] sm:$0xff]   ;;  %2949 = vmatprep.subr.bf16.mxu0 %v4318_v0  ;;  %v4347_v5 = vld [vmem:[%s6246_s1 + $0xf0] sm:$0xff]   ;;  %v4371_v9 = vld [vmem:[%s6246_s1 + $0xe8] sm:$0xff]  }
   0x3   :  { %v4329_v2 = vld [vmem:[%s6246_s1 + $0x38] sm:$0xff]   ;;  %2971 = vmatprep.subr.bf16.mxu1 %v4323_v1  ;;  %v4353_v6 = vld [vmem:[%s6246_s1 + $0x30] sm:$0xff]   ;;  %v4377_v10 = vld [vmem:[%s6246_s1 + $0x28] sm:$0xff]  }
   0x4   :  { %v4335_v3 = vld [vmem:[%s6246_s1 + $0xb8] sm:$0xff]   ;;  %2950 = vmatpush3.bf16.msra.mxu0 %v4329_v2  ;;  %v4359_v7 = vld [vmem:[%s6246_s1 + $0xb0] sm:$0xff]   ;;  %v4383_v11 = vld [vmem:[%s6246_s1 + $0xa8] sm:$0xff]  }
   0x5   :  { %2972 = vmatpush3.bf16.msra.mxu1 %v4335_v3  ;;  %2951 = vmatprep.subr.bf16.mxu0 %v4341_v4  ;;  %v4389_v12 = vld [vmem:[%s6246_s1 + $0x60] sm:$0xff]   ;;  %v4413_v16 = vld [vmem:[%s6246_s1 + $0x58] sm:$0xff]   ;;  %v4437_v20 = vld [vmem:[%s6246_s1 + $0x50] sm:$0xff]  }
   0x6   :  { %2973 = vmatprep.subr.bf16.mxu1 %v4347_v5  ;;  %v4395_v13 = vld [vmem:[%s6246_s1 + $0xe0] sm:$0xff]   ;;  %6374 = vst [vmem:[#allocation2_spill] sm:$0xff] %v4413_v16  ;;  %v4419_v17 = vld [vmem:[%s6246_s1 + $0xd8] sm:$0xff]   ;;  %6376 = vst [vmem:[#allocation4_spill] sm:$0xff] %v4437_v20 }
   0x7   :  { %v4401_v14 = vld [vmem:[%s6246_s1 + $0x20] sm:$0xff]   ;;  %v4425_v18 = vld [vmem:[%s6246_s1 + $0x18] sm:$0xff]   ;;  %v4443_v21 = vld [vmem:[%s6246_s1 + $0xd0] sm:$0xff]  }
   0x8   :  { %2952 = vmatpush3.bf16.msra.mxu0 %v4353_v6  ;;  %v4407_v15 = vld [vmem:[%s6246_s1 + $0xa0] sm:$0xff]   ;;  %6375 = vst [vmem:[#allocation3_spill] sm:$0xff] %v4425_v18  ;;  %v4431_v19 = vld [vmem:[%s6246_s1 + $0x98] sm:$0xff]   ;;  %v4449_v22 = vld [vmem:[%s6246_s1 + $0x10] sm:$0xff]  }
   0x9   :  { %2974 = vmatpush3.bf16.msra.mxu1 %v4359_v7  ;;  %2953 = vmatprep.subr.bf16.mxu0 %v4365_v8  ;;  %6377 = vst [vmem:[#allocation5_spill] sm:$0xff] %v4449_v22  ;;  %v4455_v23 = vld [vmem:[%s6246_s1 + $0x90] sm:$0xff]   ;;  %v4461_v24 = vld [vmem:[%s6246_s1 + $0x48] sm:$0xff]   ;;  %v4485_v28 = vld [vmem:[%s6246_s1 + $0x40] sm:$0xff]  }
   0xa   :  { %2975 = vmatprep.subr.bf16.mxu1 %v4371_v9  ;;  %6378 = vst [vmem:[#allocation6_spill] sm:$0xff] %v4461_v24  ;;  %v4467_v25 = vld [vmem:[%s6246_s1 + $0xc8] sm:$0xff]   ;;  %6380 = vst [vmem:[#allocation8_spill] sm:$0xff] %v4485_v28  ;;  %v4491_v29 = vld [vmem:[%s6246_s1 + $0xc0] sm:$0xff]  }
   0xb   :  { %v4473_v26 = vld [vmem:[%s6246_s1 + $0x8] sm:$0xff]   ;;  %v4497_v30 = vld [vmem:[%s6246_s1] sm:$0xff]   ;;  %v4516_v38 = vld [vmem:[%s6246_s1 + $0x178] sm:$0xff]  }
   0xc   :  { %2954 = vmatpush3.bf16.msra.mxu0 %v4377_v10  ;;  %6379 = vst [vmem:[#allocation7_spill] sm:$0xff] %v4473_v26  ;;  %v4479_v27 = vld [vmem:[%s6246_s1 + $0x88] sm:$0xff]   ;;  %v4503_v31 = vld [vmem:[%s6246_s1 + $0x80] sm:$0xff]   ;;  %v4521_v39 = vld [vmem:[%s6246_s1 + $0x1f8] sm:$0xff]  }
   0xd   :  { %2976 = vmatpush3.bf16.msra.mxu1 %v4383_v11  ;;  %2955 = vmatprep.subr.bf16.mxu0 %v4389_v12  ;;  %v159_v32 = vld [vmem:[%s6247_s0] sm:$0xff]  ;;  %v160_v33 = vld [vmem:[%s6247_s0 + $0x8] sm:$0xff]  ;;  %v4526_v40 = vld [vmem:[%s6246_s1 + $0x138] sm:$0xff]  }
   0xe   :  { %2977 = vmatprep.subr.bf16.mxu1 %v4395_v13  ;;  %v2755_v34 = vcombine.low %v159_v32, %v159_v32  ;;  %v2756_v35 = vcombine.high %v159_v32, %v159_v32  ;;  %v2757_v36 = vcombine.low %v160_v33, %v160_v33  ;;  %v2758_v37 = vcombine.high %v160_v33, %v160_v33  ;;  %v4531_v41 = vld [vmem:[%s6246_s1 + $0x1b8] sm:$0xff]   ;;  %v4538_v42 = vld [vmem:[%s6246_s1 + $0x170] sm:$0xff]   ;;  %v4562_v46 = vld [vmem:[%s6246_s1 + $0x168] sm:$0xff]  }
   0xf   :  { %v4545_v43 = vld [vmem:[%s6246_s1 + $0x1f0] sm:$0xff]   ;;  %v4569_v47 = vld [vmem:[%s6246_s1 + $0x1e8] sm:$0xff]   ;;  %v4586_v50 = vld [vmem:[%s6246_s1 + $0x160] sm:$0xff]  }
  0x10   :  { %2956 = vmatpush3.bf16.msra.mxu0 %v4401_v14  ;;  %660 = vmatprep.mubr.bf16.mxu0 %v2756_v35  ;;  %v4551_v44 = vld [vmem:[%s6246_s1 + $0x130] sm:$0xff]   ;;  %v4575_v48 = vld [vmem:[%s6246_s1 + $0x128] sm:$0xff]   ;;  %v4593_v51 = vld [vmem:[%s6246_s1 + $0x1e0] sm:$0xff]  }
  0x11   :  { %2978 = vmatpush3.bf16.msra.mxu1 %v4407_v15  ;;  %2957 = vmatprep.subr.bf16.mxu0 %v4413_v16  ;;  %v4557_v45 = vld [vmem:[%s6246_s1 + $0x1b0] sm:$0xff]   ;;  %v4581_v49 = vld [vmem:[%s6246_s1 + $0x1a8] sm:$0xff]   ;;  %v4599_v52 = vld [vmem:[%s6246_s1 + $0x120] sm:$0xff]  }
  0x12   :  { %2979 = vmatprep.subr.bf16.mxu1 %v4419_v17  ;;  %700 = vmatprep.mubr.bf16.mxu1 %v2758_v37  ;;  %v4605_v53 = vld [vmem:[%s6246_s1 + $0x1a0] sm:$0xff]   ;;  %v4610_v54 = vld [vmem:[%s6246_s1 + $0x158] sm:$0xff]   ;;  %v4634_v58 = vld [vmem:[%s6246_s1 + $0x150] sm:$0xff]  }
  0x13   :  { %6381 = vst [vmem:[#allocation9_spill] sm:$0xff] %v4605_v53  ;;  %v4617_v55 = vld [vmem:[%s6246_s1 + $0x1d8] sm:$0xff]   ;;  %v4641_v59 = vld [vmem:[%s6246_s1 + $0x1d0] sm:$0xff]   ;;  %v4658_v62 = vld [vmem:[%s6246_s1 + $0x148] sm:$0xff]  }
  0x14   :  { %2958 = vmatpush3.bf16.msra.mxu0 %v4425_v18  ;;  %6382 = vst [vmem:[#allocation10_spill] sm:$0xff] %v4617_v55  ;;  %v4623_v56 = vld [vmem:[%s6246_s1 + $0x118] sm:$0xff]   ;;  %6384 = vst [vmem:[#allocation12_spill] sm:$0xff] %v4641_v59  ;;  %v4647_v60 = vld [vmem:[%s6246_s1 + $0x110] sm:$0xff]  }
  0x15   :  { %2980 = vmatpush3.bf16.msra.mxu1 %v4431_v19  ;;  %2959 = vmatprep.subr.bf16.mxu0 %v4437_v20  ;;  %v4629_v57 = vld [vmem:[%s6246_s1 + $0x198] sm:$0xff]   ;;  %v4653_v61 = vld [vmem:[%s6246_s1 + $0x190] sm:$0xff]   ;;  %v4665_v63 = vld [vmem:[%s6246_s1 + $0x1c8] sm:$0xff]  }
  0x16   :  { %2981 = vmatprep.subr.bf16.mxu1 %v4443_v21  ;;  %6383 = vst [vmem:[#allocation11_spill] sm:$0xff] %v4629_v57  ;;  %6385 = vst [vmem:[#allocation13_spill] sm:$0xff] %v4653_v61  ;;  %v4671_v32 = vld [vmem:[%s6246_s1 + $0x108] sm:$0xff]   ;;  %v4689_v35 = vld [vmem:[%s6246_s1 + $0x1c0] sm:$0xff]  }
  0x17   :  { %6386 = vst [vmem:[#allocation14_spill] sm:$0xff] %v4665_v63  ;;  %v4677_v33 = vld [vmem:[%s6246_s1 + $0x188] sm:$0xff]   ;;  %6388 = vst [vmem:[#allocation16_spill] sm:$0xff] %v4689_v35  ;;  %v4701_v37 = vld [vmem:[%s6246_s1 + $0x180] sm:$0xff]  }
  0x18   :  { %2960 = vmatpush3.bf16.msra.mxu0 %v4449_v22  ;;  %6387 = vst [vmem:[#allocation15_spill] sm:$0xff] %v4677_v33 }
  0x19   :  { %2982 = vmatpush3.bf16.msra.mxu1 %v4455_v23  ;;  %2961 = vmatprep.subr.bf16.mxu0 %v4461_v24 }
  0x1a   :  { %2983 = vmatprep.subr.bf16.mxu1 %v4467_v25 }
  0x1c   :  { %2962 = vmatpush3.bf16.msra.mxu0 %v4473_v26 }
  0x1d   :  { %2984 = vmatpush3.bf16.msra.mxu1 %v4479_v27  ;;  %2963 = vmatprep.subr.bf16.mxu0 %v4485_v28 }
  0x1e   :  { %2985 = vmatprep.subr.bf16.mxu1 %v4491_v29 }
  0x20   :  { %2964 = vmatpush3.bf16.msra.mxu0 %v4497_v30 }
  0x21   :  { %2986 = vmatpush3.bf16.msra.mxu1 %v4503_v31  ;;  %2993 = vmatprep.subr.bf16.mxu0 %v4516_v38 }
  0x22   :  { %3015 = vmatprep.subr.bf16.mxu1 %v4521_v39 }
  0x23   :  { %661 = vmatmul.mubr.bf16.vlgmr.msra.gmra.mxu0 %v2755_v34  ;;  %v4682_v34 = vld [vmem:[%s6246_s1 + $0x140] sm:$0xff]  }
  0x24   :  { %701 = vmatmul.mubr.bf16.vlgmr.msra.gmra.mxu1 %v2757_v36  ;;  %2994 = vmatpush3.bf16.msra.mxu0 %v4526_v40  ;;  %v4695_v36 = vld [vmem:[%s6246_s1 + $0x100] sm:$0xff]  }
  0x25   :  { %3016 = vmatpush3.bf16.msra.mxu1 %v4531_v41  ;;  %2995 = vmatprep.subr.bf16.mxu0 %v4538_v42  ;;  %6389 = vst [vmem:[#allocation17_spill] sm:$0xff] %v4695_v36 }
  0x26   :  { %3017 = vmatprep.subr.bf16.mxu1 %v4545_v43 }
  0x28   :  { %2996 = vmatpush3.bf16.msra.mxu0 %v4551_v44 }
  0x29   :  { %3018 = vmatpush3.bf16.msra.mxu1 %v4557_v45  ;;  %2997 = vmatprep.subr.bf16.mxu0 %v4562_v46 }
  0x2a   :  { %3019 = vmatprep.subr.bf16.mxu1 %v4569_v47 }
  0x2c   :  { %2998 = vmatpush3.bf16.msra.mxu0 %v4575_v48 }
  0x2d   :  { %3020 = vmatpush3.bf16.msra.mxu1 %v4581_v49  ;;  %2999 = vmatprep.subr.bf16.mxu0 %v4586_v50 }
  0x2e   :  { %3021 = vmatprep.subr.bf16.mxu1 %v4593_v51 }
  0x30   :  { %3000 = vmatpush3.bf16.msra.mxu0 %v4599_v52 }
  0x31   :  { %3022 = vmatpush3.bf16.msra.mxu1 %v4605_v53  ;;  %3001 = vmatprep.subr.bf16.mxu0 %v4610_v54  ;;  %v6278_v53 = vmov 0.0  }
  0x32   :  { %3023 = vmatprep.subr.bf16.mxu1 %v4617_v55  ;;  %v4714_v55 = vld [vmem:[%s6246_s1 + $0x238] sm:$0xff]  }
  0x33   :  { %6390 = vst [vmem:[#allocation18_spill] sm:$0xff] %v4714_v55 }
  0x34   :  { %3002 = vmatpush3.bf16.msra.mxu0 %v4623_v56 }
  0x35   :  { %3024 = vmatpush3.bf16.msra.mxu1 %v4629_v57  ;;  %3003 = vmatprep.subr.bf16.mxu0 %v4634_v58 }
  0x36   :  { %3025 = vmatprep.subr.bf16.mxu1 %v4641_v59  ;;  %v162_v59 = vld [vmem:[%s6247_s0 + $0x18] sm:$0xff] }
  0x37   :  { %v2762_v57 = vcombine.high %v162_v59, %v162_v59 }
  0x38   :  { %3004 = vmatpush3.bf16.msra.mxu0 %v4647_v60 }
  0x39   :  { %3026 = vmatpush3.bf16.msra.mxu1 %v4653_v61  ;;  %3005 = vmatprep.subr.bf16.mxu0 %v4658_v62 }
  0x3a   :  { %3027 = vmatprep.subr.bf16.mxu1 %v4665_v63  ;;  %780 = vmatprep.mubr.bf16.mxu1 %v2762_v57  ;;  %v4734_v57 = vld [vmem:[%s6246_s1 + $0x228] sm:$0xff]  }
  0x3b   :  { %6392 = vst [vmem:[#allocation20_spill] sm:$0xff] %v4734_v57 }
  0x3c   :  { %3006 = vmatpush3.bf16.msra.mxu0 %v4671_v32 }
  0x3d   :  { %3028 = vmatpush3.bf16.msra.mxu1 %v4677_v33  ;;  %3007 = vmatprep.subr.bf16.mxu0 %v4682_v34  ;;  %v161_v33 = vld [vmem:[%s6247_s0 + $0x10] sm:$0xff] }
  0x3e   :  { %3029 = vmatprep.subr.bf16.mxu1 %v4689_v35  ;;  %v2759_v63 = vcombine.low %v161_v33, %v161_v33  ;;  %v2760_v61 = vcombine.high %v161_v33, %v161_v33  ;;  %v2761_v35 = vcombine.low %v162_v59, %v162_v59  ;;  %v4723_v59 = vld [vmem:[%s6246_s1 + $0x230] sm:$0xff]   ;;  %v4744_v33 = vld [vmem:[%s6246_s1 + $0x220] sm:$0xff]  }
  0x3f   :  { %6391 = vst [vmem:[#allocation19_spill] sm:$0xff] %v4723_v59  ;;  %6393 = vst [vmem:[#allocation21_spill] sm:$0xff] %v4744_v33 }
  0x40   :  { %3008 = vmatpush3.bf16.msra.mxu0 %v4695_v36  ;;  %740 = vmatprep.mubr.bf16.mxu0 %v2760_v61  ;;  %v2836_v61 = vld [vmem:[%s6247_s0 + $0x24] sm:$0xff] }
  0x41   :  { %3030 = vmatpush3.bf16.msra.mxu1 %v4701_v37  ;;  %3822 = vmatprep.subr.bf16.mxu0 %v6278_v53 }
  0x42   :  { %3046 = vmatprep.subr.bf16.mxu1 %v4318_v0 }
  0x43   :  { %741 = vmatmul.mubr.bf16.vlgmr.msra.gmra.mxu0 %v2759_v63  ;;  %v2842_v63 = vcombine.high %v2836_v61, %v2836_v61 }
  0x44   :  { %781 = vmatmul.mubr.bf16.vlgmr.msra.gmra.mxu1 %v2761_v35  ;;  %3823 = vmatpush3.bf16.msra.mxu0 %v4714_v55  ;;  %v4755_v35 = vld [vmem:[%s6246_s1 + $0x218] sm:$0xff]  }
  0x45   :  { %3047 = vmatpush3.bf16.msra.mxu1 %v4329_v2  ;;  %3824 = vmatprep.subr.bf16.mxu0 %v6278_v53  ;;  %6394 = vst [vmem:[#allocation22_spill] sm:$0xff] %v4755_v35 }
  0x46   :  { %3048 = vmatprep.subr.bf16.mxu1 %v4341_v4  ;;  %3838 = vmatprep.mubr.msk.bf16.mxu0 %vm4294_vm0, %v6278_v53 }
  0x47   :  { %898 = vmatprep.mubr.bf16.mxu1 %v2842_v63  ;;  %v4764_v63 = vld [vmem:[%s6246_s1 + $0x210] sm:$0xff]  }
  0x48   :  { %3825 = vmatpush3.bf16.msra.mxu0 %v4723_v59  ;;  %6395 = vst [vmem:[#allocation23_spill] sm:$0xff] %v4764_v63 }
  0x49   :  { %3049 = vmatpush3.bf16.msra.mxu1 %v4353_v6  ;;  %3826 = vmatprep.subr.bf16.mxu0 %v6278_v53 }
  0x4a   :  { %3050 = vmatprep.subr.bf16.mxu1 %v4365_v8 }
  0x4c   :  { %3827 = vmatpush3.bf16.msra.mxu0 %v4734_v57 }
  0x4d   :  { %3051 = vmatpush3.bf16.msra.mxu1 %v4377_v10  ;;  %3828 = vmatprep.subr.bf16.mxu0 %v6278_v53 }
  0x4e   :  { %3052 = vmatprep.subr.bf16.mxu1 %v4389_v12 }
  0x50   :  { %3829 = vmatpush3.bf16.msra.mxu0 %v4744_v33 }
  0x51   :  { %3053 = vmatpush3.bf16.msra.mxu1 %v4401_v14  ;;  %3830 = vmatprep.subr.bf16.mxu0 %v6278_v53 }
  0x52   :  { %3054 = vmatprep.subr.bf16.mxu1 %v4413_v16  ;;  %v4773_v16 = vld [vmem:[%s6246_s1 + $0x208] sm:$0xff]  }
  0x53   :  { %6396 = vst [vmem:[#allocation24_spill] sm:$0xff] %v4773_v16 }
  0x54   :  { %3831 = vmatpush3.bf16.msra.mxu0 %v4755_v35 }
  0x55   :  { %3055 = vmatpush3.bf16.msra.mxu1 %v4425_v18  ;;  %3832 = vmatprep.subr.bf16.mxu0 %v6278_v53  ;;  %v2841_v18 = vcombine.low %v2836_v61, %v2836_v61 }
  0x56   :  { %3056 = vmatprep.subr.bf16.mxu1 %v4437_v20  ;;  %v4782_v20 = vld [vmem:[%s6246_s1 + $0x200] sm:$0xff]  }
  0x58   :  { %3833 = vmatpush3.bf16.msra.mxu0 %v4764_v63 }
  0x59   :  { %3057 = vmatpush3.bf16.msra.mxu1 %v4449_v22  ;;  %3834 = vmatprep.subr.bf16.mxu0 %v6278_v53  ;;  %v4084_v22 = vld [vmem:[%s6247_s0 + $0x20] ss:$0 sps:$4 sm:$0xff]  }
  0x5a   :  { %3058 = vmatprep.subr.bf16.mxu1 %v4461_v24  ;;  %v2837_v24 = vld [vmem:[%s6247_s0 + $0x2c] sm:$0xff] }
  0x5c   :  { %3835 = vmatpush3.bf16.msra.mxu0 %v4773_v16 }
  0x5d   :  { %3059 = vmatpush3.bf16.msra.mxu1 %v4473_v26  ;;  %3836 = vmatprep.subr.bf16.mxu0 %v6278_v53  ;;  %v2838_v26 = vld [vmem:[%s6247_s0 + $0x34] sm:$0xff]  ;;  %v2844_v53 = vcombine.high %v2837_v24, %v2837_v24 }
  0x5e   :  { %3060 = vmatprep.subr.bf16.mxu1 %v4485_v28  ;;  %v2846_v28 = vcombine.high %v2838_v26, %v2838_v26 }
  0x60   :  { %3837 = vmatpush3.bf16.msra.mxu0 %v4782_v20 }
  0x61   :  { %3061 = vmatpush3.bf16.msra.mxu1 %v4497_v30  ;;  %3068 = vmatprep.subr.bf16.mxu0 %v4323_v1 }
  0x62   :  { %3090 = vmatprep.subr.bf16.mxu1 %v4516_v38 }
  0x63   :  { %3839 = vmatmul.mubr.bf16.vlgmr.msra.gmra.mxu0 %v4084_v22  ;;  %v2845_v22 = vcombine.low %v2838_v26, %v2838_v26  ;;  %v6399_v26 = vld [vmem:[#allocation10_spill] sm:$0xff] }
  0x64   :  { %899 = vmatmul.mubr.bf16.vlgmr.msra.gmra.mxu1 %v2841_v18  ;;  %3069 = vmatpush3.bf16.msra.mxu0 %v4335_v3  ;;  %v2843_v18 = vcombine.low %v2837_v24, %v2837_v24  ;;  %v6398_v24 = vld [vmem:[#allocation9_spill] sm:$0xff] }
  0x65   :  { %3091 = vmatpush3.bf16.msra.mxu1 %v4526_v40  ;;  %3070 = vmatprep.subr.bf16.mxu0 %v4347_v5 }
  0x66   :  { %3092 = vmatprep.subr.bf16.mxu1 %v4538_v42  ;;  %938 = vmatprep.mubr.bf16.mxu0 %v2844_v53  ;;  %v6397_v53 = vmov 0.0  }
  0x67   :  { %978 = vmatprep.mubr.bf16.mxu1 %v2846_v28  ;;  %v2839_v28 = vld [vmem:[%s6247_s0 + $0x3c] sm:$0xff] }
  0x68   :  { %3071 = vmatpush3.bf16.msra.mxu0 %v4359_v7  ;;  %v2848_v61 = vcombine.high %v2839_v28, %v2839_v28 }
  0x69   :  { %3093 = vmatpush3.bf16.msra.mxu1 %v4551_v44  ;;  %3072 = vmatprep.subr.bf16.mxu0 %v4371_v9 }
  0x6a   :  { %3094 = vmatprep.subr.bf16.mxu1 %v4562_v46 }
  0x6c   :  { %3073 = vmatpush3.bf16.msra.mxu0 %v4383_v11 }
  0x6d   :  { %3095 = vmatpush3.bf16.msra.mxu1 %v4575_v48  ;;  %3074 = vmatprep.subr.bf16.mxu0 %v4395_v13 }
  0x6e   :  { %3096 = vmatprep.subr.bf16.mxu1 %v4586_v50 }
  0x70   :  { %3075 = vmatpush3.bf16.msra.mxu0 %v4407_v15 }
  0x71   :  { %3097 = vmatpush3.bf16.msra.mxu1 %v4599_v52  ;;  %3076 = vmatprep.subr.bf16.mxu0 %v4419_v17 }
  0x72   :  { %3098 = vmatprep.subr.bf16.mxu1 %v4610_v54 }
  0x74   :  { %3077 = vmatpush3.bf16.msra.mxu0 %v4431_v19 }
  0x75   :  { %3099 = vmatpush3.bf16.msra.mxu1 %v4623_v56  ;;  %3078 = vmatprep.subr.bf16.mxu0 %v4443_v21 }
  0x76   :  { %3100 = vmatprep.subr.bf16.mxu1 %v4634_v58 }
  0x78   :  { %3079 = vmatpush3.bf16.msra.mxu0 %v4455_v23 }
  0x79   :  { %3101 = vmatpush3.bf16.msra.mxu1 %v4647_v60  ;;  %3080 = vmatprep.subr.bf16.mxu0 %v4467_v25 }
  0x7a   :  { %3102 = vmatprep.subr.bf16.mxu1 %v4658_v62 }
  0x7c   :  { %3081 = vmatpush3.bf16.msra.mxu0 %v4479_v27 }
  0x7d   :  { %3103 = vmatpush3.bf16.msra.mxu1 %v4671_v32  ;;  %3082 = vmatprep.subr.bf16.mxu0 %v4491_v29 }
  0x7e   :  { %3104 = vmatprep.subr.bf16.mxu1 %v4682_v34 }
  0x80   :  { %3083 = vmatpush3.bf16.msra.mxu0 %v4503_v31 }
  0x81   :  { %3105 = vmatpush3.bf16.msra.mxu1 %v4695_v36  ;;  %3112 = vmatprep.subr.bf16.mxu0 %v4521_v39  ;;  %v2851_v36 = vld [vmem:[%s6247_s0 + $0x50] sm:$0xff] }
  0x82   :  { %3842 = vmatprep.subr.bf16.mxu1 %v6397_v53 }
  0x83   :  { %939 = vmatmul.mubr.bf16.vlgmr.msra.gmra.mxu0 %v2843_v18  ;;  %v6400_v18 = vld [vmem:[#allocation11_spill] sm:$0xff] }
  0x84   :  { %979 = vmatmul.mubr.bf16.vlgmr.msra.gmra.mxu1 %v2845_v22  ;;  %3113 = vmatpush3.bf16.msra.mxu0 %v4531_v41  ;;  %v6401_v22 = vld [vmem:[#allocation12_spill] sm:$0xff] }
  0x85   :  { %3843 = vmatpush3.bf16.msra.mxu1 %v4714_v55  ;;  %3114 = vmatprep.subr.bf16.mxu0 %v4545_v43  ;;  %v4093_v55 = vld [vmem:[%s6247_s0 + $0x44] ss:$0 sps:$4 sm:$0xff]  }
  0x86   :  { %3844 = vmatprep.subr.bf16.mxu1 %v6397_v53  ;;  %1018 = vmatprep.mubr.bf16.mxu0 %v2848_v61  ;;  %v6402_v61 = vld [vmem:[#allocation13_spill] sm:$0xff] }
  0x87   :  { %3858 = vmatprep.mubr.msk.bf16.mxu1 %vm4294_vm0, %v6397_v53 }
  0x88   :  { %3115 = vmatpush3.bf16.msra.mxu0 %v4557_v45 }
  0x89   :  { %3845 = vmatpush3.bf16.msra.mxu1 %v4723_v59  ;;  %3116 = vmatprep.subr.bf16.mxu0 %v4569_v47  ;;  %v6405_v59 = vld [vmem:[#allocation16_spill] sm:$0xff] }
  0x8a   :  { %3846 = vmatprep.subr.bf16.mxu1 %v6397_v53 }
  0x8c   :  { %3117 = vmatpush3.bf16.msra.mxu0 %v4581_v49 }
  0x8d   :  { %3847 = vmatpush3.bf16.msra.mxu1 %v4734_v57  ;;  %3118 = vmatprep.subr.bf16.mxu0 %v4593_v51  ;;  %v6403_v57 = vld [vmem:[#allocation14_spill] sm:$0xff] }
  0x8e   :  { %3848 = vmatprep.subr.bf16.mxu1 %v6397_v53 }
  0x90   :  { %3119 = vmatpush3.bf16.msra.mxu0 %v6398_v24 }
  0x91   :  { %3849 = vmatpush3.bf16.msra.mxu1 %v4744_v33  ;;  %3120 = vmatprep.subr.bf16.mxu0 %v6399_v26  ;;  %v6404_v33 = vld [vmem:[#allocation15_spill] sm:$0xff] }
  0x92   :  { %3850 = vmatprep.subr.bf16.mxu1 %v6397_v53 }
  0x94   :  { %3121 = vmatpush3.bf16.msra.mxu0 %v6400_v18 }
  0x95   :  { %3851 = vmatpush3.bf16.msra.mxu1 %v4755_v35  ;;  %3122 = vmatprep.subr.bf16.mxu0 %v6401_v22  ;;  %v2847_v35 = vcombine.low %v2839_v28, %v2839_v28 }
  0x96   :  { %3852 = vmatprep.subr.bf16.mxu1 %v6397_v53 }
  0x98   :  { %3123 = vmatpush3.bf16.msra.mxu0 %v6402_v61 }
  0x99   :  { %3853 = vmatpush3.bf16.msra.mxu1 %v4764_v63  ;;  %3124 = vmatprep.subr.bf16.mxu0 %v6403_v57  ;;  %v2850_v63 = vld [vmem:[%s6247_s0 + $0x48] sm:$0xff] }
  0x9a   :  { %3854 = vmatprep.subr.bf16.mxu1 %v6397_v53  ;;  %v2856_v28 = vcombine.high %v2850_v63, %v2850_v63 }
  0x9c   :  { %3125 = vmatpush3.bf16.msra.mxu0 %v6404_v33 }
  0x9d   :  { %3855 = vmatpush3.bf16.msra.mxu1 %v4773_v16  ;;  %3126 = vmatprep.subr.bf16.mxu0 %v6405_v59  ;;  %v2858_v16 = vcombine.high %v2851_v36, %v2851_v36 }
  0x9e   :  { %3856 = vmatprep.subr.bf16.mxu1 %v6397_v53 }
  0xa0   :  { %3127 = vmatpush3.bf16.msra.mxu0 %v4701_v37 }
  0xa1   :  { %3857 = vmatpush3.bf16.msra.mxu1 %v4782_v20  ;;  %3143 = vmatprep.subr.bf16.mxu0 %v4318_v0  ;;  %v6406_v0 = vld [vmem:[#allocation2_spill] sm:$0xff] }
  0xa2   :  { %3165 = vmatprep.subr.bf16.mxu1 %v4323_v1  ;;  %v6407_v1 = vld [vmem:[#allocation3_spill] sm:$0xff] }
  0xa3   :  { %1019 = vmatmul.mubr.bf16.vlgmr.msra.gmra.mxu0 %v2847_v35 }
  0xa4   :  { %3859 = vmatmul.mubr.bf16.vlgmr.msra.gmra.mxu1 %v4093_v55  ;;  %3144 = vmatpush3.bf16.msra.mxu0 %v4329_v2  ;;  %v6408_v2 = vld [vmem:[#allocation4_spill] sm:$0xff]  ;;  %v4954_v55 = vld [vmem:[%s6246_s1 + $0x78] sm:$0xff]  }
  0xa5   :  { %3166 = vmatpush3.bf16.msra.mxu1 %v4335_v3  ;;  %3145 = vmatprep.subr.bf16.mxu0 %v4341_v4  ;;  %v6409_v3 = vld [vmem:[#allocation5_spill] sm:$0xff]  ;;  %v6410_v4 = vld [vmem:[#allocation6_spill] sm:$0xff]  ;;  %6414 = vst [vmem:[#allocation9_spill] sm:$0xff] %v4954_v55 }
  0xa6   :  { %3167 = vmatprep.subr.bf16.mxu1 %v4347_v5  ;;  %1137 = vmatprep.mubr.bf16.mxu0 %v2856_v28  ;;  %v6411_v5 = vld [vmem:[#allocation7_spill] sm:$0xff]  ;;  %v6415_v28 = vld [vmem:[#allocation18_spill] sm:$0xff] }
  0xa7   :  { %1177 = vmatprep.mubr.bf16.mxu1 %v2858_v16 }
  0xa8   :  { %3146 = vmatpush3.bf16.msra.mxu0 %v4353_v6  ;;  %v6412_v6 = vld [vmem:[#allocation8_spill] sm:$0xff] }
  0xa9   :  { %3168 = vmatpush3.bf16.msra.mxu1 %v4359_v7  ;;  %3147 = vmatprep.subr.bf16.mxu0 %v4365_v8  ;;  %v2855_v7 = vcombine.low %v2850_v63, %v2850_v63 }
  0xaa   :  { %3169 = vmatprep.subr.bf16.mxu1 %v4371_v9  ;;  %v2857_v9 = vcombine.low %v2851_v36, %v2851_v36 }
  0xac   :  { %3148 = vmatpush3.bf16.msra.mxu0 %v4377_v10 }
  0xad   :  { %3170 = vmatpush3.bf16.msra.mxu1 %v4383_v11  ;;  %3149 = vmatprep.subr.bf16.mxu0 %v4389_v12  ;;  %v2852_v11 = vld [vmem:[%s6247_s0 + $0x58] sm:$0xff] }
  0xae   :  { %3171 = vmatprep.subr.bf16.mxu1 %v4395_v13  ;;  %v2853_v13 = vld [vmem:[%s6247_s0 + $0x60] sm:$0xff] }
  0xaf   :  { %v2862_v16 = vcombine.high %v2853_v13, %v2853_v13 }
  0xb0   :  { %3150 = vmatpush3.bf16.msra.mxu0 %v4401_v14 }
  0xb1   :  { %3172 = vmatpush3.bf16.msra.mxu1 %v4407_v15  ;;  %3151 = vmatprep.subr.bf16.mxu0 %v6406_v0  ;;  %v2860_v15 = vcombine.high %v2852_v11, %v2852_v11 }
  0xb2   :  { %3173 = vmatprep.subr.bf16.mxu1 %v4419_v17  ;;  %v2859_v17 = vcombine.low %v2852_v11, %v2852_v11 }
  0xb4   :  { %3152 = vmatpush3.bf16.msra.mxu0 %v6407_v1 }
  0xb5   :  { %3174 = vmatpush3.bf16.msra.mxu1 %v4431_v19  ;;  %3153 = vmatprep.subr.bf16.mxu0 %v6408_v2  ;;  %v2861_v19 = vcombine.low %v2853_v13, %v2853_v13 }
  0xb6   :  { %3175 = vmatprep.subr.bf16.mxu1 %v4443_v21  ;;  %v4946_v21 = vld [vmem:[%s6247_s0 + $0x6c] sm:$0xff] }
  0xb7   :  { %v2870_v63 = vcombine.high %v4946_v21, %v4946_v21 }
  0xb8   :  { %3154 = vmatpush3.bf16.msra.mxu0 %v6409_v3 }
  0xb9   :  { %3176 = vmatpush3.bf16.msra.mxu1 %v4455_v23  ;;  %3155 = vmatprep.subr.bf16.mxu0 %v6410_v4  ;;  %v6413_v23 = vld [vmem:[#allocation17_spill] sm:$0xff] }
  0xba   :  { %3177 = vmatprep.subr.bf16.mxu1 %v4467_v25 }
  0xbc   :  { %3156 = vmatpush3.bf16.msra.mxu0 %v6411_v5 }
  0xbd   :  { %3178 = vmatpush3.bf16.msra.mxu1 %v4479_v27  ;;  %3157 = vmatprep.subr.bf16.mxu0 %v6412_v6 }
  0xbe   :  { %3179 = vmatprep.subr.bf16.mxu1 %v4491_v29 }
  0xc0   :  { %3158 = vmatpush3.bf16.msra.mxu0 %v4497_v30 }
  0xc1   :  { %3180 = vmatpush3.bf16.msra.mxu1 %v4503_v31  ;;  %3187 = vmatprep.subr.bf16.mxu0 %v4516_v38 }
  0xc2   :  { %3209 = vmatprep.subr.bf16.mxu1 %v4521_v39 }
  0xc3   :  { %1138 = vmatmul.mubr.bf16.vlgmr.msra.gmra.mxu0 %v2855_v7  ;;  %v4963_v7 = vld [vmem:[%s6246_s1 + $0x38] sm:$0xff]  }
  0xc4   :  { %1178 = vmatmul.mubr.bf16.vlgmr.msra.gmra.mxu1 %v2857_v9  ;;  %3188 = vmatpush3.bf16.msra.mxu0 %v4526_v40  ;;  %6416 = vst [vmem:[#allocation10_spill] sm:$0xff] %v4963_v7 }
  0xc5   :  { %3210 = vmatpush3.bf16.msra.mxu1 %v4531_v41  ;;  %3189 = vmatprep.subr.bf16.mxu0 %v4538_v42 }
  0xc6   :  { %3211 = vmatprep.subr.bf16.mxu1 %v4545_v43  ;;  %1217 = vmatprep.mubr.bf16.mxu0 %v2860_v15 }
  0xc7   :  { %1257 = vmatprep.mubr.bf16.mxu1 %v2862_v16  ;;  %v4970_v16 = vld [vmem:[%s6246_s1 + $0x70] sm:$0xff]  }
  0xc8   :  { %3190 = vmatpush3.bf16.msra.mxu0 %v4551_v44 }
  0xc9   :  { %3212 = vmatpush3.bf16.msra.mxu1 %v4557_v45  ;;  %3191 = vmatprep.subr.bf16.mxu0 %v4562_v46 }
  0xca   :  { %3213 = vmatprep.subr.bf16.mxu1 %v4569_v47 }
  0xcc   :  { %3192 = vmatpush3.bf16.msra.mxu0 %v4575_v48 }
  0xcd   :  { %3214 = vmatpush3.bf16.msra.mxu1 %v4581_v49  ;;  %3193 = vmatprep.subr.bf16.mxu0 %v4586_v50 }
  0xce   :  { %3215 = vmatprep.subr.bf16.mxu1 %v4593_v51 }
  0xd0   :  { %3194 = vmatpush3.bf16.msra.mxu0 %v4599_v52 }
  0xd1   :  { %3216 = vmatpush3.bf16.msra.mxu1 %v6398_v24  ;;  %3195 = vmatprep.subr.bf16.mxu0 %v4610_v54 }
  0xd2   :  { %3217 = vmatprep.subr.bf16.mxu1 %v6399_v26 }
  0xd4   :  { %3196 = vmatpush3.bf16.msra.mxu0 %v4623_v56 }
  0xd5   :  { %3218 = vmatpush3.bf16.msra.mxu1 %v6400_v18  ;;  %3197 = vmatprep.subr.bf16.mxu0 %v4634_v58 }
  0xd6   :  { %3219 = vmatprep.subr.bf16.mxu1 %v6401_v22 }
  0xd8   :  { %3198 = vmatpush3.bf16.msra.mxu0 %v4647_v60 }
  0xd9   :  { %3220 = vmatpush3.bf16.msra.mxu1 %v6402_v61  ;;  %3199 = vmatprep.subr.bf16.mxu0 %v4658_v62 }
  0xda   :  { %3221 = vmatprep.subr.bf16.mxu1 %v6403_v57 }
  0xdc   :  { %3200 = vmatpush3.bf16.msra.mxu0 %v4671_v32 }
  0xdd   :  { %3222 = vmatpush3.bf16.msra.mxu1 %v6404_v33  ;;  %3201 = vmatprep.subr.bf16.mxu0 %v4682_v34 }
  0xde   :  { %3223 = vmatprep.subr.bf16.mxu1 %v6405_v59 }
  0xe0   :  { %3202 = vmatpush3.bf16.msra.mxu0 %v6413_v23 }
  0xe1   :  { %3224 = vmatpush3.bf16.msra.mxu1 %v4701_v37  ;;  %3862 = vmatprep.subr.bf16.mxu0 %v6397_v53 }
  0xe2   :  { %3240 = vmatprep.subr.bf16.mxu1 %v4954_v55  ;;  %v6417_v55 = vld [vmem:[#allocation19_spill] sm:$0xff] }
  0xe3   :  { %v2965_v36 = vpop.f32.mrf.mxu0  ;;  %1218 = vmatmul.mubr.bf16.vlgmr.msra.gmra.mxu0 %v2859_v17 }
  0xe4   :  { %v2987_v35 = vpop.f32.mrf.mxu1  ;;  %1258 = vmatmul.mubr.bf16.vlgmr.msra.gmra.mxu1 %v2861_v19  ;;  %3863 = vmatpush3.bf16.msra.mxu0 %v6415_v28 }
  0xe5   :  { %3241 = vmatpush3.bf16.msra.mxu1 %v4963_v7  ;;  %v2966_v9 = vpop.f32.mrf.mxu0  ;;  %3864 = vmatprep.subr.bf16.mxu0 %v6397_v53 }
  0xe6   :  { %v2988_v11 = vpop.f32.mrf.mxu1  ;;  %v2967_v13 = vadd.f32 %v2966_v9, %v2965_v36  ;;  %3242 = vmatprep.subr.bf16.mxu1 %v4970_v16  ;;  %3878 = vmatprep.mubr.msk.bf16.mxu0 %vm4294_vm0, %v6397_v53  ;;  %v4979_v36 = vld [vmem:[%s6246_s1 + $0x30] sm:$0xff]  }
  0xe7   :  { %v2989_v15 = vadd.f32 %v2988_v11, %v2987_v35  ;;  %v2968_v17 = vpop.f32.mrf.mxu0  ;;  %1376 = vmatprep.mubr.bf16.mxu1 %v2870_v63  ;;  %v6418_v11 = vld [vmem:[#allocation20_spill] sm:$0xff]  ;;  %v6419_v63 = vld [vmem:[#allocation21_spill] sm:$0xff] }
  0xe8   :  { %v2990_v19 = vpop.f32.mrf.mxu1  ;;  %3865 = vmatpush3.bf16.msra.mxu0 %v6417_v55 }
  0xe9   :  { %v703_v7 = vadd.f32 %v2989_v15, %v2967_v13  ;;  %3243 = vmatpush3.bf16.msra.mxu1 %v4979_v36  ;;  %v2969_v35 = vpop.f32.mrf.mxu0  ;;  %3866 = vmatprep.subr.bf16.mxu0 %v6397_v53  ;;  %v6420_v13 = vld [vmem:[#allocation22_spill] sm:$0xff]  ;;  %v5042_v15 = vld [vmem:[%s6246_s1 + $0xf0] sm:$0xff]  }
  0xea   :  { %v2991_v9 = vpop.f32.mrf.mxu1  ;;  %3244 = vmatprep.subr.bf16.mxu1 %v4365_v8  ;;  %v6421_v8 = vld [vmem:[#allocation23_spill] sm:$0xff] }
  0xec   :  { %3867 = vmatpush3.bf16.msra.mxu0 %v6418_v11 }
  0xed   :  { %3245 = vmatpush3.bf16.msra.mxu1 %v4377_v10  ;;  %3868 = vmatprep.subr.bf16.mxu0 %v6397_v53  ;;  %v6422_v10 = vld [vmem:[#allocation24_spill] sm:$0xff] }
  0xee   :  { %3246 = vmatprep.subr.bf16.mxu1 %v4389_v12  ;;  %v4102_v12 = vld [vmem:[%s6247_s0 + $0x68] ss:$0 sps:$4 sm:$0xff]  }
  0xf0   :  { %3869 = vmatpush3.bf16.msra.mxu0 %v6419_v63 }
  0xf1   :  { %3247 = vmatpush3.bf16.msra.mxu1 %v4401_v14  ;;  %3870 = vmatprep.subr.bf16.mxu0 %v6397_v53  ;;  %v2869_v14 = vcombine.low %v4946_v21, %v4946_v21 }
  0xf2   :  { %3248 = vmatprep.subr.bf16.mxu1 %v6406_v0  ;;  %v5012_v0 = vld [vmem:[%s6247_s0 + $0x74] sm:$0xff] }
  0xf4   :  { %3871 = vmatpush3.bf16.msra.mxu0 %v6420_v13 }
  0xf5   :  { %3249 = vmatpush3.bf16.msra.mxu1 %v6407_v1  ;;  %3872 = vmatprep.subr.bf16.mxu0 %v6397_v53  ;;  %v5017_v1 = vld [vmem:[%s6247_s0 + $0x7c] sm:$0xff] }
  0xf6   :  { %3250 = vmatprep.subr.bf16.mxu1 %v6408_v2  ;;  %v5024_v2 = vld [vmem:[%s6246_s1 + $0xf8] sm:$0xff]  }
  0xf8   :  { %3873 = vmatpush3.bf16.msra.mxu0 %v6421_v8 }
  0xf9   :  { %3251 = vmatpush3.bf16.msra.mxu1 %v6409_v3  ;;  %3874 = vmatprep.subr.bf16.mxu0 %v6397_v53  ;;  %v2872_v3 = vcombine.high %v5012_v0, %v5012_v0 }
  0xfa   :  { %3252 = vmatprep.subr.bf16.mxu1 %v6410_v4  ;;  %v2874_v4 = vcombine.high %v5017_v1, %v5017_v1 }
  0xfc   :  { %3875 = vmatpush3.bf16.msra.mxu0 %v6422_v10 }
  0xfd   :  { %3253 = vmatpush3.bf16.msra.mxu1 %v6411_v5  ;;  %3876 = vmatprep.subr.bf16.mxu0 %v6397_v53 }
  0xfe   :  { %3254 = vmatprep.subr.bf16.mxu1 %v6412_v6 }
 0x100   :  { %3877 = vmatpush3.bf16.msra.mxu0 %v4782_v20 }
 0x101   :  { %3255 = vmatpush3.bf16.msra.mxu1 %v4497_v30  ;;  %3262 = vmatprep.subr.bf16.mxu0 %v5024_v2  ;;  %v5035_v30 = vld [vmem:[%s6246_s1 + $0xb8] sm:$0xff]  }
 0x102   :  { %3284 = vmatprep.subr.bf16.mxu1 %v4516_v38 }
 0x103   :  { %v3009_v5 = vpop.f32.mrf.mxu0  ;;  %3879 = vmatmul.mubr.bf16.vlgmr.msra.gmra.mxu0 %v4102_v12 }
 0x104   :  { %1377 = vmatmul.mubr.bf16.vlgmr.msra.gmra.mxu1 %v2869_v14  ;;  %v3031_v6 = vpop.f32.mrf.mxu1  ;;  %3263 = vmatpush3.bf16.msra.mxu0 %v5035_v30 }
 0x105   :  { %3285 = vmatpush3.bf16.msra.mxu1 %v4526_v40  ;;  %v3010_v38 = vpop.f32.mrf.mxu0  ;;  %3264 = vmatprep.subr.bf16.mxu0 %v5042_v15  ;;  %v5049_v40 = vld [vmem:[%s6246_s1 + $0xb0] sm:$0xff]  }
 0x106   :  { %v3032_v21 = vpop.f32.mrf.mxu1  ;;  %3286 = vmatprep.subr.bf16.mxu1 %v4538_v42  ;;  %v3011_v17 = vadd.f32 %v3010_v38, %v3009_v5  ;;  %1416 = vmatprep.mubr.bf16.mxu0 %v2872_v3  ;;  %v5056_v42 = vld [vmem:[%s6246_s1 + $0xe8] sm:$0xff]  }
 0x107   :  { %v3033_v19 = vadd.f32 %v3032_v21, %v3031_v6  ;;  %1456 = vmatprep.mubr.bf16.mxu1 %v2874_v4  ;;  %v3012_v35 = vpop.f32.mrf.mxu0  ;;  %v5063_v4 = vld [vmem:[%s6246_s1 + $0xa8] sm:$0xff]  }
 0x108   :  { %v3034_v9 = vpop.f32.mrf.mxu1  ;;  %v743_v12 = vadd.f32 %v3011_v17, %v703_v7  ;;  %3265 = vmatpush3.bf16.msra.mxu0 %v5049_v40  ;;  %v5188_v21 = vld [vmem:[%s6246_s1 + $0x68] sm:$0xff]  }
 0x109   :  { %3287 = vmatpush3.bf16.msra.mxu1 %v4551_v44  ;;  %v3013_v14 = vpop.f32.mrf.mxu0  ;;  %3266 = vmatprep.subr.bf16.mxu0 %v5056_v42  ;;  %v5070_v44 = vld [vmem:[%s6246_s1 + $0xe0] sm:$0xff]   ;;  %v5197_v35 = vld [vmem:[%s6246_s1 + $0x28] sm:$0xff]  }
 0x10a   :  { %3288 = vmatprep.subr.bf16.mxu1 %v4562_v46  ;;  %v3035_v7 = vpop.f32.mrf.mxu1  ;;  %v783_v3 = vadd.f32 %v3033_v19, %v743_v12  ;;  %v5077_v46 = vld [vmem:[%s6246_s1 + $0xa0] sm:$0xff]   ;;  %v5218_v14 = vld [vmem:[%s6246_s1 + $0x58] sm:$0xff]  }
 0x10b   :  { %v5204_v9 = vld [vmem:[%s6246_s1 + $0x60] sm:$0xff]   ;;  %v5225_v7 = vld [vmem:[%s6246_s1 + $0x18] sm:$0xff]  }
 0x10c   :  { %3267 = vmatpush3.bf16.msra.mxu0 %v5063_v4  ;;  %v5211_v12 = vld [vmem:[%s6246_s1 + $0x20] sm:$0xff]  }
 0x10d   :  { %3289 = vmatpush3.bf16.msra.mxu1 %v4575_v48  ;;  %3268 = vmatprep.subr.bf16.mxu0 %v5070_v44  ;;  %v5084_v48 = vld [vmem:[%s6246_s1 + $0xd8] sm:$0xff]  }
 0x10e   :  { %3290 = vmatprep.subr.bf16.mxu1 %v4586_v50  ;;  %v5091_v50 = vld [vmem:[%s6246_s1 + $0x98] sm:$0xff]  }
 0x110   :  { %3269 = vmatpush3.bf16.msra.mxu0 %v5077_v46 }
 0x111   :  { %3291 = vmatpush3.bf16.msra.mxu1 %v4599_v52  ;;  %3270 = vmatprep.subr.bf16.mxu0 %v5084_v48  ;;  %v5098_v52 = vld [vmem:[%s6246_s1 + $0xd0] sm:$0xff]  }
 0x112   :  { %3292 = vmatprep.subr.bf16.mxu1 %v4610_v54  ;;  %v5105_v54 = vld [vmem:[%s6246_s1 + $0x90] sm:$0xff]  }
 0x114   :  { %3271 = vmatpush3.bf16.msra.mxu0 %v5091_v50 }
 0x115   :  { %3293 = vmatpush3.bf16.msra.mxu1 %v4623_v56  ;;  %3272 = vmatprep.subr.bf16.mxu0 %v5098_v52  ;;  %v2871_v56 = vcombine.low %v5012_v0, %v5012_v0 }
 0x116   :  { %3294 = vmatprep.subr.bf16.mxu1 %v4634_v58  ;;  %v2873_v58 = vcombine.low %v5017_v1, %v5017_v1 }
 0x118   :  { %3273 = vmatpush3.bf16.msra.mxu0 %v5105_v54 }
 0x119   :  { %3295 = vmatpush3.bf16.msra.mxu1 %v4647_v60  ;;  %3274 = vmatprep.subr.bf16.mxu0 %v4467_v25  ;;  %v2867_v25 = vld [vmem:[%s6247_s0 + $0x84] sm:$0xff] }
 0x11a   :  { %3296 = vmatprep.subr.bf16.mxu1 %v4658_v62 }
 0x11c   :  { %3275 = vmatpush3.bf16.msra.mxu0 %v4479_v27  ;;  %v2876_v27 = vcombine.high %v2867_v25, %v2867_v25 }
 0x11d   :  { %3297 = vmatpush3.bf16.msra.mxu1 %v4671_v32  ;;  %3276 = vmatprep.subr.bf16.mxu0 %v4491_v29 }
 0x11e   :  { %3298 = vmatprep.subr.bf16.mxu1 %v4682_v34 }
 0x120   :  { %3277 = vmatpush3.bf16.msra.mxu0 %v4503_v31 }
 0x121   :  { %3299 = vmatpush3.bf16.msra.mxu1 %v6413_v23  ;;  %3306 = vmatprep.subr.bf16.mxu0 %v4521_v39 }
 0x122   :  { %3882 = vmatprep.subr.bf16.mxu1 %v6397_v53 }
 0x123   :  { %v822_v29 = vpop.f32.mrf.mxu0  ;;  %1417 = vmatmul.mubr.bf16.vlgmr.msra.gmra.mxu0 %v2871_v56  ;;  %v5239_v56 = vld [vmem:[%s6246_s1 + $0x10] sm:$0xff]  }
 0x124   :  { %1457 = vmatmul.mubr.bf16.vlgmr.msra.gmra.mxu1 %v2873_v58  ;;  %v3062_v60 = vpop.f32.mrf.mxu1  ;;  %v5126_v62 = vadd.f32 %v822_v29, %v783_v3  ;;  %3307 = vmatpush3.bf16.msra.mxu0 %v4531_v41  ;;  %v5232_v3 = vld [vmem:[%s6246_s1 + $0x50] sm:$0xff]   ;;  %v5246_v58 = vld [vmem:[%s6246_s1 + $0x48] sm:$0xff]  }
 0x125   :  { %3883 = vmatpush3.bf16.msra.mxu1 %v6415_v28  ;;  %v3840_v32 = vpop.f32.mrf.mxu0  ;;  %3308 = vmatprep.subr.bf16.mxu0 %v4545_v43  ;;  %v5264_v29 = vld [vmem:[%s6246_s1 + $0x88] sm:$0xff]  }
 0x126   :  { %6423 = vst [vmem:[#allocation11_spill] sm:$0xff] %v5126_v62  ;;  %3884 = vmatprep.subr.bf16.mxu1 %v6397_v53  ;;  %v3063_v31 = vpop.f32.mrf.mxu1  ;;  %1496 = vmatprep.mubr.bf16.mxu0 %v2876_v27  ;;  %v5258_v27 = vld [vmem:[%s6246_s1 + $0x8] sm:$0xff]   ;;  %v5276_v32 = vld [vmem:[%s6246_s1 + $0xc0] sm:$0xff]  }
 0x127   :  { %v3064_v39 = vadd.f32 %v3063_v31, %v3062_v60  ;;  %3898 = vmatprep.mubr.msk.bf16.mxu1 %vm4294_vm0, %v6397_v53  ;;  %v825_v34 = vpop.f32.mrf.mxu0  ;;  %v5270_v60 = vld [vmem:[%s6246_s1 + $0x40] sm:$0xff]   ;;  %6426 = vst [vmem:[#allocation12_spill] sm:$0xff] %v5276_v32 }
 0x128   :  { %v3065_v23 = vpop.f32.mrf.mxu1  ;;  %3309 = vmatpush3.bf16.msra.mxu0 %v4557_v45  ;;  %v2875_v45 = vcombine.low %v2867_v25, %v2867_v25  ;;  %v5252_v25 = vld [vmem:[%s6246_s1 + $0xc8] sm:$0xff]   ;;  %v5286_v34 = vld [vmem:[%s6247_s0 + $0xa0] sm:$0xff] }
 0x129   :  { %3885 = vmatpush3.bf16.msra.mxu1 %v6417_v55  ;;  %v3841_v41 = vpop.f32.mrf.mxu0  ;;  %3310 = vmatprep.subr.bf16.mxu0 %v4569_v47  ;;  %v4111_v47 = vld [vmem:[%s6247_s0 + $0x8c] ss:$0 sps:$4 sm:$0xff]   ;;  %v2887_v62 = vcombine.low %v5286_v34, %v5286_v34 }
 0x12a   :  { %3886 = vmatprep.subr.bf16.mxu1 %v6397_v53  ;;  %v3066_v43 = vpop.f32.mrf.mxu1  ;;  %v5291_v23 = vld [vmem:[%s6247_s0 + $0xa8] sm:$0xff]  ;;  %v5296_v41 = vld [vmem:[%s6246_s1] sm:$0xff]  }
 0x12b   :  { %v5302_v43 = vld [vmem:[%s6246_s1 + $0x80] sm:$0xff]  }
 0x12c   :  { %3311 = vmatpush3.bf16.msra.mxu0 %v4581_v49  ;;  %v5164_v49 = vld [vmem:[%s6247_s0 + $0x90] sm:$0xff]  ;;  %6427 = vst [vmem:[#allocation13_spill] sm:$0xff] %v5302_v43 }
 0x12d   :  { %3887 = vmatpush3.bf16.msra.mxu1 %v6418_v11  ;;  %3312 = vmatprep.subr.bf16.mxu0 %v4593_v51  ;;  %v5169_v51 = vld [vmem:[%s6247_s0 + $0x98] sm:$0xff]  ;;  %v2883_v31 = vcombine.low %v5164_v49, %v5164_v49 }
 0x12e   :  { %3888 = vmatprep.subr.bf16.mxu1 %v6397_v53 }
 0x130   :  { %3313 = vmatpush3.bf16.msra.mxu0 %v6398_v24 }
 0x131   :  { %3889 = vmatpush3.bf16.msra.mxu1 %v6419_v63  ;;  %3314 = vmatprep.subr.bf16.mxu0 %v6399_v26 }
 0x132   :  { %3890 = vmatprep.subr.bf16.mxu1 %v6397_v53 }
 0x134   :  { %3315 = vmatpush3.bf16.msra.mxu0 %v6400_v18  ;;  %v6425_v18 = vld [vmem:[#allocation10_spill] sm:$0xff] }
 0x135   :  { %3891 = vmatpush3.bf16.msra.mxu1 %v6420_v13  ;;  %3316 = vmatprep.subr.bf16.mxu0 %v6401_v22 }
 0x136   :  { %3892 = vmatprep.subr.bf16.mxu1 %v6397_v53 }
 0x138   :  { %3317 = vmatpush3.bf16.msra.mxu0 %v6402_v61 }
 0x139   :  { %3893 = vmatpush3.bf16.msra.mxu1 %v6421_v8  ;;  %3318 = vmatprep.subr.bf16.mxu0 %v6403_v57  ;;  %v2884_v57 = vcombine.high %v5164_v49, %v5164_v49  ;;  %v2888_v49 = vcombine.high %v5286_v34, %v5286_v34 }
 0x13a   :  { %3894 = vmatprep.subr.bf16.mxu1 %v6397_v53 }
 0x13c   :  { %3319 = vmatpush3.bf16.msra.mxu0 %v6404_v33  ;;  %v2886_v33 = vcombine.high %v5169_v51, %v5169_v51 }
 0x13d   :  { %3895 = vmatpush3.bf16.msra.mxu1 %v6422_v10  ;;  %3320 = vmatprep.subr.bf16.mxu0 %v6405_v59  ;;  %v6424_v59 = vld [vmem:[#allocation9_spill] sm:$0xff] }
 0x13e   :  { %3896 = vmatprep.subr.bf16.mxu1 %v6397_v53 }
 0x140   :  { %3321 = vmatpush3.bf16.msra.mxu0 %v4701_v37 }
 0x141   :  { %3897 = vmatpush3.bf16.msra.mxu1 %v4782_v20  ;;  %3337 = vmatprep.subr.bf16.mxu0 %v6424_v59 }
 0x142   :  { %3359 = vmatprep.subr.bf16.mxu1 %v5024_v2 }
 0x143   :  { %v3084_v24 = vpop.f32.mrf.mxu0  ;;  %1497 = vmatmul.mubr.bf16.vlgmr.msra.gmra.mxu0 %v2875_v45  ;;  %v5308_v45 = vld [vmem:[%s6246_s1 + $0x178] sm:$0xff]  }
 0x144   :  { %3899 = vmatmul.mubr.bf16.vlgmr.msra.gmra.mxu1 %v4111_v47  ;;  %v3106_v26 = vpop.f32.mrf.mxu1  ;;  %3338 = vmatpush3.bf16.msra.mxu0 %v6425_v18  ;;  %v5314_v47 = vld [vmem:[%s6246_s1 + $0x1f8] sm:$0xff]  }
 0x145   :  { %3360 = vmatpush3.bf16.msra.mxu1 %v5035_v30  ;;  %v3085_v37 = vpop.f32.mrf.mxu0  ;;  %3339 = vmatprep.subr.bf16.mxu0 %v4970_v16  ;;  %6428 = vst [vmem:[#allocation14_spill] sm:$0xff] %v5314_v47 }
 0x146   :  { %v3107_v22 = vpop.f32.mrf.mxu1  ;;  %3361 = vmatprep.subr.bf16.mxu1 %v5042_v15  ;;  %v3086_v61 = vadd.f32 %v3085_v37, %v3084_v24  ;;  %1615 = vmatprep.mubr.bf16.mxu0 %v2884_v57  ;;  %v5324_v24 = vld [vmem:[%s6246_s1 + $0x138] sm:$0xff]  }
 0x147   :  { %v3108_v0 = vadd.f32 %v3107_v22, %v3106_v26  ;;  %1655 = vmatprep.mubr.bf16.mxu1 %v2886_v33  ;;  %v3087_v1 = vpop.f32.mrf.mxu0  ;;  %v5330_v26 = vld [vmem:[%s6246_s1 + $0x1b8] sm:$0xff]   ;;  %v5336_v22 = vld [vmem:[%s6246_s1 + $0x170] sm:$0xff]  }
 0x148   :  { %v3109_v5 = vpop.f32.mrf.mxu1  ;;  %v941_v6 = vadd.f32 %v3086_v61, %v3064_v39  ;;  %3340 = vmatpush3.bf16.msra.mxu0 %v4979_v36  ;;  %v2885_v39 = vcombine.low %v5169_v51, %v5169_v51  ;;  %v2890_v51 = vcombine.high %v5291_v23, %v5291_v23  ;;  %6429 = vst [vmem:[#allocation15_spill] sm:$0xff] %v5330_v26  ;;  %v5342_v61 = vld [vmem:[%s6246_s1 + $0x1f0] sm:$0xff]  }
 0x149   :  { %3362 = vmatpush3.bf16.msra.mxu1 %v5049_v40  ;;  %v3088_v38 = vpop.f32.mrf.mxu0  ;;  %3341 = vmatprep.subr.bf16.mxu0 %v5188_v21  ;;  %6430 = vst [vmem:[#allocation16_spill] sm:$0xff] %v5342_v61 }
 0x14a   :  { %3363 = vmatprep.subr.bf16.mxu1 %v5056_v42  ;;  %v3110_v17 = vpop.f32.mrf.mxu1  ;;  %v5192_v19 = vadd.f32 %v3108_v0, %v941_v6  ;;  %v5348_v38 = vld [vmem:[%s6246_s1 + $0x130] sm:$0xff]  }
 0x14b   :  { %v5354_v17 = vld [vmem:[%s6246_s1 + $0x1b0] sm:$0xff]  }
 0x14c   :  { %3342 = vmatpush3.bf16.msra.mxu0 %v5197_v35  ;;  %6431 = vst [vmem:[#allocation2_spill] sm:$0xff] %v5354_v17 }
 0x14d   :  { %3364 = vmatpush3.bf16.msra.mxu1 %v5063_v4  ;;  %3343 = vmatprep.subr.bf16.mxu0 %v5204_v9 }
 0x14e   :  { %3365 = vmatprep.subr.bf16.mxu1 %v5070_v44 }
 0x150   :  { %3344 = vmatpush3.bf16.msra.mxu0 %v5211_v12 }
 0x151   :  { %3366 = vmatpush3.bf16.msra.mxu1 %v5077_v46  ;;  %3345 = vmatprep.subr.bf16.mxu0 %v5218_v14 }
 0x152   :  { %3367 = vmatprep.subr.bf16.mxu1 %v5084_v48 }
 0x154   :  { %3346 = vmatpush3.bf16.msra.mxu0 %v5225_v7 }
 0x155   :  { %3368 = vmatpush3.bf16.msra.mxu1 %v5091_v50  ;;  %3347 = vmatprep.subr.bf16.mxu0 %v5232_v3 }
 0x156   :  { %3369 = vmatprep.subr.bf16.mxu1 %v5098_v52 }
 0x158   :  { %3348 = vmatpush3.bf16.msra.mxu0 %v5239_v56 }
 0x159   :  { %3370 = vmatpush3.bf16.msra.mxu1 %v5105_v54  ;;  %3349 = vmatprep.subr.bf16.mxu0 %v5246_v58 }
 0x15a   :  { %3371 = vmatprep.subr.bf16.mxu1 %v5252_v25 }
 0x15c   :  { %3350 = vmatpush3.bf16.msra.mxu0 %v5258_v27 }
 0x15d   :  { %3372 = vmatpush3.bf16.msra.mxu1 %v5264_v29  ;;  %3351 = vmatprep.subr.bf16.mxu0 %v5270_v60 }
 0x15e   :  { %3373 = vmatprep.subr.bf16.mxu1 %v5276_v32 }
 0x160   :  { %3352 = vmatpush3.bf16.msra.mxu0 %v5296_v41 }
 0x161   :  { %3374 = vmatpush3.bf16.msra.mxu1 %v5302_v43  ;;  %3381 = vmatprep.subr.bf16.mxu0 %v5308_v45 }
 0x162   :  { %3403 = vmatprep.subr.bf16.mxu1 %v5314_v47 }
 0x163   :  { %v3128_v57 = vpop.f32.mrf.mxu0  ;;  %1616 = vmatmul.mubr.bf16.vlgmr.msra.gmra.mxu0 %v2883_v31 }
 0x164   :  { %1656 = vmatmul.mubr.bf16.vlgmr.msra.gmra.mxu1 %v2885_v39  ;;  %v1060_v33 = vpop.f32.mrf.mxu1  ;;  %3382 = vmatpush3.bf16.msra.mxu0 %v5324_v24 }
 0x165   :  { %3404 = vmatpush3.bf16.msra.mxu1 %v5330_v26  ;;  %v3129_v37 = vpop.f32.mrf.mxu0  ;;  %3383 = vmatprep.subr.bf16.mxu0 %v5336_v22  ;;  %v5506_v26 = vld [vmem:[%s6246_s1 + $0x100] sm:$0xff]  }
 0x166   :  { %3405 = vmatprep.subr.bf16.mxu1 %v5342_v61  ;;  %v3860_v0 = vpop.f32.mrf.mxu1  ;;  %v3130_v1 = vadd.f32 %v3129_v37, %v3128_v57  ;;  %1695 = vmatprep.mubr.bf16.mxu0 %v2888_v49  ;;  %v5361_v49 = vld [vmem:[%s6246_s1 + $0x168] sm:$0xff]   ;;  %v5501_v61 = vld [vmem:[%s6247_s0 + $0xb4] sm:$0xff]  ;;  %6450 = vst [vmem:[#allocation28_spill] sm:$0xff] %v5506_v26 }
 0x167   :  { %1735 = vmatprep.mubr.bf16.mxu1 %v2890_v51  ;;  %v3131_v5 = vpop.f32.mrf.mxu0  ;;  %v5367_v51 = vld [vmem:[%s6246_s1 + $0x1e8] sm:$0xff]   ;;  %v2898_v34 = vcombine.high %v5501_v61, %v5501_v61 }
 0x168   :  { %v1063_v6 = vpop.f32.mrf.mxu1  ;;  %3384 = vmatpush3.bf16.msra.mxu0 %v5348_v38  ;;  %v1021_v31 = vadd.f32 %v3130_v1, %v5192_v19  ;;  %6432 = vst [vmem:[#allocation3_spill] sm:$0xff] %v5367_v51  ;;  %v5377_v0 = vld [vmem:[%s6246_s1 + $0x128] sm:$0xff]   ;;  %v5395_v5 = vld [vmem:[%s6246_s1 + $0x1e0] sm:$0xff]   ;;  %v5425_v19 = vld [vmem:[%s6246_s1 + $0x118] sm:$0xff]  }
 0x169   :  { %3406 = vmatpush3.bf16.msra.mxu1 %v5354_v17  ;;  %v3132_v39 = vpop.f32.mrf.mxu0  ;;  %3385 = vmatprep.subr.bf16.mxu0 %v5361_v49  ;;  %v5383_v1 = vld [vmem:[%s6246_s1 + $0x1a8] sm:$0xff]   ;;  %6435 = vst [vmem:[#allocation6_spill] sm:$0xff] %v5395_v5  ;;  %v5401_v6 = vld [vmem:[%s6246_s1 + $0x120] sm:$0xff]   ;;  %6438 = vst [vmem:[#allocation17_spill] sm:$0xff] %v5425_v19 }
 0x16a   :  { %3407 = vmatprep.subr.bf16.mxu1 %v5367_v51  ;;  %v3861_v57 = vpop.f32.mrf.mxu1  ;;  %v5370_v37 = vadd.f32 %v1060_v33, %v1021_v31  ;;  %6434 = vst [vmem:[#allocation5_spill] sm:$0xff] %v5383_v1  ;;  %v5389_v33 = vld [vmem:[%s6246_s1 + $0x160] sm:$0xff]   ;;  %v5413_v39 = vld [vmem:[%s6246_s1 + $0x158] sm:$0xff]   ;;  %v5461_v51 = vld [vmem:[%s6246_s1 + $0x148] sm:$0xff]  }
 0x16b   :  { %v5407_v31 = vld [vmem:[%s6246_s1 + $0x1a0] sm:$0xff]   ;;  %v5419_v57 = vld [vmem:[%s6246_s1 + $0x1d8] sm:$0xff]   ;;  %6444 = vst [vmem:[#allocation23_spill] sm:$0xff] %v5461_v51  ;;  %v5473_v17 = vld [vmem:[%s6246_s1 + $0x108] sm:$0xff]  }
 0x16c   :  { %6433 = vst [vmem:[#allocation4_spill] sm:$0xff] %v5370_v37  ;;  %3386 = vmatpush3.bf16.msra.mxu0 %v5377_v0  ;;  %6436 = vst [vmem:[#allocation7_spill] sm:$0xff] %v5407_v31  ;;  %v5485_v37 = vld [vmem:[%s6246_s1 + $0x140] sm:$0xff]  }
 0x16d   :  { %3408 = vmatpush3.bf16.msra.mxu1 %v5383_v1  ;;  %3387 = vmatprep.subr.bf16.mxu0 %v5389_v33  ;;  %6437 = vst [vmem:[#allocation8_spill] sm:$0xff] %v5419_v57  ;;  %v5449_v1 = vld [vmem:[%s6246_s1 + $0x110] sm:$0xff]   ;;  %6446 = vst [vmem:[#allocation10_spill] sm:$0xff] %v5473_v17 }
 0x16e   :  { %3409 = vmatprep.subr.bf16.mxu1 %v5395_v5  ;;  %v5437_v5 = vld [vmem:[%s6246_s1 + $0x150] sm:$0xff]   ;;  %6442 = vst [vmem:[#allocation21_spill] sm:$0xff] %v5449_v1  ;;  %6448 = vst [vmem:[#allocation26_spill] sm:$0xff] %v5485_v37 }
 0x16f   :  { %6440 = vst [vmem:[#allocation19_spill] sm:$0xff] %v5437_v5 }
 0x170   :  { %3388 = vmatpush3.bf16.msra.mxu0 %v5401_v6 }
 0x171   :  { %3410 = vmatpush3.bf16.msra.mxu1 %v5407_v31  ;;  %3389 = vmatprep.subr.bf16.mxu0 %v5413_v39  ;;  %v5431_v31 = vld [vmem:[%s6246_s1 + $0x198] sm:$0xff]  }
 0x172   :  { %3411 = vmatprep.subr.bf16.mxu1 %v5419_v57  ;;  %6439 = vst [vmem:[#allocation18_spill] sm:$0xff] %v5431_v31  ;;  %v5443_v57 = vld [vmem:[%s6246_s1 + $0x1d0] sm:$0xff]  }
 0x173   :  { %6441 = vst [vmem:[#allocation20_spill] sm:$0xff] %v5443_v57 }
 0x174   :  { %3390 = vmatpush3.bf16.msra.mxu0 %v5425_v19 }
 0x175   :  { %3412 = vmatpush3.bf16.msra.mxu1 %v5431_v31  ;;  %3391 = vmatprep.subr.bf16.mxu0 %v5437_v5  ;;  %v5455_v31 = vld [vmem:[%s6246_s1 + $0x190] sm:$0xff]  }
 0x176   :  { %3413 = vmatprep.subr.bf16.mxu1 %v5443_v57  ;;  %6443 = vst [vmem:[#allocation22_spill] sm:$0xff] %v5455_v31  ;;  %v5467_v57 = vld [vmem:[%s6246_s1 + $0x1c8] sm:$0xff]  }
 0x177   :  { %6445 = vst [vmem:[#allocation24_spill] sm:$0xff] %v5467_v57 }
 0x178   :  { %3392 = vmatpush3.bf16.msra.mxu0 %v5449_v1 }
 0x179   :  { %3414 = vmatpush3.bf16.msra.mxu1 %v5455_v31  ;;  %3393 = vmatprep.subr.bf16.mxu0 %v5461_v51  ;;  %v5479_v31 = vld [vmem:[%s6246_s1 + $0x188] sm:$0xff]  }
 0x17a   :  { %3415 = vmatprep.subr.bf16.mxu1 %v5467_v57  ;;  %6447 = vst [vmem:[#allocation25_spill] sm:$0xff] %v5479_v31  ;;  %v5491_v57 = vld [vmem:[%s6246_s1 + $0x1c0] sm:$0xff]  }
 0x17b   :  { %6449 = vst [vmem:[#allocation27_spill] sm:$0xff] %v5491_v57 }
 0x17c   :  { %3394 = vmatpush3.bf16.msra.mxu0 %v5473_v17 }
 0x17d   :  { %3416 = vmatpush3.bf16.msra.mxu1 %v5479_v31  ;;  %3395 = vmatprep.subr.bf16.mxu0 %v5485_v37  ;;  %v2889_v31 = vcombine.low %v5291_v23, %v5291_v23 }
 0x17e   :  { %3417 = vmatprep.subr.bf16.mxu1 %v5491_v57  ;;  %v5512_v57 = vld [vmem:[%s6246_s1 + $0x180] sm:$0xff]  }
 0x17f   :  { %6451 = vst [vmem:[#allocation29_spill] sm:$0xff] %v5512_v57 }
 0x180   :  { %3396 = vmatpush3.bf16.msra.mxu0 %v5506_v26 }
 0x181   :  { %3418 = vmatpush3.bf16.msra.mxu1 %v5512_v57  ;;  %3902 = vmatprep.subr.bf16.mxu0 %v6397_v53 }
 0x182   :  { %3434 = vmatprep.subr.bf16.mxu1 %v6424_v59 }
 0x183   :  { %v3159_v23 = vpop.f32.mrf.mxu0  ;;  %1696 = vmatmul.mubr.bf16.vlgmr.msra.gmra.mxu0 %v2887_v62 }
 0x184   :  { %v3181_v47 = vpop.f32.mrf.mxu1  ;;  %1736 = vmatmul.mubr.bf16.vlgmr.msra.gmra.mxu1 %v2889_v31  ;;  %3903 = vmatpush3.bf16.msra.mxu0 %v6415_v28 }
 0x185   :  { %3435 = vmatpush3.bf16.msra.mxu1 %v6425_v18  ;;  %v3160_v26 = vpop.f32.mrf.mxu0  ;;  %3904 = vmatprep.subr.bf16.mxu0 %v6397_v53 }
 0x186   :  { %v3182_v43 = vpop.f32.mrf.mxu1  ;;  %3436 = vmatprep.subr.bf16.mxu1 %v4970_v16  ;;  %v3161_v57 = vadd.f32 %v3160_v26, %v3159_v23  ;;  %3918 = vmatprep.mubr.msk.bf16.mxu0 %vm4294_vm0, %v6397_v53 }
 0x187   :  { %v3183_v37 = vadd.f32 %v3182_v43, %v3181_v47  ;;  %1854 = vmatprep.mubr.bf16.mxu1 %v2898_v34  ;;  %v3162_v59 = vpop.f32.mrf.mxu0 }
 0x188   :  { %v3184_v32 = vpop.f32.mrf.mxu1  ;;  %3905 = vmatpush3.bf16.msra.mxu0 %v6417_v55  ;;  %v4120_v55 = vld [vmem:[%s6247_s0 + $0xb0] ss:$0 sps:$4 sm:$0xff]  }
 0x189   :  { %v1180_v62 = vadd.f32 %v3183_v37, %v3161_v57  ;;  %3437 = vmatpush3.bf16.msra.mxu1 %v4979_v36  ;;  %v3163_v28 = vpop.f32.mrf.mxu0  ;;  %3906 = vmatprep.subr.bf16.mxu0 %v6397_v53 }
 0x18a   :  { %3438 = vmatprep.subr.bf16.mxu1 %v5188_v21  ;;  %v3185_v31 = vpop.f32.mrf.mxu1 }
 0x18b   :  { %v6453_v31 = vld [vmem:[#allocation26_spill] sm:$0xff] }
 0x18c   :  { %3907 = vmatpush3.bf16.msra.mxu0 %v6418_v11  ;;  %v2897_v11 = vcombine.low %v5501_v61, %v5501_v61 }
 0x18d   :  { %3439 = vmatpush3.bf16.msra.mxu1 %v5197_v35  ;;  %3908 = vmatprep.subr.bf16.mxu0 %v6397_v53 }
 0x18e   :  { %3440 = vmatprep.subr.bf16.mxu1 %v5204_v9 }
 0x190   :  { %3909 = vmatpush3.bf16.msra.mxu0 %v6419_v63  ;;  %v2893_v63 = vld [vmem:[%s6247_s0 + $0xbc] sm:$0xff] }
 0x191   :  { %3441 = vmatpush3.bf16.msra.mxu1 %v5211_v12  ;;  %3910 = vmatprep.subr.bf16.mxu0 %v6397_v53 }
 0x192   :  { %3442 = vmatprep.subr.bf16.mxu1 %v5218_v14 }
 0x194   :  { %3911 = vmatpush3.bf16.msra.mxu0 %v6420_v13  ;;  %v2894_v13 = vld [vmem:[%s6247_s0 + $0xc4] sm:$0xff] }
 0x195   :  { %3443 = vmatpush3.bf16.msra.mxu1 %v5225_v7  ;;  %3912 = vmatprep.subr.bf16.mxu0 %v6397_v53 }
 0x196   :  { %3444 = vmatprep.subr.bf16.mxu1 %v5232_v3 }
 0x198   :  { %3913 = vmatpush3.bf16.msra.mxu0 %v6421_v8  ;;  %v2900_v8 = vcombine.high %v2893_v63, %v2893_v63 }
 0x199   :  { %3445 = vmatpush3.bf16.msra.mxu1 %v5239_v56  ;;  %3914 = vmatprep.subr.bf16.mxu0 %v6397_v53 }
 0x19a   :  { %3446 = vmatprep.subr.bf16.mxu1 %v5246_v58 }
 0x19c   :  { %3915 = vmatpush3.bf16.msra.mxu0 %v6422_v10  ;;  %v2902_v10 = vcombine.high %v2894_v13, %v2894_v13 }
 0x19d   :  { %3447 = vmatpush3.bf16.msra.mxu1 %v5258_v27  ;;  %3916 = vmatprep.subr.bf16.mxu0 %v6397_v53 }
 0x19e   :  { %3448 = vmatprep.subr.bf16.mxu1 %v5270_v60 }
 0x1a0   :  { %3917 = vmatpush3.bf16.msra.mxu0 %v4782_v20 }
 0x1a1   :  { %3449 = vmatpush3.bf16.msra.mxu1 %v5296_v41  ;;  %3456 = vmatprep.subr.bf16.mxu0 %v5024_v2 }
 0x1a2   :  { %3478 = vmatprep.subr.bf16.mxu1 %v5308_v45 }
 0x1a3   :  { %v3203_v59 = vpop.f32.mrf.mxu0  ;;  %3919 = vmatmul.mubr.bf16.vlgmr.msra.gmra.mxu0 %v4120_v55  ;;  %v2899_v55 = vcombine.low %v2893_v63, %v2893_v63 }
 0x1a4   :  { %1855 = vmatmul.mubr.bf16.vlgmr.msra.gmra.mxu1 %v2897_v11  ;;  %v3225_v32 = vpop.f32.mrf.mxu1  ;;  %3457 = vmatpush3.bf16.msra.mxu0 %v5035_v30  ;;  %v2901_v11 = vcombine.low %v2894_v13, %v2894_v13 }
 0x1a5   :  { %3479 = vmatpush3.bf16.msra.mxu1 %v5324_v24  ;;  %v3204_v43 = vpop.f32.mrf.mxu0  ;;  %3458 = vmatprep.subr.bf16.mxu0 %v5042_v15 }
 0x1a6   :  { %v3226_v47 = vpop.f32.mrf.mxu1  ;;  %3480 = vmatprep.subr.bf16.mxu1 %v5336_v22  ;;  %v3205_v20 = vadd.f32 %v3204_v43, %v3203_v59  ;;  %1894 = vmatprep.mubr.bf16.mxu0 %v2900_v8  ;;  %v5595_v8 = vld [vmem:[%s6247_s0 + $0xcc] sm:$0xff] }
 0x1a7   :  { %v3227_v26 = vadd.f32 %v3226_v47, %v3225_v32  ;;  %1934 = vmatprep.mubr.bf16.mxu1 %v2902_v10  ;;  %v3206_v61 = vpop.f32.mrf.mxu0  ;;  %v6454_v10 = vld [vmem:[#allocation13_spill] sm:$0xff]  ;;  %v6455_v59 = vld [vmem:[#allocation28_spill] sm:$0xff]  ;;  %v6456_v32 = vld [vmem:[#allocation14_spill] sm:$0xff]  ;;  %v2904_v43 = vcombine.high %v5595_v8, %v5595_v8 }
 0x1a8   :  { %v3228_v37 = vpop.f32.mrf.mxu1  ;;  %v1220_v57 = vadd.f32 %v3205_v20, %v1180_v62  ;;  %3459 = vmatpush3.bf16.msra.mxu0 %v5049_v40  ;;  %v6452_v62 = vld [vmem:[#allocation12_spill] sm:$0xff]  ;;  %v6457_v20 = vld [vmem:[#allocation15_spill] sm:$0xff] }
 0x1a9   :  { %3481 = vmatpush3.bf16.msra.mxu1 %v5348_v38  ;;  %v3207_v34 = vpop.f32.mrf.mxu0  ;;  %3460 = vmatprep.subr.bf16.mxu0 %v5056_v42  ;;  %v6459_v37 = vld [vmem:[#allocation16_spill] sm:$0xff] }
 0x1aa   :  { %3482 = vmatprep.subr.bf16.mxu1 %v5361_v49  ;;  %v3229_v23 = vpop.f32.mrf.mxu1  ;;  %v1260_v28 = vadd.f32 %v3227_v26, %v1220_v57  ;;  %v5607_v26 = vld [vmem:[%s6246_s1 + $0x238] sm:$0xff]   ;;  %v6460_v34 = vld [vmem:[#allocation11_spill] sm:$0xff] }
 0x1ab   :  { %6458 = vst [vmem:[#allocation12_spill] sm:$0xff] %v5607_v26  ;;  %v6461_v23 = vld [vmem:[#allocation4_spill] sm:$0xff] }
 0x1ac   :  { %3461 = vmatpush3.bf16.msra.mxu0 %v5063_v4 }
 0x1ad   :  { %3483 = vmatpush3.bf16.msra.mxu1 %v5377_v0  ;;  %3462 = vmatprep.subr.bf16.mxu0 %v5070_v44 }
 0x1ae   :  { %3484 = vmatprep.subr.bf16.mxu1 %v5389_v33 }
 0x1b0   :  { %3463 = vmatpush3.bf16.msra.mxu0 %v5077_v46 }
 0x1b1   :  { %3485 = vmatpush3.bf16.msra.mxu1 %v5401_v6  ;;  %3464 = vmatprep.subr.bf16.mxu0 %v5084_v48 }
 0x1b2   :  { %3486 = vmatprep.subr.bf16.mxu1 %v5413_v39 }
 0x1b4   :  { %3465 = vmatpush3.bf16.msra.mxu0 %v5091_v50 }
 0x1b5   :  { %3487 = vmatpush3.bf16.msra.mxu1 %v5425_v19  ;;  %3466 = vmatprep.subr.bf16.mxu0 %v5098_v52 }
 0x1b6   :  { %3488 = vmatprep.subr.bf16.mxu1 %v5437_v5 }
 0x1b8   :  { %3467 = vmatpush3.bf16.msra.mxu0 %v5105_v54 }
 0x1b9   :  { %3489 = vmatpush3.bf16.msra.mxu1 %v5449_v1  ;;  %3468 = vmatprep.subr.bf16.mxu0 %v5252_v25 }
 0x1ba   :  { %3490 = vmatprep.subr.bf16.mxu1 %v5461_v51  ;;  %v6480_v51 = vld [vmem:[#allocation27_spill] sm:$0xff] }
 0x1bc   :  { %3469 = vmatpush3.bf16.msra.mxu0 %v5264_v29 }
 0x1bd   :  { %3491 = vmatpush3.bf16.msra.mxu1 %v5473_v17  ;;  %3470 = vmatprep.subr.bf16.mxu0 %v6452_v62  ;;  %v6478_v17 = vld [vmem:[#allocation25_spill] sm:$0xff] }
 0x1be   :  { %3492 = vmatprep.subr.bf16.mxu1 %v6453_v31  ;;  %v6477_v31 = vld [vmem:[#allocation24_spill] sm:$0xff] }
 0x1c0   :  { %3471 = vmatpush3.bf16.msra.mxu0 %v6454_v10 }
 0x1c1   :  { %3493 = vmatpush3.bf16.msra.mxu1 %v6455_v59  ;;  %3500 = vmatprep.subr.bf16.mxu0 %v6456_v32 }
 0x1c2   :  { %3922 = vmatprep.subr.bf16.mxu1 %v6397_v53 }
 0x1c3   :  { %v1299_v47 = vpop.f32.mrf.mxu0  ;;  %1895 = vmatmul.mubr.bf16.vlgmr.msra.gmra.mxu0 %v2899_v55  ;;  %v6462_v55 = vmax.f32 %v6460_v34, %v6461_v23  ;;  %v6469_v23 = vld [vmem:[#allocation7_spill] sm:$0xff] }
 0x1c4   :  { %1935 = vmatmul.mubr.bf16.vlgmr.msra.gmra.mxu1 %v2901_v11  ;;  %v3256_v63 = vpop.f32.mrf.mxu1  ;;  %v1300_v13 = vadd.f32 %v1299_v47, %v1260_v28  ;;  %3501 = vmatpush3.bf16.msra.mxu0 %v6457_v20 }
 0x1c5   :  { %3923 = vmatpush3.bf16.msra.mxu1 %v5607_v26  ;;  %v3880_v61 = vpop.f32.mrf.mxu0  ;;  %3502 = vmatprep.subr.bf16.mxu0 %v6459_v37  ;;  %v6463_v26 = vld [vmem:[#allocation2_spill] sm:$0xff] }
 0x1c6   :  { %3924 = vmatprep.subr.bf16.mxu1 %v6397_v53  ;;  %v3257_v57 = vpop.f32.mrf.mxu1  ;;  %v5615_v11 = vmax.f32 %v6462_v55, %v1300_v13  ;;  %1974 = vmatprep.mubr.bf16.mxu0 %v2904_v43  ;;  %v5625_v61 = vld [vmem:[%s6246_s1 + $0x230] sm:$0xff]   ;;  %v6465_v13 = vld [vmem:[#allocation3_spill] sm:$0xff]  ;;  %v5643_v55 = vld [vmem:[%s6246_s1 + $0x220] sm:$0xff]  }
 0x1c7   :  { %v5617_v28 = vadd.f32 %v3257_v57, %v3256_v63  ;;  %3938 = vmatprep.mubr.msk.bf16.mxu1 %vm4294_vm0, %v6397_v53  ;;  %v1302_v47 = vpop.f32.mrf.mxu0  ;;  %6464 = vst [vmem:[#allocation13_spill] sm:$0xff] %v5625_v61  ;;  %v6466_v63 = vld [vmem:[#allocation5_spill] sm:$0xff]  ;;  %v6468_v57 = vld [vmem:[#allocation6_spill] sm:$0xff]  ;;  %6470 = vst [vmem:[#allocation15_spill] sm:$0xff] %v5643_v55 }
 0x1c8   :  { %v3259_v59 = vpop.f32.mrf.mxu1  ;;  %3503 = vmatpush3.bf16.msra.mxu0 %v6463_v26  ;;  %v6471_v47 = vld [vmem:[#allocation8_spill] sm:$0xff] }
 0x1c9   :  { %3925 = vmatpush3.bf16.msra.mxu1 %v5625_v61  ;;  %v3881_v34 = vpop.f32.mrf.mxu0  ;;  %3504 = vmatprep.subr.bf16.mxu0 %v6465_v13  ;;  %v5634_v59 = vld [vmem:[%s6246_s1 + $0x228] sm:$0xff]   ;;  %v6475_v61 = vld [vmem:[#allocation22_spill] sm:$0xff] }
 0x1ca   :  { %3926 = vmatprep.subr.bf16.mxu1 %v6397_v53  ;;  %v3260_v43 = vpop.f32.mrf.mxu1  ;;  %6467 = vst [vmem:[#allocation14_spill] sm:$0xff] %v5634_v59  ;;  %v6472_v34 = vld [vmem:[#allocation18_spill] sm:$0xff] }
 0x1cb   :  { %v5652_v43 = vld [vmem:[%s6246_s1 + $0x218] sm:$0xff]  }
 0x1cc   :  { %3505 = vmatpush3.bf16.msra.mxu0 %v6466_v63  ;;  %6473 = vst [vmem:[#allocation16_spill] sm:$0xff] %v5652_v43 }
 0x1cd   :  { %3927 = vmatpush3.bf16.msra.mxu1 %v5634_v59  ;;  %3506 = vmatprep.subr.bf16.mxu0 %v6468_v57  ;;  %v6474_v59 = vld [vmem:[#allocation20_spill] sm:$0xff] }
 0x1ce   :  { %3928 = vmatprep.subr.bf16.mxu1 %v6397_v53 }
 0x1d0   :  { %3507 = vmatpush3.bf16.msra.mxu0 %v6469_v23 }
 0x1d1   :  { %3929 = vmatpush3.bf16.msra.mxu1 %v5643_v55  ;;  %3508 = vmatprep.subr.bf16.mxu0 %v6471_v47  ;;  %v5661_v55 = vld [vmem:[%s6246_s1 + $0x210] sm:$0xff]  }
 0x1d2   :  { %3930 = vmatprep.subr.bf16.mxu1 %v6397_v53  ;;  %6476 = vst [vmem:[#allocation11_spill] sm:$0xff] %v5661_v55 }
 0x1d4   :  { %3509 = vmatpush3.bf16.msra.mxu0 %v6472_v34 }
 0x1d5   :  { %3931 = vmatpush3.bf16.msra.mxu1 %v5652_v43  ;;  %3510 = vmatprep.subr.bf16.mxu0 %v6474_v59  ;;  %v5670_v43 = vld [vmem:[%s6246_s1 + $0x208] sm:$0xff]  }
 0x1d6   :  { %3932 = vmatprep.subr.bf16.mxu1 %v6397_v53  ;;  %6479 = vst [vmem:[#allocation4_spill] sm:$0xff] %v5670_v43 }
 0x1d8   :  { %3511 = vmatpush3.bf16.msra.mxu0 %v6475_v61 }
 0x1d9   :  { %3933 = vmatpush3.bf16.msra.mxu1 %v5661_v55  ;;  %3512 = vmatprep.subr.bf16.mxu0 %v6477_v31  ;;  %v2903_v55 = vcombine.low %v5595_v8, %v5595_v8  ;;  %v4129_v31 = vld [vmem:[%s6247_s0 + $0xd4] ss:$0 sps:$4 sm:$0xff]   ;;  %v5694_v8 = vld [vmem:[%s6246_s1 + $0x200] sm:$0xff]  }
 0x1da   :  { %3934 = vmatprep.subr.bf16.mxu1 %v6397_v53  ;;  %6482 = vst [vmem:[#allocation2_spill] sm:$0xff] %v5694_v8 }
 0x1dc   :  { %3513 = vmatpush3.bf16.msra.mxu0 %v6478_v17  ;;  %v5683_v17 = vld [vmem:[%s6247_s0 + $0xd8] sm:$0xff] }
 0x1dd   :  { %3935 = vmatpush3.bf16.msra.mxu1 %v5670_v43  ;;  %3514 = vmatprep.subr.bf16.mxu0 %v6480_v51  ;;  %v5688_v43 = vld [vmem:[%s6247_s0 + $0xe0] sm:$0xff]  ;;  %v6481_v51 = vld [vmem:[#allocation29_spill] sm:$0xff]  ;;  %v2912_v61 = vcombine.high %v5683_v17, %v5683_v17 }
 0x1de   :  { %3936 = vmatprep.subr.bf16.mxu1 %v6397_v53  ;;  %v6483_v53 = vld [vmem:[#allocation9_spill] sm:$0xff]  ;;  %v2914_v1 = vcombine.high %v5688_v43, %v5688_v43 }
 0x1e0   :  { %3515 = vmatpush3.bf16.msra.mxu0 %v6481_v51 }
 0x1e1   :  { %3937 = vmatpush3.bf16.msra.mxu1 %v5694_v8  ;;  %3531 = vmatprep.subr.bf16.mxu0 %v6483_v53 }
 0x1e2   :  { %3553 = vmatprep.subr.bf16.mxu1 %v5024_v2 }
 0x1e3   :  { %v3278_v59 = vpop.f32.mrf.mxu0  ;;  %1975 = vmatmul.mubr.bf16.vlgmr.msra.gmra.mxu0 %v2903_v55 }
 0x1e4   :  { %3939 = vmatmul.mubr.bf16.vlgmr.msra.gmra.mxu1 %v4129_v31  ;;  %v3300_v51 = vpop.f32.mrf.mxu1  ;;  %3532 = vmatpush3.bf16.msra.mxu0 %v6425_v18 }
 0x1e5   :  { %3554 = vmatpush3.bf16.msra.mxu1 %v5035_v30  ;;  %v3279_v5 = vpop.f32.mrf.mxu0  ;;  %3533 = vmatprep.subr.bf16.mxu0 %v4970_v16 }
 0x1e6   :  { %v3301_v8 = vpop.f32.mrf.mxu1  ;;  %3555 = vmatprep.subr.bf16.mxu1 %v5042_v15  ;;  %v3280_v53 = vadd.f32 %v3279_v5, %v3278_v59  ;;  %2093 = vmatprep.mubr.bf16.mxu0 %v2912_v61  ;;  %v2913_v15 = vcombine.low %v5688_v43, %v5688_v43  ;;  %v6484_v61 = vld [vmem:[#allocation17_spill] sm:$0xff]  ;;  %v6485_v59 = vld [vmem:[#allocation18_spill] sm:$0xff]  ;;  %v6487_v43 = vld [vmem:[#allocation20_spill] sm:$0xff] }
 0x1e7   :  { %v3302_v2 = vadd.f32 %v3301_v8, %v3300_v51  ;;  %2133 = vmatprep.mubr.bf16.mxu1 %v2914_v1  ;;  %v3281_v34 = vpop.f32.mrf.mxu0  ;;  %v6488_v8 = vld [vmem:[#allocation21_spill] sm:$0xff] }
 0x1e8   :  { %v3303_v19 = vpop.f32.mrf.mxu1  ;;  %v1419_v55 = vadd.f32 %v3280_v53, %v5617_v28  ;;  %3534 = vmatpush3.bf16.msra.mxu0 %v4979_v36  ;;  %v2911_v36 = vcombine.low %v5683_v17, %v5683_v17  ;;  %v6486_v34 = vld [vmem:[#allocation19_spill] sm:$0xff]  ;;  %v6489_v53 = vld [vmem:[#allocation22_spill] sm:$0xff] }
 0x1e9   :  { %3556 = vmatpush3.bf16.msra.mxu1 %v5049_v40  ;;  %v3282_v18 = vpop.f32.mrf.mxu0  ;;  %3535 = vmatprep.subr.bf16.mxu0 %v5188_v21  ;;  %v5739_v40 = vld [vmem:[%s6247_s0 + $0xe8] sm:$0xff] }
 0x1ea   :  { %3557 = vmatprep.subr.bf16.mxu1 %v5056_v42  ;;  %v3304_v16 = vpop.f32.mrf.mxu1  ;;  %v1459_v30 = vadd.f32 %v3302_v2, %v1419_v55  ;;  %v5744_v42 = vld [vmem:[%s6247_s0 + $0xf0] sm:$0xff]  ;;  %v6490_v2 = vld [vmem:[#allocation23_spill] sm:$0xff]  ;;  %v6492_v18 = vld [vmem:[#allocation10_spill] sm:$0xff] }
 0x1eb   :  { %v6491_v55 = vld [vmem:[#allocation24_spill] sm:$0xff]  ;;  %v6493_v16 = vld [vmem:[#allocation25_spill] sm:$0xff] }
 0x1ec   :  { %3536 = vmatpush3.bf16.msra.mxu0 %v5197_v35 }
 0x1ed   :  { %3558 = vmatpush3.bf16.msra.mxu1 %v5063_v4  ;;  %3537 = vmatprep.subr.bf16.mxu0 %v5204_v9  ;;  %v2916_v4 = vcombine.high %v5739_v40, %v5739_v40 }
 0x1ee   :  { %3559 = vmatprep.subr.bf16.mxu1 %v5070_v44  ;;  %v2918_v44 = vcombine.high %v5744_v42, %v5744_v42 }
 0x1f0   :  { %3538 = vmatpush3.bf16.msra.mxu0 %v5211_v12 }
 0x1f1   :  { %3560 = vmatpush3.bf16.msra.mxu1 %v5077_v46  ;;  %3539 = vmatprep.subr.bf16.mxu0 %v5218_v14 }
 0x1f2   :  { %3561 = vmatprep.subr.bf16.mxu1 %v5084_v48 }
 0x1f4   :  { %3540 = vmatpush3.bf16.msra.mxu0 %v5225_v7 }
 0x1f5   :  { %3562 = vmatpush3.bf16.msra.mxu1 %v5091_v50  ;;  %3541 = vmatprep.subr.bf16.mxu0 %v5232_v3 }
 0x1f6   :  { %3563 = vmatprep.subr.bf16.mxu1 %v5098_v52 }
 0x1f8   :  { %3542 = vmatpush3.bf16.msra.mxu0 %v5239_v56 }
 0x1f9   :  { %3564 = vmatpush3.bf16.msra.mxu1 %v5105_v54  ;;  %3543 = vmatprep.subr.bf16.mxu0 %v5246_v58 }
 0x1fa   :  { %3565 = vmatprep.subr.bf16.mxu1 %v5252_v25 }
 0x1fc   :  { %3544 = vmatpush3.bf16.msra.mxu0 %v5258_v27 }
 0x1fd   :  { %3566 = vmatpush3.bf16.msra.mxu1 %v5264_v29  ;;  %3545 = vmatprep.subr.bf16.mxu0 %v5270_v60 }
 0x1fe   :  { %3567 = vmatprep.subr.bf16.mxu1 %v6452_v62 }
 0x200   :  { %3546 = vmatpush3.bf16.msra.mxu0 %v5296_v41 }
 0x201   :  { %3568 = vmatpush3.bf16.msra.mxu1 %v6454_v10  ;;  %3575 = vmatprep.subr.bf16.mxu0 %v5308_v45 }
 0x202   :  { %3597 = vmatprep.subr.bf16.mxu1 %v6456_v32 }
 0x203   :  { %v3322_v46 = vpop.f32.mrf.mxu0  ;;  %2094 = vmatmul.mubr.bf16.vlgmr.msra.gmra.mxu0 %v2911_v36  ;;  %v6495_v36 = vld [vmem:[#allocation27_spill] sm:$0xff] }
 0x204   :  { %2134 = vmatmul.mubr.bf16.vlgmr.msra.gmra.mxu1 %v2913_v15  ;;  %v1538_v48 = vpop.f32.mrf.mxu1  ;;  %3576 = vmatpush3.bf16.msra.mxu0 %v5324_v24  ;;  %v2915_v15 = vcombine.low %v5739_v40, %v5739_v40 }
 0x205   :  { %3598 = vmatpush3.bf16.msra.mxu1 %v6457_v20  ;;  %v3323_v50 = vpop.f32.mrf.mxu0  ;;  %3577 = vmatprep.subr.bf16.mxu0 %v5336_v22 }
 0x206   :  { %3599 = vmatprep.subr.bf16.mxu1 %v6459_v37  ;;  %v3900_v52 = vpop.f32.mrf.mxu1  ;;  %v3324_v54 = vadd.f32 %v3323_v50, %v3322_v46  ;;  %2173 = vmatprep.mubr.bf16.mxu0 %v2916_v4  ;;  %v2917_v4 = vcombine.low %v5744_v42, %v5744_v42  ;;  %v6496_v46 = vld [vmem:[#allocation28_spill] sm:$0xff]  ;;  %v6498_v50 = vmov 0.0  }
 0x207   :  { %2213 = vmatprep.mubr.bf16.mxu1 %v2918_v44  ;;  %v3325_v17 = vpop.f32.mrf.mxu0  ;;  %v5793_v44 = vld [vmem:[%s6247_s0 + $0xfc] sm:$0xff] }
 0x208   :  { %v1541_v51 = vpop.f32.mrf.mxu1  ;;  %3578 = vmatpush3.bf16.msra.mxu0 %v5348_v38  ;;  %v1499_v19 = vadd.f32 %v3324_v54, %v1459_v30  ;;  %v6494_v30 = vld [vmem:[#allocation26_spill] sm:$0xff]  ;;  %v5801_v52 = vld [vmem:[%s6246_s1 + $0x78] sm:$0xff]   ;;  %v2926_v40 = vcombine.high %v5793_v44, %v5793_v44  ;;  %v6500_v17 = vld [vmem:[#allocation12_spill] sm:$0xff] }
 0x209   :  { %3600 = vmatpush3.bf16.msra.mxu1 %v6463_v26  ;;  %v3326_v1 = vpop.f32.mrf.mxu0  ;;  %3579 = vmatprep.subr.bf16.mxu0 %v5361_v49  ;;  %6499 = vst [vmem:[#allocation3_spill] sm:$0xff] %v5801_v52  ;;  %v5810_v51 = vld [vmem:[%s6246_s1 + $0x38] sm:$0xff]  }
 0x20a   :  { %3601 = vmatprep.subr.bf16.mxu1 %v6465_v13  ;;  %v3901_v5 = vpop.f32.mrf.mxu1  ;;  %v5762_v31 = vadd.f32 %v1538_v48, %v1499_v19  ;;  %v6497_v48 = vld [vmem:[#allocation29_spill] sm:$0xff]  ;;  %6501 = vst [vmem:[#allocation5_spill] sm:$0xff] %v5810_v51 }
 0x20b   :  { %v5817_v5 = vld [vmem:[%s6246_s1 + $0x70] sm:$0xff]  }
 0x20c   :  { %3580 = vmatpush3.bf16.msra.mxu0 %v5377_v0 }
 0x20d   :  { %3602 = vmatpush3.bf16.msra.mxu1 %v6466_v63  ;;  %3581 = vmatprep.subr.bf16.mxu0 %v5389_v33 }
 0x20e   :  { %3603 = vmatprep.subr.bf16.mxu1 %v6468_v57 }
 0x210   :  { %3582 = vmatpush3.bf16.msra.mxu0 %v5401_v6 }
 0x211   :  { %3604 = vmatpush3.bf16.msra.mxu1 %v6469_v23  ;;  %3583 = vmatprep.subr.bf16.mxu0 %v5413_v39 }
 0x212   :  { %3605 = vmatprep.subr.bf16.mxu1 %v6471_v47 }
 0x214   :  { %3584 = vmatpush3.bf16.msra.mxu0 %v6484_v61 }
 0x215   :  { %3606 = vmatpush3.bf16.msra.mxu1 %v6485_v59  ;;  %3585 = vmatprep.subr.bf16.mxu0 %v6486_v34 }
 0x216   :  { %3607 = vmatprep.subr.bf16.mxu1 %v6487_v43 }
 0x218   :  { %3586 = vmatpush3.bf16.msra.mxu0 %v6488_v8 }
 0x219   :  { %3608 = vmatpush3.bf16.msra.mxu1 %v6489_v53  ;;  %3587 = vmatprep.subr.bf16.mxu0 %v6490_v2 }
 0x21a   :  { %3609 = vmatprep.subr.bf16.mxu1 %v6491_v55 }
 0x21c   :  { %3588 = vmatpush3.bf16.msra.mxu0 %v6492_v18 }
 0x21d   :  { %3610 = vmatpush3.bf16.msra.mxu1 %v6493_v16  ;;  %3589 = vmatprep.subr.bf16.mxu0 %v6494_v30 }
 0x21e   :  { %3611 = vmatprep.subr.bf16.mxu1 %v6495_v36  ;;  %v5826_v36 = vld [vmem:[%s6246_s1 + $0x30] sm:$0xff]  }
 0x220   :  { %3590 = vmatpush3.bf16.msra.mxu0 %v6496_v46 }
 0x221   :  { %3612 = vmatpush3.bf16.msra.mxu1 %v6497_v48  ;;  %3942 = vmatprep.subr.bf16.mxu0 %v6498_v50  ;;  %v6502_v48 = vld [vmem:[#allocation13_spill] sm:$0xff] }
 0x222   :  { %3628 = vmatprep.subr.bf16.mxu1 %v5801_v52 }
 0x223   :  { %v3353_v42 = vpop.f32.mrf.mxu0  ;;  %2174 = vmatmul.mubr.bf16.vlgmr.msra.gmra.mxu0 %v2915_v15 }
 0x224   :  { %v3375_v54 = vpop.f32.mrf.mxu1  ;;  %2214 = vmatmul.mubr.bf16.vlgmr.msra.gmra.mxu1 %v2917_v4  ;;  %3943 = vmatpush3.bf16.msra.mxu0 %v6500_v17 }
 0x225   :  { %3629 = vmatpush3.bf16.msra.mxu1 %v5810_v51  ;;  %v3354_v19 = vpop.f32.mrf.mxu0  ;;  %3944 = vmatprep.subr.bf16.mxu0 %v6498_v50 }
 0x226   :  { %v3376_v1 = vpop.f32.mrf.mxu1  ;;  %3630 = vmatprep.subr.bf16.mxu1 %v5817_v5  ;;  %v3355_v15 = vadd.f32 %v3354_v19, %v3353_v42  ;;  %3958 = vmatprep.mubr.msk.bf16.mxu0 %vm4294_vm0, %v6498_v50 }
 0x227   :  { %v3377_v4 = vadd.f32 %v3376_v1, %v3375_v54  ;;  %2332 = vmatprep.mubr.bf16.mxu1 %v2926_v40  ;;  %v3356_v28 = vpop.f32.mrf.mxu0  ;;  %v6503_v54 = vld [vmem:[#allocation14_spill] sm:$0xff]  ;;  %v5889_v40 = vld [vmem:[%s6246_s1 + $0xf0] sm:$0xff]  }
 0x228   :  { %v3378_v52 = vpop.f32.mrf.mxu1  ;;  %3945 = vmatpush3.bf16.msra.mxu0 %v6502_v48  ;;  %v6504_v28 = vld [vmem:[#allocation15_spill] sm:$0xff] }
 0x229   :  { %v1658_v51 = vadd.f32 %v3377_v4, %v3355_v15  ;;  %3631 = vmatpush3.bf16.msra.mxu1 %v5826_v36  ;;  %v3357_v16 = vpop.f32.mrf.mxu0  ;;  %3946 = vmatprep.subr.bf16.mxu0 %v6498_v50 }
 0x22a   :  { %3632 = vmatprep.subr.bf16.mxu1 %v5188_v21  ;;  %v3379_v42 = vpop.f32.mrf.mxu1  ;;  %v6505_v16 = vld [vmem:[#allocation16_spill] sm:$0xff]  ;;  %v6506_v21 = vld [vmem:[#allocation11_spill] sm:$0xff] }
 0x22c   :  { %3947 = vmatpush3.bf16.msra.mxu0 %v6503_v54 }
 0x22d   :  { %3633 = vmatpush3.bf16.msra.mxu1 %v5197_v35  ;;  %3948 = vmatprep.subr.bf16.mxu0 %v6498_v50  ;;  %v6507_v35 = vld [vmem:[#allocation4_spill] sm:$0xff] }
 0x22e   :  { %3634 = vmatprep.subr.bf16.mxu1 %v5204_v9  ;;  %v4138_v9 = vld [vmem:[%s6247_s0 + $0xf8] ss:$0 sps:$4 sm:$0xff]  }
 0x230   :  { %3949 = vmatpush3.bf16.msra.mxu0 %v6504_v28 }
 0x231   :  { %3635 = vmatpush3.bf16.msra.mxu1 %v5211_v12  ;;  %3950 = vmatprep.subr.bf16.mxu0 %v6498_v50  ;;  %v2925_v12 = vcombine.low %v5793_v44, %v5793_v44 }
 0x232   :  { %3636 = vmatprep.subr.bf16.mxu1 %v5218_v14  ;;  %v5859_v14 = vld [vmem:[%s6247_s0 + $0x104] sm:$0xff] }
 0x234   :  { %3951 = vmatpush3.bf16.msra.mxu0 %v6505_v16 }
 0x235   :  { %3637 = vmatpush3.bf16.msra.mxu1 %v5225_v7  ;;  %3952 = vmatprep.subr.bf16.mxu0 %v6498_v50  ;;  %v5864_v7 = vld [vmem:[%s6247_s0 + $0x10c] sm:$0xff] }
 0x236   :  { %3638 = vmatprep.subr.bf16.mxu1 %v5232_v3  ;;  %v6508_v3 = vld [vmem:[#allocation2_spill] sm:$0xff] }
 0x238   :  { %3953 = vmatpush3.bf16.msra.mxu0 %v6506_v21 }
 0x239   :  { %3639 = vmatpush3.bf16.msra.mxu1 %v5239_v56  ;;  %3954 = vmatprep.subr.bf16.mxu0 %v6498_v50  ;;  %v5871_v56 = vld [vmem:[%s6246_s1 + $0xf8] sm:$0xff]  }
 0x23a   :  { %3640 = vmatprep.subr.bf16.mxu1 %v5246_v58  ;;  %v2928_v58 = vcombine.high %v5859_v14, %v5859_v14 }
 0x23c   :  { %3955 = vmatpush3.bf16.msra.mxu0 %v6507_v35 }
 0x23d   :  { %3641 = vmatpush3.bf16.msra.mxu1 %v5258_v27  ;;  %3956 = vmatprep.subr.bf16.mxu0 %v6498_v50  ;;  %v2930_v27 = vcombine.high %v5864_v7, %v5864_v7 }
 0x23e   :  { %3642 = vmatprep.subr.bf16.mxu1 %v5270_v60 }
 0x240   :  { %3957 = vmatpush3.bf16.msra.mxu0 %v6508_v3 }
 0x241   :  { %3643 = vmatpush3.bf16.msra.mxu1 %v5296_v41  ;;  %3650 = vmatprep.subr.bf16.mxu0 %v5871_v56  ;;  %v5882_v41 = vld [vmem:[%s6246_s1 + $0xb8] sm:$0xff]  }
 0x242   :  { %3672 = vmatprep.subr.bf16.mxu1 %v5308_v45 }
 0x243   :  { %v3397_v60 = vpop.f32.mrf.mxu0  ;;  %3959 = vmatmul.mubr.bf16.vlgmr.msra.gmra.mxu0 %v4138_v9 }
 0x244   :  { %2333 = vmatmul.mubr.bf16.vlgmr.msra.gmra.mxu1 %v2925_v12  ;;  %v3419_v44 = vpop.f32.mrf.mxu1  ;;  %3651 = vmatpush3.bf16.msra.mxu0 %v5882_v41 }
 0x245   :  { %3673 = vmatpush3.bf16.msra.mxu1 %v5324_v24  ;;  %v3398_v45 = vpop.f32.mrf.mxu0  ;;  %3652 = vmatprep.subr.bf16.mxu0 %v5889_v40  ;;  %v5896_v24 = vld [vmem:[%s6246_s1 + $0xb0] sm:$0xff]  }
 0x246   :  { %v3420_v52 = vpop.f32.mrf.mxu1  ;;  %3674 = vmatprep.subr.bf16.mxu1 %v5336_v22  ;;  %v3399_v19 = vadd.f32 %v3398_v45, %v3397_v60  ;;  %2372 = vmatprep.mubr.bf16.mxu0 %v2928_v58  ;;  %v5903_v22 = vld [vmem:[%s6246_s1 + $0xe8] sm:$0xff]  }
 0x247   :  { %v3421_v1 = vadd.f32 %v3420_v52, %v3419_v44  ;;  %2412 = vmatprep.mubr.bf16.mxu1 %v2930_v27  ;;  %v3400_v15 = vpop.f32.mrf.mxu0  ;;  %v5910_v58 = vld [vmem:[%s6246_s1 + $0xa8] sm:$0xff]   ;;  %v6514_v27 = vld [vmem:[#allocation5_spill] sm:$0xff] }
 0x248   :  { %v3422_v4 = vpop.f32.mrf.mxu1  ;;  %v1698_v42 = vadd.f32 %v3399_v19, %v1658_v51  ;;  %3653 = vmatpush3.bf16.msra.mxu0 %v5896_v24 }
 0x249   :  { %3675 = vmatpush3.bf16.msra.mxu1 %v5348_v38  ;;  %v3401_v9 = vpop.f32.mrf.mxu0  ;;  %3654 = vmatprep.subr.bf16.mxu0 %v5903_v22  ;;  %v5917_v38 = vld [vmem:[%s6246_s1 + $0xe0] sm:$0xff]   ;;  %v4246_v4 = vld [vmem:[%s6246_s1 + $0x28] sm:$0xff]  }
 0x24a   :  { %3676 = vmatprep.subr.bf16.mxu1 %v5361_v49  ;;  %v3423_v51 = vpop.f32.mrf.mxu1  ;;  %v1738_v12 = vadd.f32 %v3421_v1, %v1698_v42  ;;  %v5924_v49 = vld [vmem:[%s6246_s1 + $0xa0] sm:$0xff]   ;;  %v4250_v9 = vld [vmem:[%s6246_s1 + $0x18] sm:$0xff]  }
 0x24b   :  { %v4248_v42 = vld [vmem:[%s6246_s1 + $0x20] sm:$0xff]   ;;  %v4252_v51 = vld [vmem:[%s6246_s1 + $0x10] sm:$0xff]  }
 0x24c   :  { %3655 = vmatpush3.bf16.msra.mxu0 %v5910_v58 }
 0x24d   :  { %3677 = vmatpush3.bf16.msra.mxu1 %v5377_v0  ;;  %3656 = vmatprep.subr.bf16.mxu0 %v5917_v38  ;;  %v5931_v0 = vld [vmem:[%s6246_s1 + $0xd8] sm:$0xff]  }
 0x24e   :  { %3678 = vmatprep.subr.bf16.mxu1 %v5389_v33  ;;  %v5938_v33 = vld [vmem:[%s6246_s1 + $0x98] sm:$0xff]  }
 0x250   :  { %3657 = vmatpush3.bf16.msra.mxu0 %v5924_v49 }
 0x251   :  { %3679 = vmatpush3.bf16.msra.mxu1 %v5401_v6  ;;  %3658 = vmatprep.subr.bf16.mxu0 %v5931_v0  ;;  %v5945_v6 = vld [vmem:[%s6246_s1 + $0xd0] sm:$0xff]  }
 0x252   :  { %3680 = vmatprep.subr.bf16.mxu1 %v5413_v39  ;;  %v5952_v39 = vld [vmem:[%s6246_s1 + $0x90] sm:$0xff]  }
 0x254   :  { %3659 = vmatpush3.bf16.msra.mxu0 %v5938_v33 }
 0x255   :  { %3681 = vmatpush3.bf16.msra.mxu1 %v6484_v61  ;;  %3660 = vmatprep.subr.bf16.mxu0 %v5945_v6  ;;  %v2927_v61 = vcombine.low %v5859_v14, %v5859_v14 }
 0x256   :  { %3682 = vmatprep.subr.bf16.mxu1 %v6486_v34  ;;  %v2929_v34 = vcombine.low %v5864_v7, %v5864_v7 }
 0x258   :  { %3661 = vmatpush3.bf16.msra.mxu0 %v5952_v39 }
 0x259   :  { %3683 = vmatpush3.bf16.msra.mxu1 %v6488_v8  ;;  %3662 = vmatprep.subr.bf16.mxu0 %v5252_v25  ;;  %v2923_v25 = vld [vmem:[%s6247_s0 + $0x114] sm:$0xff] }
 0x25a   :  { %3684 = vmatprep.subr.bf16.mxu1 %v6490_v2 }
 0x25c   :  { %3663 = vmatpush3.bf16.msra.mxu0 %v5264_v29  ;;  %v2932_v29 = vcombine.high %v2923_v25, %v2923_v25 }
 0x25d   :  { %3685 = vmatpush3.bf16.msra.mxu1 %v6492_v18  ;;  %3664 = vmatprep.subr.bf16.mxu0 %v6452_v62 }
 0x25e   :  { %3686 = vmatprep.subr.bf16.mxu1 %v6494_v30 }
 0x260   :  { %3665 = vmatpush3.bf16.msra.mxu0 %v6454_v10 }
 0x261   :  { %3687 = vmatpush3.bf16.msra.mxu1 %v6496_v46  ;;  %3694 = vmatprep.subr.bf16.mxu0 %v6456_v32  ;;  %v6509_v32 = vmax.f32 %v5615_v11, %v5762_v31  ;;  %v6511_v11 = vld [vmem:[#allocation27_spill] sm:$0xff] }
 0x262   :  { %3962 = vmatprep.subr.bf16.mxu1 %v6498_v50  ;;  %v6513_v31 = vld [vmem:[#allocation3_spill] sm:$0xff] }
 0x263   :  { %v1777_v62 = vpop.f32.mrf.mxu0  ;;  %2373 = vmatmul.mubr.bf16.vlgmr.msra.gmra.mxu0 %v2927_v61  ;;  %v6094_v61 = vld [vmem:[%s6247_s0 + $0x130] sm:$0xff] }
 0x264   :  { %2413 = vmatmul.mubr.bf16.vlgmr.msra.gmra.mxu1 %v2929_v34  ;;  %v3450_v8 = vpop.f32.mrf.mxu1  ;;  %v1778_v2 = vadd.f32 %v1777_v62, %v1738_v12  ;;  %3695 = vmatpush3.bf16.msra.mxu0 %v6457_v20  ;;  %v4253_v12 = vld [vmem:[%s6246_s1 + $0x48] sm:$0xff]   ;;  %v6099_v34 = vld [vmem:[%s6247_s0 + $0x138] sm:$0xff] }
 0x265   :  { %3963 = vmatpush3.bf16.msra.mxu1 %v6500_v17  ;;  %v3920_v18 = vpop.f32.mrf.mxu0  ;;  %3696 = vmatprep.subr.bf16.mxu0 %v6459_v37  ;;  %v4261_v62 = vld [vmem:[%s6246_s1 + $0x178] sm:$0xff]  }
 0x266   :  { %3964 = vmatprep.subr.bf16.mxu1 %v6498_v50  ;;  %v3451_v10 = vpop.f32.mrf.mxu1  ;;  %v5980_v30 = vmax.f32 %v6509_v32, %v1778_v2  ;;  %2452 = vmatprep.mubr.bf16.mxu0 %v2932_v29  ;;  %v4260_v29 = vld [vmem:[%s6246_s1 + $0x80] sm:$0xff]   ;;  %v2944_v2 = vcombine.high %v6094_v61, %v6094_v61  ;;  %v2946_v18 = vcombine.high %v6099_v34, %v6099_v34 }
 0x267   :  { %v3452_v46 = vadd.f32 %v3451_v10, %v3450_v8  ;;  %3978 = vmatprep.mubr.msk.bf16.mxu1 %vm4294_vm0, %v6498_v50  ;;  %v1780_v14 = vpop.f32.mrf.mxu0  ;;  %v4262_v8 = vld [vmem:[%s6246_s1 + $0x1f8] sm:$0xff]  }
 0x268   :  { %v3453_v20 = vpop.f32.mrf.mxu1  ;;  %3697 = vmatpush3.bf16.msra.mxu0 %v6463_v26  ;;  %v6510_v26 = vld [vmem:[#allocation25_spill] sm:$0xff] }
 0x269   :  { %3965 = vmatpush3.bf16.msra.mxu1 %v6502_v48  ;;  %v3921_v37 = vpop.f32.mrf.mxu0  ;;  %3698 = vmatprep.subr.bf16.mxu0 %v6465_v13  ;;  %v2931_v13 = vcombine.low %v2923_v25, %v2923_v25  ;;  %v4259_v25 = vld [vmem:[%s6246_s1] sm:$0xff]   ;;  %v4264_v14 = vld [vmem:[%s6246_s1 + $0x1b8] sm:$0xff]  }
 0x26a   :  { %3966 = vmatprep.subr.bf16.mxu1 %v6498_v50  ;;  %v3454_v7 = vpop.f32.mrf.mxu1  ;;  %v4265_v37 = vld [vmem:[%s6246_s1 + $0x170] sm:$0xff]  }
 0x26b   :  { %v4266_v7 = vld [vmem:[%s6246_s1 + $0x1f0] sm:$0xff]  }
 0x26c   :  { %3699 = vmatpush3.bf16.msra.mxu0 %v6466_v63  ;;  %v4147_v63 = vld [vmem:[%s6247_s0 + $0x11c] ss:$0 sps:$4 sm:$0xff]  }
 0x26d   :  { %3967 = vmatpush3.bf16.msra.mxu1 %v6503_v54  ;;  %3700 = vmatprep.subr.bf16.mxu0 %v6468_v57  ;;  %v6014_v57 = vld [vmem:[%s6247_s0 + $0x120] sm:$0xff] }
 0x26e   :  { %3968 = vmatprep.subr.bf16.mxu1 %v6498_v50 }
 0x270   :  { %3701 = vmatpush3.bf16.msra.mxu0 %v6469_v23  ;;  %v6019_v23 = vld [vmem:[%s6247_s0 + $0x128] sm:$0xff] }
 0x271   :  { %3969 = vmatpush3.bf16.msra.mxu1 %v6504_v28  ;;  %3702 = vmatprep.subr.bf16.mxu0 %v6471_v47  ;;  %v6512_v47 = vld [vmem:[#allocation29_spill] sm:$0xff] }
 0x272   :  { %3970 = vmatprep.subr.bf16.mxu1 %v6498_v50 }
 0x274   :  { %3703 = vmatpush3.bf16.msra.mxu0 %v6485_v59  ;;  %v2940_v59 = vcombine.high %v6014_v57, %v6014_v57 }
 0x275   :  { %3971 = vmatpush3.bf16.msra.mxu1 %v6505_v16  ;;  %3704 = vmatprep.subr.bf16.mxu0 %v6487_v43  ;;  %v2942_v43 = vcombine.high %v6019_v23, %v6019_v23 }
 0x276   :  { %3972 = vmatprep.subr.bf16.mxu1 %v6498_v50 }
 0x278   :  { %3705 = vmatpush3.bf16.msra.mxu0 %v6489_v53 }
 0x279   :  { %3973 = vmatpush3.bf16.msra.mxu1 %v6506_v21  ;;  %3706 = vmatprep.subr.bf16.mxu0 %v6491_v55 }
 0x27a   :  { %3974 = vmatprep.subr.bf16.mxu1 %v6498_v50 }
 0x27c   :  { %3707 = vmatpush3.bf16.msra.mxu0 %v6510_v26 }
 0x27d   :  { %3975 = vmatpush3.bf16.msra.mxu1 %v6507_v35  ;;  %3708 = vmatprep.subr.bf16.mxu0 %v6511_v11 }
 0x27e   :  { %3976 = vmatprep.subr.bf16.mxu1 %v6498_v50 }
 0x280   :  { %3709 = vmatpush3.bf16.msra.mxu0 %v6512_v47  ;;  %v4268_v47 = vld [vmem:[%s6246_s1 + $0x1b0] sm:$0xff]  }
 0x281   :  { %3977 = vmatpush3.bf16.msra.mxu1 %v6508_v3  ;;  %3725 = vmatprep.subr.bf16.mxu0 %v6513_v31 }
 0x282   :  { %3747 = vmatprep.subr.bf16.mxu1 %v5871_v56 }
 0x283   :  { %v3472_v53 = vpop.f32.mrf.mxu0  ;;  %2453 = vmatmul.mubr.bf16.vlgmr.msra.gmra.mxu0 %v2931_v13 }
 0x284   :  { %3979 = vmatmul.mubr.bf16.vlgmr.msra.gmra.mxu1 %v4147_v63  ;;  %v3494_v55 = vpop.f32.mrf.mxu1  ;;  %3726 = vmatpush3.bf16.msra.mxu0 %v6514_v27 }
 0x285   :  { %3748 = vmatpush3.bf16.msra.mxu1 %v5882_v41  ;;  %v3473_v60 = vpop.f32.mrf.mxu0  ;;  %3727 = vmatprep.subr.bf16.mxu0 %v5817_v5  ;;  %v4245_v41 = vld [vmem:[%s6246_s1 + $0x68] sm:$0xff]  }
 0x286   :  { %v3495_v44 = vpop.f32.mrf.mxu1  ;;  %3749 = vmatprep.subr.bf16.mxu1 %v5889_v40  ;;  %v3474_v56 = vadd.f32 %v3473_v60, %v3472_v53  ;;  %2571 = vmatprep.mubr.bf16.mxu0 %v2940_v59  ;;  %v4269_v59 = vld [vmem:[%s6246_s1 + $0x168] sm:$0xff]  }
 0x287   :  { %v3496_v45 = vadd.f32 %v3495_v44, %v3494_v55  ;;  %2611 = vmatprep.mubr.bf16.mxu1 %v2942_v43  ;;  %v3475_v52 = vpop.f32.mrf.mxu0  ;;  %v4270_v43 = vld [vmem:[%s6246_s1 + $0x1e8] sm:$0xff]  }
 0x288   :  { %v3497_v19 = vpop.f32.mrf.mxu1  ;;  %v1897_v1 = vadd.f32 %v3474_v56, %v3452_v46  ;;  %3728 = vmatpush3.bf16.msra.mxu0 %v5826_v36  ;;  %v4247_v36 = vld [vmem:[%s6246_s1 + $0x60] sm:$0xff]   ;;  %v4263_v46 = vld [vmem:[%s6246_s1 + $0x138] sm:$0xff]   ;;  %v4271_v60 = vld [vmem:[%s6246_s1 + $0x128] sm:$0xff]  }
 0x289   :  { %3750 = vmatpush3.bf16.msra.mxu1 %v5896_v24  ;;  %v3476_v15 = vpop.f32.mrf.mxu0  ;;  %3729 = vmatprep.subr.bf16.mxu0 %v4245_v41  ;;  %v4249_v24 = vld [vmem:[%s6246_s1 + $0x58] sm:$0xff]   ;;  %v4272_v44 = vld [vmem:[%s6246_s1 + $0x1a8] sm:$0xff]   ;;  %v4273_v56 = vld [vmem:[%s6246_s1 + $0x160] sm:$0xff]  }
 0x28a   :  { %3751 = vmatprep.subr.bf16.mxu1 %v5903_v22  ;;  %v3498_v5 = vpop.f32.mrf.mxu1  ;;  %v6039_v40 = vadd.f32 %v3496_v45, %v1897_v1  ;;  %v4251_v22 = vld [vmem:[%s6246_s1 + $0x50] sm:$0xff]   ;;  %v4274_v45 = vld [vmem:[%s6246_s1 + $0x1e0] sm:$0xff]   ;;  %v4277_v1 = vld [vmem:[%s6246_s1 + $0x158] sm:$0xff]  }
 0x28b   :  { %v4275_v52 = vld [vmem:[%s6246_s1 + $0x120] sm:$0xff]   ;;  %v4278_v15 = vld [vmem:[%s6246_s1 + $0x1d8] sm:$0xff]  }
 0x28c   :  { %3730 = vmatpush3.bf16.msra.mxu0 %v4246_v4  ;;  %v4276_v19 = vld [vmem:[%s6246_s1 + $0x1a0] sm:$0xff]   ;;  %v4279_v41 = vld [vmem:[%s6246_s1 + $0x118] sm:$0xff]   ;;  %v4282_v4 = vld [vmem:[%s6246_s1 + $0x1d0] sm:$0xff]  }
 0x28d   :  { %3752 = vmatpush3.bf16.msra.mxu1 %v5910_v58  ;;  %3731 = vmatprep.subr.bf16.mxu0 %v4247_v36  ;;  %v4254_v58 = vld [vmem:[%s6246_s1 + $0xc8] sm:$0xff]   ;;  %v4280_v5 = vld [vmem:[%s6246_s1 + $0x198] sm:$0xff]   ;;  %v4283_v36 = vld [vmem:[%s6246_s1 + $0x110] sm:$0xff]  }
 0x28e   :  { %3753 = vmatprep.subr.bf16.mxu1 %v5917_v38  ;;  %v4255_v38 = vld [vmem:[%s6246_s1 + $0x8] sm:$0xff]  }
 0x290   :  { %3732 = vmatpush3.bf16.msra.mxu0 %v4248_v42  ;;  %v4284_v42 = vld [vmem:[%s6246_s1 + $0x190] sm:$0xff]  }
 0x291   :  { %3754 = vmatpush3.bf16.msra.mxu1 %v5924_v49  ;;  %3733 = vmatprep.subr.bf16.mxu0 %v4249_v24  ;;  %v4256_v49 = vld [vmem:[%s6246_s1 + $0x88] sm:$0xff]  }
 0x292   :  { %3755 = vmatprep.subr.bf16.mxu1 %v5931_v0  ;;  %v4257_v0 = vld [vmem:[%s6246_s1 + $0x40] sm:$0xff]   ;;  %v4285_v24 = vld [vmem:[%s6246_s1 + $0x148] sm:$0xff]  }
 0x294   :  { %3734 = vmatpush3.bf16.msra.mxu0 %v4250_v9  ;;  %v4286_v9 = vld [vmem:[%s6246_s1 + $0x1c8] sm:$0xff]  }
 0x295   :  { %3756 = vmatpush3.bf16.msra.mxu1 %v5938_v33  ;;  %3735 = vmatprep.subr.bf16.mxu0 %v4251_v22  ;;  %v4258_v33 = vld [vmem:[%s6246_s1 + $0xc0] sm:$0xff]   ;;  %v4287_v22 = vld [vmem:[%s6246_s1 + $0x108] sm:$0xff]  }
 0x296   :  { %3757 = vmatprep.subr.bf16.mxu1 %v5945_v6  ;;  %v2939_v6 = vcombine.low %v6014_v57, %v6014_v57  ;;  %v4267_v57 = vld [vmem:[%s6246_s1 + $0x130] sm:$0xff]  }
 0x298   :  { %3736 = vmatpush3.bf16.msra.mxu0 %v4252_v51  ;;  %v4288_v51 = vld [vmem:[%s6246_s1 + $0x188] sm:$0xff]  }
 0x299   :  { %3758 = vmatpush3.bf16.msra.mxu1 %v5952_v39  ;;  %3737 = vmatprep.subr.bf16.mxu0 %v4253_v12  ;;  %v2941_v39 = vcombine.low %v6019_v23, %v6019_v23  ;;  %v4289_v12 = vld [vmem:[%s6246_s1 + $0x140] sm:$0xff]  }
 0x29a   :  { %3759 = vmatprep.subr.bf16.mxu1 %v4254_v58  ;;  %v4290_v58 = vld [vmem:[%s6246_s1 + $0x1c0] sm:$0xff]  }
 0x29c   :  { %3738 = vmatpush3.bf16.msra.mxu0 %v4255_v38  ;;  %v2943_v38 = vcombine.low %v6094_v61, %v6094_v61 }
 0x29d   :  { %3760 = vmatpush3.bf16.msra.mxu1 %v4256_v49  ;;  %3739 = vmatprep.subr.bf16.mxu0 %v4257_v0  ;;  %v2945_v49 = vcombine.low %v6099_v34, %v6099_v34  ;;  %v4291_v0 = vld [vmem:[%s6246_s1 + $0x100] sm:$0xff]  }
 0x29e   :  { %3761 = vmatprep.subr.bf16.mxu1 %v4258_v33  ;;  %v4292_v33 = vld [vmem:[%s6246_s1 + $0x180] sm:$0xff]  }
 0x2a0   :  { %3740 = vmatpush3.bf16.msra.mxu0 %v4259_v25 }
 0x2a1   :  { %3762 = vmatpush3.bf16.msra.mxu1 %v4260_v29  ;;  %3769 = vmatprep.subr.bf16.mxu0 %v4261_v62 }
 0x2a2   :  { %3791 = vmatprep.subr.bf16.mxu1 %v4262_v8 }
 0x2a3   :  { %v3516_v10 = vpop.f32.mrf.mxu0  ;;  %2572 = vmatmul.mubr.bf16.vlgmr.msra.gmra.mxu0 %v2939_v6 }
 0x2a4   :  { %2612 = vmatmul.mubr.bf16.vlgmr.msra.gmra.mxu1 %v2941_v39  ;;  %v2016_v32 = vpop.f32.mrf.mxu1  ;;  %3770 = vmatpush3.bf16.msra.mxu0 %v4263_v46 }
 0x2a5   :  { %3792 = vmatpush3.bf16.msra.mxu1 %v4264_v14  ;;  %v3517_v20 = vpop.f32.mrf.mxu0  ;;  %3771 = vmatprep.subr.bf16.mxu0 %v4265_v37 }
 0x2a6   :  { %3793 = vmatprep.subr.bf16.mxu1 %v4266_v7  ;;  %v3940_v26 = vpop.f32.mrf.mxu1  ;;  %v3518_v11 = vadd.f32 %v3517_v20, %v3516_v10  ;;  %2651 = vmatprep.mubr.bf16.mxu0 %v2944_v2 }
 0x2a7   :  { %2691 = vmatprep.mubr.bf16.mxu1 %v2946_v18  ;;  %v3519_v13 = vpop.f32.mrf.mxu0 }
 0x2a8   :  { %v2019_v63 = vpop.f32.mrf.mxu1  ;;  %3772 = vmatpush3.bf16.msra.mxu0 %v4267_v57  ;;  %v1977_v23 = vadd.f32 %v3518_v11, %v6039_v40  ;;  %v4281_v40 = vld [vmem:[%s6246_s1 + $0x150] sm:$0xff]  }
 0x2a9   :  { %3794 = vmatpush3.bf16.msra.mxu1 %v4268_v47  ;;  %v3520_v31 = vpop.f32.mrf.mxu0  ;;  %3773 = vmatprep.subr.bf16.mxu0 %v4269_v59 }
 0x2aa   :  { %3795 = vmatprep.subr.bf16.mxu1 %v4270_v43  ;;  %v3941_v53 = vpop.f32.mrf.mxu1  ;;  %v6142_v55 = vadd.f32 %v2016_v32, %v1977_v23 }
 0x2ac   :  { %v2022_v27 = vmax.f32 %v5980_v30, %v6142_v55  ;;  %3774 = vmatpush3.bf16.msra.mxu0 %v4271_v60 }
 0x2ad   :  { %3796 = vmatpush3.bf16.msra.mxu1 %v4272_v44  ;;  %3775 = vmatprep.subr.bf16.mxu0 %v4273_v56 }
 0x2ae   :  { %3797 = vmatprep.subr.bf16.mxu1 %v4274_v45 }
 0x2b0   :  { %3776 = vmatpush3.bf16.msra.mxu0 %v4275_v52 }
 0x2b1   :  { %3798 = vmatpush3.bf16.msra.mxu1 %v4276_v19  ;;  %3777 = vmatprep.subr.bf16.mxu0 %v4277_v1 }
 0x2b2   :  { %3799 = vmatprep.subr.bf16.mxu1 %v4278_v15 }
 0x2b4   :  { %3778 = vmatpush3.bf16.msra.mxu0 %v4279_v41 }
 0x2b5   :  { %3800 = vmatpush3.bf16.msra.mxu1 %v4280_v5  ;;  %3779 = vmatprep.subr.bf16.mxu0 %v4281_v40 }
 0x2b6   :  { %3801 = vmatprep.subr.bf16.mxu1 %v4282_v4 }
 0x2b8   :  { %3780 = vmatpush3.bf16.msra.mxu0 %v4283_v36 }
 0x2b9   :  { %3802 = vmatpush3.bf16.msra.mxu1 %v4284_v42  ;;  %3781 = vmatprep.subr.bf16.mxu0 %v4285_v24 }
 0x2ba   :  { %3803 = vmatprep.subr.bf16.mxu1 %v4286_v9 }
 0x2bc   :  { %3782 = vmatpush3.bf16.msra.mxu0 %v4287_v22 }
 0x2bd   :  { %3804 = vmatpush3.bf16.msra.mxu1 %v4288_v51  ;;  %3783 = vmatprep.subr.bf16.mxu0 %v4289_v12 }
 0x2be   :  { %3805 = vmatprep.subr.bf16.mxu1 %v4290_v58 }
 0x2c0   :  { %3784 = vmatpush3.bf16.msra.mxu0 %v4291_v0 }
 0x2c1   :  { %3806 = vmatpush3.bf16.msra.mxu1 %v4292_v33  ;;  %3982 = vmatprep.subr.bf16.mxu0 %v6498_v50 }
 0x2c3   :  { %v3547_v6 = vpop.f32.mrf.mxu0  ;;  %2652 = vmatmul.mubr.bf16.vlgmr.msra.gmra.mxu0 %v2943_v38 }
 0x2c4   :  { %v3569_v39 = vpop.f32.mrf.mxu1  ;;  %2692 = vmatmul.mubr.bf16.vlgmr.msra.gmra.mxu1 %v2945_v49  ;;  %3983 = vmatpush3.bf16.msra.mxu0 %v6500_v17 }
 0x2c5   :  { %3998 = vmatprep.mubr.msk.bf16.mxu0 %vm4294_vm0, %v6498_v50  ;;  %v3548_v61 = vpop.f32.mrf.mxu0  ;;  %3984 = vmatprep.subr.bf16.mxu0 %v6498_v50 }
 0x2c6   :  { %v3570_v34 = vpop.f32.mrf.mxu1  ;;  %v3549_v25 = vadd.f32 %v3548_v61, %v3547_v6 }
 0x2c7   :  { %v3571_v29 = vadd.f32 %v3570_v34, %v3569_v39  ;;  %v3550_v62 = vpop.f32.mrf.mxu0 }
 0x2c8   :  { %v3572_v8 = vpop.f32.mrf.mxu1  ;;  %3985 = vmatpush3.bf16.msra.mxu0 %v6502_v48  ;;  %v4156_v48 = vld [vmem:[%s6247_s0 + $0x140] ss:$0 sps:$4 sm:$0xff]  }
 0x2c9   :  { %v2136_v2 = vadd.f32 %v3571_v29, %v3549_v25  ;;  %v3551_v18 = vpop.f32.mrf.mxu0  ;;  %3986 = vmatprep.subr.bf16.mxu0 %v6498_v50 }
 0x2ca   :  { %v3573_v10 = vpop.f32.mrf.mxu1 }
 0x2cc   :  { %3987 = vmatpush3.bf16.msra.mxu0 %v6503_v54 }
 0x2cd   :  { %3988 = vmatprep.subr.bf16.mxu0 %v6498_v50 }
 0x2d0   :  { %3989 = vmatpush3.bf16.msra.mxu0 %v6504_v28 }
 0x2d1   :  { %3990 = vmatprep.subr.bf16.mxu0 %v6498_v50 }
 0x2d4   :  { %3991 = vmatpush3.bf16.msra.mxu0 %v6505_v16 }
 0x2d5   :  { %3992 = vmatprep.subr.bf16.mxu0 %v6498_v50 }
 0x2d8   :  { %3993 = vmatpush3.bf16.msra.mxu0 %v6506_v21 }
 0x2d9   :  { %3994 = vmatprep.subr.bf16.mxu0 %v6498_v50 }
 0x2dc   :  { %3995 = vmatpush3.bf16.msra.mxu0 %v6507_v35 }
 0x2dd   :  { %3996 = vmatprep.subr.bf16.mxu0 %v6498_v50 }
 0x2e0   :  { %3997 = vmatpush3.bf16.msra.mxu0 %v6508_v3 }
 0x2e3   :  { %v3591_v17 = vpop.f32.mrf.mxu0  ;;  %3999 = vmatmul.mubr.bf16.vlgmr.msra.gmra.mxu0 %v4156_v48 }
 0x2e4   :  { %v3613_v54 = vpop.f32.mrf.mxu1 }
 0x2e5   :  { %v3592_v28 = vpop.f32.mrf.mxu0 }
 0x2e6   :  { %v3614_v16 = vpop.f32.mrf.mxu1  ;;  %v3593_v32 = vadd.f32 %v3592_v28, %v3591_v17 }
 0x2e7   :  { %v3615_v46 = vadd.f32 %v3614_v16, %v3613_v54  ;;  %v3594_v21 = vpop.f32.mrf.mxu0 }
 0x2e8   :  { %v3616_v14 = vpop.f32.mrf.mxu1  ;;  %v2176_v20 = vadd.f32 %v3593_v32, %v2136_v2 }
 0x2e9   :  { %v3595_v37 = vpop.f32.mrf.mxu0 }
 0x2ea   :  { %v3617_v35 = vpop.f32.mrf.mxu1  ;;  %v2216_v7 = vadd.f32 %v3615_v46, %v2176_v20  ;;  %v2948_v20 = vld [vmem:[%s6248_s2] ss:$0 sm:$0xff] }
 0x303   :  { %v2255_v50 = vpop.f32.mrf.mxu0 }
 0x304   :  { %v3644_v26 = vpop.f32.mrf.mxu1  ;;  %v2256_v11 = vadd.f32 %v2255_v50, %v2216_v7 }
 0x305   :  { %v3960_v13 = vpop.f32.mrf.mxu0 }
 0x306   :  { %v3645_v63 = vpop.f32.mrf.mxu1  ;;  %v2261_v3 = vmax.f32 %v2022_v27, %v2256_v11 }
 0x307   :  { %v3646_v57 = vadd.f32 %v3645_v63, %v3644_v26  ;;  %v2258_v23 = vpop.f32.mrf.mxu0 }
 0x308   :  { %v3647_v47 = vpop.f32.mrf.mxu1 }
 0x309   :  { %v3961_v31 = vpop.f32.mrf.mxu0 }
 0x30a   :  { %v3648_v59 = vpop.f32.mrf.mxu1 }
 0x323   :  { %v3666_v43 = vpop.f32.mrf.mxu0 }
 0x324   :  { %v3688_v53 = vpop.f32.mrf.mxu1 }
 0x325   :  { %v3667_v60 = vpop.f32.mrf.mxu0 }
 0x326   :  { %v3689_v44 = vpop.f32.mrf.mxu1  ;;  %v3668_v56 = vadd.f32 %v3667_v60, %v3666_v43 }
 0x327   :  { %v3690_v45 = vadd.f32 %v3689_v44, %v3688_v53  ;;  %v3669_v52 = vpop.f32.mrf.mxu0 }
 0x328   :  { %v3691_v19 = vpop.f32.mrf.mxu1  ;;  %v2375_v1 = vadd.f32 %v3668_v56, %v3646_v57 }
 0x329   :  { %v3670_v15 = vpop.f32.mrf.mxu0 }
 0x32a   :  { %v3692_v41 = vpop.f32.mrf.mxu1  ;;  %v2415_v5 = vadd.f32 %v3690_v45, %v2375_v1 }
 0x343   :  { %v3710_v40 = vpop.f32.mrf.mxu0 }
 0x344   :  { %v2494_v30 = vpop.f32.mrf.mxu1 }
 0x345   :  { %v3711_v55 = vpop.f32.mrf.mxu0 }
 0x346   :  { %v3980_v27 = vpop.f32.mrf.mxu1  ;;  %v3712_v4 = vadd.f32 %v3711_v55, %v3710_v40 }
 0x347   :  { %v3713_v36 = vpop.f32.mrf.mxu0 }
 0x348   :  { %v2497_v42 = vpop.f32.mrf.mxu1  ;;  %v2455_v24 = vadd.f32 %v3712_v4, %v2415_v5 }
 0x349   :  { %v3714_v9 = vpop.f32.mrf.mxu0 }
 0x34a   :  { %v3981_v22 = vpop.f32.mrf.mxu1  ;;  %v2495_v51 = vadd.f32 %v2494_v30, %v2455_v24 }
 0x34c   :  { %v2500_v12 = vmax.f32 %v2261_v3, %v2495_v51 }
 0x363   :  { %v3741_v58 = vpop.f32.mrf.mxu0 }
 0x364   :  { %v3763_v38 = vpop.f32.mrf.mxu1 }
 0x365   :  { %v3742_v49 = vpop.f32.mrf.mxu0 }
 0x366   :  { %v3764_v0 = vpop.f32.mrf.mxu1  ;;  %v3743_v48 = vadd.f32 %v3742_v49, %v3741_v58 }
 0x367   :  { %v3744_v33 = vpop.f32.mrf.mxu0  ;;  %v3765_v17 = vadd.f32 %v3764_v0, %v3763_v38 }
 0x368   :  { %v3766_v6 = vpop.f32.mrf.mxu1 }
 0x369   :  { %v3745_v39 = vpop.f32.mrf.mxu0  ;;  %v2614_v28 = vadd.f32 %v3765_v17, %v3743_v48 }
 0x36a   :  { %v3767_v61 = vpop.f32.mrf.mxu1 }
 0x383   :  { %v3785_v34 = vpop.f32.mrf.mxu0 }
 0x384   :  { %v3807_v25 = vpop.f32.mrf.mxu1 }
 0x385   :  { %v3786_v29 = vpop.f32.mrf.mxu0 }
 0x386   :  { %v3808_v62 = vpop.f32.mrf.mxu1  ;;  %v3787_v54 = vadd.f32 %v3786_v29, %v3785_v34 }
 0x387   :  { %v3788_v8 = vpop.f32.mrf.mxu0  ;;  %v3809_v32 = vadd.f32 %v3808_v62, %v3807_v25 }
 0x388   :  { %v3810_v2 = vpop.f32.mrf.mxu1  ;;  %v2654_v16 = vadd.f32 %v3787_v54, %v2614_v28 }
 0x389   :  { %v3789_v18 = vpop.f32.mrf.mxu0 }
 0x38a   :  { %v3811_v10 = vpop.f32.mrf.mxu1  ;;  %v2694_v46 = vadd.f32 %v3809_v32, %v2654_v16 }
 0x3a3   :  { %v2733_v21 = vpop.f32.mrf.mxu0 }
 0x3a4   :  { %v2734_v14 = vadd.f32 %v2733_v21, %v2694_v46 }
 0x3a5   :  { %v4000_v37 = vpop.f32.mrf.mxu0 }
 0x3a6   :  { %v2739_v35 = vmax.f32 %v2500_v12, %v2734_v14 }
 0x3a7   :  { %v2736_v7 = vpop.f32.mrf.mxu0 }
 0x3a8   :  { %v2747_v50 = vadd.f32 %v2948_v20, %v2739_v35 }
 0x3a9   :  { %v4001_v26 = vpop.f32.mrf.mxu0 }
 0x3aa   :  { %v2748_v11 = vmax.f32 %v2747_v50, 0.0 }
 0x3ac   :  { %v2749_v13 = vpack.c.bf16 %v2748_v11, %v2748_v11 }
 0x3ae   :  { %2750 = vst [vmem:[%s6249_s3] sm:$0xf] %v2749_v13 }

</bundles_post_ra>
